<compile_context>
chip_gen: v5e
topology: v5e:2x2
jax: 0.10.0
libtpu: 0.0.40
codegen_flags: <defaults>
</compile_context>

<pallas_src>
import math

import jax
import jax.numpy as jnp
from jax.experimental import pallas as pl
from jax.experimental.pallas import tpu as pltpu

EPS = 1e-5            # nn.InstanceNorm2d default eps
NEG_SLOPE = 0.2       # nn.LeakyReLU(0.2)
INV_SQRT2 = 1.0 / math.sqrt(2.0)


# -----------------------------------------------------------------------------
# in-kernel helpers (values are per-channel lane-dense rows of shape (1, H*W))
# -----------------------------------------------------------------------------
def _lrelu(v):
    return jnp.where(v >= 0, v, NEG_SLOPE * v)


def _inorm(v, gamma, beta):
    # InstanceNorm2d (biased variance) + per-channel affine on a (1, H*W) row.
    m = jnp.mean(v)
    c = v - m
    var = jnp.mean(c * c)
    return c * jax.lax.rsqrt(var + EPS) * gamma + beta


def _edge_masks(Hs, Ws):
    """Boolean (1, Hs*Ws) masks marking the first/last column and row."""
    npix = Hs * Ws
    col = jax.lax.broadcasted_iota(jnp.int32, (1, npix), 1)
    if (Ws & (Ws - 1)) == 0:
        w_idx = jnp.bitwise_and(col, Ws - 1)
    else:
        # TODO(synk): non-power-of-two W relies on vector int remainder.
        w_idx = col % Ws
    m_w0 = w_idx == 0
    m_wl = w_idx == Ws - 1
    m_h0 = col < Ws
    m_hl = col >= npix - Ws
    return m_w0, m_wl, m_h0, m_hl


def _conv3x3(rows, w_ref, b_ref, c_out, Hs, Ws, masks, buf_ref):
    """Reflection-padded 3x3 conv on flat (1, Hs*Ws) rows (spatial in lanes).

    Each input channel is staged once into a flat lane-dense VMEM buffer; the
    nine taps are lane-offset loads from it, with jnp.where selecting the
    reflected source at image borders (reflected sources are always in-range,
    so stale buffer lanes are never selected).  Channel mixing is SMEM-scalar
    * VPU-vector FMA.
    """
    m_w0, m_wl, m_h0, m_hl = masks
    c_in = len(rows)
    npix = Hs * Ws
    base = Ws + 1
    # Stage all rows first so per-channel store->load chains can overlap.
    for ci in range(c_in):
        buf_ref[ci:ci + 1, base:base + npix] = rows[ci]
    acc = [None] * c_out
    for ci in range(c_in):
        sh = {}
        for dy in (-1, 0, 1):
            for dx in (-1, 0, 1):
                if dy == 0 and dx == 0:
                    sh[(0, 0)] = rows[ci]
                else:
                    off = base + dy * Ws + dx
                    sh[(dy, dx)] = buf_ref[ci:ci + 1, off:off + npix]
        for dh in (-1, 0, 1):
            for dw in (-1, 0, 1):
                t = sh[(dh, dw)]
                if dw != 0:                               # column reflection
                    t = jnp.where(m_w0 if dw < 0 else m_wl, sh[(dh, -dw)], t)
                if dh != 0:                               # row reflection
                    tr = sh[(-dh, dw)]
                    if dw != 0:
                        tr = jnp.where(m_w0 if dw < 0 else m_wl,
                                       sh[(-dh, -dw)], tr)
                    t = jnp.where(m_h0 if dh < 0 else m_hl, tr, t)
                for co in range(c_out):
                    wgt = w_ref[((co * c_in + ci) * 3 + (dh + 1)) * 3 + (dw + 1)]
                    term = wgt * t
                    acc[co] = term if acc[co] is None else acc[co] + term
    return [acc[co] + b_ref[co] for co in range(c_out)]


def _pool_rows(rows, pmat, buf_ref, npix):
    """Exact 2x2 avg-pool of flat rows via one MXU contraction.

    The rows are staged into a (c, npix) lane-dense slab and contracted with a
    constant {0, 0.25} pooling matrix.  The slab is split into three
    bf16-exact pieces (manual bf16x3) so the result is exact to ~2^-25 no
    matter how the MXU handles f32 inputs.
    """
    c = len(rows)
    for i in range(c):
        buf_ref[i:i + 1, 0:npix] = rows[i]
    slab = buf_ref[0:c, 0:npix]
    hi = slab.astype(jnp.bfloat16)
    r1 = slab - hi.astype(jnp.float32)
    mid = r1.astype(jnp.bfloat16)
    lo = (r1 - mid.astype(jnp.float32)).astype(jnp.bfloat16)
    pooled = (jnp.dot(hi, pmat, preferred_element_type=jnp.float32)
              + jnp.dot(mid, pmat, preferred_element_type=jnp.float32)
              + jnp.dot(lo, pmat, preferred_element_type=jnp.float32))
    return [pooled[i:i + 1, :] for i in range(c)]


# -----------------------------------------------------------------------------
# kernel factory: whole ResBlk (shortcut + residual + combine) for one batch
# element per grid step.
# -----------------------------------------------------------------------------
def _make_kernel(c_in, c_out, H, W, normalize, downsample, learned_sc):
    HW = H * W
    Ho, Wo = (H // 2, W // 2) if downsample else (H, W)

    def kernel(*refs):
        it = iter(refs)
        x_ref = next(it)                       # (c_in, HW)
        w1 = next(it); b1 = next(it)
        w2 = next(it); b2 = next(it)
        wsc = next(it) if learned_sc else None
        if normalize:
            g1 = next(it); be1 = next(it); g2 = next(it); be2 = next(it)
        pool_ref = next(it) if downsample else None
        o_ref = next(it)                       # (c_out, Ho*Wo)
        buf_ref = next(it)                     # VMEM staging buffer

        masks_full = _edge_masks(H, W)
        masks_out = _edge_masks(Ho, Wo) if downsample else masks_full
        pmat = pool_ref[...] if downsample else None

        xs = [x_ref[ci:ci + 1, :].astype(jnp.float32) for ci in range(c_in)]

        # ---- shortcut: [1x1 conv] -> [2x2 avg-pool] -------------------------
        if learned_sc:
            sc = []
            for co in range(c_out):
                a = None
                for ci in range(c_in):
                    t = wsc[co * c_in + ci] * xs[ci]
                    a = t if a is None else a + t
                sc.append(a)
        else:
            sc = xs
        if downsample:
            sc = _pool_rows(sc, pmat, buf_ref, HW)

        # ---- residual: [norm1] -> lrelu -> conv1 -> [pool] -> [norm2]
        #                -> lrelu -> conv2 -----------------------------------
        res = xs
        if normalize:
            res = [_inorm(res[ci], g1[ci], be1[ci]) for ci in range(c_in)]
        res = [_lrelu(v) for v in res]
        res = _conv3x3(res, w1, b1, c_in, H, W, masks_full, buf_ref)
        if downsample:
            res = _pool_rows(res, pmat, buf_ref, HW)
        if normalize:
            res = [_inorm(res[ci], g2[ci], be2[ci]) for ci in range(c_in)]
        res = [_lrelu(v) for v in res]
        res = _conv3x3(res, w2, b2, c_out, Ho, Wo, masks_out, buf_ref)

        # ---- combine + lane-dense row stores --------------------------------
        for co in range(c_out):
            o_ref[co:co + 1, :] = ((sc[co] + res[co]) * INV_SQRT2).astype(o_ref.dtype)

    return kernel


# -----------------------------------------------------------------------------
# wrapper
# -----------------------------------------------------------------------------
def _smem():
    return pl.BlockSpec(memory_space=pltpu.MemorySpace.SMEM)


def _flat_f32(a):
    return jnp.asarray(a, jnp.float32).reshape(-1)


def _pool_matrix(H, W):
    """(H*W, Ho*Wo) matrix with 0.25 where input pixel i belongs to pool cell j."""
    Ho, Wo = H // 2, W // 2
    i = jnp.arange(H * W)
    hi, wi = i // W, i % W
    j = jnp.arange(Ho * Wo)
    ho, wo = j // Wo, j % Wo
    sel = ((hi[:, None] // 2) == ho[None, :]) & ((wi[:, None] // 2) == wo[None, :])
    return jnp.where(sel, 0.25, 0.0).astype(jnp.bfloat16)   # 0.25/0 exact in bf16


def _avg_pool2(v):
    # exact 2x2 average pool, stride 2 (reference only; XLA-level)
    return 0.25 * (v[:, :, 0::2, 0::2] + v[:, :, 1::2, 0::2]
                   + v[:, :, 0::2, 1::2] + v[:, :, 1::2, 1::2])


def resblk_forward(x, params, *, normalize=False, downsample=False):
    """ResBlk forward on NCHW input x: (N, dim_in, H, W) -> (N, dim_out, Ho, Wo)."""
    N, c_in, H, W = x.shape
    c_out = params["conv2_w"].shape[0]
    learned_sc = "conv1x1_w" in params
    assert learned_sc == (c_in != c_out)
    assert H >= 2 and W >= 2, "reflection padding needs H, W >= 2"
    if downsample:
        assert H % 2 == 0 and W % 2 == 0 and H >= 4 and W >= 4
        Ho, Wo = H // 2, W // 2
    else:
        Ho, Wo = H, W
    HW, HWo = H * W, Ho * Wo
    c_buf = max(c_in, c_out)

    # Lane-dense layout: flatten spatial into the lane axis (free reshape).
    x_flat = x.reshape(N, c_in, HW)

    inputs = [x_flat,
              _flat_f32(params["conv1_w"]), _flat_f32(params["conv1_b"]),
              _flat_f32(params["conv2_w"]), _flat_f32(params["conv2_b"])]
    in_specs = [pl.BlockSpec((None, c_in, HW), lambda n: (n, 0, 0))] + [_smem()] * 4
    if learned_sc:
        inputs.append(_flat_f32(params["conv1x1_w"]))
        in_specs.append(_smem())
    if normalize:
        for k in ("norm1_w", "norm1_b", "norm2_w", "norm2_b"):
            inputs.append(_flat_f32(params[k]))
            in_specs.append(_smem())
    if downsample:
        inputs.append(_pool_matrix(H, W))
        in_specs.append(pl.BlockSpec((HW, HWo), lambda n: (0, 0)))

    kernel = _make_kernel(c_in, c_out, H, W, normalize, downsample, learned_sc)
    out_flat = pl.pallas_call(
        kernel,
        out_shape=jax.ShapeDtypeStruct((N, c_out, HWo), x.dtype),
        grid=(N,),
        in_specs=in_specs,
        out_specs=pl.BlockSpec((None, c_out, HWo), lambda n: (n, 0, 0)),
        # flat lane-dense staging buffer: HW data columns + a 1-pixel halo of
        # W+1 columns on each side for the nine 3x3 tap offsets.
        scratch_shapes=[pltpu.VMEM((c_buf, HW + 2 * W + 2), jnp.float32)],
        compiler_params=pltpu.CompilerParams(
            dimension_semantics=("parallel",),
            vmem_limit_bytes=32 * 1024 * 1024),
    )(*inputs)
    return out_flat.reshape(N, c_out, Ho, Wo)


# -----------------------------------------------------------------------------
# pure-JAX reference mirroring the PyTorch module
# -----------------------------------------------------------------------------
def resblk_ref(x, params, *, normalize=False, downsample=False):
    learned_sc = "conv1x1_w" in params
    hp = jax.lax.Precision.HIGHEST

    def lrelu(v):
        return jnp.where(v >= 0, v, NEG_SLOPE * v)

    def inorm(v, wgt, b):
        m = jnp.mean(v, axis=(2, 3), keepdims=True)
        var = jnp.mean(jnp.square(v - m), axis=(2, 3), keepdims=True)
        vn = (v - m) * jax.lax.rsqrt(var + EPS)
        return vn * wgt.reshape(1, -1, 1, 1) + b.reshape(1, -1, 1, 1)

    def conv3x3(v, wgt, b):
        h, w = v.shape[2], v.shape[3]
        vp = jnp.pad(v, ((0, 0), (0, 0), (1, 1), (1, 1)), mode="reflect")
        out = None
        for kh in range(3):
            for kw in range(3):
                term = jnp.einsum("oi,nihw->nohw", wgt[:, :, kh, kw],
                                  vp[:, :, kh:kh + h, kw:kw + w], precision=hp)
                out = term if out is None else out + term
        return out + b.reshape(1, -1, 1, 1)

    s = x
    if learned_sc:
        s = jnp.einsum("oi,nihw->nohw", params["conv1x1_w"][:, :, 0, 0], s,
                       precision=hp)
    if downsample:
        s = _avg_pool2(s)

    r = x
    if normalize:
        r = inorm(r, params["norm1_w"], params["norm1_b"])
    r = lrelu(r)
    r = conv3x3(r, params["conv1_w"], params["conv1_b"])
    if downsample:
        r = _avg_pool2(r)
    if normalize:
        r = inorm(r, params["norm2_w"], params["norm2_b"])
    r = lrelu(r)
    r = conv3x3(r, params["conv2_w"], params["conv2_b"])

    return (s + r) * INV_SQRT2


def init_resblk_params(key, dim_in, dim_out, *, normalize):
    """Deterministic synthetic parameters with ResBlk's shapes."""
    ks = jax.random.split(key, 9)

    def conv_w(k, shape):
        fan_in = shape[1] * shape[2] * shape[3]
        bound = 1.0 / math.sqrt(fan_in)
        return jax.random.uniform(k, shape, minval=-bound, maxval=bound,
                                  dtype=jnp.float32)

    def conv_b(k, n, fan_in):
        bound = 1.0 / math.sqrt(fan_in)
        return jax.random.uniform(k, (n,), minval=-bound, maxval=bound,
                                  dtype=jnp.float32)

    p = {
        "conv1_w": conv_w(ks[0], (dim_in, dim_in, 3, 3)),
        "conv1_b": conv_b(ks[1], dim_in, dim_in * 9),
        "conv2_w": conv_w(ks[2], (dim_out, dim_in, 3, 3)),
        "conv2_b": conv_b(ks[3], dim_out, dim_in * 9),
    }
    if dim_in != dim_out:
        p["conv1x1_w"] = conv_w(ks[4], (dim_out, dim_in, 1, 1))
    if normalize:
        p["norm1_w"] = 1.0 + 0.1 * jax.random.normal(ks[5], (dim_in,), dtype=jnp.float32)
        p["norm1_b"] = 0.1 * jax.random.normal(ks[6], (dim_in,), dtype=jnp.float32)
        p["norm2_w"] = 1.0 + 0.1 * jax.random.normal(ks[7], (dim_in,), dtype=jnp.float32)
        p["norm2_b"] = 0.1 * jax.random.normal(ks[8], (dim_in,), dtype=jnp.float32)
    return p


if __name__ == "__main__":
    N, H, W = 2, 16, 16
    key = jax.random.PRNGKey(0)

    configs = [
        dict(dim_in=4, dim_out=4, normalize=False, downsample=False),  # defaults
        dict(dim_in=4, dim_out=4, normalize=True, downsample=False),
        dict(dim_in=4, dim_out=4, normalize=False, downsample=True),   # identity shortcut + pool
        dict(dim_in=4, dim_out=8, normalize=True, downsample=True),    # all paths
    ]

    for cfg in configs:
        key, kx, kp = jax.random.split(key, 3)
        x = jax.random.normal(kx, (N, cfg["dim_in"], H, W), dtype=jnp.float32)
        params = init_resblk_params(kp, cfg["dim_in"], cfg["dim_out"],
                                    normalize=cfg["normalize"])
        out = jax.block_until_ready(
            resblk_forward(x, params, normalize=cfg["normalize"],
                           downsample=cfg["downsample"]))
        ref = jax.block_until_ready(
            resblk_ref(x, params, normalize=cfg["normalize"],
                       downsample=cfg["downsample"]))
        assert out.shape == ref.shape, (out.shape, ref.shape)
        max_err = float(jnp.max(jnp.abs(out - ref)))
        assert jnp.allclose(out, ref, atol=3e-5, rtol=3e-5), \
            f"mismatch vs reference for {cfg}: max abs err {max_err}"
    print("KERNEL_OK")
</pallas_src>

<mosaic_0001>
module attributes {stable_mosaic.version = 11 : i64} {
  func.func @kernel(%arg0: i32, %arg1: memref<1x4x256xf32, #tpu.memory_space<vmem>>, %arg2: memref<144xf32, #tpu.memory_space<smem>>, %arg3: memref<4xf32, #tpu.memory_space<smem>>, %arg4: memref<144xf32, #tpu.memory_space<smem>>, %arg5: memref<4xf32, #tpu.memory_space<smem>>, %arg6: memref<1x4x256xf32, #tpu.memory_space<vmem>>, %arg7: memref<4x290xf32, #tpu.memory_space<vmem>>) attributes {dimension_semantics = [#tpu.dimension_semantics<parallel>], iteration_bounds = array<i64: 2>, scalar_prefetch = 0 : i64, scratch_operands = 1 : i64, tpu.core_type = #tpu.core_type<tc>, window_params = [{transform_indices = @transform_0, window_bounds = array<i64: 1, 4, 256>}, {transform_indices = @transform_1, window_bounds = array<i64: 144>}, {transform_indices = @transform_2, window_bounds = array<i64: 4>}, {transform_indices = @transform_3, window_bounds = array<i64: 144>}, {transform_indices = @transform_4, window_bounds = array<i64: 4>}, {transform_indices = @transform_5, window_bounds = array<i64: 1, 4, 256>}]} {
    %0 = tpu.iota {dimensions = array<i32: 1>} : vector<1x256xi32>
    %c15_i32 = arith.constant 15 : i32
    %1 = vector.broadcast %c15_i32 : i32 to vector<1x256xi32>
    %2 = arith.andi %0, %1 : vector<1x256xi32>
    %c0_i32 = arith.constant 0 : i32
    %3 = vector.broadcast %c0_i32 : i32 to vector<1x256xi32>
    %4 = arith.cmpi eq, %2, %3 : vector<1x256xi32>
    %c15_i32_0 = arith.constant 15 : i32
    %5 = vector.broadcast %c15_i32_0 : i32 to vector<1x256xi32>
    %6 = arith.cmpi eq, %2, %5 : vector<1x256xi32>
    %c16_i32 = arith.constant 16 : i32
    %7 = vector.broadcast %c16_i32 : i32 to vector<1x256xi32>
    %8 = arith.cmpi slt, %0, %7 : vector<1x256xi32>
    %c240_i32 = arith.constant 240 : i32
    %9 = vector.broadcast %c240_i32 : i32 to vector<1x256xi32>
    %10 = arith.cmpi sge, %0, %9 : vector<1x256xi32>
    %c0 = arith.constant 0 : index
    %c0_1 = arith.constant 0 : index
    %c0_2 = arith.constant 0 : index
    %11 = vector.load %arg1[%c0, %c0_1, %c0_2] : memref<1x4x256xf32, #tpu.memory_space<vmem>>, vector<1x1x256xf32>
    %12 = vector.shape_cast %11 : vector<1x1x256xf32> to vector<1x256xf32>
    %c0_3 = arith.constant 0 : index
    %c1 = arith.constant 1 : index
    %c0_4 = arith.constant 0 : index
    %13 = vector.load %arg1[%c0_3, %c1, %c0_4] : memref<1x4x256xf32, #tpu.memory_space<vmem>>, vector<1x1x256xf32>
    %14 = vector.shape_cast %13 : vector<1x1x256xf32> to vector<1x256xf32>
    %c0_5 = arith.constant 0 : index
    %c2 = arith.constant 2 : index
    %c0_6 = arith.constant 0 : index
    %15 = vector.load %arg1[%c0_5, %c2, %c0_6] : memref<1x4x256xf32, #tpu.memory_space<vmem>>, vector<1x1x256xf32>
    %16 = vector.shape_cast %15 : vector<1x1x256xf32> to vector<1x256xf32>
    %c0_7 = arith.constant 0 : index
    %c3 = arith.constant 3 : index
    %c0_8 = arith.constant 0 : index
    %17 = vector.load %arg1[%c0_7, %c3, %c0_8] : memref<1x4x256xf32, #tpu.memory_space<vmem>>, vector<1x1x256xf32>
    %18 = vector.shape_cast %17 : vector<1x1x256xf32> to vector<1x256xf32>
    %cst = arith.constant 0.000000e+00 : f32
    %19 = vector.broadcast %cst : f32 to vector<1x256xf32>
    %20 = arith.cmpf oge, %12, %19 : vector<1x256xf32>
    %cst_9 = arith.constant 2.000000e-01 : f32
    %21 = vector.broadcast %cst_9 : f32 to vector<1x256xf32>
    %22 = arith.mulf %21, %12 : vector<1x256xf32>
    %23 = arith.select %20, %12, %22 : vector<1x256xi1>, vector<1x256xf32>
    %cst_10 = arith.constant 0.000000e+00 : f32
    %24 = vector.broadcast %cst_10 : f32 to vector<1x256xf32>
    %25 = arith.cmpf oge, %14, %24 : vector<1x256xf32>
    %cst_11 = arith.constant 2.000000e-01 : f32
    %26 = vector.broadcast %cst_11 : f32 to vector<1x256xf32>
    %27 = arith.mulf %26, %14 : vector<1x256xf32>
    %28 = arith.select %25, %14, %27 : vector<1x256xi1>, vector<1x256xf32>
    %cst_12 = arith.constant 0.000000e+00 : f32
    %29 = vector.broadcast %cst_12 : f32 to vector<1x256xf32>
    %30 = arith.cmpf oge, %16, %29 : vector<1x256xf32>
    %cst_13 = arith.constant 2.000000e-01 : f32
    %31 = vector.broadcast %cst_13 : f32 to vector<1x256xf32>
    %32 = arith.mulf %31, %16 : vector<1x256xf32>
    %33 = arith.select %30, %16, %32 : vector<1x256xi1>, vector<1x256xf32>
    %cst_14 = arith.constant 0.000000e+00 : f32
    %34 = vector.broadcast %cst_14 : f32 to vector<1x256xf32>
    %35 = arith.cmpf oge, %18, %34 : vector<1x256xf32>
    %cst_15 = arith.constant 2.000000e-01 : f32
    %36 = vector.broadcast %cst_15 : f32 to vector<1x256xf32>
    %37 = arith.mulf %36, %18 : vector<1x256xf32>
    %38 = arith.select %35, %18, %37 : vector<1x256xi1>, vector<1x256xf32>
    %c0_16 = arith.constant 0 : index
    %c17 = arith.constant 17 : index
    %39 = vector.load %arg7[%c0_16, %c17] : memref<4x290xf32, #tpu.memory_space<vmem>>, vector<1x256xf32>
    tpu.vector_store %arg7[%c0_16, %c17], %23 {strides = array<i32>} : memref<4x290xf32, #tpu.memory_space<vmem>>, vector<1x256xf32>,
    %c1_17 = arith.constant 1 : index
    %c17_18 = arith.constant 17 : index
    %40 = vector.load %arg7[%c1_17, %c17_18] : memref<4x290xf32, #tpu.memory_space<vmem>>, vector<1x256xf32>
    tpu.vector_store %arg7[%c1_17, %c17_18], %28 {strides = array<i32>} : memref<4x290xf32, #tpu.memory_space<vmem>>, vector<1x256xf32>,
    %c2_19 = arith.constant 2 : index
    %c17_20 = arith.constant 17 : index
    %41 = vector.load %arg7[%c2_19, %c17_20] : memref<4x290xf32, #tpu.memory_space<vmem>>, vector<1x256xf32>
    tpu.vector_store %arg7[%c2_19, %c17_20], %33 {strides = array<i32>} : memref<4x290xf32, #tpu.memory_space<vmem>>, vector<1x256xf32>,
    %c3_21 = arith.constant 3 : index
    %c17_22 = arith.constant 17 : index
    %42 = vector.load %arg7[%c3_21, %c17_22] : memref<4x290xf32, #tpu.memory_space<vmem>>, vector<1x256xf32>
    tpu.vector_store %arg7[%c3_21, %c17_22], %38 {strides = array<i32>} : memref<4x290xf32, #tpu.memory_space<vmem>>, vector<1x256xf32>,
    %c0_23 = arith.constant 0 : index
    %c0_24 = arith.constant 0 : index
    %43 = vector.load %arg7[%c0_23, %c0_24] : memref<4x290xf32, #tpu.memory_space<vmem>>, vector<1x256xf32>
    %c0_25 = arith.constant 0 : index
    %c1_26 = arith.constant 1 : index
    %44 = vector.load %arg7[%c0_25, %c1_26] : memref<4x290xf32, #tpu.memory_space<vmem>>, vector<1x256xf32>
    %c0_27 = arith.constant 0 : index
    %c2_28 = arith.constant 2 : index
    %45 = vector.load %arg7[%c0_27, %c2_28] : memref<4x290xf32, #tpu.memory_space<vmem>>, vector<1x256xf32>
    %c0_29 = arith.constant 0 : index
    %c16 = arith.constant 16 : index
    %46 = vector.load %arg7[%c0_29, %c16] : memref<4x290xf32, #tpu.memory_space<vmem>>, vector<1x256xf32>
    %c0_30 = arith.constant 0 : index
    %c18 = arith.constant 18 : index
    %47 = vector.load %arg7[%c0_30, %c18] : memref<4x290xf32, #tpu.memory_space<vmem>>, vector<1x256xf32>
    %c0_31 = arith.constant 0 : index
    %c32 = arith.constant 32 : index
    %48 = vector.load %arg7[%c0_31, %c32] : memref<4x290xf32, #tpu.memory_space<vmem>>, vector<1x256xf32>
    %c0_32 = arith.constant 0 : index
    %c33 = arith.constant 33 : index
    %49 = vector.load %arg7[%c0_32, %c33] : memref<4x290xf32, #tpu.memory_space<vmem>>, vector<1x256xf32>
    %c0_33 = arith.constant 0 : index
    %c34 = arith.constant 34 : index
    %50 = vector.load %arg7[%c0_33, %c34] : memref<4x290xf32, #tpu.memory_space<vmem>>, vector<1x256xf32>
    %51 = arith.select %4, %45, %43 : vector<1x256xi1>, vector<1x256xf32>
    %52 = arith.select %4, %50, %48 : vector<1x256xi1>, vector<1x256xf32>
    %53 = arith.select %8, %52, %51 : vector<1x256xi1>, vector<1x256xf32>
    %c0_34 = arith.constant 0 : index
    %54 = memref.load %arg2[%c0_34] : memref<144xf32, #tpu.memory_space<smem>>
    %55 = vector.broadcast %54 : f32 to vector<1x256xf32>
    %56 = arith.mulf %55, %53 : vector<1x256xf32>
    %c36 = arith.constant 36 : index
    %57 = memref.load %arg2[%c36] : memref<144xf32, #tpu.memory_space<smem>>
    %58 = vector.broadcast %57 : f32 to vector<1x256xf32>
    %59 = arith.mulf %58, %53 : vector<1x256xf32>
    %c72 = arith.constant 72 : index
    %60 = memref.load %arg2[%c72] : memref<144xf32, #tpu.memory_space<smem>>
    %61 = vector.broadcast %60 : f32 to vector<1x256xf32>
    %62 = arith.mulf %61, %53 : vector<1x256xf32>
    %c108 = arith.constant 108 : index
    %63 = memref.load %arg2[%c108] : memref<144xf32, #tpu.memory_space<smem>>
    %64 = vector.broadcast %63 : f32 to vector<1x256xf32>
    %65 = arith.mulf %64, %53 : vector<1x256xf32>
    %66 = arith.select %8, %49, %44 : vector<1x256xi1>, vector<1x256xf32>
    %c1_35 = arith.constant 1 : index
    %67 = memref.load %arg2[%c1_35] : memref<144xf32, #tpu.memory_space<smem>>
    %68 = vector.broadcast %67 : f32 to vector<1x256xf32>
    %69 = arith.mulf %68, %66 : vector<1x256xf32>
    %70 = arith.addf %56, %69 : vector<1x256xf32>
    %c37 = arith.constant 37 : index
    %71 = memref.load %arg2[%c37] : memref<144xf32, #tpu.memory_space<smem>>
    %72 = vector.broadcast %71 : f32 to vector<1x256xf32>
    %73 = arith.mulf %72, %66 : vector<1x256xf32>
    %74 = arith.addf %59, %73 : vector<1x256xf32>
    %c73 = arith.constant 73 : index
    %75 = memref.load %arg2[%c73] : memref<144xf32, #tpu.memory_space<smem>>
    %76 = vector.broadcast %75 : f32 to vector<1x256xf32>
    %77 = arith.mulf %76, %66 : vector<1x256xf32>
    %78 = arith.addf %62, %77 : vector<1x256xf32>
    %c109 = arith.constant 109 : index
    %79 = memref.load %arg2[%c109] : memref<144xf32, #tpu.memory_space<smem>>
    %80 = vector.broadcast %79 : f32 to vector<1x256xf32>
    %81 = arith.mulf %80, %66 : vector<1x256xf32>
    %82 = arith.addf %65, %81 : vector<1x256xf32>
    %83 = arith.select %6, %43, %45 : vector<1x256xi1>, vector<1x256xf32>
    %84 = arith.select %6, %48, %50 : vector<1x256xi1>, vector<1x256xf32>
    %85 = arith.select %8, %84, %83 : vector<1x256xi1>, vector<1x256xf32>
    %c2_36 = arith.constant 2 : index
    %86 = memref.load %arg2[%c2_36] : memref<144xf32, #tpu.memory_space<smem>>
    %87 = vector.broadcast %86 : f32 to vector<1x256xf32>
    %88 = arith.mulf %87, %85 : vector<1x256xf32>
    %89 = arith.addf %70, %88 : vector<1x256xf32>
    %c38 = arith.constant 38 : index
    %90 = memref.load %arg2[%c38] : memref<144xf32, #tpu.memory_space<smem>>
    %91 = vector.broadcast %90 : f32 to vector<1x256xf32>
    %92 = arith.mulf %91, %85 : vector<1x256xf32>
    %93 = arith.addf %74, %92 : vector<1x256xf32>
    %c74 = arith.constant 74 : index
    %94 = memref.load %arg2[%c74] : memref<144xf32, #tpu.memory_space<smem>>
    %95 = vector.broadcast %94 : f32 to vector<1x256xf32>
    %96 = arith.mulf %95, %85 : vector<1x256xf32>
    %97 = arith.addf %78, %96 : vector<1x256xf32>
    %c110 = arith.constant 110 : index
    %98 = memref.load %arg2[%c110] : memref<144xf32, #tpu.memory_space<smem>>
    %99 = vector.broadcast %98 : f32 to vector<1x256xf32>
    %100 = arith.mulf %99, %85 : vector<1x256xf32>
    %101 = arith.addf %82, %100 : vector<1x256xf32>
    %102 = arith.select %4, %47, %46 : vector<1x256xi1>, vector<1x256xf32>
    %c3_37 = arith.constant 3 : index
    %103 = memref.load %arg2[%c3_37] : memref<144xf32, #tpu.memory_space<smem>>
    %104 = vector.broadcast %103 : f32 to vector<1x256xf32>
    %105 = arith.mulf %104, %102 : vector<1x256xf32>
    %106 = arith.addf %89, %105 : vector<1x256xf32>
    %c39 = arith.constant 39 : index
    %107 = memref.load %arg2[%c39] : memref<144xf32, #tpu.memory_space<smem>>
    %108 = vector.broadcast %107 : f32 to vector<1x256xf32>
    %109 = arith.mulf %108, %102 : vector<1x256xf32>
    %110 = arith.addf %93, %109 : vector<1x256xf32>
    %c75 = arith.constant 75 : index
    %111 = memref.load %arg2[%c75] : memref<144xf32, #tpu.memory_space<smem>>
    %112 = vector.broadcast %111 : f32 to vector<1x256xf32>
    %113 = arith.mulf %112, %102 : vector<1x256xf32>
    %114 = arith.addf %97, %113 : vector<1x256xf32>
    %c111 = arith.constant 111 : index
    %115 = memref.load %arg2[%c111] : memref<144xf32, #tpu.memory_space<smem>>
    %116 = vector.broadcast %115 : f32 to vector<1x256xf32>
    %117 = arith.mulf %116, %102 : vector<1x256xf32>
    %118 = arith.addf %101, %117 : vector<1x256xf32>
    %c4 = arith.constant 4 : index
    %119 = memref.load %arg2[%c4] : memref<144xf32, #tpu.memory_space<smem>>
    %120 = vector.broadcast %119 : f32 to vector<1x256xf32>
    %121 = arith.mulf %120, %23 : vector<1x256xf32>
    %122 = arith.addf %106, %121 : vector<1x256xf32>
    %c40 = arith.constant 40 : index
    %123 = memref.load %arg2[%c40] : memref<144xf32, #tpu.memory_space<smem>>
    %124 = vector.broadcast %123 : f32 to vector<1x256xf32>
    %125 = arith.mulf %124, %23 : vector<1x256xf32>
    %126 = arith.addf %110, %125 : vector<1x256xf32>
    %c76 = arith.constant 76 : index
    %127 = memref.load %arg2[%c76] : memref<144xf32, #tpu.memory_space<smem>>
    %128 = vector.broadcast %127 : f32 to vector<1x256xf32>
    %129 = arith.mulf %128, %23 : vector<1x256xf32>
    %130 = arith.addf %114, %129 : vector<1x256xf32>
    %c112 = arith.constant 112 : index
    %131 = memref.load %arg2[%c112] : memref<144xf32, #tpu.memory_space<smem>>
    %132 = vector.broadcast %131 : f32 to vector<1x256xf32>
    %133 = arith.mulf %132, %23 : vector<1x256xf32>
    %134 = arith.addf %118, %133 : vector<1x256xf32>
    %135 = arith.select %6, %46, %47 : vector<1x256xi1>, vector<1x256xf32>
    %c5 = arith.constant 5 : index
    %136 = memref.load %arg2[%c5] : memref<144xf32, #tpu.memory_space<smem>>
    %137 = vector.broadcast %136 : f32 to vector<1x256xf32>
    %138 = arith.mulf %137, %135 : vector<1x256xf32>
    %139 = arith.addf %122, %138 : vector<1x256xf32>
    %c41 = arith.constant 41 : index
    %140 = memref.load %arg2[%c41] : memref<144xf32, #tpu.memory_space<smem>>
    %141 = vector.broadcast %140 : f32 to vector<1x256xf32>
    %142 = arith.mulf %141, %135 : vector<1x256xf32>
    %143 = arith.addf %126, %142 : vector<1x256xf32>
    %c77 = arith.constant 77 : index
    %144 = memref.load %arg2[%c77] : memref<144xf32, #tpu.memory_space<smem>>
    %145 = vector.broadcast %144 : f32 to vector<1x256xf32>
    %146 = arith.mulf %145, %135 : vector<1x256xf32>
    %147 = arith.addf %130, %146 : vector<1x256xf32>
    %c113 = arith.constant 113 : index
    %148 = memref.load %arg2[%c113] : memref<144xf32, #tpu.memory_space<smem>>
    %149 = vector.broadcast %148 : f32 to vector<1x256xf32>
    %150 = arith.mulf %149, %135 : vector<1x256xf32>
    %151 = arith.addf %134, %150 : vector<1x256xf32>
    %152 = arith.select %4, %50, %48 : vector<1x256xi1>, vector<1x256xf32>
    %153 = arith.select %4, %45, %43 : vector<1x256xi1>, vector<1x256xf32>
    %154 = arith.select %10, %153, %152 : vector<1x256xi1>, vector<1x256xf32>
    %c6 = arith.constant 6 : index
    %155 = memref.load %arg2[%c6] : memref<144xf32, #tpu.memory_space<smem>>
    %156 = vector.broadcast %155 : f32 to vector<1x256xf32>
    %157 = arith.mulf %156, %154 : vector<1x256xf32>
    %158 = arith.addf %139, %157 : vector<1x256xf32>
    %c42 = arith.constant 42 : index
    %159 = memref.load %arg2[%c42] : memref<144xf32, #tpu.memory_space<smem>>
    %160 = vector.broadcast %159 : f32 to vector<1x256xf32>
    %161 = arith.mulf %160, %154 : vector<1x256xf32>
    %162 = arith.addf %143, %161 : vector<1x256xf32>
    %c78 = arith.constant 78 : index
    %163 = memref.load %arg2[%c78] : memref<144xf32, #tpu.memory_space<smem>>
    %164 = vector.broadcast %163 : f32 to vector<1x256xf32>
    %165 = arith.mulf %164, %154 : vector<1x256xf32>
    %166 = arith.addf %147, %165 : vector<1x256xf32>
    %c114 = arith.constant 114 : index
    %167 = memref.load %arg2[%c114] : memref<144xf32, #tpu.memory_space<smem>>
    %168 = vector.broadcast %167 : f32 to vector<1x256xf32>
    %169 = arith.mulf %168, %154 : vector<1x256xf32>
    %170 = arith.addf %151, %169 : vector<1x256xf32>
    %171 = arith.select %10, %44, %49 : vector<1x256xi1>, vector<1x256xf32>
    %c7 = arith.constant 7 : index
    %172 = memref.load %arg2[%c7] : memref<144xf32, #tpu.memory_space<smem>>
    %173 = vector.broadcast %172 : f32 to vector<1x256xf32>
    %174 = arith.mulf %173, %171 : vector<1x256xf32>
    %175 = arith.addf %158, %174 : vector<1x256xf32>
    %c43 = arith.constant 43 : index
    %176 = memref.load %arg2[%c43] : memref<144xf32, #tpu.memory_space<smem>>
    %177 = vector.broadcast %176 : f32 to vector<1x256xf32>
    %178 = arith.mulf %177, %171 : vector<1x256xf32>
    %179 = arith.addf %162, %178 : vector<1x256xf32>
    %c79 = arith.constant 79 : index
    %180 = memref.load %arg2[%c79] : memref<144xf32, #tpu.memory_space<smem>>
    %181 = vector.broadcast %180 : f32 to vector<1x256xf32>
    %182 = arith.mulf %181, %171 : vector<1x256xf32>
    %183 = arith.addf %166, %182 : vector<1x256xf32>
    %c115 = arith.constant 115 : index
    %184 = memref.load %arg2[%c115] : memref<144xf32, #tpu.memory_space<smem>>
    %185 = vector.broadcast %184 : f32 to vector<1x256xf32>
    %186 = arith.mulf %185, %171 : vector<1x256xf32>
    %187 = arith.addf %170, %186 : vector<1x256xf32>
    %188 = arith.select %6, %48, %50 : vector<1x256xi1>, vector<1x256xf32>
    %189 = arith.select %6, %43, %45 : vector<1x256xi1>, vector<1x256xf32>
    %190 = arith.select %10, %189, %188 : vector<1x256xi1>, vector<1x256xf32>
    %c8 = arith.constant 8 : index
    %191 = memref.load %arg2[%c8] : memref<144xf32, #tpu.memory_space<smem>>
    %192 = vector.broadcast %191 : f32 to vector<1x256xf32>
    %193 = arith.mulf %192, %190 : vector<1x256xf32>
    %194 = arith.addf %175, %193 : vector<1x256xf32>
    %c44 = arith.constant 44 : index
    %195 = memref.load %arg2[%c44] : memref<144xf32, #tpu.memory_space<smem>>
    %196 = vector.broadcast %195 : f32 to vector<1x256xf32>
    %197 = arith.mulf %196, %190 : vector<1x256xf32>
    %198 = arith.addf %179, %197 : vector<1x256xf32>
    %c80 = arith.constant 80 : index
    %199 = memref.load %arg2[%c80] : memref<144xf32, #tpu.memory_space<smem>>
    %200 = vector.broadcast %199 : f32 to vector<1x256xf32>
    %201 = arith.mulf %200, %190 : vector<1x256xf32>
    %202 = arith.addf %183, %201 : vector<1x256xf32>
    %c116 = arith.constant 116 : index
    %203 = memref.load %arg2[%c116] : memref<144xf32, #tpu.memory_space<smem>>
    %204 = vector.broadcast %203 : f32 to vector<1x256xf32>
    %205 = arith.mulf %204, %190 : vector<1x256xf32>
    %206 = arith.addf %187, %205 : vector<1x256xf32>
    %c1_38 = arith.constant 1 : index
    %c0_39 = arith.constant 0 : index
    %207 = vector.load %arg7[%c1_38, %c0_39] : memref<4x290xf32, #tpu.memory_space<vmem>>, vector<1x256xf32>
    %c1_40 = arith.constant 1 : index
    %c1_41 = arith.constant 1 : index
    %208 = vector.load %arg7[%c1_40, %c1_41] : memref<4x290xf32, #tpu.memory_space<vmem>>, vector<1x256xf32>
    %c1_42 = arith.constant 1 : index
    %c2_43 = arith.constant 2 : index
    %209 = vector.load %arg7[%c1_42, %c2_43] : memref<4x290xf32, #tpu.memory_space<vmem>>, vector<1x256xf32>
    %c1_44 = arith.constant 1 : index
    %c16_45 = arith.constant 16 : index
    %210 = vector.load %arg7[%c1_44, %c16_45] : memref<4x290xf32, #tpu.memory_space<vmem>>, vector<1x256xf32>
    %c1_46 = arith.constant 1 : index
    %c18_47 = arith.constant 18 : index
    %211 = vector.load %arg7[%c1_46, %c18_47] : memref<4x290xf32, #tpu.memory_space<vmem>>, vector<1x256xf32>
    %c1_48 = arith.constant 1 : index
    %c32_49 = arith.constant 32 : index
    %212 = vector.load %arg7[%c1_48, %c32_49] : memref<4x290xf32, #tpu.memory_space<vmem>>, vector<1x256xf32>
    %c1_50 = arith.constant 1 : index
    %c33_51 = arith.constant 33 : index
    %213 = vector.load %arg7[%c1_50, %c33_51] : memref<4x290xf32, #tpu.memory_space<vmem>>, vector<1x256xf32>
    %c1_52 = arith.constant 1 : index
    %c34_53 = arith.constant 34 : index
    %214 = vector.load %arg7[%c1_52, %c34_53] : memref<4x290xf32, #tpu.memory_space<vmem>>, vector<1x256xf32>
    %215 = arith.select %4, %209, %207 : vector<1x256xi1>, vector<1x256xf32>
    %216 = arith.select %4, %214, %212 : vector<1x256xi1>, vector<1x256xf32>
    %217 = arith.select %8, %216, %215 : vector<1x256xi1>, vector<1x256xf32>
    %c9 = arith.constant 9 : index
    %218 = memref.load %arg2[%c9] : memref<144xf32, #tpu.memory_space<smem>>
    %219 = vector.broadcast %218 : f32 to vector<1x256xf32>
    %220 = arith.mulf %219, %217 : vector<1x256xf32>
    %221 = arith.addf %194, %220 : vector<1x256xf32>
    %c45 = arith.constant 45 : index
    %222 = memref.load %arg2[%c45] : memref<144xf32, #tpu.memory_space<smem>>
    %223 = vector.broadcast %222 : f32 to vector<1x256xf32>
    %224 = arith.mulf %223, %217 : vector<1x256xf32>
    %225 = arith.addf %198, %224 : vector<1x256xf32>
    %c81 = arith.constant 81 : index
    %226 = memref.load %arg2[%c81] : memref<144xf32, #tpu.memory_space<smem>>
    %227 = vector.broadcast %226 : f32 to vector<1x256xf32>
    %228 = arith.mulf %227, %217 : vector<1x256xf32>
    %229 = arith.addf %202, %228 : vector<1x256xf32>
    %c117 = arith.constant 117 : index
    %230 = memref.load %arg2[%c117] : memref<144xf32, #tpu.memory_space<smem>>
    %231 = vector.broadcast %230 : f32 to vector<1x256xf32>
    %232 = arith.mulf %231, %217 : vector<1x256xf32>
    %233 = arith.addf %206, %232 : vector<1x256xf32>
    %234 = arith.select %8, %213, %208 : vector<1x256xi1>, vector<1x256xf32>
    %c10 = arith.constant 10 : index
    %235 = memref.load %arg2[%c10] : memref<144xf32, #tpu.memory_space<smem>>
    %236 = vector.broadcast %235 : f32 to vector<1x256xf32>
    %237 = arith.mulf %236, %234 : vector<1x256xf32>
    %238 = arith.addf %221, %237 : vector<1x256xf32>
    %c46 = arith.constant 46 : index
    %239 = memref.load %arg2[%c46] : memref<144xf32, #tpu.memory_space<smem>>
    %240 = vector.broadcast %239 : f32 to vector<1x256xf32>
    %241 = arith.mulf %240, %234 : vector<1x256xf32>
    %242 = arith.addf %225, %241 : vector<1x256xf32>
    %c82 = arith.constant 82 : index
    %243 = memref.load %arg2[%c82] : memref<144xf32, #tpu.memory_space<smem>>
    %244 = vector.broadcast %243 : f32 to vector<1x256xf32>
    %245 = arith.mulf %244, %234 : vector<1x256xf32>
    %246 = arith.addf %229, %245 : vector<1x256xf32>
    %c118 = arith.constant 118 : index
    %247 = memref.load %arg2[%c118] : memref<144xf32, #tpu.memory_space<smem>>
    %248 = vector.broadcast %247 : f32 to vector<1x256xf32>
    %249 = arith.mulf %248, %234 : vector<1x256xf32>
    %250 = arith.addf %233, %249 : vector<1x256xf32>
    %251 = arith.select %6, %207, %209 : vector<1x256xi1>, vector<1x256xf32>
    %252 = arith.select %6, %212, %214 : vector<1x256xi1>, vector<1x256xf32>
    %253 = arith.select %8, %252, %251 : vector<1x256xi1>, vector<1x256xf32>
    %c11 = arith.constant 11 : index
    %254 = memref.load %arg2[%c11] : memref<144xf32, #tpu.memory_space<smem>>
    %255 = vector.broadcast %254 : f32 to vector<1x256xf32>
    %256 = arith.mulf %255, %253 : vector<1x256xf32>
    %257 = arith.addf %238, %256 : vector<1x256xf32>
    %c47 = arith.constant 47 : index
    %258 = memref.load %arg2[%c47] : memref<144xf32, #tpu.memory_space<smem>>
    %259 = vector.broadcast %258 : f32 to vector<1x256xf32>
    %260 = arith.mulf %259, %253 : vector<1x256xf32>
    %261 = arith.addf %242, %260 : vector<1x256xf32>
    %c83 = arith.constant 83 : index
    %262 = memref.load %arg2[%c83] : memref<144xf32, #tpu.memory_space<smem>>
    %263 = vector.broadcast %262 : f32 to vector<1x256xf32>
    %264 = arith.mulf %263, %253 : vector<1x256xf32>
    %265 = arith.addf %246, %264 : vector<1x256xf32>
    %c119 = arith.constant 119 : index
    %266 = memref.load %arg2[%c119] : memref<144xf32, #tpu.memory_space<smem>>
    %267 = vector.broadcast %266 : f32 to vector<1x256xf32>
    %268 = arith.mulf %267, %253 : vector<1x256xf32>
    %269 = arith.addf %250, %268 : vector<1x256xf32>
    %270 = arith.select %4, %211, %210 : vector<1x256xi1>, vector<1x256xf32>
    %c12 = arith.constant 12 : index
    %271 = memref.load %arg2[%c12] : memref<144xf32, #tpu.memory_space<smem>>
    %272 = vector.broadcast %271 : f32 to vector<1x256xf32>
    %273 = arith.mulf %272, %270 : vector<1x256xf32>
    %274 = arith.addf %257, %273 : vector<1x256xf32>
    %c48 = arith.constant 48 : index
    %275 = memref.load %arg2[%c48] : memref<144xf32, #tpu.memory_space<smem>>
    %276 = vector.broadcast %275 : f32 to vector<1x256xf32>
    %277 = arith.mulf %276, %270 : vector<1x256xf32>
    %278 = arith.addf %261, %277 : vector<1x256xf32>
    %c84 = arith.constant 84 : index
    %279 = memref.load %arg2[%c84] : memref<144xf32, #tpu.memory_space<smem>>
    %280 = vector.broadcast %279 : f32 to vector<1x256xf32>
    %281 = arith.mulf %280, %270 : vector<1x256xf32>
    %282 = arith.addf %265, %281 : vector<1x256xf32>
    %c120 = arith.constant 120 : index
    %283 = memref.load %arg2[%c120] : memref<144xf32, #tpu.memory_space<smem>>
    %284 = vector.broadcast %283 : f32 to vector<1x256xf32>
    %285 = arith.mulf %284, %270 : vector<1x256xf32>
    %286 = arith.addf %269, %285 : vector<1x256xf32>
    %c13 = arith.constant 13 : index
    %287 = memref.load %arg2[%c13] : memref<144xf32, #tpu.memory_space<smem>>
    %288 = vector.broadcast %287 : f32 to vector<1x256xf32>
    %289 = arith.mulf %288, %28 : vector<1x256xf32>
    %290 = arith.addf %274, %289 : vector<1x256xf32>
    %c49 = arith.constant 49 : index
    %291 = memref.load %arg2[%c49] : memref<144xf32, #tpu.memory_space<smem>>
    %292 = vector.broadcast %291 : f32 to vector<1x256xf32>
    %293 = arith.mulf %292, %28 : vector<1x256xf32>
    %294 = arith.addf %278, %293 : vector<1x256xf32>
    %c85 = arith.constant 85 : index
    %295 = memref.load %arg2[%c85] : memref<144xf32, #tpu.memory_space<smem>>
    %296 = vector.broadcast %295 : f32 to vector<1x256xf32>
    %297 = arith.mulf %296, %28 : vector<1x256xf32>
    %298 = arith.addf %282, %297 : vector<1x256xf32>
    %c121 = arith.constant 121 : index
    %299 = memref.load %arg2[%c121] : memref<144xf32, #tpu.memory_space<smem>>
    %300 = vector.broadcast %299 : f32 to vector<1x256xf32>
    %301 = arith.mulf %300, %28 : vector<1x256xf32>
    %302 = arith.addf %286, %301 : vector<1x256xf32>
    %303 = arith.select %6, %210, %211 : vector<1x256xi1>, vector<1x256xf32>
    %c14 = arith.constant 14 : index
    %304 = memref.load %arg2[%c14] : memref<144xf32, #tpu.memory_space<smem>>
    %305 = vector.broadcast %304 : f32 to vector<1x256xf32>
    %306 = arith.mulf %305, %303 : vector<1x256xf32>
    %307 = arith.addf %290, %306 : vector<1x256xf32>
    %c50 = arith.constant 50 : index
    %308 = memref.load %arg2[%c50] : memref<144xf32, #tpu.memory_space<smem>>
    %309 = vector.broadcast %308 : f32 to vector<1x256xf32>
    %310 = arith.mulf %309, %303 : vector<1x256xf32>
    %311 = arith.addf %294, %310 : vector<1x256xf32>
    %c86 = arith.constant 86 : index
    %312 = memref.load %arg2[%c86] : memref<144xf32, #tpu.memory_space<smem>>
    %313 = vector.broadcast %312 : f32 to vector<1x256xf32>
    %314 = arith.mulf %313, %303 : vector<1x256xf32>
    %315 = arith.addf %298, %314 : vector<1x256xf32>
    %c122 = arith.constant 122 : index
    %316 = memref.load %arg2[%c122] : memref<144xf32, #tpu.memory_space<smem>>
    %317 = vector.broadcast %316 : f32 to vector<1x256xf32>
    %318 = arith.mulf %317, %303 : vector<1x256xf32>
    %319 = arith.addf %302, %318 : vector<1x256xf32>
    %320 = arith.select %4, %214, %212 : vector<1x256xi1>, vector<1x256xf32>
    %321 = arith.select %4, %209, %207 : vector<1x256xi1>, vector<1x256xf32>
    %322 = arith.select %10, %321, %320 : vector<1x256xi1>, vector<1x256xf32>
    %c15 = arith.constant 15 : index
    %323 = memref.load %arg2[%c15] : memref<144xf32, #tpu.memory_space<smem>>
    %324 = vector.broadcast %323 : f32 to vector<1x256xf32>
    %325 = arith.mulf %324, %322 : vector<1x256xf32>
    %326 = arith.addf %307, %325 : vector<1x256xf32>
    %c51 = arith.constant 51 : index
    %327 = memref.load %arg2[%c51] : memref<144xf32, #tpu.memory_space<smem>>
    %328 = vector.broadcast %327 : f32 to vector<1x256xf32>
    %329 = arith.mulf %328, %322 : vector<1x256xf32>
    %330 = arith.addf %311, %329 : vector<1x256xf32>
    %c87 = arith.constant 87 : index
    %331 = memref.load %arg2[%c87] : memref<144xf32, #tpu.memory_space<smem>>
    %332 = vector.broadcast %331 : f32 to vector<1x256xf32>
    %333 = arith.mulf %332, %322 : vector<1x256xf32>
    %334 = arith.addf %315, %333 : vector<1x256xf32>
    %c123 = arith.constant 123 : index
    %335 = memref.load %arg2[%c123] : memref<144xf32, #tpu.memory_space<smem>>
    %336 = vector.broadcast %335 : f32 to vector<1x256xf32>
    %337 = arith.mulf %336, %322 : vector<1x256xf32>
    %338 = arith.addf %319, %337 : vector<1x256xf32>
    %339 = arith.select %10, %208, %213 : vector<1x256xi1>, vector<1x256xf32>
    %c16_54 = arith.constant 16 : index
    %340 = memref.load %arg2[%c16_54] : memref<144xf32, #tpu.memory_space<smem>>
    %341 = vector.broadcast %340 : f32 to vector<1x256xf32>
    %342 = arith.mulf %341, %339 : vector<1x256xf32>
    %343 = arith.addf %326, %342 : vector<1x256xf32>
    %c52 = arith.constant 52 : index
    %344 = memref.load %arg2[%c52] : memref<144xf32, #tpu.memory_space<smem>>
    %345 = vector.broadcast %344 : f32 to vector<1x256xf32>
    %346 = arith.mulf %345, %339 : vector<1x256xf32>
    %347 = arith.addf %330, %346 : vector<1x256xf32>
    %c88 = arith.constant 88 : index
    %348 = memref.load %arg2[%c88] : memref<144xf32, #tpu.memory_space<smem>>
    %349 = vector.broadcast %348 : f32 to vector<1x256xf32>
    %350 = arith.mulf %349, %339 : vector<1x256xf32>
    %351 = arith.addf %334, %350 : vector<1x256xf32>
    %c124 = arith.constant 124 : index
    %352 = memref.load %arg2[%c124] : memref<144xf32, #tpu.memory_space<smem>>
    %353 = vector.broadcast %352 : f32 to vector<1x256xf32>
    %354 = arith.mulf %353, %339 : vector<1x256xf32>
    %355 = arith.addf %338, %354 : vector<1x256xf32>
    %356 = arith.select %6, %212, %214 : vector<1x256xi1>, vector<1x256xf32>
    %357 = arith.select %6, %207, %209 : vector<1x256xi1>, vector<1x256xf32>
    %358 = arith.select %10, %357, %356 : vector<1x256xi1>, vector<1x256xf32>
    %c17_55 = arith.constant 17 : index
    %359 = memref.load %arg2[%c17_55] : memref<144xf32, #tpu.memory_space<smem>>
    %360 = vector.broadcast %359 : f32 to vector<1x256xf32>
    %361 = arith.mulf %360, %358 : vector<1x256xf32>
    %362 = arith.addf %343, %361 : vector<1x256xf32>
    %c53 = arith.constant 53 : index
    %363 = memref.load %arg2[%c53] : memref<144xf32, #tpu.memory_space<smem>>
    %364 = vector.broadcast %363 : f32 to vector<1x256xf32>
    %365 = arith.mulf %364, %358 : vector<1x256xf32>
    %366 = arith.addf %347, %365 : vector<1x256xf32>
    %c89 = arith.constant 89 : index
    %367 = memref.load %arg2[%c89] : memref<144xf32, #tpu.memory_space<smem>>
    %368 = vector.broadcast %367 : f32 to vector<1x256xf32>
    %369 = arith.mulf %368, %358 : vector<1x256xf32>
    %370 = arith.addf %351, %369 : vector<1x256xf32>
    %c125 = arith.constant 125 : index
    %371 = memref.load %arg2[%c125] : memref<144xf32, #tpu.memory_space<smem>>
    %372 = vector.broadcast %371 : f32 to vector<1x256xf32>
    %373 = arith.mulf %372, %358 : vector<1x256xf32>
    %374 = arith.addf %355, %373 : vector<1x256xf32>
    %c2_56 = arith.constant 2 : index
    %c0_57 = arith.constant 0 : index
    %375 = vector.load %arg7[%c2_56, %c0_57] : memref<4x290xf32, #tpu.memory_space<vmem>>, vector<1x256xf32>
    %c2_58 = arith.constant 2 : index
    %c1_59 = arith.constant 1 : index
    %376 = vector.load %arg7[%c2_58, %c1_59] : memref<4x290xf32, #tpu.memory_space<vmem>>, vector<1x256xf32>
    %c2_60 = arith.constant 2 : index
    %c2_61 = arith.constant 2 : index
    %377 = vector.load %arg7[%c2_60, %c2_61] : memref<4x290xf32, #tpu.memory_space<vmem>>, vector<1x256xf32>
    %c2_62 = arith.constant 2 : index
    %c16_63 = arith.constant 16 : index
    %378 = vector.load %arg7[%c2_62, %c16_63] : memref<4x290xf32, #tpu.memory_space<vmem>>, vector<1x256xf32>
    %c2_64 = arith.constant 2 : index
    %c18_65 = arith.constant 18 : index
    %379 = vector.load %arg7[%c2_64, %c18_65] : memref<4x290xf32, #tpu.memory_space<vmem>>, vector<1x256xf32>
    %c2_66 = arith.constant 2 : index
    %c32_67 = arith.constant 32 : index
    %380 = vector.load %arg7[%c2_66, %c32_67] : memref<4x290xf32, #tpu.memory_space<vmem>>, vector<1x256xf32>
    %c2_68 = arith.constant 2 : index
    %c33_69 = arith.constant 33 : index
    %381 = vector.load %arg7[%c2_68, %c33_69] : memref<4x290xf32, #tpu.memory_space<vmem>>, vector<1x256xf32>
    %c2_70 = arith.constant 2 : index
    %c34_71 = arith.constant 34 : index
    %382 = vector.load %arg7[%c2_70, %c34_71] : memref<4x290xf32, #tpu.memory_space<vmem>>, vector<1x256xf32>
    %383 = arith.select %4, %377, %375 : vector<1x256xi1>, vector<1x256xf32>
    %384 = arith.select %4, %382, %380 : vector<1x256xi1>, vector<1x256xf32>
    %385 = arith.select %8, %384, %383 : vector<1x256xi1>, vector<1x256xf32>
    %c18_72 = arith.constant 18 : index
    %386 = memref.load %arg2[%c18_72] : memref<144xf32, #tpu.memory_space<smem>>
    %387 = vector.broadcast %386 : f32 to vector<1x256xf32>
    %388 = arith.mulf %387, %385 : vector<1x256xf32>
    %389 = arith.addf %362, %388 : vector<1x256xf32>
    %c54 = arith.constant 54 : index
    %390 = memref.load %arg2[%c54] : memref<144xf32, #tpu.memory_space<smem>>
    %391 = vector.broadcast %390 : f32 to vector<1x256xf32>
    %392 = arith.mulf %391, %385 : vector<1x256xf32>
    %393 = arith.addf %366, %392 : vector<1x256xf32>
    %c90 = arith.constant 90 : index
    %394 = memref.load %arg2[%c90] : memref<144xf32, #tpu.memory_space<smem>>
    %395 = vector.broadcast %394 : f32 to vector<1x256xf32>
    %396 = arith.mulf %395, %385 : vector<1x256xf32>
    %397 = arith.addf %370, %396 : vector<1x256xf32>
    %c126 = arith.constant 126 : index
    %398 = memref.load %arg2[%c126] : memref<144xf32, #tpu.memory_space<smem>>
    %399 = vector.broadcast %398 : f32 to vector<1x256xf32>
    %400 = arith.mulf %399, %385 : vector<1x256xf32>
    %401 = arith.addf %374, %400 : vector<1x256xf32>
    %402 = arith.select %8, %381, %376 : vector<1x256xi1>, vector<1x256xf32>
    %c19 = arith.constant 19 : index
    %403 = memref.load %arg2[%c19] : memref<144xf32, #tpu.memory_space<smem>>
    %404 = vector.broadcast %403 : f32 to vector<1x256xf32>
    %405 = arith.mulf %404, %402 : vector<1x256xf32>
    %406 = arith.addf %389, %405 : vector<1x256xf32>
    %c55 = arith.constant 55 : index
    %407 = memref.load %arg2[%c55] : memref<144xf32, #tpu.memory_space<smem>>
    %408 = vector.broadcast %407 : f32 to vector<1x256xf32>
    %409 = arith.mulf %408, %402 : vector<1x256xf32>
    %410 = arith.addf %393, %409 : vector<1x256xf32>
    %c91 = arith.constant 91 : index
    %411 = memref.load %arg2[%c91] : memref<144xf32, #tpu.memory_space<smem>>
    %412 = vector.broadcast %411 : f32 to vector<1x256xf32>
    %413 = arith.mulf %412, %402 : vector<1x256xf32>
    %414 = arith.addf %397, %413 : vector<1x256xf32>
    %c127 = arith.constant 127 : index
    %415 = memref.load %arg2[%c127] : memref<144xf32, #tpu.memory_space<smem>>
    %416 = vector.broadcast %415 : f32 to vector<1x256xf32>
    %417 = arith.mulf %416, %402 : vector<1x256xf32>
    %418 = arith.addf %401, %417 : vector<1x256xf32>
    %419 = arith.select %6, %375, %377 : vector<1x256xi1>, vector<1x256xf32>
    %420 = arith.select %6, %380, %382 : vector<1x256xi1>, vector<1x256xf32>
    %421 = arith.select %8, %420, %419 : vector<1x256xi1>, vector<1x256xf32>
    %c20 = arith.constant 20 : index
    %422 = memref.load %arg2[%c20] : memref<144xf32, #tpu.memory_space<smem>>
    %423 = vector.broadcast %422 : f32 to vector<1x256xf32>
    %424 = arith.mulf %423, %421 : vector<1x256xf32>
    %425 = arith.addf %406, %424 : vector<1x256xf32>
    %c56 = arith.constant 56 : index
    %426 = memref.load %arg2[%c56] : memref<144xf32, #tpu.memory_space<smem>>
    %427 = vector.broadcast %426 : f32 to vector<1x256xf32>
    %428 = arith.mulf %427, %421 : vector<1x256xf32>
    %429 = arith.addf %410, %428 : vector<1x256xf32>
    %c92 = arith.constant 92 : index
    %430 = memref.load %arg2[%c92] : memref<144xf32, #tpu.memory_space<smem>>
    %431 = vector.broadcast %430 : f32 to vector<1x256xf32>
    %432 = arith.mulf %431, %421 : vector<1x256xf32>
    %433 = arith.addf %414, %432 : vector<1x256xf32>
    %c128 = arith.constant 128 : index
    %434 = memref.load %arg2[%c128] : memref<144xf32, #tpu.memory_space<smem>>
    %435 = vector.broadcast %434 : f32 to vector<1x256xf32>
    %436 = arith.mulf %435, %421 : vector<1x256xf32>
    %437 = arith.addf %418, %436 : vector<1x256xf32>
    %438 = arith.select %4, %379, %378 : vector<1x256xi1>, vector<1x256xf32>
    %c21 = arith.constant 21 : index
    %439 = memref.load %arg2[%c21] : memref<144xf32, #tpu.memory_space<smem>>
    %440 = vector.broadcast %439 : f32 to vector<1x256xf32>
    %441 = arith.mulf %440, %438 : vector<1x256xf32>
    %442 = arith.addf %425, %441 : vector<1x256xf32>
    %c57 = arith.constant 57 : index
    %443 = memref.load %arg2[%c57] : memref<144xf32, #tpu.memory_space<smem>>
    %444 = vector.broadcast %443 : f32 to vector<1x256xf32>
    %445 = arith.mulf %444, %438 : vector<1x256xf32>
    %446 = arith.addf %429, %445 : vector<1x256xf32>
    %c93 = arith.constant 93 : index
    %447 = memref.load %arg2[%c93] : memref<144xf32, #tpu.memory_space<smem>>
    %448 = vector.broadcast %447 : f32 to vector<1x256xf32>
    %449 = arith.mulf %448, %438 : vector<1x256xf32>
    %450 = arith.addf %433, %449 : vector<1x256xf32>
    %c129 = arith.constant 129 : index
    %451 = memref.load %arg2[%c129] : memref<144xf32, #tpu.memory_space<smem>>
    %452 = vector.broadcast %451 : f32 to vector<1x256xf32>
    %453 = arith.mulf %452, %438 : vector<1x256xf32>
    %454 = arith.addf %437, %453 : vector<1x256xf32>
    %c22 = arith.constant 22 : index
    %455 = memref.load %arg2[%c22] : memref<144xf32, #tpu.memory_space<smem>>
    %456 = vector.broadcast %455 : f32 to vector<1x256xf32>
    %457 = arith.mulf %456, %33 : vector<1x256xf32>
    %458 = arith.addf %442, %457 : vector<1x256xf32>
    %c58 = arith.constant 58 : index
    %459 = memref.load %arg2[%c58] : memref<144xf32, #tpu.memory_space<smem>>
    %460 = vector.broadcast %459 : f32 to vector<1x256xf32>
    %461 = arith.mulf %460, %33 : vector<1x256xf32>
    %462 = arith.addf %446, %461 : vector<1x256xf32>
    %c94 = arith.constant 94 : index
    %463 = memref.load %arg2[%c94] : memref<144xf32, #tpu.memory_space<smem>>
    %464 = vector.broadcast %463 : f32 to vector<1x256xf32>
    %465 = arith.mulf %464, %33 : vector<1x256xf32>
    %466 = arith.addf %450, %465 : vector<1x256xf32>
    %c130 = arith.constant 130 : index
    %467 = memref.load %arg2[%c130] : memref<144xf32, #tpu.memory_space<smem>>
    %468 = vector.broadcast %467 : f32 to vector<1x256xf32>
    %469 = arith.mulf %468, %33 : vector<1x256xf32>
    %470 = arith.addf %454, %469 : vector<1x256xf32>
    %471 = arith.select %6, %378, %379 : vector<1x256xi1>, vector<1x256xf32>
    %c23 = arith.constant 23 : index
    %472 = memref.load %arg2[%c23] : memref<144xf32, #tpu.memory_space<smem>>
    %473 = vector.broadcast %472 : f32 to vector<1x256xf32>
    %474 = arith.mulf %473, %471 : vector<1x256xf32>
    %475 = arith.addf %458, %474 : vector<1x256xf32>
    %c59 = arith.constant 59 : index
    %476 = memref.load %arg2[%c59] : memref<144xf32, #tpu.memory_space<smem>>
    %477 = vector.broadcast %476 : f32 to vector<1x256xf32>
    %478 = arith.mulf %477, %471 : vector<1x256xf32>
    %479 = arith.addf %462, %478 : vector<1x256xf32>
    %c95 = arith.constant 95 : index
    %480 = memref.load %arg2[%c95] : memref<144xf32, #tpu.memory_space<smem>>
    %481 = vector.broadcast %480 : f32 to vector<1x256xf32>
    %482 = arith.mulf %481, %471 : vector<1x256xf32>
    %483 = arith.addf %466, %482 : vector<1x256xf32>
    %c131 = arith.constant 131 : index
    %484 = memref.load %arg2[%c131] : memref<144xf32, #tpu.memory_space<smem>>
    %485 = vector.broadcast %484 : f32 to vector<1x256xf32>
    %486 = arith.mulf %485, %471 : vector<1x256xf32>
    %487 = arith.addf %470, %486 : vector<1x256xf32>
    %488 = arith.select %4, %382, %380 : vector<1x256xi1>, vector<1x256xf32>
    %489 = arith.select %4, %377, %375 : vector<1x256xi1>, vector<1x256xf32>
    %490 = arith.select %10, %489, %488 : vector<1x256xi1>, vector<1x256xf32>
    %c24 = arith.constant 24 : index
    %491 = memref.load %arg2[%c24] : memref<144xf32, #tpu.memory_space<smem>>
    %492 = vector.broadcast %491 : f32 to vector<1x256xf32>
    %493 = arith.mulf %492, %490 : vector<1x256xf32>
    %494 = arith.addf %475, %493 : vector<1x256xf32>
    %c60 = arith.constant 60 : index
    %495 = memref.load %arg2[%c60] : memref<144xf32, #tpu.memory_space<smem>>
    %496 = vector.broadcast %495 : f32 to vector<1x256xf32>
    %497 = arith.mulf %496, %490 : vector<1x256xf32>
    %498 = arith.addf %479, %497 : vector<1x256xf32>
    %c96 = arith.constant 96 : index
    %499 = memref.load %arg2[%c96] : memref<144xf32, #tpu.memory_space<smem>>
    %500 = vector.broadcast %499 : f32 to vector<1x256xf32>
    %501 = arith.mulf %500, %490 : vector<1x256xf32>
    %502 = arith.addf %483, %501 : vector<1x256xf32>
    %c132 = arith.constant 132 : index
    %503 = memref.load %arg2[%c132] : memref<144xf32, #tpu.memory_space<smem>>
    %504 = vector.broadcast %503 : f32 to vector<1x256xf32>
    %505 = arith.mulf %504, %490 : vector<1x256xf32>
    %506 = arith.addf %487, %505 : vector<1x256xf32>
    %507 = arith.select %10, %376, %381 : vector<1x256xi1>, vector<1x256xf32>
    %c25 = arith.constant 25 : index
    %508 = memref.load %arg2[%c25] : memref<144xf32, #tpu.memory_space<smem>>
    %509 = vector.broadcast %508 : f32 to vector<1x256xf32>
    %510 = arith.mulf %509, %507 : vector<1x256xf32>
    %511 = arith.addf %494, %510 : vector<1x256xf32>
    %c61 = arith.constant 61 : index
    %512 = memref.load %arg2[%c61] : memref<144xf32, #tpu.memory_space<smem>>
    %513 = vector.broadcast %512 : f32 to vector<1x256xf32>
    %514 = arith.mulf %513, %507 : vector<1x256xf32>
    %515 = arith.addf %498, %514 : vector<1x256xf32>
    %c97 = arith.constant 97 : index
    %516 = memref.load %arg2[%c97] : memref<144xf32, #tpu.memory_space<smem>>
    %517 = vector.broadcast %516 : f32 to vector<1x256xf32>
    %518 = arith.mulf %517, %507 : vector<1x256xf32>
    %519 = arith.addf %502, %518 : vector<1x256xf32>
    %c133 = arith.constant 133 : index
    %520 = memref.load %arg2[%c133] : memref<144xf32, #tpu.memory_space<smem>>
    %521 = vector.broadcast %520 : f32 to vector<1x256xf32>
    %522 = arith.mulf %521, %507 : vector<1x256xf32>
    %523 = arith.addf %506, %522 : vector<1x256xf32>
    %524 = arith.select %6, %380, %382 : vector<1x256xi1>, vector<1x256xf32>
    %525 = arith.select %6, %375, %377 : vector<1x256xi1>, vector<1x256xf32>
    %526 = arith.select %10, %525, %524 : vector<1x256xi1>, vector<1x256xf32>
    %c26 = arith.constant 26 : index
    %527 = memref.load %arg2[%c26] : memref<144xf32, #tpu.memory_space<smem>>
    %528 = vector.broadcast %527 : f32 to vector<1x256xf32>
    %529 = arith.mulf %528, %526 : vector<1x256xf32>
    %530 = arith.addf %511, %529 : vector<1x256xf32>
    %c62 = arith.constant 62 : index
    %531 = memref.load %arg2[%c62] : memref<144xf32, #tpu.memory_space<smem>>
    %532 = vector.broadcast %531 : f32 to vector<1x256xf32>
    %533 = arith.mulf %532, %526 : vector<1x256xf32>
    %534 = arith.addf %515, %533 : vector<1x256xf32>
    %c98 = arith.constant 98 : index
    %535 = memref.load %arg2[%c98] : memref<144xf32, #tpu.memory_space<smem>>
    %536 = vector.broadcast %535 : f32 to vector<1x256xf32>
    %537 = arith.mulf %536, %526 : vector<1x256xf32>
    %538 = arith.addf %519, %537 : vector<1x256xf32>
    %c134 = arith.constant 134 : index
    %539 = memref.load %arg2[%c134] : memref<144xf32, #tpu.memory_space<smem>>
    %540 = vector.broadcast %539 : f32 to vector<1x256xf32>
    %541 = arith.mulf %540, %526 : vector<1x256xf32>
    %542 = arith.addf %523, %541 : vector<1x256xf32>
    %c3_73 = arith.constant 3 : index
    %c0_74 = arith.constant 0 : index
    %543 = vector.load %arg7[%c3_73, %c0_74] : memref<4x290xf32, #tpu.memory_space<vmem>>, vector<1x256xf32>
    %c3_75 = arith.constant 3 : index
    %c1_76 = arith.constant 1 : index
    %544 = vector.load %arg7[%c3_75, %c1_76] : memref<4x290xf32, #tpu.memory_space<vmem>>, vector<1x256xf32>
    %c3_77 = arith.constant 3 : index
    %c2_78 = arith.constant 2 : index
    %545 = vector.load %arg7[%c3_77, %c2_78] : memref<4x290xf32, #tpu.memory_space<vmem>>, vector<1x256xf32>
    %c3_79 = arith.constant 3 : index
    %c16_80 = arith.constant 16 : index
    %546 = vector.load %arg7[%c3_79, %c16_80] : memref<4x290xf32, #tpu.memory_space<vmem>>, vector<1x256xf32>
    %c3_81 = arith.constant 3 : index
    %c18_82 = arith.constant 18 : index
    %547 = vector.load %arg7[%c3_81, %c18_82] : memref<4x290xf32, #tpu.memory_space<vmem>>, vector<1x256xf32>
    %c3_83 = arith.constant 3 : index
    %c32_84 = arith.constant 32 : index
    %548 = vector.load %arg7[%c3_83, %c32_84] : memref<4x290xf32, #tpu.memory_space<vmem>>, vector<1x256xf32>
    %c3_85 = arith.constant 3 : index
    %c33_86 = arith.constant 33 : index
    %549 = vector.load %arg7[%c3_85, %c33_86] : memref<4x290xf32, #tpu.memory_space<vmem>>, vector<1x256xf32>
    %c3_87 = arith.constant 3 : index
    %c34_88 = arith.constant 34 : index
    %550 = vector.load %arg7[%c3_87, %c34_88] : memref<4x290xf32, #tpu.memory_space<vmem>>, vector<1x256xf32>
    %551 = arith.select %4, %545, %543 : vector<1x256xi1>, vector<1x256xf32>
    %552 = arith.select %4, %550, %548 : vector<1x256xi1>, vector<1x256xf32>
    %553 = arith.select %8, %552, %551 : vector<1x256xi1>, vector<1x256xf32>
    %c27 = arith.constant 27 : index
    %554 = memref.load %arg2[%c27] : memref<144xf32, #tpu.memory_space<smem>>
    %555 = vector.broadcast %554 : f32 to vector<1x256xf32>
    %556 = arith.mulf %555, %553 : vector<1x256xf32>
    %557 = arith.addf %530, %556 : vector<1x256xf32>
    %c63 = arith.constant 63 : index
    %558 = memref.load %arg2[%c63] : memref<144xf32, #tpu.memory_space<smem>>
    %559 = vector.broadcast %558 : f32 to vector<1x256xf32>
    %560 = arith.mulf %559, %553 : vector<1x256xf32>
    %561 = arith.addf %534, %560 : vector<1x256xf32>
    %c99 = arith.constant 99 : index
    %562 = memref.load %arg2[%c99] : memref<144xf32, #tpu.memory_space<smem>>
    %563 = vector.broadcast %562 : f32 to vector<1x256xf32>
    %564 = arith.mulf %563, %553 : vector<1x256xf32>
    %565 = arith.addf %538, %564 : vector<1x256xf32>
    %c135 = arith.constant 135 : index
    %566 = memref.load %arg2[%c135] : memref<144xf32, #tpu.memory_space<smem>>
    %567 = vector.broadcast %566 : f32 to vector<1x256xf32>
    %568 = arith.mulf %567, %553 : vector<1x256xf32>
    %569 = arith.addf %542, %568 : vector<1x256xf32>
    %570 = arith.select %8, %549, %544 : vector<1x256xi1>, vector<1x256xf32>
    %c28 = arith.constant 28 : index
    %571 = memref.load %arg2[%c28] : memref<144xf32, #tpu.memory_space<smem>>
    %572 = vector.broadcast %571 : f32 to vector<1x256xf32>
    %573 = arith.mulf %572, %570 : vector<1x256xf32>
    %574 = arith.addf %557, %573 : vector<1x256xf32>
    %c64 = arith.constant 64 : index
    %575 = memref.load %arg2[%c64] : memref<144xf32, #tpu.memory_space<smem>>
    %576 = vector.broadcast %575 : f32 to vector<1x256xf32>
    %577 = arith.mulf %576, %570 : vector<1x256xf32>
    %578 = arith.addf %561, %577 : vector<1x256xf32>
    %c100 = arith.constant 100 : index
    %579 = memref.load %arg2[%c100] : memref<144xf32, #tpu.memory_space<smem>>
    %580 = vector.broadcast %579 : f32 to vector<1x256xf32>
    %581 = arith.mulf %580, %570 : vector<1x256xf32>
    %582 = arith.addf %565, %581 : vector<1x256xf32>
    %c136 = arith.constant 136 : index
    %583 = memref.load %arg2[%c136] : memref<144xf32, #tpu.memory_space<smem>>
    %584 = vector.broadcast %583 : f32 to vector<1x256xf32>
    %585 = arith.mulf %584, %570 : vector<1x256xf32>
    %586 = arith.addf %569, %585 : vector<1x256xf32>
    %587 = arith.select %6, %543, %545 : vector<1x256xi1>, vector<1x256xf32>
    %588 = arith.select %6, %548, %550 : vector<1x256xi1>, vector<1x256xf32>
    %589 = arith.select %8, %588, %587 : vector<1x256xi1>, vector<1x256xf32>
    %c29 = arith.constant 29 : index
    %590 = memref.load %arg2[%c29] : memref<144xf32, #tpu.memory_space<smem>>
    %591 = vector.broadcast %590 : f32 to vector<1x256xf32>
    %592 = arith.mulf %591, %589 : vector<1x256xf32>
    %593 = arith.addf %574, %592 : vector<1x256xf32>
    %c65 = arith.constant 65 : index
    %594 = memref.load %arg2[%c65] : memref<144xf32, #tpu.memory_space<smem>>
    %595 = vector.broadcast %594 : f32 to vector<1x256xf32>
    %596 = arith.mulf %595, %589 : vector<1x256xf32>
    %597 = arith.addf %578, %596 : vector<1x256xf32>
    %c101 = arith.constant 101 : index
    %598 = memref.load %arg2[%c101] : memref<144xf32, #tpu.memory_space<smem>>
    %599 = vector.broadcast %598 : f32 to vector<1x256xf32>
    %600 = arith.mulf %599, %589 : vector<1x256xf32>
    %601 = arith.addf %582, %600 : vector<1x256xf32>
    %c137 = arith.constant 137 : index
    %602 = memref.load %arg2[%c137] : memref<144xf32, #tpu.memory_space<smem>>
    %603 = vector.broadcast %602 : f32 to vector<1x256xf32>
    %604 = arith.mulf %603, %589 : vector<1x256xf32>
    %605 = arith.addf %586, %604 : vector<1x256xf32>
    %606 = arith.select %4, %547, %546 : vector<1x256xi1>, vector<1x256xf32>
    %c30 = arith.constant 30 : index
    %607 = memref.load %arg2[%c30] : memref<144xf32, #tpu.memory_space<smem>>
    %608 = vector.broadcast %607 : f32 to vector<1x256xf32>
    %609 = arith.mulf %608, %606 : vector<1x256xf32>
    %610 = arith.addf %593, %609 : vector<1x256xf32>
    %c66 = arith.constant 66 : index
    %611 = memref.load %arg2[%c66] : memref<144xf32, #tpu.memory_space<smem>>
    %612 = vector.broadcast %611 : f32 to vector<1x256xf32>
    %613 = arith.mulf %612, %606 : vector<1x256xf32>
    %614 = arith.addf %597, %613 : vector<1x256xf32>
    %c102 = arith.constant 102 : index
    %615 = memref.load %arg2[%c102] : memref<144xf32, #tpu.memory_space<smem>>
    %616 = vector.broadcast %615 : f32 to vector<1x256xf32>
    %617 = arith.mulf %616, %606 : vector<1x256xf32>
    %618 = arith.addf %601, %617 : vector<1x256xf32>
    %c138 = arith.constant 138 : index
    %619 = memref.load %arg2[%c138] : memref<144xf32, #tpu.memory_space<smem>>
    %620 = vector.broadcast %619 : f32 to vector<1x256xf32>
    %621 = arith.mulf %620, %606 : vector<1x256xf32>
    %622 = arith.addf %605, %621 : vector<1x256xf32>
    %c31 = arith.constant 31 : index
    %623 = memref.load %arg2[%c31] : memref<144xf32, #tpu.memory_space<smem>>
    %624 = vector.broadcast %623 : f32 to vector<1x256xf32>
    %625 = arith.mulf %624, %38 : vector<1x256xf32>
    %626 = arith.addf %610, %625 : vector<1x256xf32>
    %c67 = arith.constant 67 : index
    %627 = memref.load %arg2[%c67] : memref<144xf32, #tpu.memory_space<smem>>
    %628 = vector.broadcast %627 : f32 to vector<1x256xf32>
    %629 = arith.mulf %628, %38 : vector<1x256xf32>
    %630 = arith.addf %614, %629 : vector<1x256xf32>
    %c103 = arith.constant 103 : index
    %631 = memref.load %arg2[%c103] : memref<144xf32, #tpu.memory_space<smem>>
    %632 = vector.broadcast %631 : f32 to vector<1x256xf32>
    %633 = arith.mulf %632, %38 : vector<1x256xf32>
    %634 = arith.addf %618, %633 : vector<1x256xf32>
    %c139 = arith.constant 139 : index
    %635 = memref.load %arg2[%c139] : memref<144xf32, #tpu.memory_space<smem>>
    %636 = vector.broadcast %635 : f32 to vector<1x256xf32>
    %637 = arith.mulf %636, %38 : vector<1x256xf32>
    %638 = arith.addf %622, %637 : vector<1x256xf32>
    %639 = arith.select %6, %546, %547 : vector<1x256xi1>, vector<1x256xf32>
    %c32_89 = arith.constant 32 : index
    %640 = memref.load %arg2[%c32_89] : memref<144xf32, #tpu.memory_space<smem>>
    %641 = vector.broadcast %640 : f32 to vector<1x256xf32>
    %642 = arith.mulf %641, %639 : vector<1x256xf32>
    %643 = arith.addf %626, %642 : vector<1x256xf32>
    %c68 = arith.constant 68 : index
    %644 = memref.load %arg2[%c68] : memref<144xf32, #tpu.memory_space<smem>>
    %645 = vector.broadcast %644 : f32 to vector<1x256xf32>
    %646 = arith.mulf %645, %639 : vector<1x256xf32>
    %647 = arith.addf %630, %646 : vector<1x256xf32>
    %c104 = arith.constant 104 : index
    %648 = memref.load %arg2[%c104] : memref<144xf32, #tpu.memory_space<smem>>
    %649 = vector.broadcast %648 : f32 to vector<1x256xf32>
    %650 = arith.mulf %649, %639 : vector<1x256xf32>
    %651 = arith.addf %634, %650 : vector<1x256xf32>
    %c140 = arith.constant 140 : index
    %652 = memref.load %arg2[%c140] : memref<144xf32, #tpu.memory_space<smem>>
    %653 = vector.broadcast %652 : f32 to vector<1x256xf32>
    %654 = arith.mulf %653, %639 : vector<1x256xf32>
    %655 = arith.addf %638, %654 : vector<1x256xf32>
    %656 = arith.select %4, %550, %548 : vector<1x256xi1>, vector<1x256xf32>
    %657 = arith.select %4, %545, %543 : vector<1x256xi1>, vector<1x256xf32>
    %658 = arith.select %10, %657, %656 : vector<1x256xi1>, vector<1x256xf32>
    %c33_90 = arith.constant 33 : index
    %659 = memref.load %arg2[%c33_90] : memref<144xf32, #tpu.memory_space<smem>>
    %660 = vector.broadcast %659 : f32 to vector<1x256xf32>
    %661 = arith.mulf %660, %658 : vector<1x256xf32>
    %662 = arith.addf %643, %661 : vector<1x256xf32>
    %c69 = arith.constant 69 : index
    %663 = memref.load %arg2[%c69] : memref<144xf32, #tpu.memory_space<smem>>
    %664 = vector.broadcast %663 : f32 to vector<1x256xf32>
    %665 = arith.mulf %664, %658 : vector<1x256xf32>
    %666 = arith.addf %647, %665 : vector<1x256xf32>
    %c105 = arith.constant 105 : index
    %667 = memref.load %arg2[%c105] : memref<144xf32, #tpu.memory_space<smem>>
    %668 = vector.broadcast %667 : f32 to vector<1x256xf32>
    %669 = arith.mulf %668, %658 : vector<1x256xf32>
    %670 = arith.addf %651, %669 : vector<1x256xf32>
    %c141 = arith.constant 141 : index
    %671 = memref.load %arg2[%c141] : memref<144xf32, #tpu.memory_space<smem>>
    %672 = vector.broadcast %671 : f32 to vector<1x256xf32>
    %673 = arith.mulf %672, %658 : vector<1x256xf32>
    %674 = arith.addf %655, %673 : vector<1x256xf32>
    %675 = arith.select %10, %544, %549 : vector<1x256xi1>, vector<1x256xf32>
    %c34_91 = arith.constant 34 : index
    %676 = memref.load %arg2[%c34_91] : memref<144xf32, #tpu.memory_space<smem>>
    %677 = vector.broadcast %676 : f32 to vector<1x256xf32>
    %678 = arith.mulf %677, %675 : vector<1x256xf32>
    %679 = arith.addf %662, %678 : vector<1x256xf32>
    %c70 = arith.constant 70 : index
    %680 = memref.load %arg2[%c70] : memref<144xf32, #tpu.memory_space<smem>>
    %681 = vector.broadcast %680 : f32 to vector<1x256xf32>
    %682 = arith.mulf %681, %675 : vector<1x256xf32>
    %683 = arith.addf %666, %682 : vector<1x256xf32>
    %c106 = arith.constant 106 : index
    %684 = memref.load %arg2[%c106] : memref<144xf32, #tpu.memory_space<smem>>
    %685 = vector.broadcast %684 : f32 to vector<1x256xf32>
    %686 = arith.mulf %685, %675 : vector<1x256xf32>
    %687 = arith.addf %670, %686 : vector<1x256xf32>
    %c142 = arith.constant 142 : index
    %688 = memref.load %arg2[%c142] : memref<144xf32, #tpu.memory_space<smem>>
    %689 = vector.broadcast %688 : f32 to vector<1x256xf32>
    %690 = arith.mulf %689, %675 : vector<1x256xf32>
    %691 = arith.addf %674, %690 : vector<1x256xf32>
    %692 = arith.select %6, %548, %550 : vector<1x256xi1>, vector<1x256xf32>
    %693 = arith.select %6, %543, %545 : vector<1x256xi1>, vector<1x256xf32>
    %694 = arith.select %10, %693, %692 : vector<1x256xi1>, vector<1x256xf32>
    %c35 = arith.constant 35 : index
    %695 = memref.load %arg2[%c35] : memref<144xf32, #tpu.memory_space<smem>>
    %696 = vector.broadcast %695 : f32 to vector<1x256xf32>
    %697 = arith.mulf %696, %694 : vector<1x256xf32>
    %698 = arith.addf %679, %697 : vector<1x256xf32>
    %c71 = arith.constant 71 : index
    %699 = memref.load %arg2[%c71] : memref<144xf32, #tpu.memory_space<smem>>
    %700 = vector.broadcast %699 : f32 to vector<1x256xf32>
    %701 = arith.mulf %700, %694 : vector<1x256xf32>
    %702 = arith.addf %683, %701 : vector<1x256xf32>
    %c107 = arith.constant 107 : index
    %703 = memref.load %arg2[%c107] : memref<144xf32, #tpu.memory_space<smem>>
    %704 = vector.broadcast %703 : f32 to vector<1x256xf32>
    %705 = arith.mulf %704, %694 : vector<1x256xf32>
    %706 = arith.addf %687, %705 : vector<1x256xf32>
    %c143 = arith.constant 143 : index
    %707 = memref.load %arg2[%c143] : memref<144xf32, #tpu.memory_space<smem>>
    %708 = vector.broadcast %707 : f32 to vector<1x256xf32>
    %709 = arith.mulf %708, %694 : vector<1x256xf32>
    %710 = arith.addf %691, %709 : vector<1x256xf32>
    %c0_92 = arith.constant 0 : index
    %711 = memref.load %arg3[%c0_92] : memref<4xf32, #tpu.memory_space<smem>>
    %712 = vector.broadcast %711 : f32 to vector<1x256xf32>
    %713 = arith.addf %698, %712 : vector<1x256xf32>
    %c1_93 = arith.constant 1 : index
    %714 = memref.load %arg3[%c1_93] : memref<4xf32, #tpu.memory_space<smem>>
    %715 = vector.broadcast %714 : f32 to vector<1x256xf32>
    %716 = arith.addf %702, %715 : vector<1x256xf32>
    %c2_94 = arith.constant 2 : index
    %717 = memref.load %arg3[%c2_94] : memref<4xf32, #tpu.memory_space<smem>>
    %718 = vector.broadcast %717 : f32 to vector<1x256xf32>
    %719 = arith.addf %706, %718 : vector<1x256xf32>
    %c3_95 = arith.constant 3 : index
    %720 = memref.load %arg3[%c3_95] : memref<4xf32, #tpu.memory_space<smem>>
    %721 = vector.broadcast %720 : f32 to vector<1x256xf32>
    %722 = arith.addf %710, %721 : vector<1x256xf32>
    %cst_96 = arith.constant 0.000000e+00 : f32
    %723 = vector.broadcast %cst_96 : f32 to vector<1x256xf32>
    %724 = arith.cmpf oge, %713, %723 : vector<1x256xf32>
    %cst_97 = arith.constant 2.000000e-01 : f32
    %725 = vector.broadcast %cst_97 : f32 to vector<1x256xf32>
    %726 = arith.mulf %725, %713 : vector<1x256xf32>
    %727 = arith.select %724, %713, %726 : vector<1x256xi1>, vector<1x256xf32>
    %cst_98 = arith.constant 0.000000e+00 : f32
    %728 = vector.broadcast %cst_98 : f32 to vector<1x256xf32>
    %729 = arith.cmpf oge, %716, %728 : vector<1x256xf32>
    %cst_99 = arith.constant 2.000000e-01 : f32
    %730 = vector.broadcast %cst_99 : f32 to vector<1x256xf32>
    %731 = arith.mulf %730, %716 : vector<1x256xf32>
    %732 = arith.select %729, %716, %731 : vector<1x256xi1>, vector<1x256xf32>
    %cst_100 = arith.constant 0.000000e+00 : f32
    %733 = vector.broadcast %cst_100 : f32 to vector<1x256xf32>
    %734 = arith.cmpf oge, %719, %733 : vector<1x256xf32>
    %cst_101 = arith.constant 2.000000e-01 : f32
    %735 = vector.broadcast %cst_101 : f32 to vector<1x256xf32>
    %736 = arith.mulf %735, %719 : vector<1x256xf32>
    %737 = arith.select %734, %719, %736 : vector<1x256xi1>, vector<1x256xf32>
    %cst_102 = arith.constant 0.000000e+00 : f32
    %738 = vector.broadcast %cst_102 : f32 to vector<1x256xf32>
    %739 = arith.cmpf oge, %722, %738 : vector<1x256xf32>
    %cst_103 = arith.constant 2.000000e-01 : f32
    %740 = vector.broadcast %cst_103 : f32 to vector<1x256xf32>
    %741 = arith.mulf %740, %722 : vector<1x256xf32>
    %742 = arith.select %739, %722, %741 : vector<1x256xi1>, vector<1x256xf32>
    %c0_104 = arith.constant 0 : index
    %c17_105 = arith.constant 17 : index
    %743 = vector.load %arg7[%c0_104, %c17_105] : memref<4x290xf32, #tpu.memory_space<vmem>>, vector<1x256xf32>
    tpu.vector_store %arg7[%c0_104, %c17_105], %727 {strides = array<i32>} : memref<4x290xf32, #tpu.memory_space<vmem>>, vector<1x256xf32>,
    %c1_106 = arith.constant 1 : index
    %c17_107 = arith.constant 17 : index
    %744 = vector.load %arg7[%c1_106, %c17_107] : memref<4x290xf32, #tpu.memory_space<vmem>>, vector<1x256xf32>
    tpu.vector_store %arg7[%c1_106, %c17_107], %732 {strides = array<i32>} : memref<4x290xf32, #tpu.memory_space<vmem>>, vector<1x256xf32>,
    %c2_108 = arith.constant 2 : index
    %c17_109 = arith.constant 17 : index
    %745 = vector.load %arg7[%c2_108, %c17_109] : memref<4x290xf32, #tpu.memory_space<vmem>>, vector<1x256xf32>
    tpu.vector_store %arg7[%c2_108, %c17_109], %737 {strides = array<i32>} : memref<4x290xf32, #tpu.memory_space<vmem>>, vector<1x256xf32>,
    %c3_110 = arith.constant 3 : index
    %c17_111 = arith.constant 17 : index
    %746 = vector.load %arg7[%c3_110, %c17_111] : memref<4x290xf32, #tpu.memory_space<vmem>>, vector<1x256xf32>
    tpu.vector_store %arg7[%c3_110, %c17_111], %742 {strides = array<i32>} : memref<4x290xf32, #tpu.memory_space<vmem>>, vector<1x256xf32>,
    %c0_112 = arith.constant 0 : index
    %c0_113 = arith.constant 0 : index
    %747 = vector.load %arg7[%c0_112, %c0_113] : memref<4x290xf32, #tpu.memory_space<vmem>>, vector<1x256xf32>
    %c0_114 = arith.constant 0 : index
    %c1_115 = arith.constant 1 : index
    %748 = vector.load %arg7[%c0_114, %c1_115] : memref<4x290xf32, #tpu.memory_space<vmem>>, vector<1x256xf32>
    %c0_116 = arith.constant 0 : index
    %c2_117 = arith.constant 2 : index
    %749 = vector.load %arg7[%c0_116, %c2_117] : memref<4x290xf32, #tpu.memory_space<vmem>>, vector<1x256xf32>
    %c0_118 = arith.constant 0 : index
    %c16_119 = arith.constant 16 : index
    %750 = vector.load %arg7[%c0_118, %c16_119] : memref<4x290xf32, #tpu.memory_space<vmem>>, vector<1x256xf32>
    %c0_120 = arith.constant 0 : index
    %c18_121 = arith.constant 18 : index
    %751 = vector.load %arg7[%c0_120, %c18_121] : memref<4x290xf32, #tpu.memory_space<vmem>>, vector<1x256xf32>
    %c0_122 = arith.constant 0 : index
    %c32_123 = arith.constant 32 : index
    %752 = vector.load %arg7[%c0_122, %c32_123] : memref<4x290xf32, #tpu.memory_space<vmem>>, vector<1x256xf32>
    %c0_124 = arith.constant 0 : index
    %c33_125 = arith.constant 33 : index
    %753 = vector.load %arg7[%c0_124, %c33_125] : memref<4x290xf32, #tpu.memory_space<vmem>>, vector<1x256xf32>
    %c0_126 = arith.constant 0 : index
    %c34_127 = arith.constant 34 : index
    %754 = vector.load %arg7[%c0_126, %c34_127] : memref<4x290xf32, #tpu.memory_space<vmem>>, vector<1x256xf32>
    %755 = arith.select %4, %749, %747 : vector<1x256xi1>, vector<1x256xf32>
    %756 = arith.select %4, %754, %752 : vector<1x256xi1>, vector<1x256xf32>
    %757 = arith.select %8, %756, %755 : vector<1x256xi1>, vector<1x256xf32>
    %c0_128 = arith.constant 0 : index
    %758 = memref.load %arg4[%c0_128] : memref<144xf32, #tpu.memory_space<smem>>
    %759 = vector.broadcast %758 : f32 to vector<1x256xf32>
    %760 = arith.mulf %759, %757 : vector<1x256xf32>
    %c36_129 = arith.constant 36 : index
    %761 = memref.load %arg4[%c36_129] : memref<144xf32, #tpu.memory_space<smem>>
    %762 = vector.broadcast %761 : f32 to vector<1x256xf32>
    %763 = arith.mulf %762, %757 : vector<1x256xf32>
    %c72_130 = arith.constant 72 : index
    %764 = memref.load %arg4[%c72_130] : memref<144xf32, #tpu.memory_space<smem>>
    %765 = vector.broadcast %764 : f32 to vector<1x256xf32>
    %766 = arith.mulf %765, %757 : vector<1x256xf32>
    %c108_131 = arith.constant 108 : index
    %767 = memref.load %arg4[%c108_131] : memref<144xf32, #tpu.memory_space<smem>>
    %768 = vector.broadcast %767 : f32 to vector<1x256xf32>
    %769 = arith.mulf %768, %757 : vector<1x256xf32>
    %770 = arith.select %8, %753, %748 : vector<1x256xi1>, vector<1x256xf32>
    %c1_132 = arith.constant 1 : index
    %771 = memref.load %arg4[%c1_132] : memref<144xf32, #tpu.memory_space<smem>>
    %772 = vector.broadcast %771 : f32 to vector<1x256xf32>
    %773 = arith.mulf %772, %770 : vector<1x256xf32>
    %774 = arith.addf %760, %773 : vector<1x256xf32>
    %c37_133 = arith.constant 37 : index
    %775 = memref.load %arg4[%c37_133] : memref<144xf32, #tpu.memory_space<smem>>
    %776 = vector.broadcast %775 : f32 to vector<1x256xf32>
    %777 = arith.mulf %776, %770 : vector<1x256xf32>
    %778 = arith.addf %763, %777 : vector<1x256xf32>
    %c73_134 = arith.constant 73 : index
    %779 = memref.load %arg4[%c73_134] : memref<144xf32, #tpu.memory_space<smem>>
    %780 = vector.broadcast %779 : f32 to vector<1x256xf32>
    %781 = arith.mulf %780, %770 : vector<1x256xf32>
    %782 = arith.addf %766, %781 : vector<1x256xf32>
    %c109_135 = arith.constant 109 : index
    %783 = memref.load %arg4[%c109_135] : memref<144xf32, #tpu.memory_space<smem>>
    %784 = vector.broadcast %783 : f32 to vector<1x256xf32>
    %785 = arith.mulf %784, %770 : vector<1x256xf32>
    %786 = arith.addf %769, %785 : vector<1x256xf32>
    %787 = arith.select %6, %747, %749 : vector<1x256xi1>, vector<1x256xf32>
    %788 = arith.select %6, %752, %754 : vector<1x256xi1>, vector<1x256xf32>
    %789 = arith.select %8, %788, %787 : vector<1x256xi1>, vector<1x256xf32>
    %c2_136 = arith.constant 2 : index
    %790 = memref.load %arg4[%c2_136] : memref<144xf32, #tpu.memory_space<smem>>
    %791 = vector.broadcast %790 : f32 to vector<1x256xf32>
    %792 = arith.mulf %791, %789 : vector<1x256xf32>
    %793 = arith.addf %774, %792 : vector<1x256xf32>
    %c38_137 = arith.constant 38 : index
    %794 = memref.load %arg4[%c38_137] : memref<144xf32, #tpu.memory_space<smem>>
    %795 = vector.broadcast %794 : f32 to vector<1x256xf32>
    %796 = arith.mulf %795, %789 : vector<1x256xf32>
    %797 = arith.addf %778, %796 : vector<1x256xf32>
    %c74_138 = arith.constant 74 : index
    %798 = memref.load %arg4[%c74_138] : memref<144xf32, #tpu.memory_space<smem>>
    %799 = vector.broadcast %798 : f32 to vector<1x256xf32>
    %800 = arith.mulf %799, %789 : vector<1x256xf32>
    %801 = arith.addf %782, %800 : vector<1x256xf32>
    %c110_139 = arith.constant 110 : index
    %802 = memref.load %arg4[%c110_139] : memref<144xf32, #tpu.memory_space<smem>>
    %803 = vector.broadcast %802 : f32 to vector<1x256xf32>
    %804 = arith.mulf %803, %789 : vector<1x256xf32>
    %805 = arith.addf %786, %804 : vector<1x256xf32>
    %806 = arith.select %4, %751, %750 : vector<1x256xi1>, vector<1x256xf32>
    %c3_140 = arith.constant 3 : index
    %807 = memref.load %arg4[%c3_140] : memref<144xf32, #tpu.memory_space<smem>>
    %808 = vector.broadcast %807 : f32 to vector<1x256xf32>
    %809 = arith.mulf %808, %806 : vector<1x256xf32>
    %810 = arith.addf %793, %809 : vector<1x256xf32>
    %c39_141 = arith.constant 39 : index
    %811 = memref.load %arg4[%c39_141] : memref<144xf32, #tpu.memory_space<smem>>
    %812 = vector.broadcast %811 : f32 to vector<1x256xf32>
    %813 = arith.mulf %812, %806 : vector<1x256xf32>
    %814 = arith.addf %797, %813 : vector<1x256xf32>
    %c75_142 = arith.constant 75 : index
    %815 = memref.load %arg4[%c75_142] : memref<144xf32, #tpu.memory_space<smem>>
    %816 = vector.broadcast %815 : f32 to vector<1x256xf32>
    %817 = arith.mulf %816, %806 : vector<1x256xf32>
    %818 = arith.addf %801, %817 : vector<1x256xf32>
    %c111_143 = arith.constant 111 : index
    %819 = memref.load %arg4[%c111_143] : memref<144xf32, #tpu.memory_space<smem>>
    %820 = vector.broadcast %819 : f32 to vector<1x256xf32>
    %821 = arith.mulf %820, %806 : vector<1x256xf32>
    %822 = arith.addf %805, %821 : vector<1x256xf32>
    %c4_144 = arith.constant 4 : index
    %823 = memref.load %arg4[%c4_144] : memref<144xf32, #tpu.memory_space<smem>>
    %824 = vector.broadcast %823 : f32 to vector<1x256xf32>
    %825 = arith.mulf %824, %727 : vector<1x256xf32>
    %826 = arith.addf %810, %825 : vector<1x256xf32>
    %c40_145 = arith.constant 40 : index
    %827 = memref.load %arg4[%c40_145] : memref<144xf32, #tpu.memory_space<smem>>
    %828 = vector.broadcast %827 : f32 to vector<1x256xf32>
    %829 = arith.mulf %828, %727 : vector<1x256xf32>
    %830 = arith.addf %814, %829 : vector<1x256xf32>
    %c76_146 = arith.constant 76 : index
    %831 = memref.load %arg4[%c76_146] : memref<144xf32, #tpu.memory_space<smem>>
    %832 = vector.broadcast %831 : f32 to vector<1x256xf32>
    %833 = arith.mulf %832, %727 : vector<1x256xf32>
    %834 = arith.addf %818, %833 : vector<1x256xf32>
    %c112_147 = arith.constant 112 : index
    %835 = memref.load %arg4[%c112_147] : memref<144xf32, #tpu.memory_space<smem>>
    %836 = vector.broadcast %835 : f32 to vector<1x256xf32>
    %837 = arith.mulf %836, %727 : vector<1x256xf32>
    %838 = arith.addf %822, %837 : vector<1x256xf32>
    %839 = arith.select %6, %750, %751 : vector<1x256xi1>, vector<1x256xf32>
    %c5_148 = arith.constant 5 : index
    %840 = memref.load %arg4[%c5_148] : memref<144xf32, #tpu.memory_space<smem>>
    %841 = vector.broadcast %840 : f32 to vector<1x256xf32>
    %842 = arith.mulf %841, %839 : vector<1x256xf32>
    %843 = arith.addf %826, %842 : vector<1x256xf32>
    %c41_149 = arith.constant 41 : index
    %844 = memref.load %arg4[%c41_149] : memref<144xf32, #tpu.memory_space<smem>>
    %845 = vector.broadcast %844 : f32 to vector<1x256xf32>
    %846 = arith.mulf %845, %839 : vector<1x256xf32>
    %847 = arith.addf %830, %846 : vector<1x256xf32>
    %c77_150 = arith.constant 77 : index
    %848 = memref.load %arg4[%c77_150] : memref<144xf32, #tpu.memory_space<smem>>
    %849 = vector.broadcast %848 : f32 to vector<1x256xf32>
    %850 = arith.mulf %849, %839 : vector<1x256xf32>
    %851 = arith.addf %834, %850 : vector<1x256xf32>
    %c113_151 = arith.constant 113 : index
    %852 = memref.load %arg4[%c113_151] : memref<144xf32, #tpu.memory_space<smem>>
    %853 = vector.broadcast %852 : f32 to vector<1x256xf32>
    %854 = arith.mulf %853, %839 : vector<1x256xf32>
    %855 = arith.addf %838, %854 : vector<1x256xf32>
    %856 = arith.select %4, %754, %752 : vector<1x256xi1>, vector<1x256xf32>
    %857 = arith.select %4, %749, %747 : vector<1x256xi1>, vector<1x256xf32>
    %858 = arith.select %10, %857, %856 : vector<1x256xi1>, vector<1x256xf32>
    %c6_152 = arith.constant 6 : index
    %859 = memref.load %arg4[%c6_152] : memref<144xf32, #tpu.memory_space<smem>>
    %860 = vector.broadcast %859 : f32 to vector<1x256xf32>
    %861 = arith.mulf %860, %858 : vector<1x256xf32>
    %862 = arith.addf %843, %861 : vector<1x256xf32>
    %c42_153 = arith.constant 42 : index
    %863 = memref.load %arg4[%c42_153] : memref<144xf32, #tpu.memory_space<smem>>
    %864 = vector.broadcast %863 : f32 to vector<1x256xf32>
    %865 = arith.mulf %864, %858 : vector<1x256xf32>
    %866 = arith.addf %847, %865 : vector<1x256xf32>
    %c78_154 = arith.constant 78 : index
    %867 = memref.load %arg4[%c78_154] : memref<144xf32, #tpu.memory_space<smem>>
    %868 = vector.broadcast %867 : f32 to vector<1x256xf32>
    %869 = arith.mulf %868, %858 : vector<1x256xf32>
    %870 = arith.addf %851, %869 : vector<1x256xf32>
    %c114_155 = arith.constant 114 : index
    %871 = memref.load %arg4[%c114_155] : memref<144xf32, #tpu.memory_space<smem>>
    %872 = vector.broadcast %871 : f32 to vector<1x256xf32>
    %873 = arith.mulf %872, %858 : vector<1x256xf32>
    %874 = arith.addf %855, %873 : vector<1x256xf32>
    %875 = arith.select %10, %748, %753 : vector<1x256xi1>, vector<1x256xf32>
    %c7_156 = arith.constant 7 : index
    %876 = memref.load %arg4[%c7_156] : memref<144xf32, #tpu.memory_space<smem>>
    %877 = vector.broadcast %876 : f32 to vector<1x256xf32>
    %878 = arith.mulf %877, %875 : vector<1x256xf32>
    %879 = arith.addf %862, %878 : vector<1x256xf32>
    %c43_157 = arith.constant 43 : index
    %880 = memref.load %arg4[%c43_157] : memref<144xf32, #tpu.memory_space<smem>>
    %881 = vector.broadcast %880 : f32 to vector<1x256xf32>
    %882 = arith.mulf %881, %875 : vector<1x256xf32>
    %883 = arith.addf %866, %882 : vector<1x256xf32>
    %c79_158 = arith.constant 79 : index
    %884 = memref.load %arg4[%c79_158] : memref<144xf32, #tpu.memory_space<smem>>
    %885 = vector.broadcast %884 : f32 to vector<1x256xf32>
    %886 = arith.mulf %885, %875 : vector<1x256xf32>
    %887 = arith.addf %870, %886 : vector<1x256xf32>
    %c115_159 = arith.constant 115 : index
    %888 = memref.load %arg4[%c115_159] : memref<144xf32, #tpu.memory_space<smem>>
    %889 = vector.broadcast %888 : f32 to vector<1x256xf32>
    %890 = arith.mulf %889, %875 : vector<1x256xf32>
    %891 = arith.addf %874, %890 : vector<1x256xf32>
    %892 = arith.select %6, %752, %754 : vector<1x256xi1>, vector<1x256xf32>
    %893 = arith.select %6, %747, %749 : vector<1x256xi1>, vector<1x256xf32>
    %894 = arith.select %10, %893, %892 : vector<1x256xi1>, vector<1x256xf32>
    %c8_160 = arith.constant 8 : index
    %895 = memref.load %arg4[%c8_160] : memref<144xf32, #tpu.memory_space<smem>>
    %896 = vector.broadcast %895 : f32 to vector<1x256xf32>
    %897 = arith.mulf %896, %894 : vector<1x256xf32>
    %898 = arith.addf %879, %897 : vector<1x256xf32>
    %c44_161 = arith.constant 44 : index
    %899 = memref.load %arg4[%c44_161] : memref<144xf32, #tpu.memory_space<smem>>
    %900 = vector.broadcast %899 : f32 to vector<1x256xf32>
    %901 = arith.mulf %900, %894 : vector<1x256xf32>
    %902 = arith.addf %883, %901 : vector<1x256xf32>
    %c80_162 = arith.constant 80 : index
    %903 = memref.load %arg4[%c80_162] : memref<144xf32, #tpu.memory_space<smem>>
    %904 = vector.broadcast %903 : f32 to vector<1x256xf32>
    %905 = arith.mulf %904, %894 : vector<1x256xf32>
    %906 = arith.addf %887, %905 : vector<1x256xf32>
    %c116_163 = arith.constant 116 : index
    %907 = memref.load %arg4[%c116_163] : memref<144xf32, #tpu.memory_space<smem>>
    %908 = vector.broadcast %907 : f32 to vector<1x256xf32>
    %909 = arith.mulf %908, %894 : vector<1x256xf32>
    %910 = arith.addf %891, %909 : vector<1x256xf32>
    %c1_164 = arith.constant 1 : index
    %c0_165 = arith.constant 0 : index
    %911 = vector.load %arg7[%c1_164, %c0_165] : memref<4x290xf32, #tpu.memory_space<vmem>>, vector<1x256xf32>
    %c1_166 = arith.constant 1 : index
    %c1_167 = arith.constant 1 : index
    %912 = vector.load %arg7[%c1_166, %c1_167] : memref<4x290xf32, #tpu.memory_space<vmem>>, vector<1x256xf32>
    %c1_168 = arith.constant 1 : index
    %c2_169 = arith.constant 2 : index
    %913 = vector.load %arg7[%c1_168, %c2_169] : memref<4x290xf32, #tpu.memory_space<vmem>>, vector<1x256xf32>
    %c1_170 = arith.constant 1 : index
    %c16_171 = arith.constant 16 : index
    %914 = vector.load %arg7[%c1_170, %c16_171] : memref<4x290xf32, #tpu.memory_space<vmem>>, vector<1x256xf32>
    %c1_172 = arith.constant 1 : index
    %c18_173 = arith.constant 18 : index
    %915 = vector.load %arg7[%c1_172, %c18_173] : memref<4x290xf32, #tpu.memory_space<vmem>>, vector<1x256xf32>
    %c1_174 = arith.constant 1 : index
    %c32_175 = arith.constant 32 : index
    %916 = vector.load %arg7[%c1_174, %c32_175] : memref<4x290xf32, #tpu.memory_space<vmem>>, vector<1x256xf32>
    %c1_176 = arith.constant 1 : index
    %c33_177 = arith.constant 33 : index
    %917 = vector.load %arg7[%c1_176, %c33_177] : memref<4x290xf32, #tpu.memory_space<vmem>>, vector<1x256xf32>
    %c1_178 = arith.constant 1 : index
    %c34_179 = arith.constant 34 : index
    %918 = vector.load %arg7[%c1_178, %c34_179] : memref<4x290xf32, #tpu.memory_space<vmem>>, vector<1x256xf32>
    %919 = arith.select %4, %913, %911 : vector<1x256xi1>, vector<1x256xf32>
    %920 = arith.select %4, %918, %916 : vector<1x256xi1>, vector<1x256xf32>
    %921 = arith.select %8, %920, %919 : vector<1x256xi1>, vector<1x256xf32>
    %c9_180 = arith.constant 9 : index
    %922 = memref.load %arg4[%c9_180] : memref<144xf32, #tpu.memory_space<smem>>
    %923 = vector.broadcast %922 : f32 to vector<1x256xf32>
    %924 = arith.mulf %923, %921 : vector<1x256xf32>
    %925 = arith.addf %898, %924 : vector<1x256xf32>
    %c45_181 = arith.constant 45 : index
    %926 = memref.load %arg4[%c45_181] : memref<144xf32, #tpu.memory_space<smem>>
    %927 = vector.broadcast %926 : f32 to vector<1x256xf32>
    %928 = arith.mulf %927, %921 : vector<1x256xf32>
    %929 = arith.addf %902, %928 : vector<1x256xf32>
    %c81_182 = arith.constant 81 : index
    %930 = memref.load %arg4[%c81_182] : memref<144xf32, #tpu.memory_space<smem>>
    %931 = vector.broadcast %930 : f32 to vector<1x256xf32>
    %932 = arith.mulf %931, %921 : vector<1x256xf32>
    %933 = arith.addf %906, %932 : vector<1x256xf32>
    %c117_183 = arith.constant 117 : index
    %934 = memref.load %arg4[%c117_183] : memref<144xf32, #tpu.memory_space<smem>>
    %935 = vector.broadcast %934 : f32 to vector<1x256xf32>
    %936 = arith.mulf %935, %921 : vector<1x256xf32>
    %937 = arith.addf %910, %936 : vector<1x256xf32>
    %938 = arith.select %8, %917, %912 : vector<1x256xi1>, vector<1x256xf32>
    %c10_184 = arith.constant 10 : index
    %939 = memref.load %arg4[%c10_184] : memref<144xf32, #tpu.memory_space<smem>>
    %940 = vector.broadcast %939 : f32 to vector<1x256xf32>
    %941 = arith.mulf %940, %938 : vector<1x256xf32>
    %942 = arith.addf %925, %941 : vector<1x256xf32>
    %c46_185 = arith.constant 46 : index
    %943 = memref.load %arg4[%c46_185] : memref<144xf32, #tpu.memory_space<smem>>
    %944 = vector.broadcast %943 : f32 to vector<1x256xf32>
    %945 = arith.mulf %944, %938 : vector<1x256xf32>
    %946 = arith.addf %929, %945 : vector<1x256xf32>
    %c82_186 = arith.constant 82 : index
    %947 = memref.load %arg4[%c82_186] : memref<144xf32, #tpu.memory_space<smem>>
    %948 = vector.broadcast %947 : f32 to vector<1x256xf32>
    %949 = arith.mulf %948, %938 : vector<1x256xf32>
    %950 = arith.addf %933, %949 : vector<1x256xf32>
    %c118_187 = arith.constant 118 : index
    %951 = memref.load %arg4[%c118_187] : memref<144xf32, #tpu.memory_space<smem>>
    %952 = vector.broadcast %951 : f32 to vector<1x256xf32>
    %953 = arith.mulf %952, %938 : vector<1x256xf32>
    %954 = arith.addf %937, %953 : vector<1x256xf32>
    %955 = arith.select %6, %911, %913 : vector<1x256xi1>, vector<1x256xf32>
    %956 = arith.select %6, %916, %918 : vector<1x256xi1>, vector<1x256xf32>
    %957 = arith.select %8, %956, %955 : vector<1x256xi1>, vector<1x256xf32>
    %c11_188 = arith.constant 11 : index
    %958 = memref.load %arg4[%c11_188] : memref<144xf32, #tpu.memory_space<smem>>
    %959 = vector.broadcast %958 : f32 to vector<1x256xf32>
    %960 = arith.mulf %959, %957 : vector<1x256xf32>
    %961 = arith.addf %942, %960 : vector<1x256xf32>
    %c47_189 = arith.constant 47 : index
    %962 = memref.load %arg4[%c47_189] : memref<144xf32, #tpu.memory_space<smem>>
    %963 = vector.broadcast %962 : f32 to vector<1x256xf32>
    %964 = arith.mulf %963, %957 : vector<1x256xf32>
    %965 = arith.addf %946, %964 : vector<1x256xf32>
    %c83_190 = arith.constant 83 : index
    %966 = memref.load %arg4[%c83_190] : memref<144xf32, #tpu.memory_space<smem>>
    %967 = vector.broadcast %966 : f32 to vector<1x256xf32>
    %968 = arith.mulf %967, %957 : vector<1x256xf32>
    %969 = arith.addf %950, %968 : vector<1x256xf32>
    %c119_191 = arith.constant 119 : index
    %970 = memref.load %arg4[%c119_191] : memref<144xf32, #tpu.memory_space<smem>>
    %971 = vector.broadcast %970 : f32 to vector<1x256xf32>
    %972 = arith.mulf %971, %957 : vector<1x256xf32>
    %973 = arith.addf %954, %972 : vector<1x256xf32>
    %974 = arith.select %4, %915, %914 : vector<1x256xi1>, vector<1x256xf32>
    %c12_192 = arith.constant 12 : index
    %975 = memref.load %arg4[%c12_192] : memref<144xf32, #tpu.memory_space<smem>>
    %976 = vector.broadcast %975 : f32 to vector<1x256xf32>
    %977 = arith.mulf %976, %974 : vector<1x256xf32>
    %978 = arith.addf %961, %977 : vector<1x256xf32>
    %c48_193 = arith.constant 48 : index
    %979 = memref.load %arg4[%c48_193] : memref<144xf32, #tpu.memory_space<smem>>
    %980 = vector.broadcast %979 : f32 to vector<1x256xf32>
    %981 = arith.mulf %980, %974 : vector<1x256xf32>
    %982 = arith.addf %965, %981 : vector<1x256xf32>
    %c84_194 = arith.constant 84 : index
    %983 = memref.load %arg4[%c84_194] : memref<144xf32, #tpu.memory_space<smem>>
    %984 = vector.broadcast %983 : f32 to vector<1x256xf32>
    %985 = arith.mulf %984, %974 : vector<1x256xf32>
    %986 = arith.addf %969, %985 : vector<1x256xf32>
    %c120_195 = arith.constant 120 : index
    %987 = memref.load %arg4[%c120_195] : memref<144xf32, #tpu.memory_space<smem>>
    %988 = vector.broadcast %987 : f32 to vector<1x256xf32>
    %989 = arith.mulf %988, %974 : vector<1x256xf32>
    %990 = arith.addf %973, %989 : vector<1x256xf32>
    %c13_196 = arith.constant 13 : index
    %991 = memref.load %arg4[%c13_196] : memref<144xf32, #tpu.memory_space<smem>>
    %992 = vector.broadcast %991 : f32 to vector<1x256xf32>
    %993 = arith.mulf %992, %732 : vector<1x256xf32>
    %994 = arith.addf %978, %993 : vector<1x256xf32>
    %c49_197 = arith.constant 49 : index
    %995 = memref.load %arg4[%c49_197] : memref<144xf32, #tpu.memory_space<smem>>
    %996 = vector.broadcast %995 : f32 to vector<1x256xf32>
    %997 = arith.mulf %996, %732 : vector<1x256xf32>
    %998 = arith.addf %982, %997 : vector<1x256xf32>
    %c85_198 = arith.constant 85 : index
    %999 = memref.load %arg4[%c85_198] : memref<144xf32, #tpu.memory_space<smem>>
    %1000 = vector.broadcast %999 : f32 to vector<1x256xf32>
    %1001 = arith.mulf %1000, %732 : vector<1x256xf32>
    %1002 = arith.addf %986, %1001 : vector<1x256xf32>
    %c121_199 = arith.constant 121 : index
    %1003 = memref.load %arg4[%c121_199] : memref<144xf32, #tpu.memory_space<smem>>
    %1004 = vector.broadcast %1003 : f32 to vector<1x256xf32>
    %1005 = arith.mulf %1004, %732 : vector<1x256xf32>
    %1006 = arith.addf %990, %1005 : vector<1x256xf32>
    %1007 = arith.select %6, %914, %915 : vector<1x256xi1>, vector<1x256xf32>
    %c14_200 = arith.constant 14 : index
    %1008 = memref.load %arg4[%c14_200] : memref<144xf32, #tpu.memory_space<smem>>
    %1009 = vector.broadcast %1008 : f32 to vector<1x256xf32>
    %1010 = arith.mulf %1009, %1007 : vector<1x256xf32>
    %1011 = arith.addf %994, %1010 : vector<1x256xf32>
    %c50_201 = arith.constant 50 : index
    %1012 = memref.load %arg4[%c50_201] : memref<144xf32, #tpu.memory_space<smem>>
    %1013 = vector.broadcast %1012 : f32 to vector<1x256xf32>
    %1014 = arith.mulf %1013, %1007 : vector<1x256xf32>
    %1015 = arith.addf %998, %1014 : vector<1x256xf32>
    %c86_202 = arith.constant 86 : index
    %1016 = memref.load %arg4[%c86_202] : memref<144xf32, #tpu.memory_space<smem>>
    %1017 = vector.broadcast %1016 : f32 to vector<1x256xf32>
    %1018 = arith.mulf %1017, %1007 : vector<1x256xf32>
    %1019 = arith.addf %1002, %1018 : vector<1x256xf32>
    %c122_203 = arith.constant 122 : index
    %1020 = memref.load %arg4[%c122_203] : memref<144xf32, #tpu.memory_space<smem>>
    %1021 = vector.broadcast %1020 : f32 to vector<1x256xf32>
    %1022 = arith.mulf %1021, %1007 : vector<1x256xf32>
    %1023 = arith.addf %1006, %1022 : vector<1x256xf32>
    %1024 = arith.select %4, %918, %916 : vector<1x256xi1>, vector<1x256xf32>
    %1025 = arith.select %4, %913, %911 : vector<1x256xi1>, vector<1x256xf32>
    %1026 = arith.select %10, %1025, %1024 : vector<1x256xi1>, vector<1x256xf32>
    %c15_204 = arith.constant 15 : index
    %1027 = memref.load %arg4[%c15_204] : memref<144xf32, #tpu.memory_space<smem>>
    %1028 = vector.broadcast %1027 : f32 to vector<1x256xf32>
    %1029 = arith.mulf %1028, %1026 : vector<1x256xf32>
    %1030 = arith.addf %1011, %1029 : vector<1x256xf32>
    %c51_205 = arith.constant 51 : index
    %1031 = memref.load %arg4[%c51_205] : memref<144xf32, #tpu.memory_space<smem>>
    %1032 = vector.broadcast %1031 : f32 to vector<1x256xf32>
    %1033 = arith.mulf %1032, %1026 : vector<1x256xf32>
    %1034 = arith.addf %1015, %1033 : vector<1x256xf32>
    %c87_206 = arith.constant 87 : index
    %1035 = memref.load %arg4[%c87_206] : memref<144xf32, #tpu.memory_space<smem>>
    %1036 = vector.broadcast %1035 : f32 to vector<1x256xf32>
    %1037 = arith.mulf %1036, %1026 : vector<1x256xf32>
    %1038 = arith.addf %1019, %1037 : vector<1x256xf32>
    %c123_207 = arith.constant 123 : index
    %1039 = memref.load %arg4[%c123_207] : memref<144xf32, #tpu.memory_space<smem>>
    %1040 = vector.broadcast %1039 : f32 to vector<1x256xf32>
    %1041 = arith.mulf %1040, %1026 : vector<1x256xf32>
    %1042 = arith.addf %1023, %1041 : vector<1x256xf32>
    %1043 = arith.select %10, %912, %917 : vector<1x256xi1>, vector<1x256xf32>
    %c16_208 = arith.constant 16 : index
    %1044 = memref.load %arg4[%c16_208] : memref<144xf32, #tpu.memory_space<smem>>
    %1045 = vector.broadcast %1044 : f32 to vector<1x256xf32>
    %1046 = arith.mulf %1045, %1043 : vector<1x256xf32>
    %1047 = arith.addf %1030, %1046 : vector<1x256xf32>
    %c52_209 = arith.constant 52 : index
    %1048 = memref.load %arg4[%c52_209] : memref<144xf32, #tpu.memory_space<smem>>
    %1049 = vector.broadcast %1048 : f32 to vector<1x256xf32>
    %1050 = arith.mulf %1049, %1043 : vector<1x256xf32>
    %1051 = arith.addf %1034, %1050 : vector<1x256xf32>
    %c88_210 = arith.constant 88 : index
    %1052 = memref.load %arg4[%c88_210] : memref<144xf32, #tpu.memory_space<smem>>
    %1053 = vector.broadcast %1052 : f32 to vector<1x256xf32>
    %1054 = arith.mulf %1053, %1043 : vector<1x256xf32>
    %1055 = arith.addf %1038, %1054 : vector<1x256xf32>
    %c124_211 = arith.constant 124 : index
    %1056 = memref.load %arg4[%c124_211] : memref<144xf32, #tpu.memory_space<smem>>
    %1057 = vector.broadcast %1056 : f32 to vector<1x256xf32>
    %1058 = arith.mulf %1057, %1043 : vector<1x256xf32>
    %1059 = arith.addf %1042, %1058 : vector<1x256xf32>
    %1060 = arith.select %6, %916, %918 : vector<1x256xi1>, vector<1x256xf32>
    %1061 = arith.select %6, %911, %913 : vector<1x256xi1>, vector<1x256xf32>
    %1062 = arith.select %10, %1061, %1060 : vector<1x256xi1>, vector<1x256xf32>
    %c17_212 = arith.constant 17 : index
    %1063 = memref.load %arg4[%c17_212] : memref<144xf32, #tpu.memory_space<smem>>
    %1064 = vector.broadcast %1063 : f32 to vector<1x256xf32>
    %1065 = arith.mulf %1064, %1062 : vector<1x256xf32>
    %1066 = arith.addf %1047, %1065 : vector<1x256xf32>
    %c53_213 = arith.constant 53 : index
    %1067 = memref.load %arg4[%c53_213] : memref<144xf32, #tpu.memory_space<smem>>
    %1068 = vector.broadcast %1067 : f32 to vector<1x256xf32>
    %1069 = arith.mulf %1068, %1062 : vector<1x256xf32>
    %1070 = arith.addf %1051, %1069 : vector<1x256xf32>
    %c89_214 = arith.constant 89 : index
    %1071 = memref.load %arg4[%c89_214] : memref<144xf32, #tpu.memory_space<smem>>
    %1072 = vector.broadcast %1071 : f32 to vector<1x256xf32>
    %1073 = arith.mulf %1072, %1062 : vector<1x256xf32>
    %1074 = arith.addf %1055, %1073 : vector<1x256xf32>
    %c125_215 = arith.constant 125 : index
    %1075 = memref.load %arg4[%c125_215] : memref<144xf32, #tpu.memory_space<smem>>
    %1076 = vector.broadcast %1075 : f32 to vector<1x256xf32>
    %1077 = arith.mulf %1076, %1062 : vector<1x256xf32>
    %1078 = arith.addf %1059, %1077 : vector<1x256xf32>
    %c2_216 = arith.constant 2 : index
    %c0_217 = arith.constant 0 : index
    %1079 = vector.load %arg7[%c2_216, %c0_217] : memref<4x290xf32, #tpu.memory_space<vmem>>, vector<1x256xf32>
    %c2_218 = arith.constant 2 : index
    %c1_219 = arith.constant 1 : index
    %1080 = vector.load %arg7[%c2_218, %c1_219] : memref<4x290xf32, #tpu.memory_space<vmem>>, vector<1x256xf32>
    %c2_220 = arith.constant 2 : index
    %c2_221 = arith.constant 2 : index
    %1081 = vector.load %arg7[%c2_220, %c2_221] : memref<4x290xf32, #tpu.memory_space<vmem>>, vector<1x256xf32>
    %c2_222 = arith.constant 2 : index
    %c16_223 = arith.constant 16 : index
    %1082 = vector.load %arg7[%c2_222, %c16_223] : memref<4x290xf32, #tpu.memory_space<vmem>>, vector<1x256xf32>
    %c2_224 = arith.constant 2 : index
    %c18_225 = arith.constant 18 : index
    %1083 = vector.load %arg7[%c2_224, %c18_225] : memref<4x290xf32, #tpu.memory_space<vmem>>, vector<1x256xf32>
    %c2_226 = arith.constant 2 : index
    %c32_227 = arith.constant 32 : index
    %1084 = vector.load %arg7[%c2_226, %c32_227] : memref<4x290xf32, #tpu.memory_space<vmem>>, vector<1x256xf32>
    %c2_228 = arith.constant 2 : index
    %c33_229 = arith.constant 33 : index
    %1085 = vector.load %arg7[%c2_228, %c33_229] : memref<4x290xf32, #tpu.memory_space<vmem>>, vector<1x256xf32>
    %c2_230 = arith.constant 2 : index
    %c34_231 = arith.constant 34 : index
    %1086 = vector.load %arg7[%c2_230, %c34_231] : memref<4x290xf32, #tpu.memory_space<vmem>>, vector<1x256xf32>
    %1087 = arith.select %4, %1081, %1079 : vector<1x256xi1>, vector<1x256xf32>
    %1088 = arith.select %4, %1086, %1084 : vector<1x256xi1>, vector<1x256xf32>
    %1089 = arith.select %8, %1088, %1087 : vector<1x256xi1>, vector<1x256xf32>
    %c18_232 = arith.constant 18 : index
    %1090 = memref.load %arg4[%c18_232] : memref<144xf32, #tpu.memory_space<smem>>
    %1091 = vector.broadcast %1090 : f32 to vector<1x256xf32>
    %1092 = arith.mulf %1091, %1089 : vector<1x256xf32>
    %1093 = arith.addf %1066, %1092 : vector<1x256xf32>
    %c54_233 = arith.constant 54 : index
    %1094 = memref.load %arg4[%c54_233] : memref<144xf32, #tpu.memory_space<smem>>
    %1095 = vector.broadcast %1094 : f32 to vector<1x256xf32>
    %1096 = arith.mulf %1095, %1089 : vector<1x256xf32>
    %1097 = arith.addf %1070, %1096 : vector<1x256xf32>
    %c90_234 = arith.constant 90 : index
    %1098 = memref.load %arg4[%c90_234] : memref<144xf32, #tpu.memory_space<smem>>
    %1099 = vector.broadcast %1098 : f32 to vector<1x256xf32>
    %1100 = arith.mulf %1099, %1089 : vector<1x256xf32>
    %1101 = arith.addf %1074, %1100 : vector<1x256xf32>
    %c126_235 = arith.constant 126 : index
    %1102 = memref.load %arg4[%c126_235] : memref<144xf32, #tpu.memory_space<smem>>
    %1103 = vector.broadcast %1102 : f32 to vector<1x256xf32>
    %1104 = arith.mulf %1103, %1089 : vector<1x256xf32>
    %1105 = arith.addf %1078, %1104 : vector<1x256xf32>
    %1106 = arith.select %8, %1085, %1080 : vector<1x256xi1>, vector<1x256xf32>
    %c19_236 = arith.constant 19 : index
    %1107 = memref.load %arg4[%c19_236] : memref<144xf32, #tpu.memory_space<smem>>
    %1108 = vector.broadcast %1107 : f32 to vector<1x256xf32>
    %1109 = arith.mulf %1108, %1106 : vector<1x256xf32>
    %1110 = arith.addf %1093, %1109 : vector<1x256xf32>
    %c55_237 = arith.constant 55 : index
    %1111 = memref.load %arg4[%c55_237] : memref<144xf32, #tpu.memory_space<smem>>
    %1112 = vector.broadcast %1111 : f32 to vector<1x256xf32>
    %1113 = arith.mulf %1112, %1106 : vector<1x256xf32>
    %1114 = arith.addf %1097, %1113 : vector<1x256xf32>
    %c91_238 = arith.constant 91 : index
    %1115 = memref.load %arg4[%c91_238] : memref<144xf32, #tpu.memory_space<smem>>
    %1116 = vector.broadcast %1115 : f32 to vector<1x256xf32>
    %1117 = arith.mulf %1116, %1106 : vector<1x256xf32>
    %1118 = arith.addf %1101, %1117 : vector<1x256xf32>
    %c127_239 = arith.constant 127 : index
    %1119 = memref.load %arg4[%c127_239] : memref<144xf32, #tpu.memory_space<smem>>
    %1120 = vector.broadcast %1119 : f32 to vector<1x256xf32>
    %1121 = arith.mulf %1120, %1106 : vector<1x256xf32>
    %1122 = arith.addf %1105, %1121 : vector<1x256xf32>
    %1123 = arith.select %6, %1079, %1081 : vector<1x256xi1>, vector<1x256xf32>
    %1124 = arith.select %6, %1084, %1086 : vector<1x256xi1>, vector<1x256xf32>
    %1125 = arith.select %8, %1124, %1123 : vector<1x256xi1>, vector<1x256xf32>
    %c20_240 = arith.constant 20 : index
    %1126 = memref.load %arg4[%c20_240] : memref<144xf32, #tpu.memory_space<smem>>
    %1127 = vector.broadcast %1126 : f32 to vector<1x256xf32>
    %1128 = arith.mulf %1127, %1125 : vector<1x256xf32>
    %1129 = arith.addf %1110, %1128 : vector<1x256xf32>
    %c56_241 = arith.constant 56 : index
    %1130 = memref.load %arg4[%c56_241] : memref<144xf32, #tpu.memory_space<smem>>
    %1131 = vector.broadcast %1130 : f32 to vector<1x256xf32>
    %1132 = arith.mulf %1131, %1125 : vector<1x256xf32>
    %1133 = arith.addf %1114, %1132 : vector<1x256xf32>
    %c92_242 = arith.constant 92 : index
    %1134 = memref.load %arg4[%c92_242] : memref<144xf32, #tpu.memory_space<smem>>
    %1135 = vector.broadcast %1134 : f32 to vector<1x256xf32>
    %1136 = arith.mulf %1135, %1125 : vector<1x256xf32>
    %1137 = arith.addf %1118, %1136 : vector<1x256xf32>
    %c128_243 = arith.constant 128 : index
    %1138 = memref.load %arg4[%c128_243] : memref<144xf32, #tpu.memory_space<smem>>
    %1139 = vector.broadcast %1138 : f32 to vector<1x256xf32>
    %1140 = arith.mulf %1139, %1125 : vector<1x256xf32>
    %1141 = arith.addf %1122, %1140 : vector<1x256xf32>
    %1142 = arith.select %4, %1083, %1082 : vector<1x256xi1>, vector<1x256xf32>
    %c21_244 = arith.constant 21 : index
    %1143 = memref.load %arg4[%c21_244] : memref<144xf32, #tpu.memory_space<smem>>
    %1144 = vector.broadcast %1143 : f32 to vector<1x256xf32>
    %1145 = arith.mulf %1144, %1142 : vector<1x256xf32>
    %1146 = arith.addf %1129, %1145 : vector<1x256xf32>
    %c57_245 = arith.constant 57 : index
    %1147 = memref.load %arg4[%c57_245] : memref<144xf32, #tpu.memory_space<smem>>
    %1148 = vector.broadcast %1147 : f32 to vector<1x256xf32>
    %1149 = arith.mulf %1148, %1142 : vector<1x256xf32>
    %1150 = arith.addf %1133, %1149 : vector<1x256xf32>
    %c93_246 = arith.constant 93 : index
    %1151 = memref.load %arg4[%c93_246] : memref<144xf32, #tpu.memory_space<smem>>
    %1152 = vector.broadcast %1151 : f32 to vector<1x256xf32>
    %1153 = arith.mulf %1152, %1142 : vector<1x256xf32>
    %1154 = arith.addf %1137, %1153 : vector<1x256xf32>
    %c129_247 = arith.constant 129 : index
    %1155 = memref.load %arg4[%c129_247] : memref<144xf32, #tpu.memory_space<smem>>
    %1156 = vector.broadcast %1155 : f32 to vector<1x256xf32>
    %1157 = arith.mulf %1156, %1142 : vector<1x256xf32>
    %1158 = arith.addf %1141, %1157 : vector<1x256xf32>
    %c22_248 = arith.constant 22 : index
    %1159 = memref.load %arg4[%c22_248] : memref<144xf32, #tpu.memory_space<smem>>
    %1160 = vector.broadcast %1159 : f32 to vector<1x256xf32>
    %1161 = arith.mulf %1160, %737 : vector<1x256xf32>
    %1162 = arith.addf %1146, %1161 : vector<1x256xf32>
    %c58_249 = arith.constant 58 : index
    %1163 = memref.load %arg4[%c58_249] : memref<144xf32, #tpu.memory_space<smem>>
    %1164 = vector.broadcast %1163 : f32 to vector<1x256xf32>
    %1165 = arith.mulf %1164, %737 : vector<1x256xf32>
    %1166 = arith.addf %1150, %1165 : vector<1x256xf32>
    %c94_250 = arith.constant 94 : index
    %1167 = memref.load %arg4[%c94_250] : memref<144xf32, #tpu.memory_space<smem>>
    %1168 = vector.broadcast %1167 : f32 to vector<1x256xf32>
    %1169 = arith.mulf %1168, %737 : vector<1x256xf32>
    %1170 = arith.addf %1154, %1169 : vector<1x256xf32>
    %c130_251 = arith.constant 130 : index
    %1171 = memref.load %arg4[%c130_251] : memref<144xf32, #tpu.memory_space<smem>>
    %1172 = vector.broadcast %1171 : f32 to vector<1x256xf32>
    %1173 = arith.mulf %1172, %737 : vector<1x256xf32>
    %1174 = arith.addf %1158, %1173 : vector<1x256xf32>
    %1175 = arith.select %6, %1082, %1083 : vector<1x256xi1>, vector<1x256xf32>
    %c23_252 = arith.constant 23 : index
    %1176 = memref.load %arg4[%c23_252] : memref<144xf32, #tpu.memory_space<smem>>
    %1177 = vector.broadcast %1176 : f32 to vector<1x256xf32>
    %1178 = arith.mulf %1177, %1175 : vector<1x256xf32>
    %1179 = arith.addf %1162, %1178 : vector<1x256xf32>
    %c59_253 = arith.constant 59 : index
    %1180 = memref.load %arg4[%c59_253] : memref<144xf32, #tpu.memory_space<smem>>
    %1181 = vector.broadcast %1180 : f32 to vector<1x256xf32>
    %1182 = arith.mulf %1181, %1175 : vector<1x256xf32>
    %1183 = arith.addf %1166, %1182 : vector<1x256xf32>
    %c95_254 = arith.constant 95 : index
    %1184 = memref.load %arg4[%c95_254] : memref<144xf32, #tpu.memory_space<smem>>
    %1185 = vector.broadcast %1184 : f32 to vector<1x256xf32>
    %1186 = arith.mulf %1185, %1175 : vector<1x256xf32>
    %1187 = arith.addf %1170, %1186 : vector<1x256xf32>
    %c131_255 = arith.constant 131 : index
    %1188 = memref.load %arg4[%c131_255] : memref<144xf32, #tpu.memory_space<smem>>
    %1189 = vector.broadcast %1188 : f32 to vector<1x256xf32>
    %1190 = arith.mulf %1189, %1175 : vector<1x256xf32>
    %1191 = arith.addf %1174, %1190 : vector<1x256xf32>
    %1192 = arith.select %4, %1086, %1084 : vector<1x256xi1>, vector<1x256xf32>
    %1193 = arith.select %4, %1081, %1079 : vector<1x256xi1>, vector<1x256xf32>
    %1194 = arith.select %10, %1193, %1192 : vector<1x256xi1>, vector<1x256xf32>
    %c24_256 = arith.constant 24 : index
    %1195 = memref.load %arg4[%c24_256] : memref<144xf32, #tpu.memory_space<smem>>
    %1196 = vector.broadcast %1195 : f32 to vector<1x256xf32>
    %1197 = arith.mulf %1196, %1194 : vector<1x256xf32>
    %1198 = arith.addf %1179, %1197 : vector<1x256xf32>
    %c60_257 = arith.constant 60 : index
    %1199 = memref.load %arg4[%c60_257] : memref<144xf32, #tpu.memory_space<smem>>
    %1200 = vector.broadcast %1199 : f32 to vector<1x256xf32>
    %1201 = arith.mulf %1200, %1194 : vector<1x256xf32>
    %1202 = arith.addf %1183, %1201 : vector<1x256xf32>
    %c96_258 = arith.constant 96 : index
    %1203 = memref.load %arg4[%c96_258] : memref<144xf32, #tpu.memory_space<smem>>
    %1204 = vector.broadcast %1203 : f32 to vector<1x256xf32>
    %1205 = arith.mulf %1204, %1194 : vector<1x256xf32>
    %1206 = arith.addf %1187, %1205 : vector<1x256xf32>
    %c132_259 = arith.constant 132 : index
    %1207 = memref.load %arg4[%c132_259] : memref<144xf32, #tpu.memory_space<smem>>
    %1208 = vector.broadcast %1207 : f32 to vector<1x256xf32>
    %1209 = arith.mulf %1208, %1194 : vector<1x256xf32>
    %1210 = arith.addf %1191, %1209 : vector<1x256xf32>
    %1211 = arith.select %10, %1080, %1085 : vector<1x256xi1>, vector<1x256xf32>
    %c25_260 = arith.constant 25 : index
    %1212 = memref.load %arg4[%c25_260] : memref<144xf32, #tpu.memory_space<smem>>
    %1213 = vector.broadcast %1212 : f32 to vector<1x256xf32>
    %1214 = arith.mulf %1213, %1211 : vector<1x256xf32>
    %1215 = arith.addf %1198, %1214 : vector<1x256xf32>
    %c61_261 = arith.constant 61 : index
    %1216 = memref.load %arg4[%c61_261] : memref<144xf32, #tpu.memory_space<smem>>
    %1217 = vector.broadcast %1216 : f32 to vector<1x256xf32>
    %1218 = arith.mulf %1217, %1211 : vector<1x256xf32>
    %1219 = arith.addf %1202, %1218 : vector<1x256xf32>
    %c97_262 = arith.constant 97 : index
    %1220 = memref.load %arg4[%c97_262] : memref<144xf32, #tpu.memory_space<smem>>
    %1221 = vector.broadcast %1220 : f32 to vector<1x256xf32>
    %1222 = arith.mulf %1221, %1211 : vector<1x256xf32>
    %1223 = arith.addf %1206, %1222 : vector<1x256xf32>
    %c133_263 = arith.constant 133 : index
    %1224 = memref.load %arg4[%c133_263] : memref<144xf32, #tpu.memory_space<smem>>
    %1225 = vector.broadcast %1224 : f32 to vector<1x256xf32>
    %1226 = arith.mulf %1225, %1211 : vector<1x256xf32>
    %1227 = arith.addf %1210, %1226 : vector<1x256xf32>
    %1228 = arith.select %6, %1084, %1086 : vector<1x256xi1>, vector<1x256xf32>
    %1229 = arith.select %6, %1079, %1081 : vector<1x256xi1>, vector<1x256xf32>
    %1230 = arith.select %10, %1229, %1228 : vector<1x256xi1>, vector<1x256xf32>
    %c26_264 = arith.constant 26 : index
    %1231 = memref.load %arg4[%c26_264] : memref<144xf32, #tpu.memory_space<smem>>
    %1232 = vector.broadcast %1231 : f32 to vector<1x256xf32>
    %1233 = arith.mulf %1232, %1230 : vector<1x256xf32>
    %1234 = arith.addf %1215, %1233 : vector<1x256xf32>
    %c62_265 = arith.constant 62 : index
    %1235 = memref.load %arg4[%c62_265] : memref<144xf32, #tpu.memory_space<smem>>
    %1236 = vector.broadcast %1235 : f32 to vector<1x256xf32>
    %1237 = arith.mulf %1236, %1230 : vector<1x256xf32>
    %1238 = arith.addf %1219, %1237 : vector<1x256xf32>
    %c98_266 = arith.constant 98 : index
    %1239 = memref.load %arg4[%c98_266] : memref<144xf32, #tpu.memory_space<smem>>
    %1240 = vector.broadcast %1239 : f32 to vector<1x256xf32>
    %1241 = arith.mulf %1240, %1230 : vector<1x256xf32>
    %1242 = arith.addf %1223, %1241 : vector<1x256xf32>
    %c134_267 = arith.constant 134 : index
    %1243 = memref.load %arg4[%c134_267] : memref<144xf32, #tpu.memory_space<smem>>
    %1244 = vector.broadcast %1243 : f32 to vector<1x256xf32>
    %1245 = arith.mulf %1244, %1230 : vector<1x256xf32>
    %1246 = arith.addf %1227, %1245 : vector<1x256xf32>
    %c3_268 = arith.constant 3 : index
    %c0_269 = arith.constant 0 : index
    %1247 = vector.load %arg7[%c3_268, %c0_269] : memref<4x290xf32, #tpu.memory_space<vmem>>, vector<1x256xf32>
    %c3_270 = arith.constant 3 : index
    %c1_271 = arith.constant 1 : index
    %1248 = vector.load %arg7[%c3_270, %c1_271] : memref<4x290xf32, #tpu.memory_space<vmem>>, vector<1x256xf32>
    %c3_272 = arith.constant 3 : index
    %c2_273 = arith.constant 2 : index
    %1249 = vector.load %arg7[%c3_272, %c2_273] : memref<4x290xf32, #tpu.memory_space<vmem>>, vector<1x256xf32>
    %c3_274 = arith.constant 3 : index
    %c16_275 = arith.constant 16 : index
    %1250 = vector.load %arg7[%c3_274, %c16_275] : memref<4x290xf32, #tpu.memory_space<vmem>>, vector<1x256xf32>
    %c3_276 = arith.constant 3 : index
    %c18_277 = arith.constant 18 : index
    %1251 = vector.load %arg7[%c3_276, %c18_277] : memref<4x290xf32, #tpu.memory_space<vmem>>, vector<1x256xf32>
    %c3_278 = arith.constant 3 : index
    %c32_279 = arith.constant 32 : index
    %1252 = vector.load %arg7[%c3_278, %c32_279] : memref<4x290xf32, #tpu.memory_space<vmem>>, vector<1x256xf32>
    %c3_280 = arith.constant 3 : index
    %c33_281 = arith.constant 33 : index
    %1253 = vector.load %arg7[%c3_280, %c33_281] : memref<4x290xf32, #tpu.memory_space<vmem>>, vector<1x256xf32>
    %c3_282 = arith.constant 3 : index
    %c34_283 = arith.constant 34 : index
    %1254 = vector.load %arg7[%c3_282, %c34_283] : memref<4x290xf32, #tpu.memory_space<vmem>>, vector<1x256xf32>
    %1255 = arith.select %4, %1249, %1247 : vector<1x256xi1>, vector<1x256xf32>
    %1256 = arith.select %4, %1254, %1252 : vector<1x256xi1>, vector<1x256xf32>
    %1257 = arith.select %8, %1256, %1255 : vector<1x256xi1>, vector<1x256xf32>
    %c27_284 = arith.constant 27 : index
    %1258 = memref.load %arg4[%c27_284] : memref<144xf32, #tpu.memory_space<smem>>
    %1259 = vector.broadcast %1258 : f32 to vector<1x256xf32>
    %1260 = arith.mulf %1259, %1257 : vector<1x256xf32>
    %1261 = arith.addf %1234, %1260 : vector<1x256xf32>
    %c63_285 = arith.constant 63 : index
    %1262 = memref.load %arg4[%c63_285] : memref<144xf32, #tpu.memory_space<smem>>
    %1263 = vector.broadcast %1262 : f32 to vector<1x256xf32>
    %1264 = arith.mulf %1263, %1257 : vector<1x256xf32>
    %1265 = arith.addf %1238, %1264 : vector<1x256xf32>
    %c99_286 = arith.constant 99 : index
    %1266 = memref.load %arg4[%c99_286] : memref<144xf32, #tpu.memory_space<smem>>
    %1267 = vector.broadcast %1266 : f32 to vector<1x256xf32>
    %1268 = arith.mulf %1267, %1257 : vector<1x256xf32>
    %1269 = arith.addf %1242, %1268 : vector<1x256xf32>
    %c135_287 = arith.constant 135 : index
    %1270 = memref.load %arg4[%c135_287] : memref<144xf32, #tpu.memory_space<smem>>
    %1271 = vector.broadcast %1270 : f32 to vector<1x256xf32>
    %1272 = arith.mulf %1271, %1257 : vector<1x256xf32>
    %1273 = arith.addf %1246, %1272 : vector<1x256xf32>
    %1274 = arith.select %8, %1253, %1248 : vector<1x256xi1>, vector<1x256xf32>
    %c28_288 = arith.constant 28 : index
    %1275 = memref.load %arg4[%c28_288] : memref<144xf32, #tpu.memory_space<smem>>
    %1276 = vector.broadcast %1275 : f32 to vector<1x256xf32>
    %1277 = arith.mulf %1276, %1274 : vector<1x256xf32>
    %1278 = arith.addf %1261, %1277 : vector<1x256xf32>
    %c64_289 = arith.constant 64 : index
    %1279 = memref.load %arg4[%c64_289] : memref<144xf32, #tpu.memory_space<smem>>
    %1280 = vector.broadcast %1279 : f32 to vector<1x256xf32>
    %1281 = arith.mulf %1280, %1274 : vector<1x256xf32>
    %1282 = arith.addf %1265, %1281 : vector<1x256xf32>
    %c100_290 = arith.constant 100 : index
    %1283 = memref.load %arg4[%c100_290] : memref<144xf32, #tpu.memory_space<smem>>
    %1284 = vector.broadcast %1283 : f32 to vector<1x256xf32>
    %1285 = arith.mulf %1284, %1274 : vector<1x256xf32>
    %1286 = arith.addf %1269, %1285 : vector<1x256xf32>
    %c136_291 = arith.constant 136 : index
    %1287 = memref.load %arg4[%c136_291] : memref<144xf32, #tpu.memory_space<smem>>
    %1288 = vector.broadcast %1287 : f32 to vector<1x256xf32>
    %1289 = arith.mulf %1288, %1274 : vector<1x256xf32>
    %1290 = arith.addf %1273, %1289 : vector<1x256xf32>
    %1291 = arith.select %6, %1247, %1249 : vector<1x256xi1>, vector<1x256xf32>
    %1292 = arith.select %6, %1252, %1254 : vector<1x256xi1>, vector<1x256xf32>
    %1293 = arith.select %8, %1292, %1291 : vector<1x256xi1>, vector<1x256xf32>
    %c29_292 = arith.constant 29 : index
    %1294 = memref.load %arg4[%c29_292] : memref<144xf32, #tpu.memory_space<smem>>
    %1295 = vector.broadcast %1294 : f32 to vector<1x256xf32>
    %1296 = arith.mulf %1295, %1293 : vector<1x256xf32>
    %1297 = arith.addf %1278, %1296 : vector<1x256xf32>
    %c65_293 = arith.constant 65 : index
    %1298 = memref.load %arg4[%c65_293] : memref<144xf32, #tpu.memory_space<smem>>
    %1299 = vector.broadcast %1298 : f32 to vector<1x256xf32>
    %1300 = arith.mulf %1299, %1293 : vector<1x256xf32>
    %1301 = arith.addf %1282, %1300 : vector<1x256xf32>
    %c101_294 = arith.constant 101 : index
    %1302 = memref.load %arg4[%c101_294] : memref<144xf32, #tpu.memory_space<smem>>
    %1303 = vector.broadcast %1302 : f32 to vector<1x256xf32>
    %1304 = arith.mulf %1303, %1293 : vector<1x256xf32>
    %1305 = arith.addf %1286, %1304 : vector<1x256xf32>
    %c137_295 = arith.constant 137 : index
    %1306 = memref.load %arg4[%c137_295] : memref<144xf32, #tpu.memory_space<smem>>
    %1307 = vector.broadcast %1306 : f32 to vector<1x256xf32>
    %1308 = arith.mulf %1307, %1293 : vector<1x256xf32>
    %1309 = arith.addf %1290, %1308 : vector<1x256xf32>
    %1310 = arith.select %4, %1251, %1250 : vector<1x256xi1>, vector<1x256xf32>
    %c30_296 = arith.constant 30 : index
    %1311 = memref.load %arg4[%c30_296] : memref<144xf32, #tpu.memory_space<smem>>
    %1312 = vector.broadcast %1311 : f32 to vector<1x256xf32>
    %1313 = arith.mulf %1312, %1310 : vector<1x256xf32>
    %1314 = arith.addf %1297, %1313 : vector<1x256xf32>
    %c66_297 = arith.constant 66 : index
    %1315 = memref.load %arg4[%c66_297] : memref<144xf32, #tpu.memory_space<smem>>
    %1316 = vector.broadcast %1315 : f32 to vector<1x256xf32>
    %1317 = arith.mulf %1316, %1310 : vector<1x256xf32>
    %1318 = arith.addf %1301, %1317 : vector<1x256xf32>
    %c102_298 = arith.constant 102 : index
    %1319 = memref.load %arg4[%c102_298] : memref<144xf32, #tpu.memory_space<smem>>
    %1320 = vector.broadcast %1319 : f32 to vector<1x256xf32>
    %1321 = arith.mulf %1320, %1310 : vector<1x256xf32>
    %1322 = arith.addf %1305, %1321 : vector<1x256xf32>
    %c138_299 = arith.constant 138 : index
    %1323 = memref.load %arg4[%c138_299] : memref<144xf32, #tpu.memory_space<smem>>
    %1324 = vector.broadcast %1323 : f32 to vector<1x256xf32>
    %1325 = arith.mulf %1324, %1310 : vector<1x256xf32>
    %1326 = arith.addf %1309, %1325 : vector<1x256xf32>
    %c31_300 = arith.constant 31 : index
    %1327 = memref.load %arg4[%c31_300] : memref<144xf32, #tpu.memory_space<smem>>
    %1328 = vector.broadcast %1327 : f32 to vector<1x256xf32>
    %1329 = arith.mulf %1328, %742 : vector<1x256xf32>
    %1330 = arith.addf %1314, %1329 : vector<1x256xf32>
    %c67_301 = arith.constant 67 : index
    %1331 = memref.load %arg4[%c67_301] : memref<144xf32, #tpu.memory_space<smem>>
    %1332 = vector.broadcast %1331 : f32 to vector<1x256xf32>
    %1333 = arith.mulf %1332, %742 : vector<1x256xf32>
    %1334 = arith.addf %1318, %1333 : vector<1x256xf32>
    %c103_302 = arith.constant 103 : index
    %1335 = memref.load %arg4[%c103_302] : memref<144xf32, #tpu.memory_space<smem>>
    %1336 = vector.broadcast %1335 : f32 to vector<1x256xf32>
    %1337 = arith.mulf %1336, %742 : vector<1x256xf32>
    %1338 = arith.addf %1322, %1337 : vector<1x256xf32>
    %c139_303 = arith.constant 139 : index
    %1339 = memref.load %arg4[%c139_303] : memref<144xf32, #tpu.memory_space<smem>>
    %1340 = vector.broadcast %1339 : f32 to vector<1x256xf32>
    %1341 = arith.mulf %1340, %742 : vector<1x256xf32>
    %1342 = arith.addf %1326, %1341 : vector<1x256xf32>
    %1343 = arith.select %6, %1250, %1251 : vector<1x256xi1>, vector<1x256xf32>
    %c32_304 = arith.constant 32 : index
    %1344 = memref.load %arg4[%c32_304] : memref<144xf32, #tpu.memory_space<smem>>
    %1345 = vector.broadcast %1344 : f32 to vector<1x256xf32>
    %1346 = arith.mulf %1345, %1343 : vector<1x256xf32>
    %1347 = arith.addf %1330, %1346 : vector<1x256xf32>
    %c68_305 = arith.constant 68 : index
    %1348 = memref.load %arg4[%c68_305] : memref<144xf32, #tpu.memory_space<smem>>
    %1349 = vector.broadcast %1348 : f32 to vector<1x256xf32>
    %1350 = arith.mulf %1349, %1343 : vector<1x256xf32>
    %1351 = arith.addf %1334, %1350 : vector<1x256xf32>
    %c104_306 = arith.constant 104 : index
    %1352 = memref.load %arg4[%c104_306] : memref<144xf32, #tpu.memory_space<smem>>
    %1353 = vector.broadcast %1352 : f32 to vector<1x256xf32>
    %1354 = arith.mulf %1353, %1343 : vector<1x256xf32>
    %1355 = arith.addf %1338, %1354 : vector<1x256xf32>
    %c140_307 = arith.constant 140 : index
    %1356 = memref.load %arg4[%c140_307] : memref<144xf32, #tpu.memory_space<smem>>
    %1357 = vector.broadcast %1356 : f32 to vector<1x256xf32>
    %1358 = arith.mulf %1357, %1343 : vector<1x256xf32>
    %1359 = arith.addf %1342, %1358 : vector<1x256xf32>
    %1360 = arith.select %4, %1254, %1252 : vector<1x256xi1>, vector<1x256xf32>
    %1361 = arith.select %4, %1249, %1247 : vector<1x256xi1>, vector<1x256xf32>
    %1362 = arith.select %10, %1361, %1360 : vector<1x256xi1>, vector<1x256xf32>
    %c33_308 = arith.constant 33 : index
    %1363 = memref.load %arg4[%c33_308] : memref<144xf32, #tpu.memory_space<smem>>
    %1364 = vector.broadcast %1363 : f32 to vector<1x256xf32>
    %1365 = arith.mulf %1364, %1362 : vector<1x256xf32>
    %1366 = arith.addf %1347, %1365 : vector<1x256xf32>
    %c69_309 = arith.constant 69 : index
    %1367 = memref.load %arg4[%c69_309] : memref<144xf32, #tpu.memory_space<smem>>
    %1368 = vector.broadcast %1367 : f32 to vector<1x256xf32>
    %1369 = arith.mulf %1368, %1362 : vector<1x256xf32>
    %1370 = arith.addf %1351, %1369 : vector<1x256xf32>
    %c105_310 = arith.constant 105 : index
    %1371 = memref.load %arg4[%c105_310] : memref<144xf32, #tpu.memory_space<smem>>
    %1372 = vector.broadcast %1371 : f32 to vector<1x256xf32>
    %1373 = arith.mulf %1372, %1362 : vector<1x256xf32>
    %1374 = arith.addf %1355, %1373 : vector<1x256xf32>
    %c141_311 = arith.constant 141 : index
    %1375 = memref.load %arg4[%c141_311] : memref<144xf32, #tpu.memory_space<smem>>
    %1376 = vector.broadcast %1375 : f32 to vector<1x256xf32>
    %1377 = arith.mulf %1376, %1362 : vector<1x256xf32>
    %1378 = arith.addf %1359, %1377 : vector<1x256xf32>
    %1379 = arith.select %10, %1248, %1253 : vector<1x256xi1>, vector<1x256xf32>
    %c34_312 = arith.constant 34 : index
    %1380 = memref.load %arg4[%c34_312] : memref<144xf32, #tpu.memory_space<smem>>
    %1381 = vector.broadcast %1380 : f32 to vector<1x256xf32>
    %1382 = arith.mulf %1381, %1379 : vector<1x256xf32>
    %1383 = arith.addf %1366, %1382 : vector<1x256xf32>
    %c70_313 = arith.constant 70 : index
    %1384 = memref.load %arg4[%c70_313] : memref<144xf32, #tpu.memory_space<smem>>
    %1385 = vector.broadcast %1384 : f32 to vector<1x256xf32>
    %1386 = arith.mulf %1385, %1379 : vector<1x256xf32>
    %1387 = arith.addf %1370, %1386 : vector<1x256xf32>
    %c106_314 = arith.constant 106 : index
    %1388 = memref.load %arg4[%c106_314] : memref<144xf32, #tpu.memory_space<smem>>
    %1389 = vector.broadcast %1388 : f32 to vector<1x256xf32>
    %1390 = arith.mulf %1389, %1379 : vector<1x256xf32>
    %1391 = arith.addf %1374, %1390 : vector<1x256xf32>
    %c142_315 = arith.constant 142 : index
    %1392 = memref.load %arg4[%c142_315] : memref<144xf32, #tpu.memory_space<smem>>
    %1393 = vector.broadcast %1392 : f32 to vector<1x256xf32>
    %1394 = arith.mulf %1393, %1379 : vector<1x256xf32>
    %1395 = arith.addf %1378, %1394 : vector<1x256xf32>
    %1396 = arith.select %6, %1252, %1254 : vector<1x256xi1>, vector<1x256xf32>
    %1397 = arith.select %6, %1247, %1249 : vector<1x256xi1>, vector<1x256xf32>
    %1398 = arith.select %10, %1397, %1396 : vector<1x256xi1>, vector<1x256xf32>
    %c35_316 = arith.constant 35 : index
    %1399 = memref.load %arg4[%c35_316] : memref<144xf32, #tpu.memory_space<smem>>
    %1400 = vector.broadcast %1399 : f32 to vector<1x256xf32>
    %1401 = arith.mulf %1400, %1398 : vector<1x256xf32>
    %1402 = arith.addf %1383, %1401 : vector<1x256xf32>
    %c71_317 = arith.constant 71 : index
    %1403 = memref.load %arg4[%c71_317] : memref<144xf32, #tpu.memory_space<smem>>
    %1404 = vector.broadcast %1403 : f32 to vector<1x256xf32>
    %1405 = arith.mulf %1404, %1398 : vector<1x256xf32>
    %1406 = arith.addf %1387, %1405 : vector<1x256xf32>
    %c107_318 = arith.constant 107 : index
    %1407 = memref.load %arg4[%c107_318] : memref<144xf32, #tpu.memory_space<smem>>
    %1408 = vector.broadcast %1407 : f32 to vector<1x256xf32>
    %1409 = arith.mulf %1408, %1398 : vector<1x256xf32>
    %1410 = arith.addf %1391, %1409 : vector<1x256xf32>
    %c143_319 = arith.constant 143 : index
    %1411 = memref.load %arg4[%c143_319] : memref<144xf32, #tpu.memory_space<smem>>
    %1412 = vector.broadcast %1411 : f32 to vector<1x256xf32>
    %1413 = arith.mulf %1412, %1398 : vector<1x256xf32>
    %1414 = arith.addf %1395, %1413 : vector<1x256xf32>
    %c0_320 = arith.constant 0 : index
    %1415 = memref.load %arg5[%c0_320] : memref<4xf32, #tpu.memory_space<smem>>
    %1416 = vector.broadcast %1415 : f32 to vector<1x256xf32>
    %1417 = arith.addf %1402, %1416 : vector<1x256xf32>
    %c1_321 = arith.constant 1 : index
    %1418 = memref.load %arg5[%c1_321] : memref<4xf32, #tpu.memory_space<smem>>
    %1419 = vector.broadcast %1418 : f32 to vector<1x256xf32>
    %1420 = arith.addf %1406, %1419 : vector<1x256xf32>
    %c2_322 = arith.constant 2 : index
    %1421 = memref.load %arg5[%c2_322] : memref<4xf32, #tpu.memory_space<smem>>
    %1422 = vector.broadcast %1421 : f32 to vector<1x256xf32>
    %1423 = arith.addf %1410, %1422 : vector<1x256xf32>
    %c3_323 = arith.constant 3 : index
    %1424 = memref.load %arg5[%c3_323] : memref<4xf32, #tpu.memory_space<smem>>
    %1425 = vector.broadcast %1424 : f32 to vector<1x256xf32>
    %1426 = arith.addf %1414, %1425 : vector<1x256xf32>
    %1427 = arith.addf %12, %1417 : vector<1x256xf32>
    %cst_324 = arith.constant 0.707106769 : f32
    %1428 = vector.broadcast %cst_324 : f32 to vector<1x256xf32>
    %1429 = arith.mulf %1427, %1428 : vector<1x256xf32>
    %c0_325 = arith.constant 0 : index
    %c0_326 = arith.constant 0 : index
    %c0_327 = arith.constant 0 : index
    %1430 = vector.load %arg6[%c0_325, %c0_326, %c0_327] : memref<1x4x256xf32, #tpu.memory_space<vmem>>, vector<1x1x256xf32>
    %1431 = vector.shape_cast %1430 : vector<1x1x256xf32> to vector<1x256xf32>
    %1432 = vector.shape_cast %1429 : vector<1x256xf32> to vector<1x1x256xf32>
    tpu.vector_store %arg6[%c0_325, %c0_326, %c0_327], %1432 {strides = array<i32>} : memref<1x4x256xf32, #tpu.memory_space<vmem>>, vector<1x1x256xf32>,
    %1433 = arith.addf %14, %1420 : vector<1x256xf32>
    %cst_328 = arith.constant 0.707106769 : f32
    %1434 = vector.broadcast %cst_328 : f32 to vector<1x256xf32>
    %1435 = arith.mulf %1433, %1434 : vector<1x256xf32>
    %c0_329 = arith.constant 0 : index
    %c1_330 = arith.constant 1 : index
    %c0_331 = arith.constant 0 : index
    %1436 = vector.load %arg6[%c0_329, %c1_330, %c0_331] : memref<1x4x256xf32, #tpu.memory_space<vmem>>, vector<1x1x256xf32>
    %1437 = vector.shape_cast %1436 : vector<1x1x256xf32> to vector<1x256xf32>
    %1438 = vector.shape_cast %1435 : vector<1x256xf32> to vector<1x1x256xf32>
    tpu.vector_store %arg6[%c0_329, %c1_330, %c0_331], %1438 {strides = array<i32>} : memref<1x4x256xf32, #tpu.memory_space<vmem>>, vector<1x1x256xf32>,
    %1439 = arith.addf %16, %1423 : vector<1x256xf32>
    %cst_332 = arith.constant 0.707106769 : f32
    %1440 = vector.broadcast %cst_332 : f32 to vector<1x256xf32>
    %1441 = arith.mulf %1439, %1440 : vector<1x256xf32>
    %c0_333 = arith.constant 0 : index
    %c2_334 = arith.constant 2 : index
    %c0_335 = arith.constant 0 : index
    %1442 = vector.load %arg6[%c0_333, %c2_334, %c0_335] : memref<1x4x256xf32, #tpu.memory_space<vmem>>, vector<1x1x256xf32>
    %1443 = vector.shape_cast %1442 : vector<1x1x256xf32> to vector<1x256xf32>
    %1444 = vector.shape_cast %1441 : vector<1x256xf32> to vector<1x1x256xf32>
    tpu.vector_store %arg6[%c0_333, %c2_334, %c0_335], %1444 {strides = array<i32>} : memref<1x4x256xf32, #tpu.memory_space<vmem>>, vector<1x1x256xf32>,
    %1445 = arith.addf %18, %1426 : vector<1x256xf32>
    %cst_336 = arith.constant 0.707106769 : f32
    %1446 = vector.broadcast %cst_336 : f32 to vector<1x256xf32>
    %1447 = arith.mulf %1445, %1446 : vector<1x256xf32>
    %c0_337 = arith.constant 0 : index
    %c3_338 = arith.constant 3 : index
    %c0_339 = arith.constant 0 : index
    %1448 = vector.load %arg6[%c0_337, %c3_338, %c0_339] : memref<1x4x256xf32, #tpu.memory_space<vmem>>, vector<1x1x256xf32>
    %1449 = vector.shape_cast %1448 : vector<1x1x256xf32> to vector<1x256xf32>
    %1450 = vector.shape_cast %1447 : vector<1x256xf32> to vector<1x1x256xf32>
    tpu.vector_store %arg6[%c0_337, %c3_338, %c0_339], %1450 {strides = array<i32>} : memref<1x4x256xf32, #tpu.memory_space<vmem>>, vector<1x1x256xf32>,
    return
  }
  func.func @transform_0(%arg0: i32) -> (i32, i32, i32) {
    %c0_i32 = arith.constant 0 : i32
    %c0_i32_0 = arith.constant 0 : i32
    %c0_i32_1 = arith.constant 0 : i32
    return %arg0, %c0_i32, %c0_i32_0 : i32, i32, i32
  }
  func.func @transform_1(%arg0: i32) -> i32 {
    %c0_i32 = arith.constant 0 : i32
    %c0_i32_0 = arith.constant 0 : i32
    return %c0_i32 : i32
  }
  func.func @transform_2(%arg0: i32) -> i32 {
    %c0_i32 = arith.constant 0 : i32
    %c0_i32_0 = arith.constant 0 : i32
    return %c0_i32 : i32
  }
  func.func @transform_3(%arg0: i32) -> i32 {
    %c0_i32 = arith.constant 0 : i32
    %c0_i32_0 = arith.constant 0 : i32
    return %c0_i32 : i32
  }
  func.func @transform_4(%arg0: i32) -> i32 {
    %c0_i32 = arith.constant 0 : i32
    %c0_i32_0 = arith.constant 0 : i32
    return %c0_i32 : i32
  }
  func.func @transform_5(%arg0: i32) -> (i32, i32, i32) {
    %c0_i32 = arith.constant 0 : i32
    %c0_i32_0 = arith.constant 0 : i32
    %c0_i32_1 = arith.constant 0 : i32
    return %arg0, %c0_i32, %c0_i32_0 : i32, i32, i32
  }
}

</mosaic_0001>

<bundles_post_ra>
// kernel: tpu_custom_call.1
= control target key start
LH: loop header
LB: loop body
LE: loop exit
PB: predicated region body
PF: predicated region fallthrough
CT: control target
= control target key end

     0   :  { %s8053_s0 = inlined_call_operand.hbm [shape: f32[2,4,256], index: 0, kind: input, shape index: {}]   ;;  %s8054_s1 = inlined_call_operand.hbm [shape: f32[144], index: 1, kind: input, shape index: {}]   ;;  %s8055_s2 = inlined_call_operand.hbm [shape: f32[4], index: 2, kind: input, shape index: {}]   ;;  %s8056_s3 = inlined_call_operand.vmem [shape: f32[144], index: 3, kind: input, shape index: {}]   ;;  %s8057_s4 = inlined_call_operand.vmem [shape: f32[4], index: 4, kind: input, shape index: {}]   ;;  %s8058_s5 = inlined_call_operand.hbm [shape: f32[2,4,256], index: 5, kind: output, shape index: {}]  }
   0x1   :  { %8241 = sst [smem:[#allocation61_spill]] %s8053_s0 }
   0x2   :  { %8242 = sst [smem:[#allocation62_spill]] %s8054_s1 }
   0x3   :  { %8243 = sst [smem:[#allocation63_spill]] %s8055_s2 }
   0x4   :  { %8244 = sst [smem:[#allocation64_spill]] %s8056_s3 }
   0x5   :  { %8245 = sst [smem:[#allocation65_spill]] %s8057_s4 }
   0x6   :  { %8246 = sst [smem:[#allocation66_spill]] %s8058_s5 }
   0x7   :  { %10 = vsyncpa [#allocation4], 0 }
   0x8   :  { %12 = vsyncpa [#allocation4 + $0x1], 0 }
   0x9   :  { %13 = vsyncpa [#allocation6], 0 }
   0xa   :  { %14 = vsyncpa [#allocation10], 0 }
   0xb   :  { %15 = vsyncpa [#allocation7], 0 }
   0xc   :  { %16 = vsyncpa [#allocation13], 0 }
   0xd   :  { %17 = vsyncpa [#allocation5], 0 }
   0xe   :  { %19 = vsyncpa [#allocation5 + $0x1], 0  ;;  %s3890_s18 = smov 0   ;;  %s3892_s19 = smov 0  }
   0xf   :  { %s3894_s20 = smov 0   ;;  %s3896_s21 = smov 0  }
  0x10 LB: > { %8247 = sst [smem:[#allocation21_spill]] %s3834_s18  ;;  %s3914_s25 = sadd.s32 4294967295, %s3846_s21   ;;  %s3846_s21 = sphi %s3896_s21, %s8750_s21   ;;  %s3842_s20 = sphi %s3894_s20, %s8753_s20   ;;  %s3838_s19 = sphi %s3892_s19, %s8752_s19   ;;  %s3834_s18 = sphi %s3890_s18, %s8751_s18  }
  0x11   : > { %8248 = sst [smem:[#allocation22_spill]] %s3838_s19  ;;  %p3254_p0 = scmp.ge.s32.totalorder %s3846_s21, 1 }
  0x12   : > { %8249 = sst [smem:[#allocation23_spill]] %s3842_s20  ;;  %p46_p1 = scmp.eq.s32.totalorder %s3914_s25, 0 }
  0x13   : > { %8250 = sst [smem:[#allocation24_spill]] %s3846_s21  ;;  %p166_p2 = scmp.lt.s32.totalorder %s3846_s21, 3 }
  0x14   : > { %s8251_s1 = sld [smem:[#allocation62_spill]]  ;;  %s3848_s11 = smov [#allocation8]  }
  0x15   : > { %8252 = sst [smem:[#allocation25_spill]] %s3914_s25  ;;  %p3919_p3 = pnand %p3254_p0, %p166_p2 }
  0x16   : > { %s8254_s2 = sld [smem:[#allocation63_spill]]  ;;  %s3849_s12 = smov [#allocation9]  }
  0x17   : > { %p3595_p5 = pneg %p3919_p3  ;;  %s8255_s3 = sld [smem:[#allocation64_spill]] }
  0x18   : > { %s8256_s4 = sld [smem:[#allocation65_spill]]  ;;  %s3850_s13 = smov [#allocation11]  }
  0x19   : > { %p3596_p6 = pnand %p3595_p5, %p46_p1  ;;  %s3851_s14 = smov [#allocation12]  }
  0x1a   : > { %s178_s24 = sshll.u32 %s8251_s1, 4  ;;  %s3253_s15 = sadd.s32 4294967294, %s3846_s21   ;;  %s179_s24 = int_to_ptr.hbm [resolvable:$true] %s178_s24 }
  0x1b   : > { %3598 = dma.hbm_to_smem (!%p3596_p6), %s179_s24, 32, %s3848_s11, [#allocation6]  }
  0x1c   : > { %s188_s29 = sshll.u32 %s8254_s2, 4  ;;  %s3939_s16 = sadd.s32 1, %s3846_s21   ;;  %s189_s29 = int_to_ptr.hbm [resolvable:$true] %s188_s29 }
  0x1d   : > { %s198_s7 = sshll.u32 %s8255_s3, 4  ;;  %8257 = sst [smem:[#allocation26_spill]] %s3939_s16  ;;  %s199_s7 = int_to_ptr.vmem [resolvable:$true] %s198_s7 }
  0x1e   : > { %s208_s10 = sshll.u32 %s8256_s4, 4  ;;  %s29_s17 = ssub.s32 %s3846_s21, %s3939_s16  ;;  %s209_s10 = int_to_ptr.vmem [resolvable:$true] %s208_s10 }
  0x1f   : > { %3601 = dma.hbm_to_smem (!%p3596_p6), %s189_s29, 16, %s3849_s12, [#allocation10]  }
  0x20   : > { %3604 = dma.vmem_to_smem (!%p3596_p6), %s199_s7, 32, %s3850_s13, [#allocation7]  }
  0x21   : > { %3607 = dma.vmem_to_smem (!%p3596_p6), %s209_s10, 16, %s3851_s14, [#allocation13]  }
  0x22   : > { %s32_s22 = sadd.s32 1, %s3842_s20  ;;  %p30_p7 = scmp.eq.s32.totalorder %s29_s17, 0 }
  0x23   : > { %p39_p8 = scmp.ne.s32.totalorder %s3842_s20, %s3838_s19  ;;  %p40_p9 = scmp.eq.s32.totalorder %s3846_s21, 0 }
  0x24   : > { %p45_p10 = scmp.ne.s32.totalorder %s3838_s19, %s3834_s18  ;;  %p153_p13 = scmp.eq.s32.totalorder %s3914_s25, 1 }
  0x25   : > { %s3950_s23 = scalar_select %p30_p7, %s3842_s20, %s32_s22  }
  0x26   : > { %p3952_p11 = por %p40_p9, %p39_p8  ;;  %p3958_p12 = por %p46_p1, %p45_p10 }
  0x27   : > { %8258 = sst [smem:[#allocation27_spill]] %s3950_s23  ;;  %p159_p0 = scmp.eq.s32.totalorder %s3253_s15, 1 }
  0x28   : > { %p3620_p2 = scmp.lt.s32.totalorder %s3846_s21, 2  ;;  %s219_s28 = sand.u32 1, %s3842_s20  }
  0x29   : > { %p3965_p5 = por %p153_p13, %p39_p8  ;;  %p3969_p6 = por %p159_p0, %p45_p10 }
  0x2a   : > { %s3260_s6 = sshll.u32 %s219_s28, 3  ;;  %s3573_s7 = sshll.u32 %s3846_s21, 3 }
  0x2b   : > { %s8261_s29 = scalar_select %p3965_p5, 1, 0 }
  0x2c   : > { %s8263_s30 = scalar_select %p3969_p6, 1, 0 }
  0x2d   : > { %8262 = sst [smem:[#allocation28_spill]] %s8261_s29  ;;  %s223_s11 = scalar_lea.vmem [#allocation3], %s3260_s6 }
  0x2e   : > { %8264 = sst [smem:[#allocation29_spill]] %s8263_s30  ;;  %s232_s12 = sshll.u32 %s223_s11, 4  ;;  %s233_s12 = int_to_ptr.vmem [resolvable:$true] %s232_s12 }
  0x2f   : > { %s8265_s0 = sld [smem:[#allocation61_spill]]  ;;  %p3979_p7 = pnand %p3620_p2, %p3952_p11 }
  0x30   : > { %s220_s15 = scalar_lea.sflag [#allocation4], %s219_s28 }
  0x31   : > { %p3738_p9 = pneg %p3979_p7 }
  0x35   : > { %s228_s10 = scalar_lea.hbm %s8265_s0, %s3573_s7  ;;  %s3741_s8 = scalar_lea.hbm %s8265_s0, 16 }
  0x36   : > { %s230_s13 = sshll.u32 %s228_s10, 4  ;;  %s231_s13 = int_to_ptr.hbm [resolvable:$true] %s230_s13 }
  0x37   : > { %s3734_s17 = sshra.s32 %s231_s13, 4  ;;  %s3735_s17 = int_to_ptr.hbm [resolvable:$true] %s3734_s17 }
  0x38   : > { %s3736_s22 = scalar_lea.hbm %s3735_s17, 8  ;;  %p3742_p11 = scmp.lt.s32.totalorder %s3735_s17, %s8265_s0 }
  0x39   : > { %p3737_p8 = scmp.ne.s32.totalorder %s3735_s17, %s3736_s22  ;;  %p3743_p0 = scmp.lt.s32.totalorder %s3741_s8, %s3736_s22 }
  0x3b   : > { %p3739_p10 = pnand %p3738_p9, %p3737_p8  ;;  %p3744_p2 = por %p3743_p0, %p3742_p11 }
  0x3d   : > { %p3740_p13 = pneg %p3739_p10 }
  0x3f   : > { %p3745_p4 = pnand %p3744_p2, %p3740_p13 }
  0x41   : > { %3748 = shalt.err (!%p3745_p4)
}
  0x42   : > { %3611 = dma.hbm_to_vmem [thread:$0]  (!%p3979_p7), %s231_s13, 128, %s233_s12, %s220_s15  }
  0x43   : > { %241 = sbr.rel (%p3919_p3) target bundleno = 1103 (0x44f), region = 40 }
  0x48   : > { %s3996_s28 = sand.u32 1, %s3838_s19  }
  0x49   : > { %8267 = sst [smem:[#allocation30_spill]] %s3996_s28  ;;  %s8059_s10 = sshll.u32 %s3996_s28, 3 }
  0x4a   : > { %s244_s11 = scalar_lea.sflag [#allocation4], %s3996_s28  ;;  %s4002_s17 = scalar_lea.vmem [#allocation3], %s8059_s10 }
  0x4b   : > { %8268 = sst [smem:[#allocation31_spill]] %s4002_s17 }
  0x4c   : > { %3809 = dma.done.wait (%p3958_p12), %s244_s11, 128  }
  0x4d   : > { %3811 = vsyncadd (%p3958_p12), %s244_s11, 4294967168 }
  0x4e   : > { %3813 = dma.done.wait (%p46_p1), [#allocation6], 32  }
  0x4f   : > { %3815 = vsyncadd (%p46_p1), [#allocation6], 4294967264 }
  0x50   : > { %3817 = dma.done.wait (%p46_p1), [#allocation10], 16  }
  0x51   : > { %3819 = vsyncadd (%p46_p1), [#allocation10], 4294967280 }
  0x52   : > { %3821 = dma.done.wait (%p46_p1), [#allocation7], 32  }
  0x53   : > { %3823 = vsyncadd (%p46_p1), [#allocation7], 4294967264 }
  0x54   : > { %3825 = dma.done.wait (%p46_p1), [#allocation13], 16  }
  0x55   : > { %3827 = vsyncadd (%p46_p1), [#allocation13], 4294967280 }
  0x56   : > { %273 = sfence }
  0x57   : > { %v309_v0 = vld [vmem:[%s4002_s17] ss:$4 sm:$0x3]  ;;  %v3270_v2 = vld [vmem:[%s4002_s17 + $0x1] ss:$4 sm:$0x3]  ;;  %v8092_v12 = vlaneseq }
  0x58   : > { %vm316_vm0 = vcmp.ge.f32.partialorder %v309_v0, 0.0  ;;  %v317_v1 = vmul.f32 0.2, %v309_v0  ;;  %s8060_s26 = smov 17   ;;  %v320_v5 = vmul.f32 0.2, %v3270_v2 }
  0x59   : > { %v3271_v4 = vld [vmem:[%s4002_s17 + $0x2] ss:$4 sm:$0x3]  ;;  %vm319_vm2 = vcmp.ge.f32.partialorder %v3270_v2, 0.0  ;;  %vm336_vm4 = vcmp.ge.s32.totalorder %v8092_v12, 17  ;;  %vm337_vm5 = vcmp.lt.s32.totalorder %v8092_v12, 273 }
  0x5a   : > { %v4026_v3 = vsel %vm316_vm0, %v309_v0, %v317_v1  ;;  %vm322_vm1 = vcmp.ge.f32.partialorder %v3271_v4, 0.0  ;;  %v323_v6 = vmul.f32 0.2, %v3271_v4  ;;  %v4035_v8 = vsel %vm319_vm2, %v3270_v2, %v320_v5  ;;  %v3272_v9 = vld [vmem:[%s4002_s17 + $0x3] ss:$4 sm:$0x3]  ;;  %vm4046_vm7 = vmand %vm336_vm4, %vm337_vm5 }
  0x5b   : > { %329 = vrot.lane.b32.xlu0 %v4026_v3, %s8060_s26  ;;  %v326_v10 = vmul.f32 0.2, %v3272_v9  ;;  %vm325_vm3 = vcmp.ge.f32.partialorder %v3272_v9, 0.0  ;;  %vm332_vm6 = vcmask 138240   ;;  %v8271_v15 = vmov 0  ;;  %s8074_s27 = smov 126  }
  0x5c   : > { %v4031_v7 = vsel %vm322_vm1, %v3271_v4, %v323_v6  ;;  %v8272_v15 = vsel %vm4046_vm7, 4294967295, %v8271_v15  ;;  %s8070_s12 = smov 94   ;;  %s8066_s13 = smov 96   ;;  %v4163_v43 = vand.u32 127, %v8092_v12  ;;  %v8286_v5 = vmov 0 }
  0x5d   : > { %8269 = vst [vmem:[#allocation32_spill] sm:$0xff] %v4031_v7  ;;  %349 = vrot.lane.b32.xlu1 %v4031_v7, %s8060_s26  ;;  %v4040_v11 = vsel %vm325_vm3, %v3272_v9, %v326_v10  ;;  %s8064_s14 = smov 95   ;;  %s8062_s15 = smov 127   ;;  %v8292_v6 = vmov 0  ;;  %v8295_v9 = vmov 0  ;;  %vm376_vm12 = vcmask 1031168  }
  0x5e   : > { %8270 = vst [vmem:[#allocation33_spill] sm:$0xff] %v4040_v11  ;;  %s8072_s22 = smov 110   ;;  %s8068_s6 = smov 112   ;;  %v4172_v45 = vadd.s32 128, %v4163_v43  ;;  %v299_v52 = vand.u32 15, %v4163_v43  ;;  %vm8186_vm13 = vcmp.lt.s32.totalorder %v4163_v43, 16 }
  0x5f   : > { %8273 = vst [vmem:[#allocation34_spill] sm:$0xff] %v8272_v15  ;;  %s4105_s7 = sld [smem:[#allocation8 + $0x4]]  ;;  %s8275_s1 = smov 112   ;;  %vm8188_vm14 = vcmask 769024   ;;  %vm8187_vm15 = vcmask 785408   ;;  %vm8184_vm0 = vcmask 777216  }
  0x60   : > { %s4109_s8 = sld [smem:[#allocation8 + $0x28]]  ;;  %8277 = vst [vmem:[#allocation36_spill] sm:$0xff] %v4163_v43  ;;  %s8279_s16 = smov 96   ;;  %v300_v57 = vand.u32 15, %v4172_v45  ;;  %vm4235_vm8 = vcmp.eq.s32.totalorder %v299_v52, 0  ;;  %vm4245_vm10 = vcmp.eq.s32.totalorder %v299_v52, 15 }
  0x61   : > { %s4111_s9 = sld [smem:[#allocation8 + $0x4c]]  ;;  %8278 = vst [vmem:[#allocation37_spill] sm:$0xff] %v4172_v45  ;;  %s8280_s30 = smov 126   ;;  %v8287_v5 = vsel %vm4235_vm8, 4294967295, %v8286_v5  ;;  %v8293_v6 = vsel %vm4245_vm10, 4294967295, %v8292_v6  ;;  %vm8183_vm1 = vcmask 1039360  }
  0x62   : > { %s4113_s24 = sld [smem:[#allocation8 + $0x70]]  ;;  %8288 = vst [vmem:[#allocation43_spill] sm:$0xff] %v8287_v5  ;;  %vm4241_vm9 = vcmp.eq.s32.totalorder %v300_v57, 0  ;;  %vm4249_vm11 = vcmp.eq.s32.totalorder %v300_v57, 15  ;;  %vm8185_vm2 = vcmp.ge.s32.totalorder %v4172_v45, 240  ;;  %vm8182_vm3 = vcmask 900096  }
  0x63   : > { %341 = vrot.lane.b32.xlu0 %v4035_v8, %s8060_s26  ;;  %s4115_s11 = sld [smem:[#allocation8 + $0xd]]  ;;  %8294 = vst [vmem:[#allocation45_spill] sm:$0xff] %v8293_v6  ;;  %v8296_v9 = vsel %vm4249_vm11, 4294967295, %v8295_v9  ;;  %vm8181_vm4 = vcmask 916480  }
  0x64   : > { %s4120_s10 = sld [smem:[#allocation8 + $0x31]]  ;;  %8297 = vst [vmem:[#allocation46_spill] sm:$0xff] %v8296_v9 }
  0x65   : > { %357 = vrot.lane.b32.xlu1 %v4040_v11, %s8060_s26  ;;  %s4123_s26 = sld [smem:[#allocation8 + $0x55]]  ;;  %v557_v46 = vstv %s4105_s7 }
  0x66   : > { %s4143_s0 = sld [smem:[#allocation8 + $0x2]]  ;;  %v567_v49 = vstv %s4109_s8  ;;  %v4206_v58 = vmul.f32 %v557_v46, %v4026_v3 }
  0x67   : > { %s4146_s2 = sld [smem:[#allocation8 + $0x26]]  ;;  %v577_v50 = vstv %s4111_s9  ;;  %v4213_v60 = vmul.f32 %v567_v49, %v4026_v3 }
  0x68   : > { %s4148_s3 = sld [smem:[#allocation8 + $0x4a]]  ;;  %v587_v51 = vstv %s4113_s24  ;;  %v4216_v61 = vmul.f32 %v577_v50, %v4026_v3 }
  0x69   : > { %s4154_s4 = sld [smem:[#allocation8 + $0x6e]]  ;;  %v894_v54 = vstv %s4115_s11  ;;  %v4219_v62 = vmul.f32 %v587_v51, %v4026_v3 }
  0x6a   : > { %s4160_s23 = sld [smem:[#allocation8 + $0x2a]]  ;;  %v904_v55 = vstv %s4120_s10  ;;  %v4227_v1 = vmul.f32 %v894_v54, %v4035_v8 }
  0x6b   : > { %s4165_s20 = sld [smem:[#allocation8 + $0x4e]]  ;;  %v914_v56 = vstv %s4123_s26  ;;  %v4230_v2 = vmul.f32 %v904_v55, %v4035_v8 }
  0x6c   : > { %s4169_s19 = sld [smem:[#allocation8 + $0x72]]  ;;  %8283 = vst [vmem:[#allocation40_spill] sm:$0xff] %v4227_v1  ;;  %v4233_v4 = vmul.f32 %v914_v56, %v4035_v8 }
  0x6d   : > { %s4178_s21 = sld [smem:[#allocation8 + $0x8]]  ;;  %8284 = vst [vmem:[#allocation41_spill] sm:$0xff] %v4230_v2 }
  0x6e   : > { %s4182_s18 = sld [smem:[#allocation8 + $0x2c]]  ;;  %8285 = vst [vmem:[#allocation42_spill] sm:$0xff] %v4233_v4 }
  0x6f   : > { %8276 = sst [smem:[#allocation35_spill]] %s4154_s4 }
  0x70   : > { %s4187_s29 = sld [smem:[#allocation8 + $0x50]] }
  0x71   : > { %s4195_s5 = sld [smem:[#allocation8 + $0x74]]  ;;  %v8108_v46 = vstv %s4165_s20 }
  0x72   : > { %s4203_s7 = sld [smem:[#allocation8 + $0x7]]  ;;  %v8109_v49 = vstv %s4169_s19 }
  0x73   : > { %s4210_s8 = sld [smem:[#allocation8 + $0x2b]]  ;;  %v8110_v50 = vstv %s4178_s21 }
  0x74   : > { %s4222_s10 = sld [smem:[#allocation8 + $0x4f]]  ;;  %v8111_v51 = vstv %s4182_s18 }
  0x75   : > { %s4239_s26 = sld [smem:[#allocation8 + $0x73]] }
  0x76   : > { %s4258_s9 = sld [smem:[#allocation8 + $0x1]]  ;;  %v8113_v52 = vstv %s4187_s29 }
  0x77   : > { %s4277_s24 = sld [smem:[#allocation8 + $0x25]]  ;;  %v8117_v54 = vstv %s4195_s5 }
  0x78   : > { %s4285_s11 = sld [smem:[#allocation8 + $0x49]]  ;;  %v8321_v2 = vstv %s4203_s7 }
  0x79   : > { %s4289_s28 = sld [smem:[#allocation8 + $0x6d]] }
  0x7a   : > { %8281 = sst [smem:[#allocation38_spill]] %s4222_s10 }
  0x7b   : > { %8289 = sst [smem:[#allocation44_spill]] %s4239_s26 }
  0x7c   : > { %s4304_s17 = sld [smem:[#allocation8 + $0x3]]  ;;  %v8312_v4 = vstv %s4258_s9 }
  0x7d   : > { %s4309_s25 = sld [smem:[#allocation8 + $0x27]] }
  0x7e   : > { %s4404_s26 = sld [smem:[#allocation8 + $0x29]] }
  0x7f   : > { %s4413_s10 = sld [smem:[#allocation8 + $0x4d]]  ;;  %v8317_v1 = vstv %s4289_s28 }
  0x83   : > { %8301 = sst [smem:[#allocation49_spill]] %s4309_s25 }
  0x84   : > { %s4430_s25 = sld [smem:[#allocation8 + $0x71]] }
  0xcd   : > { %v330_v13 = vpop.permute.xlu0 %329 }
  0xce   : > { %v331_v14 = vrot.slane %v330_v13, 7 }
  0xcf   : > { %v350_v27 = vpop.permute.xlu1 %349 }
  0xd0   : > { %v333_v16 = vsel %vm332_vm6, %v331_v14, %v330_v13  ;;  %v351_v28 = vrot.slane %v350_v27, 7 }
  0xd1   : > { %339 = vst.msk [vmem:[#allocation2] ss:$4 sm:$0x7] %vm4046_vm7, %v333_v16 }
  0xd2   : > { %v352_v29 = vsel %vm332_vm6, %v351_v28, %v350_v27  ;;  %v8103_v28 = vstv %s4154_s4  ;;  %s8304_s4 = smov 110  }
  0xd3   : > { %355 = vst.msk [vmem:[#allocation2 + $0x2] ss:$4 sm:$0x7] %vm4046_vm7, %v352_v29 }
  0xd5   : > { %v342_v20 = vpop.permute.xlu0 %341 }
  0xd6   : > { %v343_v21 = vrot.slane %v342_v20, 7 }
  0xd7   : > { %v358_v31 = vpop.permute.xlu1 %357 }
  0xd8   : > { %v365_v17 = vld [vmem:[#allocation2] ss:$4 sm:$0x7]  ;;  %v344_v22 = vsel %vm332_vm6, %v343_v21, %v342_v20  ;;  %v359_v32 = vrot.slane %v358_v31, 7 }
  0xd9   : > { %v369_v18 = vperm.slane %v365_v17, 2  ;;  %v367_v19 = vperm.slane %v365_v17, 0  ;;  %347 = vst.msk [vmem:[#allocation2 + $0x1] ss:$4 sm:$0x7] %vm4046_vm7, %v344_v22  ;;  %v368_v23 = vperm.slane %v365_v17, 1 }
  0xda   : > { %v360_v33 = vsel %vm332_vm6, %v359_v32, %v358_v31  ;;  %v1038_v35 = vld [vmem:[#allocation2 + $0x2] ss:$4 sm:$0x7]  ;;  %v4208_v59 = vld [vmem:[#allocation2] ss:$4 sm:$0x3] }
  0xdb   : > { %374 = vrot.lane.b32.xlu0 %v369_v18, %s8074_s27  ;;  %388 = vrot.lane.b32.xlu1 %v367_v19, %s8070_s12  ;;  %363 = vst.msk [vmem:[#allocation2 + $0x3] ss:$4 sm:$0x7] %vm4046_vm7, %v360_v33  ;;  %v4107_v37 = vperm.slane %v1038_v35, 0  ;;  %v4133_v39 = vperm.slane %v1038_v35, 2  ;;  %v4167_v44 = vperm.slane %v1038_v35, 1  ;;  %v8112_v33 = vstv %s4160_s23 }
  0xdc   : > { %370 = vrot.lane.b32.xlu2 %v367_v19, %s8074_s27  ;;  %v382_v10 = vperm.slane %v4208_v59, 0  ;;  %v383_v14 = vperm.slane %v4208_v59, 1 }
  0xe0   : > { %v701_v24 = vld [vmem:[#allocation2 + $0x1] ss:$4 sm:$0x7] }
  0xe1   : > { %v703_v25 = vperm.slane %v701_v24, 0  ;;  %v705_v26 = vperm.slane %v701_v24, 2  ;;  %v704_v30 = vperm.slane %v701_v24, 1  ;;  %v4224_v0 = vld [vmem:[#allocation2 + $0x1] ss:$4 sm:$0x3]  ;;  %v8100_v24 = vstv %s4143_s0 }
  0xe2   : > { %8282 = vst [vmem:[#allocation39_spill] sm:$0xff] %v4224_v0  ;;  %v8346_v0 = vstv %s4195_s5  ;;  %s4619_s5 = sld [smem:[#allocation8 + $0x2f]] }
  0xe3   : > { %392 = vrot.lane.b32.xlu0 %v369_v18, %s8070_s12  ;;  %399 = vrot.lane.b32.xlu1 %v367_v19, %s8066_s13 }
  0xe4   : > { %372 = vrot.lane.b32.xlu2 %v368_v23, %s8074_s27 }
  0xeb   : > { %403 = vrot.lane.b32.xlu0 %v369_v18, %s8066_s13  ;;  %430 = vrot.lane.b32.xlu1 %v367_v19, %s8064_s14 }
  0xec   : > { %390 = vrot.lane.b32.xlu2 %v368_v23, %s8070_s12 }
  0xf3   : > { %434 = vrot.lane.b32.xlu0 %v369_v18, %s8064_s14  ;;  %441 = vrot.lane.b32.xlu1 %v367_v19, %s8062_s15 }
  0xf4   : > { %401 = vrot.lane.b32.xlu2 %v368_v23, %s8066_s13 }
  0xfb   : > { %445 = vrot.lane.b32.xlu0 %v369_v18, %s8062_s15  ;;  %508 = vrot.lane.b32.xlu1 %v367_v19, %s8072_s22 }
  0xfc   : > { %432 = vrot.lane.b32.xlu2 %v368_v23, %s8064_s14 }
 0x103   : > { %512 = vrot.lane.b32.xlu0 %v369_v18, %s8072_s22  ;;  %519 = vrot.lane.b32.xlu1 %v367_v19, %s8068_s6 }
 0x104   : > { %443 = vrot.lane.b32.xlu2 %v368_v23, %s8062_s15 }
 0x10b   : > { %523 = vrot.lane.b32.xlu0 %v369_v18, %s8068_s6  ;;  %706 = vrot.lane.b32.xlu1 %v703_v25, %s8074_s27  ;;  %v4268_v18 = vld [vmem:[#allocation2 + $0x2] ss:$4 sm:$0x3] }
 0x10c   : > { %510 = vrot.lane.b32.xlu2 %v368_v23, %s8072_s22  ;;  %8300 = vst [vmem:[#allocation48_spill] sm:$0xff] %v4268_v18 }
 0x113   : > { %710 = vrot.lane.b32.xlu0 %v705_v26, %s8074_s27  ;;  %723 = vrot.lane.b32.xlu1 %v703_v25, %s8070_s12 }
 0x114   : > { %521 = vrot.lane.b32.xlu2 %v368_v23, %s8068_s6 }
 0x11b   : > { %727 = vrot.lane.b32.xlu0 %v705_v26, %s8070_s12  ;;  %733 = vrot.lane.b32.xlu1 %v703_v25, %s8066_s13 }
 0x11c   : > { %708 = vrot.lane.b32.xlu2 %v704_v30, %s8074_s27 }
 0x123   : > { %737 = vrot.lane.b32.xlu0 %v705_v26, %s8066_s13  ;;  %771 = vrot.lane.b32.xlu1 %v703_v25, %s8064_s14 }
 0x124   : > { %725 = vrot.lane.b32.xlu2 %v704_v30, %s8070_s12  ;;  %s4137_s12 = sld [smem:[#allocation8 + $0x6c]] }
 0x12a   : > { %v8096_v23 = vstv %s4137_s12 }
 0x12b   : > { %775 = vrot.lane.b32.xlu0 %v705_v26, %s8064_s14  ;;  %781 = vrot.lane.b32.xlu1 %v703_v25, %s8062_s15 }
 0x12c   : > { %735 = vrot.lane.b32.xlu2 %v704_v30, %s8066_s13  ;;  %s4131_s13 = sld [smem:[#allocation8 + $0x24]] }
 0x132   : > { %v8094_v20 = vstv %s4131_s13 }
 0x133   : > { %785 = vrot.lane.b32.xlu0 %v705_v26, %s8062_s15  ;;  %847 = vrot.lane.b32.xlu1 %v703_v25, %s8072_s22 }
 0x134   : > { %773 = vrot.lane.b32.xlu2 %v704_v30, %s8064_s14  ;;  %s4129_s14 = sld [smem:[#allocation8]] }
 0x136   : > { %v4098_v34 = vpop.permute.xlu2 %370 }
 0x13a   : > { %v415_v19 = vstv %s4129_s14  ;;  %s8318_s14 = smov 112  }
 0x13b   : > { %851 = vrot.lane.b32.xlu0 %v705_v26, %s8072_s22  ;;  %857 = vrot.lane.b32.xlu1 %v703_v25, %s8068_s6  ;;  %v8099_v25 = vstv %s4146_s2 }
 0x13c   : > { %783 = vrot.lane.b32.xlu2 %v704_v30, %s8062_s15  ;;  %s4125_s15 = sld [smem:[#allocation8 + $0x79]] }
 0x13e   : > { %v4103_v36 = vpop.permute.xlu2 %372 }
 0x13f   : > { %v377_v31 = vsel %vm376_vm12, %v4098_v34, %v4103_v36  ;;  %v1375_v34 = vld [vmem:[#allocation2 + $0x3] ss:$4 sm:$0x7] }
 0x140   : > { %v386_v55 = vsel %vm4235_vm8, %v377_v31, %v382_v10  ;;  %v4338_v29 = vperm.slane %v1375_v34, 2 }
 0x142   : > { %v924_v63 = vstv %s4125_s15  ;;  %s8298_s15 = smov 95  }
 0x143   : > { %861 = vrot.lane.b32.xlu0 %v705_v26, %s8068_s6  ;;  %1043 = vrot.lane.b32.xlu1 %v4107_v37, %s8074_s27  ;;  %s4135_s6 = sld [smem:[#allocation8 + $0x48]]  ;;  %v4261_v13 = vmul.f32 %v924_v63, %v4035_v8  ;;  %v8104_v26 = vstv %s4148_s3 }
 0x144   : > { %849 = vrot.lane.b32.xlu2 %v704_v30, %s8072_s22  ;;  %s8274_s22 = smov 94  }
 0x145   : > { %8299 = vst [vmem:[#allocation47_spill] sm:$0xff] %v4261_v13 }
 0x146   : > { %v4127_v38 = vpop.permute.xlu2 %390 }
 0x149   : > { %v8095_v21 = vstv %s4135_s6  ;;  %v8310_v15 = vstv %s4135_s6  ;;  %s4554_s6 = sld [smem:[#allocation8 + $0x51]] }
 0x14b   : > { %1047 = vrot.lane.b32.xlu0 %v4133_v39, %s8074_s27  ;;  %1060 = vrot.lane.b32.xlu1 %v4107_v37, %s8274_s22  ;;  %s4158_s27 = sld [smem:[#allocation8 + $0x6]] }
 0x14c   : > { %859 = vrot.lane.b32.xlu2 %v704_v30, %s8275_s1  ;;  %v4336_v30 = vperm.slane %v1375_v34, 0  ;;  %s4382_s1 = sld [smem:[#allocation8 + $0x5]] }
 0x14d   : > { %v4150_v40 = vpop.permute.xlu0 %374  ;;  %v4152_v41 = vpop.permute.xlu1 %388 }
 0x14e   : > { %v4156_v42 = vpop.permute.xlu2 %401  ;;  %v378_v35 = vsel %vm376_vm12, %v4103_v36, %v4150_v40  ;;  %v478_v36 = vsel %vm4245_vm10, %v382_v10, %v377_v31  ;;  %v395_v16 = vsel %vm8188_vm14, %v4152_v41, %v4127_v38 }
 0x14f   : > { %v4325_v57 = vsel %vm4241_vm9, %v378_v35, %v383_v14  ;;  %v4344_v17 = vsel %vm4249_vm11, %v383_v14, %v378_v35 }
 0x150   : > { %v4368_v40 = vmul.f32 %v8094_v20, %v4325_v57  ;;  %v4373_v63 = vmul.f32 %v8095_v21, %v4325_v57  ;;  %v4378_v10 = vmul.f32 %v8096_v23, %v4325_v57  ;;  %v4387_v41 = vmul.f32 %v8100_v24, %v4344_v17 }
 0x151   : > { %v8114_v32 = vstv %s4158_s27  ;;  %v4392_v20 = vmul.f32 %v8099_v25, %v4344_v17  ;;  %v4397_v21 = vmul.f32 %v8104_v26, %v4344_v17  ;;  %v4402_v23 = vmul.f32 %v8103_v28, %v4344_v17 }
 0x153   : > { %1064 = vrot.lane.b32.xlu0 %v4133_v39, %s8274_s22  ;;  %1070 = vrot.lane.b32.xlu1 %v4107_v37, %s8279_s16 }
 0x154   : > { %1045 = vrot.lane.b32.xlu2 %v4167_v44, %s8280_s30  ;;  %s4321_s30 = sld [smem:[#allocation8 + $0x4b]] }
 0x155   : > { %v4185_v47 = vpop.permute.xlu0 %392  ;;  %v4189_v48 = vpop.permute.xlu1 %399 }
 0x156   : > { %v4197_v53 = vpop.permute.xlu2 %432  ;;  %v406_v59 = vsel %vm8187_vm15, %v4189_v48, %v4156_v42  ;;  %v4340_v48 = vperm.slane %v1375_v34, 1  ;;  %v4357_v34 = vmul.f32 %v415_v19, %v4325_v57 }
 0x157   : > { %v410_v14 = vsel %vm4235_vm8, %v395_v16, %v406_v59  ;;  %v480_v35 = vsel %vm4245_vm10, %v406_v59, %v395_v16  ;;  %v396_v16 = vsel %vm8188_vm14, %v4127_v38, %v4185_v47 }
 0x158   : > { %8303 = vst [vmem:[#allocation50_spill] sm:$0xff] %v4340_v48  ;;  %v412_v59 = vsel %vm8186_vm13, %v410_v14, %v386_v55  ;;  %v4417_v28 = vsel %vm8186_vm13, %v480_v35, %v478_v36  ;;  %v4421_v26 = vmul.f32 %v8114_v32, %v410_v14  ;;  %v4434_v55 = vmul.f32 %v8112_v33, %v410_v14 }
 0x159   : > { %v4438_v36 = vmul.f32 %v8108_v46, %v410_v14  ;;  %v4451_v47 = vmul.f32 %v8110_v50, %v480_v35  ;;  %v4455_v25 = vmul.f32 %v8111_v51, %v480_v35  ;;  %v4459_v46 = vmul.f32 %v8113_v52, %v480_v35 }
 0x15a   : > { %v416_v50 = vmul.f32 %v415_v19, %v412_v59  ;;  %v8309_v51 = vstv %s4131_s13  ;;  %s8316_s13 = sld [smem:[#allocation44_spill]]  ;;  %v8340_v48 = vstv %s4321_s30 }
 0x15b   : > { %1074 = vrot.lane.b32.xlu0 %v4133_v39, %s8279_s16  ;;  %1108 = vrot.lane.b32.xlu1 %v4107_v37, %s8298_s15  ;;  %8305 = vst [vmem:[#allocation51_spill] sm:$0xff] %v4451_v47  ;;  %v420_v33 = vmul.f32 %v8309_v51, %v412_v59  ;;  %v8313_v51 = vstv %s4277_s24 }
 0x15c   : > { %1062 = vrot.lane.b32.xlu2 %v4167_v44, %s8274_s22  ;;  %s8302_s22 = smov 127   ;;  %8306 = vst [vmem:[#allocation52_spill] sm:$0xff] %v4455_v25 }
 0x15d   : > { %v4273_v22 = vpop.permute.xlu0 %403  ;;  %v4275_v8 = vpop.permute.xlu1 %430  ;;  %8307 = vst [vmem:[#allocation53_spill] sm:$0xff] %v4459_v46 }
 0x15e   : > { %v4283_v27 = vpop.permute.xlu2 %443  ;;  %v407_v24 = vsel %vm8187_vm15, %v4156_v42, %v4273_v22  ;;  %v4468_v22 = vmul.f32 %v8117_v54, %v480_v35  ;;  %v424_v35 = vmul.f32 %v8310_v15, %v412_v59  ;;  %v8311_v54 = vstv %s4137_s12  ;;  %s8315_s12 = sld [smem:[#allocation38_spill]] }
 0x15f   : > { %v428_v11 = vmul.f32 %v8311_v54, %v412_v59  ;;  %v481_v13 = vsel %vm4249_vm11, %v407_v24, %v396_v16 }
 0x160   : > { %8308 = vst [vmem:[#allocation54_spill] sm:$0xff] %v4468_v22 }
 0x163   : > { %1112 = vrot.lane.b32.xlu0 %v4133_v39, %s8298_s15  ;;  %1118 = vrot.lane.b32.xlu1 %v4107_v37, %s8302_s22 }
 0x164   : > { %1072 = vrot.lane.b32.xlu2 %v4167_v44, %s8279_s16  ;;  %s4363_s16 = sld [smem:[#allocation8 + $0x6f]] }
 0x165   : > { %v4334_v31 = vpop.permute.xlu0 %434  ;;  %v442_v12 = vpop.permute.xlu1 %441 }
 0x166   : > { %v4351_v56 = vpop.permute.xlu2 %510  ;;  %v448_v38 = vsel %vm8183_vm1, %v442_v12, %v4283_v27  ;;  %v4442_v12 = vmul.f32 %v8109_v49, %v410_v14  ;;  %v437_v14 = vsel %vm8184_vm0, %v4275_v8, %v4197_v53  ;;  %v411_v8 = vsel %vm4241_vm9, %v396_v16, %v407_v24 }
 0x167   : > { %v452_v52 = vsel %vm8186_vm13, %v437_v14, %v448_v38  ;;  %v623_v19 = vsel %vm8185_vm2, %v4325_v57, %v411_v8  ;;  %v8314_v38 = vstv %s4285_s11  ;;  %v8319_v16 = vstv %s4143_s0  ;;  %s4532_s0 = sld [smem:[#allocation8 + $0x9]] }
 0x168   : > { %v456_v15 = vmul.f32 %v8312_v4, %v452_v52  ;;  %v462_v7 = vmul.f32 %v8313_v51, %v452_v52  ;;  %v468_v18 = vmul.f32 %v8314_v38, %v452_v52  ;;  %v474_v24 = vmul.f32 %v8317_v1, %v452_v52 }
 0x169   : > { %v486_v57 = vmul.f32 %v8319_v16, %v4417_v28  ;;  %v8320_v8 = vstv %s4146_s2  ;;  %v675_v38 = vsel %vm8185_vm2, %v4344_v17, %v481_v13  ;;  %v4521_v59 = vmul.f32 %v8321_v2, %v437_v14  ;;  %s8330_s2 = sld [smem:[#allocation49_spill]] }
 0x16a   : > { %v492_v51 = vmul.f32 %v8320_v8, %v4417_v28  ;;  %v8322_v1 = vstv %s4210_s8  ;;  %v8324_v8 = vstv %s4158_s27  ;;  %v8326_v13 = vstv %s8315_s12  ;;  %s8331_s27 = sld [smem:[#allocation35_spill]] }
 0x16b   : > { %1122 = vrot.lane.b32.xlu0 %v4133_v39, %s8302_s22  ;;  %1184 = vrot.lane.b32.xlu1 %v4107_v37, %s8304_s4  ;;  %v4525_v52 = vmul.f32 %v8322_v1, %v437_v14  ;;  %v4536_v4 = vmul.f32 %v8324_v8, %v623_v19  ;;  %v4540_v17 = vmul.f32 %v8326_v13, %v437_v14  ;;  %v8328_v2 = vstv %s8316_s13 }
 0x16c   : > { %1110 = vrot.lane.b32.xlu2 %v4167_v44, %s8298_s15  ;;  %v4544_v1 = vmul.f32 %v8328_v2, %v437_v14  ;;  %v458_v54 = vadd.f32 %v456_v15, %v416_v50  ;;  %v470_v8 = vadd.f32 %v468_v18, %v424_v35  ;;  %v8332_v50 = vstv %s4160_s23  ;;  %s4576_s23 = sld [smem:[#allocation8 + $0x75]] }
 0x16d   : > { %v4464_v49 = vpop.permute.xlu0 %445  ;;  %v509_v42 = vpop.permute.xlu1 %508  ;;  %8325 = vst [vmem:[#allocation55_spill] sm:$0xff] %v4536_v4  ;;  %v4558_v15 = vmul.f32 %v8332_v50, %v623_v19  ;;  %v8334_v4 = vstv %s4165_s20  ;;  %v476_v18 = vadd.f32 %v474_v24, %v428_v11  ;;  %v8341_v50 = vstv %s4178_s21  ;;  %s4628_s20 = sld [smem:[#allocation8 + $0x53]] }
 0x16e   : > { %v4476_v32 = vpop.permute.xlu2 %521  ;;  %8327 = vst [vmem:[#allocation56_spill] sm:$0xff] %v4540_v17  ;;  %v515_v13 = vsel %vm8182_vm3, %v509_v42, %v4351_v56  ;;  %v8336_v42 = vstv %s4169_s19  ;;  %v8344_v5 = vstv %s4363_s16  ;;  %s4591_s19 = sld [smem:[#allocation8 + $0xb]]  ;;  %v4599_v17 = vmul.f32 %v8346_v0, %v675_v38 }
 0x16f   : > { %8329 = vst [vmem:[#allocation57_spill] sm:$0xff] %v4544_v1  ;;  %v4568_v35 = vmul.f32 %v8336_v42, %v623_v19  ;;  %v8339_v47 = vstv %s8330_s2  ;;  %v8345_v42 = vstv %s4187_s29  ;;  %s4638_s21 = sld [smem:[#allocation8 + $0x77]] }
 0x170   : > { %8333 = vst [vmem:[#allocation58_spill] sm:$0xff] %v4558_v15  ;;  %v4580_v15 = vmul.f32 %v8341_v50, %v675_v38  ;;  %v8343_v24 = vstv %s8331_s27  ;;  %v449_v50 = vsel %vm8183_vm1, %v4283_v27, %v4464_v49  ;;  %v571_v27 = vperm.slane %v4213_v60, 1  ;;  %s4662_s29 = sld [smem:[#allocation8 + $0xf]] }
 0x171   : > { %8337 = vst [vmem:[#allocation60_spill] sm:$0xff] %v4568_v35  ;;  %s4824_s27 = sld [smem:[#allocation8 + $0x76]] }
 0x173   : > { %1188 = vrot.lane.b32.xlu0 %v4133_v39, %s8304_s4  ;;  %1194 = vrot.lane.b32.xlu1 %v4107_v37, %s8318_s14  ;;  %v8323_v37 = vstv %s4148_s3  ;;  %s4546_s3 = sld [smem:[#allocation8 + $0x2d]] }
 0x174   : > { %1120 = vrot.lane.b32.xlu2 %v4167_v44, %s8302_s22  ;;  %v498_v16 = vmul.f32 %v8323_v37, %v4417_v28  ;;  %v464_v37 = vadd.f32 %v462_v7, %v420_v33  ;;  %v4562_v7 = vmul.f32 %v8334_v4, %v623_v19  ;;  %v8342_v4 = vstv %s4182_s18  ;;  %s8347_s18 = smov 126  }
 0x175   : > { %v513_v22 = vpop.permute.xlu0 %512  ;;  %v520_v46 = vpop.permute.xlu1 %519  ;;  %v4584_v11 = vmul.f32 %v8342_v4, %v675_v38 }
 0x176   : > { %v526_v14 = vsel %vm8181_vm4, %v520_v46, %v4476_v32  ;;  %v4552_v2 = vpop.permute.xlu2 %708  ;;  %8335 = vst [vmem:[#allocation59_spill] sm:$0xff] %v4562_v7  ;;  %v8338_v46 = vstv %s4304_s17  ;;  %v504_v7 = vmul.f32 %v8343_v24, %v4417_v28  ;;  %v500_v35 = vadd.f32 %v498_v16, %v470_v8 }
 0x177   : > { %v530_v33 = vsel %vm4235_vm8, %v515_v13, %v526_v14  ;;  %v8356_v8 = vstv %s4382_s1 }
 0x178   : > { %v534_v25 = vmul.f32 %v8338_v46, %v530_v33  ;;  %v540_v43 = vmul.f32 %v8339_v47, %v530_v33  ;;  %v546_v1 = vmul.f32 %v8340_v48, %v530_v33  ;;  %v552_v19 = vmul.f32 %v8344_v5, %v530_v33 }
 0x179   : > { %v4595_v46 = vmul.f32 %v8345_v42, %v675_v38  ;;  %v488_v47 = vadd.f32 %v486_v57, %v458_v54  ;;  %v494_v48 = vadd.f32 %v492_v51, %v464_v37  ;;  %v506_v4 = vadd.f32 %v504_v7, %v476_v18 }
 0x17a   : > { %v561_v5 = vperm.slane %v4206_v58, 1  ;;  %v548_v54 = vadd.f32 %v546_v1, %v500_v35  ;;  %v581_v57 = vperm.slane %v4216_v61, 1  ;;  %v8348_v38 = vstv %s4258_s9  ;;  %s4698_s9 = sld [smem:[#allocation8 + $0x57]] }
 0x17b   : > { %1198 = vrot.lane.b32.xlu0 %v4133_v39, %s8318_s14  ;;  %1380 = vrot.lane.b32.xlu1 %v4336_v30, %s8347_s18  ;;  %v536_v28 = vadd.f32 %v534_v25, %v488_v47  ;;  %v542_v0 = vadd.f32 %v540_v43, %v494_v48  ;;  %v438_v39 = vsel %vm8184_vm0, %v4197_v53, %v4334_v31  ;;  %v8349_v31 = vstv %s4277_s24  ;;  %s4719_s24 = sld [smem:[#allocation8 + $0x35]] }
 0x17c   : > { %1186 = vrot.lane.b32.xlu2 %v4167_v44, %s8304_s4  ;;  %v554_v49 = vadd.f32 %v552_v19, %v506_v4  ;;  %v457_v16 = vmul.f32 %v8348_v38, %v449_v50  ;;  %v463_v7 = vmul.f32 %v8349_v31, %v449_v50  ;;  %v8350_v18 = vstv %s4285_s11  ;;  %s4749_s11 = sld [smem:[#allocation8 + $0x7d]] }
 0x17d   : > { %v524_v51 = vpop.permute.xlu0 %523  ;;  %v4617_v43 = vpop.permute.xlu1 %706  ;;  %v469_v33 = vmul.f32 %v8350_v18, %v449_v50  ;;  %v596_v35 = vsel %vm4245_vm10, %v526_v14, %v515_v13  ;;  %v8351_v19 = vstv %s4289_s28  ;;  %v8352_v47 = vperm.slane %v4206_v58, 0  ;;  %s8360_s28 = smov 94  }
 0x17e   : > { %v4623_v1 = vpop.permute.xlu2 %725  ;;  %v527_v24 = vsel %vm8181_vm4, %v4476_v32, %v524_v51  ;;  %v475_v42 = vmul.f32 %v8351_v19, %v449_v50  ;;  %v8353_v4 = vperm.slane %v4213_v60, 0  ;;  %v8354_v31 = vperm.slane %v4216_v61, 0 }
 0x17f   : > { %v564_v48 = vadd.f32 %v8352_v47, %v536_v28  ;;  %v516_v13 = vsel %vm8182_vm3, %v4351_v56, %v513_v22  ;;  %v8355_v14 = vperm.slane %v4219_v62, 0  ;;  %v766_v51 = vstv %s4576_s23  ;;  %s4976_s23 = sld [smem:[#allocation8 + $0x78]] }
 0x180   : > { %v574_v38 = vadd.f32 %v8353_v4, %v542_v0  ;;  %v584_v18 = vadd.f32 %v8354_v31, %v548_v54  ;;  %v824_v53 = vstv %s4591_s19  ;;  %v600_v19 = vmul.f32 %v8356_v8, %v596_v35  ;;  %s4980_s19 = sld [smem:[#allocation8 + $0xe]] }
 0x181   : > { %v594_v32 = vadd.f32 %v8355_v14, %v554_v49  ;;  %v8357_v37 = vstv %s4404_s26  ;;  %v8358_v28 = vstv %s4413_s10  ;;  %v531_v0 = vsel %vm4241_vm9, %v516_v13, %v527_v24 }
 0x182   : > { %v606_v25 = vmul.f32 %v8357_v37, %v596_v35  ;;  %v612_v47 = vmul.f32 %v8358_v28, %v596_v35  ;;  %v459_v56 = vadd.f32 %v457_v16, %v4357_v34  ;;  %v465_v22 = vadd.f32 %v463_v7, %v4368_v40 }
 0x183   : > { %v471_v54 = vadd.f32 %v469_v33, %v4373_v63  ;;  %v8359_v49 = vstv %s4430_s25  ;;  %1384 = vrot.lane.b32.xlu0 %v4338_v29, %s8347_s18  ;;  %v477_v37 = vadd.f32 %v475_v42, %v4378_v10  ;;  %v602_v4 = vadd.f32 %v600_v19, %v564_v48  ;;  %1397 = vrot.lane.b32.xlu1 %v4336_v30, %s8360_s28 }
 0x184   : > { %v618_v8 = vmul.f32 %v8359_v49, %v596_v35  ;;  %v608_v31 = vadd.f32 %v606_v25, %v574_v38  ;;  %v614_v14 = vadd.f32 %v612_v47, %v584_v18  ;;  %v8361_v40 = vstv %s4304_s17  ;;  %1196 = vrot.lane.b32.xlu2 %v4167_v44, %s8318_s14  ;;  %s4692_s17 = sld [smem:[#allocation8 + $0x33]] }
 0x185   : > { %v535_v63 = vmul.f32 %v8361_v40, %v531_v0  ;;  %v8362_v16 = vstv %s8330_s2  ;;  %v830_v33 = vstv %s4619_s5  ;;  %v4681_v35 = vpop.permute.xlu0 %710  ;;  %v724_v28 = vpop.permute.xlu1 %723  ;;  %v649_v10 = vsel %vm8185_vm2, %v449_v50, %v438_v39  ;;  %s4788_s2 = sld [smem:[#allocation8 + $0x58]] }
 0x186   : > { %v620_v34 = vadd.f32 %v618_v8, %v594_v32  ;;  %v541_v7 = vmul.f32 %v8362_v16, %v531_v0  ;;  %v8363_v25 = vstv %s4321_s30  ;;  %v8364_v48 = vstv %s4363_s16  ;;  %v4690_v32 = vpop.permute.xlu2 %735  ;;  %s4704_s16 = sld [smem:[#allocation8 + $0x7b]] }
 0x187   : > { %v547_v42 = vmul.f32 %v8363_v25, %v531_v0  ;;  %v553_v38 = vmul.f32 %v8364_v48, %v531_v0  ;;  %v836_v18 = vstv %s4628_s20  ;;  %v489_v19 = vadd.f32 %v4387_v41, %v459_v56  ;;  %s4712_s30 = sld [smem:[#allocation8 + $0x11]] }
 0x188   : > { %v495_v44 = vadd.f32 %v4392_v20, %v465_v22  ;;  %v501_v47 = vadd.f32 %v4397_v21, %v471_v54  ;;  %v842_v49 = vstv %s4638_s21  ;;  %v628_v50 = vadd.f32 %v4421_v26, %v602_v4  ;;  %s5002_s5 = sld [smem:[#allocation8 + $0x32]] }
 0x189   : > { %v634_v39 = vadd.f32 %v4434_v55, %v608_v31  ;;  %v640_v0 = vadd.f32 %v4438_v36, %v614_v14  ;;  %v507_v8 = vadd.f32 %v4402_v23, %v477_v37  ;;  %v646_v20 = vadd.f32 %v4442_v12, %v620_v34  ;;  %s5010_s20 = sld [smem:[#allocation8 + $0x56]] }
 0x18a   : > { %v537_v21 = vadd.f32 %v535_v63, %v489_v19  ;;  %v543_v41 = vadd.f32 %v541_v7, %v495_v44  ;;  %v4710_v56 = vsel %vm376_vm12, %v4617_v43, %v4552_v2  ;;  %v8365_v26 = vstv %s4203_s7  ;;  %s4737_s7 = sld [smem:[#allocation8 + $0x59]]  ;;  %v8369_v63 = vld [vmem:[#allocation56_spill] sm:$0xff]  ;;  %v8370_v7 = vld [vmem:[#allocation39_spill] sm:$0xff] }
 0x18b   : > { %v4716_v55 = vmul.f32 %v8365_v26, %v649_v10  ;;  %v549_v22 = vadd.f32 %v547_v42, %v501_v47  ;;  %v555_v36 = vadd.f32 %v553_v38, %v507_v8  ;;  %v962_v54 = vstv %s4662_s29  ;;  %1401 = vrot.lane.b32.xlu0 %v4338_v29, %s8360_s28  ;;  %v8375_v38 = vld [vmem:[#allocation50_spill] sm:$0xff]  ;;  %s5016_s21 = sld [smem:[#allocation8 + $0x7a]] }
 0x18c   : > { %v8366_v23 = vstv %s4210_s8  ;;  %v8367_v12 = vstv %s8315_s12  ;;  %v8368_v31 = vstv %s8316_s13  ;;  %v597_v43 = vsel %vm4249_vm11, %v527_v24, %v516_v13  ;;  %s8373_s8 = smov 96   ;;  %v8374_v24 = vld [vmem:[#allocation57_spill] sm:$0xff]  ;;  %1382 = vrot.lane.b32.xlu2 %v8375_v38, %s8347_s18  ;;  %s4760_s12 = sld [smem:[#allocation8 + $0x10]] }
 0x18d   : > { %v4723_v37 = vmul.f32 %v8366_v23, %v649_v10  ;;  %v4727_v4 = vmul.f32 %v8367_v12, %v649_v10  ;;  %v4731_v14 = vmul.f32 %v8368_v31, %v649_v10  ;;  %v654_v34 = vadd.f32 %v4521_v59, %v628_v50  ;;  %1407 = vrot.lane.b32.xlu1 %v4336_v30, %s8373_s8  ;;  %v728_v19 = vpop.permute.xlu0 %727  ;;  %v734_v44 = vpop.permute.xlu1 %733  ;;  %s4774_s13 = sld [smem:[#allocation8 + $0x34]]  ;;  %v8382_v12 = vld [vmem:[#allocation51_spill] sm:$0xff] }
 0x18e   : > { %v660_v40 = vadd.f32 %v4525_v52, %v634_v39  ;;  %v666_v16 = vadd.f32 %v8369_v63, %v640_v0  ;;  %v8371_v25 = vperm.slane %v8370_v7, 0  ;;  %v672_v13 = vadd.f32 %v8374_v24, %v646_v20  ;;  %v4772_v47 = vpop.permute.xlu2 %773  ;;  %v8383_v63 = vld [vmem:[#allocation52_spill] sm:$0xff]  ;;  %s5159_s29 = sld [smem:[#allocation8 + $0x12]] }
 0x18f   : > { %v565_v59 = vadd.f32 %v561_v5, %v537_v21  ;;  %v575_v52 = vadd.f32 %v571_v27, %v543_v41  ;;  %v729_v48 = vsel %vm8188_vm14, %v724_v28, %v4623_v1  ;;  %v585_v58 = vadd.f32 %v581_v57, %v549_v22 }
 0x190   : > { %v721_v10 = vsel %vm4235_vm8, %v4710_v56, %v8371_v25  ;;  %v8376_v5 = vperm.slane %v4219_v62, 1  ;;  %v4768_v27 = vsel %vm8188_vm14, %v4623_v1, %v728_v19  ;;  %v739_v28 = vsel %vm8187_vm15, %v734_v44, %v4690_v32 }
 0x191   : > { %v8377_v50 = vstv %s4382_s1  ;;  %v8378_v0 = vstv %s4404_s26  ;;  %v4782_v61 = vsel %vm4235_vm8, %v729_v48, %v739_v28  ;;  %v4786_v62 = vsel %vm4245_vm10, %v739_v28, %v729_v48  ;;  %s4798_s1 = sld [smem:[#allocation8 + $0x7c]] }
 0x192   : > { %v595_v60 = vadd.f32 %v8376_v5, %v555_v36  ;;  %v601_v39 = vmul.f32 %v8377_v50, %v597_v43  ;;  %v607_v8 = vmul.f32 %v8378_v0, %v597_v43  ;;  %v8379_v57 = vstv %s4413_s10  ;;  %s4800_s26 = sld [smem:[#allocation8 + $0xa]]  ;;  %v8387_v5 = vld [vmem:[#allocation54_spill] sm:$0xff] }
 0x193   : > { %v613_v1 = vmul.f32 %v8379_v57, %v597_v43  ;;  %v8380_v20 = vstv %s4430_s25  ;;  %v968_v41 = vstv %s4692_s17  ;;  %v745_v22 = vsel %vm8186_vm13, %v4782_v61, %v721_v10  ;;  %s4804_s25 = sld [smem:[#allocation8 + $0x2e]]  ;;  %1411 = vrot.lane.b32.xlu0 %v4338_v29, %s8373_s8 }
 0x194   : > { %v619_v21 = vmul.f32 %v8380_v20, %v597_v43  ;;  %v603_v36 = vadd.f32 %v601_v39, %v565_v59  ;;  %v609_v23 = vadd.f32 %v607_v8, %v575_v52  ;;  %v680_v31 = vadd.f32 %v8382_v12, %v654_v34  ;;  %s4812_s10 = sld [smem:[#allocation8 + $0x52]]  ;;  %v8386_v59 = vld [vmem:[#allocation53_spill] sm:$0xff]  ;;  %1399 = vrot.lane.b32.xlu2 %v8375_v38, %s8360_s28  ;;  %v8390_v12 = vld [vmem:[#allocation58_spill] sm:$0xff] }
 0x195   : > { %v686_v25 = vadd.f32 %v8383_v63, %v660_v40  ;;  %v615_v43 = vadd.f32 %v613_v1, %v585_v58  ;;  %v8384_v48 = vstv %s4532_s0  ;;  %v8385_v19 = vstv %s4546_s3  ;;  %1445 = vrot.lane.b32.xlu1 %v4336_v30, %s8298_s15  ;;  %v738_v8 = vpop.permute.xlu0 %737  ;;  %v772_v57 = vpop.permute.xlu1 %771  ;;  %s5179_s17 = sld [smem:[#allocation8 + $0x36]] }
 0x196   : > { %v621_v24 = vadd.f32 %v619_v21, %v595_v60  ;;  %v749_v10 = vmul.f32 %v8384_v48, %v745_v22  ;;  %v755_v44 = vmul.f32 %v8385_v19, %v745_v22  ;;  %v692_v52 = vadd.f32 %v8386_v59, %v666_v16  ;;  %v8389_v21 = vld [vmem:[#allocation55_spill] sm:$0xff]  ;;  %v4846_v63 = vpop.permute.xlu2 %783  ;;  %s5664_s28 = sld [smem:[#allocation8 + $0x69]] }
 0x197   : > { %v698_v34 = vadd.f32 %v8387_v5, %v672_v13  ;;  %v8388_v28 = vstv %s4554_s6  ;;  %v767_v58 = vmul.f32 %v766_v51, %v745_v22  ;;  %v974_v60 = vstv %s4698_s9  ;;  %s5185_s9 = sld [smem:[#allocation8 + $0x5a]] }
 0x198   : > { %v761_v40 = vmul.f32 %v8388_v28, %v745_v22  ;;  %v8139_v50 = vstv %s4704_s16  ;;  %v4826_v39 = vadd.f32 %v749_v10, %v680_v31  ;;  %v4828_v0 = vadd.f32 %v755_v44, %v686_v25  ;;  %v8391_v25 = vld [vmem:[#allocation59_spill] sm:$0xff]  ;;  %v8392_v10 = vld [vmem:[#allocation60_spill] sm:$0xff] }
 0x199   : > { %v713_v16 = vsel %vm376_vm12, %v4552_v2, %v4681_v35  ;;  %v8138_v13 = vstv %s4712_s30  ;;  %v769_v20 = vadd.f32 %v767_v58, %v698_v34  ;;  %v629_v22 = vadd.f32 %v8389_v21, %v603_v36 }
 0x19a   : > { %v763_v1 = vadd.f32 %v761_v40, %v692_v52  ;;  %v635_v31 = vadd.f32 %v8390_v12, %v609_v23  ;;  %v4840_v2 = vsel %vm8187_vm15, %v4690_v32, %v738_v8  ;;  %v4844_v35 = vsel %vm8184_vm0, %v772_v57, %v4772_v47 }
 0x19b   : > { %v641_v48 = vadd.f32 %v8391_v25, %v615_v43  ;;  %v647_v19 = vadd.f32 %v8392_v10, %v621_v24  ;;  %v744_v36 = vsel %vm4241_vm9, %v4768_v27, %v4840_v2  ;;  %v8137_v23 = vstv %s4719_s24  ;;  %1449 = vrot.lane.b32.xlu0 %v4338_v29, %s8298_s15 }
 0x19c   : > { %v8136_v44 = vstv %s4737_s7  ;;  %v8135_v59 = vstv %s4749_s11  ;;  %v8393_v43 = vperm.slane %v8370_v7, 1  ;;  %v655_v40 = vadd.f32 %v4716_v55, %v629_v22  ;;  %1409 = vrot.lane.b32.xlu2 %v8375_v38, %s8373_s8  ;;  %s5649_s8 = sld [smem:[#allocation8 + $0x21]] }
 0x19d   : > { %v794_v57 = vstv %s4800_s26  ;;  %v800_v21 = vstv %s4804_s25  ;;  %v661_v12 = vadd.f32 %v4723_v37, %v635_v31  ;;  %v667_v25 = vadd.f32 %v4727_v4, %v641_v48  ;;  %1455 = vrot.lane.b32.xlu1 %v4336_v30, %s8302_s22  ;;  %s5225_s26 = sld [smem:[#allocation8 + $0x3a]] }
 0x19e   : > { %v4866_v24 = vsel %vm4241_vm9, %v713_v16, %v8393_v43  ;;  %v8394_v58 = vmov %v8393_v43  ;;  %v673_v10 = vadd.f32 %v4731_v14, %v647_v19  ;;  %v8395_v43 = vperm.slane %v8370_v7, 0  ;;  %v776_v19 = vpop.permute.xlu0 %775  ;;  %s5243_s25 = sld [smem:[#allocation8 + $0x82]] }
 0x19f   : > { %v4876_v8 = vsel %vm4249_vm11, %v8394_v58, %v713_v16  ;;  %v8396_v16 = vstv %s4532_s0  ;;  %v8397_v58 = vstv %s4546_s3  ;;  %v806_v37 = vstv %s4812_s10  ;;  %s4938_s0 = sld [smem:[#allocation8 + $0xc]] }
 0x1a0   : > { %v817_v55 = vsel %vm4245_vm10, %v8395_v43, %v4710_v56  ;;  %v750_v22 = vmul.f32 %v8396_v16, %v4866_v24  ;;  %v756_v28 = vmul.f32 %v8397_v58, %v4866_v24  ;;  %v812_v4 = vstv %s4824_s27  ;;  %v782_v43 = vpop.permute.xlu1 %781  ;;  %s4940_s3 = sld [smem:[#allocation8 + $0x30]] }
 0x1a1   : > { %v8398_v14 = vstv %s4554_s6  ;;  %v768_v56 = vmul.f32 %v766_v51, %v4866_v24  ;;  %v4909_v31 = vmul.f32 %v824_v53, %v4876_v8  ;;  %v4914_v48 = vmul.f32 %v830_v33, %v4876_v8  ;;  %s4952_s6 = sld [smem:[#allocation8 + $0x54]] }
 0x1a2   : > { %v762_v7 = vmul.f32 %v8398_v14, %v4866_v24  ;;  %v821_v16 = vsel %vm8186_vm13, %v4786_v62, %v817_v55  ;;  %v778_v51 = vsel %vm8184_vm0, %v4772_v47, %v776_v19  ;;  %v787_v58 = vsel %vm8183_vm1, %v782_v43, %v4846_v63  ;;  %v4925_v14 = vpop.permute.xlu2 %849  ;;  %s5245_s10 = sld [smem:[#allocation8 + $0x1f]] }
 0x1a3   : > { %v681_v34 = vadd.f32 %v4580_v15, %v655_v40  ;;  %v791_v5 = vsel %vm8186_vm13, %v4844_v35, %v787_v58  ;;  %v687_v52 = vadd.f32 %v4584_v11, %v661_v12  ;;  %v693_v55 = vadd.f32 %v4595_v46, %v667_v25  ;;  %1459 = vrot.lane.b32.xlu0 %v4338_v29, %s8302_s22  ;;  %s5251_s27 = sld [smem:[#allocation8 + $0x43]] }
 0x1a4   : > { %v699_v32 = vadd.f32 %v4599_v17, %v673_v10  ;;  %v795_v47 = vmul.f32 %v794_v57, %v791_v5  ;;  %v801_v19 = vmul.f32 %v800_v21, %v791_v5  ;;  %v807_v43 = vmul.f32 %v806_v37, %v791_v5  ;;  %1447 = vrot.lane.b32.xlu2 %v8375_v38, %s8298_s15  ;;  %s5635_s15 = sld [smem:[#allocation8 + $0x65]] }
 0x1a5   : > { %v813_v15 = vmul.f32 %v812_v4, %v791_v5  ;;  %v825_v11 = vmul.f32 %v824_v53, %v821_v16  ;;  %v831_v46 = vmul.f32 %v830_v33, %v821_v16  ;;  %v837_v17 = vmul.f32 %v836_v18, %v821_v16  ;;  %1521 = vrot.lane.b32.xlu1 %v4336_v30, %s8304_s4 }
 0x1a6   : > { %v843_v40 = vmul.f32 %v842_v49, %v821_v16  ;;  %v797_v12 = vadd.f32 %v795_v47, %v4826_v39  ;;  %v803_v25 = vadd.f32 %v801_v19, %v4828_v0  ;;  %v809_v10 = vadd.f32 %v807_v43, %v763_v1  ;;  %v786_v47 = vpop.permute.xlu0 %785 }
 0x1a7   : > { %v815_v5 = vadd.f32 %v813_v15, %v769_v20  ;;  %v4957_v58 = vmul.f32 %v836_v18, %v4876_v8  ;;  %v4962_v53 = vmul.f32 %v842_v49, %v4876_v8  ;;  %v4967_v33 = vmul.f32 %v962_v54, %v4782_v61 }
 0x1a8   : > { %v4972_v39 = vmul.f32 %v968_v41, %v4782_v61  ;;  %v4982_v18 = vadd.f32 %v825_v11, %v797_v12  ;;  %v4984_v49 = vadd.f32 %v831_v46, %v803_v25  ;;  %v4986_v0 = vadd.f32 %v837_v17, %v809_v10  ;;  %v848_v15 = vpop.permute.xlu1 %847 }
 0x1a9   : > { %v4988_v1 = vadd.f32 %v843_v40, %v815_v5  ;;  %v4993_v20 = vmul.f32 %v974_v60, %v4782_v61  ;;  %v4998_v16 = vmul.f32 %v8139_v50, %v4782_v61  ;;  %v752_v19 = vadd.f32 %v750_v22, %v681_v34 }
 0x1aa   : > { %v758_v43 = vadd.f32 %v756_v28, %v687_v52  ;;  %v764_v11 = vadd.f32 %v762_v7, %v693_v55  ;;  %v770_v46 = vadd.f32 %v768_v56, %v699_v32  ;;  %v788_v17 = vsel %vm8183_vm1, %v4846_v63, %v786_v47  ;;  %v5008_v40 = vpop.permute.xlu2 %859 }
 0x1ab   : > { %v853_v61 = vsel %vm8182_vm3, %v848_v15, %v4925_v14  ;;  %v796_v52 = vmul.f32 %v794_v57, %v788_v17  ;;  %v802_v34 = vmul.f32 %v800_v21, %v788_v17  ;;  %v808_v28 = vmul.f32 %v806_v37, %v788_v17  ;;  %1525 = vrot.lane.b32.xlu0 %v4338_v29, %s8304_s4 }
 0x1ac   : > { %v814_v32 = vmul.f32 %v812_v4, %v788_v17  ;;  %v5021_v63 = vmul.f32 %v8138_v13, %v4786_v62  ;;  %v5026_v22 = vmul.f32 %v8137_v23, %v4786_v62  ;;  %v960_v57 = vsel %vm8185_vm2, %v4866_v24, %v744_v36  ;;  %1457 = vrot.lane.b32.xlu2 %v8375_v38, %s8302_s22  ;;  %s5619_s22 = sld [smem:[#allocation8 + $0x41]] }
 0x1ad   : > { %v5038_v21 = vsel %vm8185_vm2, %v788_v17, %v778_v51  ;;  %v5040_v37 = vadd.f32 %v796_v52, %v752_v19  ;;  %v5042_v4 = vadd.f32 %v802_v34, %v758_v43  ;;  %v5044_v7 = vadd.f32 %v808_v28, %v764_v11  ;;  %1531 = vrot.lane.b32.xlu1 %v4336_v30, %s8318_s14  ;;  %v8406_v17 = vld [vmem:[#allocation40_spill] sm:$0xff]  ;;  %v8407_v52 = vld [vmem:[#allocation41_spill] sm:$0xff] }
 0x1ae   : > { %v5046_v56 = vadd.f32 %v814_v32, %v770_v46  ;;  %v5051_v55 = vmul.f32 %v8136_v44, %v4786_v62  ;;  %v5056_v36 = vmul.f32 %v8135_v59, %v4786_v62  ;;  %v8142_v24 = vstv %s4938_s0  ;;  %v852_v46 = vpop.permute.xlu0 %851  ;;  %v8409_v32 = vld [vmem:[#allocation47_spill] sm:$0xff] }
 0x1af   : > { %v8143_v51 = vstv %s4940_s3  ;;  %v8401_v12 = vsel %vm4249_vm11, %v4840_v2, %v4768_v27  ;;  %v8402_v10 = vstv %s4760_s12  ;;  %v8403_v47 = vstv %s4774_s13 }
 0x1b0   : > { %8399 = vst [vmem:[#allocation56_spill] sm:$0xff] %v5051_v55  ;;  %v5068_v25 = vsel %vm8185_vm2, %v4876_v8, %v8401_v12  ;;  %v5073_v5 = vmul.f32 %v8402_v10, %v4844_v35  ;;  %v5078_v62 = vmul.f32 %v8403_v47, %v4844_v35  ;;  %v8404_v19 = vstv %s4788_s2  ;;  %v858_v12 = vpop.permute.xlu1 %857 }
 0x1b1   : > { %8400 = vst [vmem:[#allocation39_spill] sm:$0xff] %v5056_v36  ;;  %v5083_v43 = vmul.f32 %v8404_v19, %v4844_v35  ;;  %v5089_v27 = vmul.f32 %v962_v54, %v960_v57  ;;  %v8405_v2 = vstv %s4798_s1  ;;  %v8144_v15 = vstv %s4952_s6 }
 0x1b2   : > { %v5094_v8 = vmul.f32 %v8405_v2, %v4844_v35  ;;  %v8145_v11 = vstv %s4976_s23  ;;  %v897_v54 = vperm.slane %v8406_v17, 0  ;;  %v907_v34 = vperm.slane %v8407_v52, 0  ;;  %v8408_v35 = vld [vmem:[#allocation42_spill] sm:$0xff]  ;;  %v5112_v59 = vpop.permute.xlu2 %1045 }
 0x1b3   : > { %v917_v28 = vperm.slane %v8408_v35, 0  ;;  %v927_v30 = vperm.slane %v8409_v32, 0  ;;  %v854_v10 = vsel %vm8182_vm3, %v4925_v14, %v852_v46  ;;  %v863_v2 = vsel %vm8181_vm4, %v858_v12, %v5008_v40  ;;  %1535 = vrot.lane.b32.xlu0 %v4338_v29, %s8318_s14 }
 0x1b4   : > { %v867_v13 = vsel %vm4235_vm8, %v853_v61, %v863_v2  ;;  %v933_v50 = vsel %vm4245_vm10, %v863_v2, %v853_v61  ;;  %v5130_v44 = vmul.f32 %v968_v41, %v960_v57  ;;  %v5134_v23 = vmul.f32 %v974_v60, %v960_v57  ;;  %1523 = vrot.lane.b32.xlu2 %v8375_v38, %s8304_s4  ;;  %s5617_s4 = sld [smem:[#allocation8 + $0x1d]] }
 0x1b5   : > { %v871_v14 = vmul.f32 %v8142_v24, %v867_v13  ;;  %v877_v46 = vmul.f32 %v8143_v51, %v867_v13  ;;  %v883_v12 = vmul.f32 %v8144_v15, %v867_v13  ;;  %v889_v19 = vmul.f32 %v8145_v11, %v867_v13 }
 0x1b6   : > { %v8410_v47 = vstv %s4704_s16  ;;  %v8411_v61 = vstv %s4712_s30  ;;  %v8413_v41 = vstv %s4980_s19  ;;  %v8414_v26 = vstv %s5002_s5  ;;  %s5203_s16 = sld [smem:[#allocation8 + $0x16]] }
 0x1b7   : > { %v5138_v45 = vmul.f32 %v8410_v47, %v960_v57  ;;  %v5143_v2 = vmul.f32 %v8411_v61, %v5068_v25  ;;  %v873_v24 = vadd.f32 %v871_v14, %v4982_v18  ;;  %v879_v51 = vadd.f32 %v877_v46, %v4984_v49  ;;  %s5223_s30 = sld [smem:[#allocation8 + $0x7e]] }
 0x1b8   : > { %v885_v15 = vadd.f32 %v883_v12, %v4986_v0  ;;  %v891_v13 = vadd.f32 %v889_v19, %v4988_v1  ;;  %v937_v11 = vmul.f32 %v8413_v41, %v933_v50  ;;  %v943_v60 = vmul.f32 %v8414_v26, %v933_v50  ;;  %v862_v1 = vpop.permute.xlu0 %861  ;;  %s5337_s19 = sld [smem:[#allocation8 + $0x13]] }
 0x1b9   : > { %8412 = vst [vmem:[#allocation57_spill] sm:$0xff] %v5143_v2  ;;  %v8415_v36 = vstv %s5010_s20  ;;  %v8416_v57 = vstv %s5016_s21  ;;  %v901_v61 = vadd.f32 %v897_v54, %v873_v24  ;;  %v911_v2 = vadd.f32 %v907_v34, %v879_v51 }
 0x1ba   : > { %v949_v55 = vmul.f32 %v8415_v36, %v933_v50  ;;  %v955_v47 = vmul.f32 %v8416_v57, %v933_v50  ;;  %v921_v18 = vadd.f32 %v917_v28, %v885_v15  ;;  %v931_v14 = vadd.f32 %v927_v30, %v891_v13  ;;  %v1044_v36 = vpop.permute.xlu1 %1043  ;;  %v5167_v54 = vpop.permute.xlu2 %1062 }
 0x1bb   : > { %v898_v49 = vperm.slane %v8406_v17, 1  ;;  %v908_v26 = vperm.slane %v8407_v52, 1  ;;  %v918_v0 = vperm.slane %v8408_v35, 1  ;;  %v928_v50 = vperm.slane %v8409_v32, 1 }
 0x1bc   : > { %v939_v29 = vadd.f32 %v937_v11, %v901_v61  ;;  %v945_v24 = vadd.f32 %v943_v60, %v911_v2  ;;  %v951_v51 = vadd.f32 %v949_v55, %v921_v18  ;;  %v957_v15 = vadd.f32 %v955_v47, %v931_v14  ;;  %1533 = vrot.lane.b32.xlu2 %v8375_v38, %s8318_s14  ;;  %s5597_s14 = sld [smem:[#allocation8 + $0x87]] }
 0x1bd   : > { %v828_v34 = vadd.f32 %v4909_v31, %v5040_v37  ;;  %v834_v17 = vadd.f32 %v4914_v48, %v5042_v4  ;;  %v864_v52 = vsel %vm8181_vm4, %v5008_v40, %v862_v1  ;;  %v5177_v35 = vsel %vm376_vm12, %v1044_v36, %v5112_v59 }
 0x1be   : > { %v965_v55 = vadd.f32 %v4967_v33, %v939_v29  ;;  %v971_v11 = vadd.f32 %v4972_v39, %v945_v24  ;;  %v977_v31 = vadd.f32 %v4993_v20, %v951_v51  ;;  %v983_v48 = vadd.f32 %v4998_v16, %v957_v15 }
 0x1bf   : > { %v840_v40 = vadd.f32 %v4957_v58, %v5044_v7  ;;  %v846_v33 = vadd.f32 %v4962_v53, %v5046_v56  ;;  %v868_v39 = vsel %vm4241_vm9, %v854_v10, %v864_v52  ;;  %v934_v20 = vsel %vm4249_vm11, %v864_v52, %v854_v10 }
 0x1c0   : > { %v991_v37 = vadd.f32 %v5073_v5, %v965_v55  ;;  %v997_v16 = vadd.f32 %v5078_v62, %v971_v11  ;;  %v5198_v4 = vadd.f32 %v5083_v43, %v977_v31  ;;  %v5201_v28 = vadd.f32 %v5094_v8, %v983_v48  ;;  %v1048_v47 = vpop.permute.xlu0 %1047 }
 0x1c1   : > { %v8417_v58 = vstv %s4938_s0  ;;  %v8418_v7 = vstv %s4940_s3  ;;  %v8419_v32 = vstv %s4952_s6  ;;  %v8420_v19 = vstv %s4976_s23  ;;  %s5253_s0 = sld [smem:[#allocation8 + $0x67]] }
 0x1c2   : > { %v872_v53 = vmul.f32 %v8417_v58, %v868_v39  ;;  %v878_v56 = vmul.f32 %v8418_v7, %v868_v39  ;;  %v884_v30 = vmul.f32 %v8419_v32, %v868_v39  ;;  %v890_v10 = vmul.f32 %v8420_v19, %v868_v39  ;;  %v1061_v61 = vpop.permute.xlu1 %1060  ;;  %v5241_v51 = vpop.permute.xlu2 %1072  ;;  %s5267_s3 = sld [smem:[#allocation8 + $0x8b]]  ;;  %v8430_v7 = vld [vmem:[#allocation48_spill] sm:$0xff] }
 0x1c3   : > { %v8421_v5 = vstv %s4719_s24  ;;  %v8422_v43 = vmov %v8413_v41  ;;  %v8423_v8 = vstv %s5002_s5  ;;  %v1085_v2 = vstv %s5159_s29  ;;  %s5229_s24 = sld [smem:[#allocation8 + $0x5e]] }
 0x1c4   : > { %v5216_v62 = vmul.f32 %v8421_v5, %v5068_v25  ;;  %v938_v46 = vmul.f32 %v8422_v43, %v934_v20  ;;  %v944_v12 = vmul.f32 %v8423_v8, %v934_v20  ;;  %v874_v13 = vadd.f32 %v872_v53, %v828_v34  ;;  %s5317_s6 = sld [smem:[#allocation8 + $0x18]] }
 0x1c5   : > { %v880_v41 = vadd.f32 %v878_v56, %v834_v17  ;;  %v886_v60 = vadd.f32 %v884_v30, %v840_v40  ;;  %v892_v57 = vadd.f32 %v890_v10, %v846_v33  ;;  %v8424_v18 = vstv %s5010_s20  ;;  %s5335_s23 = sld [smem:[#allocation8 + $0x3c]] }
 0x1c6   : > { %v950_v14 = vmul.f32 %v8424_v18, %v934_v20  ;;  %v8425_v1 = vstv %s5016_s21  ;;  %v5237_v29 = vsel %vm376_vm12, %v5112_v59, %v1048_v47  ;;  %v1066_v24 = vsel %vm8188_vm14, %v1061_v61, %v5167_v54  ;;  %v8436_v61 = vld [vmem:[#allocation57_spill] sm:$0xff]  ;;  %s5341_s5 = sld [smem:[#allocation8 + $0x37]] }
 0x1c7   : > { %v956_v36 = vmul.f32 %v8425_v1, %v934_v20  ;;  %v902_v38 = vadd.f32 %v898_v49, %v874_v13  ;;  %v912_v15 = vadd.f32 %v908_v26, %v880_v41  ;;  %v922_v34 = vadd.f32 %v918_v0, %v886_v60  ;;  %v8434_v13 = vld [vmem:[#allocation56_spill] sm:$0xff]  ;;  %v8435_v60 = vld [vmem:[#allocation39_spill] sm:$0xff]  ;;  %s5359_s20 = sld [smem:[#allocation8 + $0x60]] }
 0x1c8   : > { %v932_v17 = vadd.f32 %v928_v50, %v892_v57  ;;  %v1091_v52 = vstv %s5179_s17  ;;  %v1097_v59 = vstv %s5185_s9  ;;  %v1017_v55 = vadd.f32 %v5021_v63, %v991_v37  ;;  %v1065_v43 = vpop.permute.xlu0 %1064  ;;  %s5373_s21 = sld [smem:[#allocation8 + $0x84]] }
 0x1c9   : > { %v1023_v11 = vadd.f32 %v5026_v22, %v997_v16  ;;  %v940_v31 = vadd.f32 %v938_v46, %v902_v38  ;;  %v946_v48 = vadd.f32 %v944_v12, %v912_v15  ;;  %v952_v49 = vadd.f32 %v950_v14, %v922_v34  ;;  %s5381_s29 = sld [smem:[#allocation8 + $0x1a]] }
 0x1ca   : > { %v958_v40 = vadd.f32 %v956_v36, %v932_v17  ;;  %v8426_v26 = vstv %s4760_s12  ;;  %v8427_v50 = vstv %s4774_s13  ;;  %v8428_v39 = vstv %s4788_s2  ;;  %s5284_s12 = sld [smem:[#allocation8 + $0x14]]  ;;  %v1071_v46 = vpop.permute.xlu1 %1070  ;;  %v5299_v12 = vpop.permute.xlu2 %1110 }
 0x1cb   : > { %v990_v0 = vmul.f32 %v8426_v26, %v5038_v21  ;;  %v996_v33 = vmul.f32 %v8427_v50, %v5038_v21  ;;  %v1002_v63 = vmul.f32 %v8428_v39, %v5038_v21  ;;  %v8429_v22 = vstv %s4798_s1  ;;  %s5291_s13 = sld [smem:[#allocation8 + $0x38]] }
 0x1cc   : > { %v1008_v20 = vmul.f32 %v8429_v22, %v5038_v21  ;;  %v966_v37 = vadd.f32 %v5089_v27, %v940_v31  ;;  %v972_v16 = vadd.f32 %v5130_v44, %v946_v48  ;;  %v978_v58 = vadd.f32 %v5134_v23, %v952_v49  ;;  %s5293_s2 = sld [smem:[#allocation8 + $0x5c]] }
 0x1cd   : > { %v984_v53 = vadd.f32 %v5138_v45, %v958_v40  ;;  %v8431_v56 = vperm.slane %v8430_v7, 0  ;;  %v1103_v19 = vstv %s5223_s30  ;;  %v8433_v44 = vperm.slane %v8430_v7, 1  ;;  %s5305_s1 = sld [smem:[#allocation8 + $0x80]] }
 0x1ce   : > { %v992_v23 = vadd.f32 %v990_v0, %v966_v37  ;;  %v998_v27 = vadd.f32 %v996_v33, %v972_v16  ;;  %v1004_v10 = vadd.f32 %v1002_v63, %v978_v58  ;;  %v1076_v8 = vsel %vm8187_vm15, %v1071_v46, %v5241_v51  ;;  %s5396_s17 = sld [smem:[#allocation8 + $0x3e]] }
 0x1cf   : > { %v1058_v32 = vsel %vm4235_vm8, %v5177_v35, %v8431_v56  ;;  %v8432_v30 = vmov %v8431_v56  ;;  %v1059_v45 = vsel %vm4241_vm9, %v5237_v29, %v8433_v44  ;;  %v1010_v5 = vadd.f32 %v1008_v20, %v984_v53  ;;  %s5398_s9 = sld [smem:[#allocation8 + $0x62]] }
 0x1d0   : > { %v1154_v21 = vsel %vm4245_vm10, %v8432_v30, %v5177_v35  ;;  %v1067_v35 = vsel %vm8188_vm14, %v5167_v54, %v1065_v43  ;;  %v1029_v41 = vadd.f32 %v8434_v13, %v5198_v4  ;;  %v1035_v57 = vadd.f32 %v8435_v60, %v5201_v28  ;;  %s5423_s30 = sld [smem:[#allocation8 + $0x19]] }
 0x1d1   : > { %v5309_v47 = vsel %vm4235_vm8, %v1066_v24, %v1076_v8  ;;  %v5313_v54 = vsel %vm4245_vm10, %v1076_v8, %v1066_v24  ;;  %v1018_v18 = vadd.f32 %v8436_v61, %v992_v23  ;;  %v1024_v14 = vadd.f32 %v5216_v62, %v998_v27 }
 0x1d2   : > { %v1082_v28 = vsel %vm8186_vm13, %v5309_v47, %v1058_v32  ;;  %v5325_v1 = vsel %vm8186_vm13, %v5313_v54, %v1154_v21  ;;  %v8438_v36 = vstv %s4737_s7  ;;  %v8439_v24 = vstv %s4749_s11  ;;  %s5343_s7 = sld [smem:[#allocation8 + $0x5b]]  ;;  %v5363_v37 = vpop.permute.xlu2 %1120 }
 0x1d3   : > { %v1028_v38 = vmul.f32 %v8438_v36, %v5068_v25  ;;  %v1034_v15 = vmul.f32 %v8439_v24, %v5068_v25  ;;  %v1087_v34 = vmul.f32 %v1085_v2, %v1059_v45  ;;  %v1093_v62 = vmul.f32 %v1091_v52, %v1059_v45  ;;  %s5353_s11 = sld [smem:[#allocation8 + $0x7f]] }
 0x1d4   : > { %v1099_v17 = vmul.f32 %v1097_v59, %v1059_v45  ;;  %v1105_v31 = vmul.f32 %v1103_v19, %v1059_v45  ;;  %v1086_v48 = vmul.f32 %v1085_v2, %v1082_v28  ;;  %v1092_v49 = vmul.f32 %v1091_v52, %v1082_v28  ;;  %v1075_v2 = vpop.permute.xlu0 %1074  ;;  %v1109_v52 = vpop.permute.xlu1 %1108 }
 0x1d5   : > { %v1098_v40 = vmul.f32 %v1097_v59, %v1082_v28  ;;  %v1104_v26 = vmul.f32 %v1103_v19, %v1082_v28  ;;  %v1030_v0 = vadd.f32 %v1028_v38, %v1004_v10  ;;  %v1036_v50 = vadd.f32 %v1034_v15, %v1010_v5  ;;  %v8442_v10 = vld [vmem:[#allocation32_spill] sm:$0xff] }
 0x1d6   : > { %v5345_v25 = vadd.f32 %v1086_v48, %v1017_v55  ;;  %v5347_v33 = vadd.f32 %v1092_v49, %v1023_v11  ;;  %v5349_v39 = vadd.f32 %v1087_v34, %v1018_v18  ;;  %v5351_v63 = vadd.f32 %v1093_v62, %v1024_v14 }
 0x1d7   : > { %v1100_v59 = vadd.f32 %v1098_v40, %v1029_v41  ;;  %v1106_v22 = vadd.f32 %v1104_v26, %v1035_v57  ;;  %v5355_v20 = vadd.f32 %v1099_v17, %v1030_v0  ;;  %v5357_v55 = vadd.f32 %v1105_v31, %v1036_v50 }
 0x1d8   : > { %v1077_v11 = vsel %vm8187_vm15, %v5241_v51, %v1075_v2  ;;  %v1231_v16 = vstv %s5203_s16  ;;  %v8440_v58 = vmov %v8433_v44  ;;  %v1241_v30 = vstv %s5225_s26  ;;  %s5409_s16 = sld [smem:[#allocation8 + $0x86]] }
 0x1d9   : > { %v5371_v53 = vsel %vm4249_vm11, %v8440_v58, %v5237_v29  ;;  %v1081_v56 = vsel %vm4241_vm9, %v1067_v35, %v1077_v11  ;;  %v1157_v32 = vsel %vm4249_vm11, %v1077_v11, %v1067_v35  ;;  %v1251_v51 = vstv %s5229_s24  ;;  %v8443_v35 = vld [vmem:[#allocation33_spill] sm:$0xff]  ;;  %s5425_s26 = sld [smem:[#allocation8 + $0x3d]] }
 0x1da   : > { %v5385_v19 = vsel %vm8185_vm2, %v1059_v45, %v1081_v56  ;;  %v5390_v29 = vsel %vm8185_vm2, %v5371_v53, %v1157_v32  ;;  %v1261_v7 = vstv %s5243_s25  ;;  %v1568_v44 = vstv %s5245_s10  ;;  %s5432_s24 = sld [smem:[#allocation8 + $0x61]]  ;;  %v5444_v34 = vpop.permute.xlu2 %1186 }
 0x1db   : > { %v1578_v23 = vstv %s5251_s27  ;;  %v1588_v27 = vstv %s5253_s0  ;;  %v5401_v45 = vmul.f32 %v1231_v16, %v8442_v10  ;;  %v5404_v5 = vmul.f32 %v1241_v30, %v8442_v10  ;;  %s5449_s25 = sld [smem:[#allocation8 + $0x85]] }
 0x1dc   : > { %v5407_v43 = vmul.f32 %v1251_v51, %v8442_v10  ;;  %v5412_v46 = vmul.f32 %v1261_v7, %v8442_v10  ;;  %v5415_v8 = vmul.f32 %v1568_v44, %v8443_v35  ;;  %v5418_v13 = vmul.f32 %v1578_v23, %v8443_v35  ;;  %v1113_v60 = vpop.permute.xlu0 %1112  ;;  %v1119_v28 = vpop.permute.xlu1 %1118  ;;  %s5454_s10 = sld [smem:[#allocation8 + $0x15]] }
 0x1dd   : > { %v5421_v41 = vmul.f32 %v1588_v27, %v8443_v35  ;;  %v1131_v57 = vstv %s5337_s19  ;;  %v1137_v61 = vstv %s5341_s5  ;;  %v1143_v18 = vstv %s5343_s7  ;;  %s5456_s27 = sld [smem:[#allocation8 + $0x39]] }
 0x1de   : > { %v1149_v14 = vstv %s5353_s11  ;;  %v1161_v36 = vstv %s5284_s12  ;;  %v5436_v38 = vsel %vm8184_vm0, %v1109_v52, %v5299_v12  ;;  %v5440_v24 = vsel %vm8184_vm0, %v5299_v12, %v1113_v60  ;;  %s5464_s0 = sld [smem:[#allocation8 + $0x5d]] }
 0x1df   : > { %v1124_v15 = vsel %vm8183_vm1, %v1119_v28, %v5363_v37  ;;  %v1167_v62 = vstv %s5291_s13  ;;  %v1173_v17 = vstv %s5293_s2  ;;  %v1179_v31 = vstv %s5305_s1  ;;  %s5470_s12 = sld [smem:[#allocation8 + $0x81]] }
 0x1e0   : > { %v1128_v48 = vsel %vm8186_vm13, %v5436_v38, %v1124_v15  ;;  %v1162_v0 = vmul.f32 %v1161_v36, %v5325_v1  ;;  %v1168_v50 = vmul.f32 %v1167_v62, %v5325_v1  ;;  %v1174_v2 = vmul.f32 %v1173_v17, %v5325_v1  ;;  %s5472_s13 = sld [smem:[#allocation8 + $0x17]] }
 0x1e1   : > { %v1132_v49 = vmul.f32 %v1131_v57, %v1128_v48  ;;  %v1138_v40 = vmul.f32 %v1137_v61, %v1128_v48  ;;  %v1144_v12 = vmul.f32 %v1143_v18, %v1128_v48  ;;  %v1150_v26 = vmul.f32 %v1149_v14, %v1128_v48  ;;  %s5486_s2 = sld [smem:[#allocation8 + $0x3b]] }
 0x1e2   : > { %v1180_v52 = vmul.f32 %v1179_v31, %v5325_v1  ;;  %v8148_v30 = vstv %s5317_s6  ;;  %v8147_v51 = vstv %s5335_s23  ;;  %v8151_v7 = vstv %s5359_s20  ;;  %s5495_s1 = sld [smem:[#allocation8 + $0x5f]] }
 0x1e3   : > { %v1134_v11 = vadd.f32 %v1132_v49, %v5345_v25  ;;  %v1140_v16 = vadd.f32 %v1138_v40, %v5347_v33  ;;  %v1146_v58 = vadd.f32 %v1144_v12, %v1100_v59  ;;  %v1152_v56 = vadd.f32 %v1150_v26, %v1106_v22  ;;  %s5503_s19 = sld [smem:[#allocation8 + $0x83]] }
 0x1e4   : > { %v8154_v22 = vstv %s5373_s21  ;;  %v8152_v44 = vstv %s5381_s29  ;;  %v8153_v23 = vstv %s5396_s17  ;;  %v8159_v27 = vstv %s5398_s9  ;;  %v1123_v10 = vpop.permute.xlu0 %1122  ;;  %v1185_v60 = vpop.permute.xlu1 %1184  ;;  %s5579_s5 = sld [smem:[#allocation8 + $0x1b]] }
 0x1e5   : > { %v5474_v1 = vadd.f32 %v1162_v0, %v1134_v11  ;;  %v5476_v25 = vadd.f32 %v1168_v50, %v1140_v16  ;;  %v5478_v33 = vadd.f32 %v1174_v2, %v1146_v58  ;;  %v5480_v59 = vadd.f32 %v1180_v52, %v1152_v56  ;;  %v5501_v50 = vpop.permute.xlu2 %1196  ;;  %s5585_s7 = sld [smem:[#allocation8 + $0x3f]] }
 0x1e6   : > { %v1325_v15 = vstv %s5423_s30  ;;  %v8161_v48 = vstv %s5425_s26  ;;  %v5493_v49 = vsel %vm8183_vm1, %v5363_v37, %v1123_v10  ;;  %v1163_v37 = vmul.f32 %v1161_v36, %v5371_v53  ;;  %s5595_s11 = sld [smem:[#allocation8 + $0x63]] }
 0x1e7   : > { %v1133_v40 = vmul.f32 %v1131_v57, %v5493_v49  ;;  %v1139_v12 = vmul.f32 %v1137_v61, %v5493_v49  ;;  %v1145_v26 = vmul.f32 %v1143_v18, %v5493_v49  ;;  %v1151_v0 = vmul.f32 %v1149_v14, %v5493_v49  ;;  %s5724_s30 = sld [smem:[#allocation8 + $0x6a]] }
 0x1e8   : > { %v1169_v2 = vmul.f32 %v1167_v62, %v5371_v53  ;;  %v1175_v57 = vmul.f32 %v1173_v17, %v5371_v53  ;;  %v1181_v61 = vmul.f32 %v1179_v31, %v5371_v53  ;;  %v5516_v36 = vmul.f32 %v8148_v30, %v5309_v47 }
 0x1e9   : > { %v1135_v18 = vadd.f32 %v1133_v40, %v5349_v39  ;;  %v1141_v14 = vadd.f32 %v1139_v12, %v5351_v63  ;;  %v1147_v52 = vadd.f32 %v1145_v26, %v5355_v20  ;;  %v1153_v11 = vadd.f32 %v1151_v0, %v5357_v55 }
 0x1ea   : > { %v5521_v62 = vmul.f32 %v8147_v51, %v5309_v47  ;;  %v8160_v17 = vstv %s5432_s24  ;;  %v8149_v55 = vstv %s5454_s10  ;;  %v1213_v31 = vstv %s5456_s27  ;;  %s5693_s27 = sld [smem:[#allocation8 + $0x47]] }
 0x1eb   : > { %v5525_v53 = vadd.f32 %v1163_v37, %v1135_v18  ;;  %v5527_v39 = vadd.f32 %v1169_v2, %v1141_v14  ;;  %v5529_v63 = vadd.f32 %v1175_v57, %v1147_v52  ;;  %v5531_v20 = vadd.f32 %v1181_v61, %v1153_v11 }
 0x1ec   : > { %v8150_v58 = vstv %s5464_s0  ;;  %v8155_v56 = vstv %s5470_s12  ;;  %v1189_v10 = vpop.permute.xlu0 %1188  ;;  %v1234_v40 = vperm.slane %v5401_v45, 0  ;;  %v1244_v12 = vperm.slane %v5404_v5, 0  ;;  %v1195_v37 = vpop.permute.xlu1 %1194 }
 0x1ed   : > { %v1254_v26 = vperm.slane %v5407_v43, 0  ;;  %v1264_v0 = vperm.slane %v5412_v46, 0  ;;  %v1190_v2 = vsel %vm8182_vm3, %v1185_v60, %v5444_v34  ;;  %v1273_v57 = vstv %s5472_s13  ;;  %v5553_v28 = vpop.permute.xlu2 %1382  ;;  %s5714_s13 = sld [smem:[#allocation8 + $0x22]] }
 0x1ee   : > { %v1279_v61 = vstv %s5486_s2  ;;  %v1200_v18 = vsel %vm8181_vm4, %v1195_v37, %v5501_v50  ;;  %v1285_v14 = vstv %s5495_s1  ;;  %v1291_v52 = vstv %s5503_s19  ;;  %s5860_s2 = sld [smem:[#allocation8 + $0x8a]] }
 0x1ef   : > { %v1204_v11 = vsel %vm4235_vm8, %v1190_v2, %v1200_v18  ;;  %v1270_v32 = vsel %vm4245_vm10, %v1200_v18, %v1190_v2  ;;  %v1312_v30 = vmul.f32 %v8151_v7, %v5309_v47  ;;  %v1318_v2 = vmul.f32 %v8154_v22, %v5309_v47  ;;  %s5901_s1 = sld [smem:[#allocation8 + $0x20]] }
 0x1f0   : > { %v1208_v60 = vmul.f32 %v8149_v55, %v1204_v11  ;;  %v1214_v51 = vmul.f32 %v1213_v31, %v1204_v11  ;;  %v1220_v37 = vmul.f32 %v8150_v58, %v1204_v11  ;;  %v1226_v16 = vmul.f32 %v8155_v56, %v1204_v11  ;;  %s5913_s19 = sld [smem:[#allocation8 + $0x44]] }
 0x1f1   : > { %v5572_v18 = vmul.f32 %v8152_v44, %v5313_v54  ;;  %v5577_v55 = vmul.f32 %v8153_v23, %v5313_v54  ;;  %v1274_v44 = vmul.f32 %v1273_v57, %v1270_v32  ;;  %v1280_v23 = vmul.f32 %v1279_v61, %v1270_v32 }
 0x1f2   : > { %v1210_v58 = vadd.f32 %v1208_v60, %v5474_v1  ;;  %v1216_v11 = vadd.f32 %v1214_v51, %v5476_v25  ;;  %v1222_v7 = vadd.f32 %v1220_v37, %v5478_v33  ;;  %v1228_v47 = vadd.f32 %v1226_v16, %v5480_v59 }
 0x1f3   : > { %v1286_v22 = vmul.f32 %v1285_v14, %v1270_v32  ;;  %v1292_v56 = vmul.f32 %v1291_v52, %v1270_v32  ;;  %v5602_v59 = vmul.f32 %v8159_v27, %v5313_v54  ;;  %v1326_v16 = vmul.f32 %v1325_v15, %v5436_v38 }
 0x1f4   : > { %v1238_v1 = vadd.f32 %v1234_v40, %v1210_v58  ;;  %v1248_v51 = vadd.f32 %v1244_v12, %v1216_v11  ;;  %v1258_v25 = vadd.f32 %v1254_v26, %v1222_v7  ;;  %v1268_v33 = vadd.f32 %v1264_v0, %v1228_v47  ;;  %v1199_v40 = vpop.permute.xlu0 %1198  ;;  %v5615_v7 = vpop.permute.xlu1 %1380 }
 0x1f5   : > { %v1332_v32 = vmul.f32 %v8161_v48, %v5436_v38  ;;  %v5613_v58 = vmul.f32 %v8160_v17, %v5436_v38  ;;  %v8444_v37 = vstv %s5317_s6  ;;  %v8445_v47 = vstv %s5449_s25  ;;  %s5639_s6 = sld [smem:[#allocation8 + $0x89]] }
 0x1f6   : > { %v1276_v12 = vadd.f32 %v1274_v44, %v1238_v1  ;;  %v1282_v26 = vadd.f32 %v1280_v23, %v1248_v51  ;;  %v1288_v0 = vadd.f32 %v1286_v22, %v1258_v25  ;;  %v1294_v60 = vadd.f32 %v1292_v56, %v1268_v33  ;;  %v5633_v44 = vpop.permute.xlu2 %1399 }
 0x1f7   : > { %v5624_v11 = vmul.f32 %v8444_v37, %v5385_v19  ;;  %v1344_v27 = vmul.f32 %v8445_v47, %v5436_v38  ;;  %v1191_v17 = vsel %vm8182_vm3, %v5444_v34, %v1189_v10  ;;  %v1201_v48 = vsel %vm8181_vm4, %v5501_v50, %v1199_v40 }
 0x1f8   : > { %v1302_v22 = vadd.f32 %v5516_v36, %v1276_v12  ;;  %v1308_v23 = vadd.f32 %v5521_v62, %v1282_v26  ;;  %v1314_v56 = vadd.f32 %v1312_v30, %v1288_v0  ;;  %v1320_v38 = vadd.f32 %v1318_v2, %v1294_v60 }
 0x1f9   : > { %v8446_v34 = vstv %s5335_s23  ;;  %v1235_v10 = vperm.slane %v5401_v45, 1  ;;  %v1205_v1 = vsel %vm4241_vm9, %v1191_v17, %v1201_v48  ;;  %v1271_v36 = vsel %vm4249_vm11, %v1201_v48, %v1191_v17  ;;  %s5654_s23 = sld [smem:[#allocation8 + $0x45]] }
 0x1fa   : > { %v1307_v50 = vmul.f32 %v8446_v34, %v5385_v19  ;;  %v1328_v30 = vadd.f32 %v1326_v16, %v1302_v22  ;;  %v1245_v62 = vperm.slane %v5404_v5, 1  ;;  %v1255_v2 = vperm.slane %v5407_v43, 1 }
 0x1fb   : > { %v1265_v51 = vperm.slane %v5412_v46, 1  ;;  %v8447_v25 = vstv %s5454_s10  ;;  %v1215_v33 = vmul.f32 %v1213_v31, %v1205_v1  ;;  %v8448_v40 = vstv %s5464_s0  ;;  %s5675_s10 = sld [smem:[#allocation8 + $0x8d]] }
 0x1fc   : > { %v1209_v45 = vmul.f32 %v8447_v25, %v1205_v1  ;;  %v1221_v12 = vmul.f32 %v8448_v40, %v1205_v1  ;;  %v8449_v48 = vstv %s5470_s12  ;;  %v8450_v5 = vstv %s5359_s20  ;;  %v5681_v47 = vpop.permute.xlu0 %1384  ;;  %s5683_s20 = sld [smem:[#allocation8 + $0x23]] }
 0x1fd   : > { %v1227_v17 = vmul.f32 %v8449_v48, %v1205_v1  ;;  %v1313_v43 = vmul.f32 %v8450_v5, %v5385_v19  ;;  %v1323_v46 = vsel %vm8185_vm2, %v5493_v49, %v5440_v24  ;;  %v1334_v16 = vadd.f32 %v1332_v32, %v1308_v23  ;;  %s5700_s0 = sld [smem:[#allocation8 + $0x6b]] }
 0x1fe   : > { %v1275_v26 = vmul.f32 %v1273_v57, %v1271_v36  ;;  %v1211_v31 = vadd.f32 %v1209_v45, %v5525_v53  ;;  %v1217_v0 = vadd.f32 %v1215_v33, %v5527_v39  ;;  %v1223_v60 = vadd.f32 %v1221_v12, %v5529_v63  ;;  %v5691_v53 = vpop.permute.xlu1 %1397  ;;  %v5698_v23 = vpop.permute.xlu2 %1409  ;;  %s5709_s12 = sld [smem:[#allocation8 + $0x8f]] }
 0x1ff   : > { %v1229_v37 = vadd.f32 %v1227_v17, %v5531_v20  ;;  %v1281_v24 = vmul.f32 %v1279_v61, %v1271_v36  ;;  %v1287_v49 = vmul.f32 %v1285_v14, %v1271_v36  ;;  %v1293_v57 = vmul.f32 %v1291_v52, %v1271_v36 }
 0x200   : > { %v5696_v39 = vadd.f32 %v5572_v18, %v1328_v30  ;;  %v1239_v63 = vadd.f32 %v1235_v10, %v1211_v31  ;;  %v1249_v20 = vadd.f32 %v1245_v62, %v1217_v0  ;;  %v1259_v32 = vadd.f32 %v1255_v2, %v1223_v60 }
 0x201   : > { %v1269_v22 = vadd.f32 %v1265_v51, %v1229_v37  ;;  %v8451_v61 = vstv %s5373_s21  ;;  %v1327_v52 = vmul.f32 %v1325_v15, %v1323_v46  ;;  %v8452_v34 = vstv %s5425_s26  ;;  %s5721_s21 = sld [smem:[#allocation8 + $0x46]] }
 0x202   : > { %v1319_v14 = vmul.f32 %v8451_v61, %v5385_v19  ;;  %v1333_v1 = vmul.f32 %v8452_v34, %v1323_v46  ;;  %v5712_v18 = vadd.f32 %v5577_v55, %v1334_v16  ;;  %v1277_v10 = vadd.f32 %v1275_v26, %v1239_v63  ;;  %s5738_s26 = sld [smem:[#allocation8 + $0x8e]] }
 0x203   : > { %v1283_v36 = vadd.f32 %v1281_v24, %v1249_v20  ;;  %v1289_v30 = vadd.f32 %v1287_v49, %v1259_v32  ;;  %v1295_v62 = vadd.f32 %v1293_v57, %v1269_v22  ;;  %v8453_v19 = vstv %s5432_s24  ;;  %s5742_s24 = sld [smem:[#allocation8 + $0x1c]] }
 0x204   : > { %v1339_v2 = vmul.f32 %v8453_v19, %v1323_v46  ;;  %v8454_v15 = vstv %s5449_s25  ;;  %v1340_v25 = vadd.f32 %v5613_v58, %v1314_v56  ;;  %v1346_v45 = vadd.f32 %v1344_v27, %v1320_v38  ;;  %v5740_v31 = vpop.permute.xlu0 %1401  ;;  %s5848_s25 = sld [smem:[#allocation8 + $0x66]] }
 0x205   : > { %v1345_v51 = vmul.f32 %v8454_v15, %v1323_v46  ;;  %v1303_v55 = vadd.f32 %v5624_v11, %v1277_v10  ;;  %v1309_v33 = vadd.f32 %v1307_v50, %v1283_v36  ;;  %v1315_v40 = vadd.f32 %v1313_v43, %v1289_v30  ;;  %v1374_v11 = vld [vmem:[#allocation2 + $0x3] ss:$4 sm:$0x3] }
 0x206   : > { %v1321_v12 = vadd.f32 %v1319_v14, %v1295_v62  ;;  %v8455_v48 = vstv %s5409_s16  ;;  %v8456_v5 = vstv %s5381_s29  ;;  %v8457_v58 = vstv %s5396_s17  ;;  %v1408_v24 = vpop.permute.xlu1 %1407  ;;  %s5752_s29 = sld [smem:[#allocation8 + $0x40]]  ;;  %v5769_v61 = vpop.permute.xlu2 %1447 }
 0x207   : > { %v1370_v17 = vmul.f32 %v8455_v48, %v5313_v54  ;;  %v1353_v46 = vmul.f32 %v8456_v5, %v5390_v29  ;;  %v1359_v27 = vmul.f32 %v8457_v58, %v5390_v29  ;;  %v8458_v56 = vstv %s5398_s9  ;;  %s5771_s17 = sld [smem:[#allocation8 + $0x88]] }
 0x208   : > { %v1365_v38 = vmul.f32 %v8458_v56, %v5390_v29  ;;  %v1329_v50 = vadd.f32 %v1327_v52, %v1303_v55  ;;  %v1335_v43 = vadd.f32 %v1333_v1, %v1309_v33  ;;  %v1341_v16 = vadd.f32 %v1339_v2, %v1315_v40  ;;  %s5789_s9 = sld [smem:[#allocation8 + $0x1e]] }
 0x209   : > { %v1347_v26 = vadd.f32 %v1345_v51, %v1321_v12  ;;  %v8459_v54 = vstv %s5267_s3  ;;  %v8460_v60 = vmov %v8455_v48  ;;  %v5755_v49 = vadd.f32 %v5602_v59, %v1340_v25  ;;  %s5759_s3 = sld [smem:[#allocation8 + $0x64]] }
 0x20a   : > { %v5747_v0 = vmul.f32 %v8459_v54, %v8443_v35  ;;  %v1371_v37 = vmul.f32 %v8460_v60, %v5390_v29  ;;  %v5757_v57 = vadd.f32 %v1370_v17, %v1346_v45  ;;  %v1391_v63 = vperm.slane %v1374_v11, 0  ;;  %s5798_s16 = sld [smem:[#allocation8 + $0x42]] }
 0x20b   : > { %v5761_v35 = vadd.f32 %v1353_v46, %v1329_v50  ;;  %v5763_v29 = vadd.f32 %v1359_v27, %v1335_v43  ;;  %v5765_v20 = vadd.f32 %v1365_v38, %v1341_v16  ;;  %v1392_v32 = vperm.slane %v1374_v11, 1 }
 0x20c   : > { %v1422_v59 = vstv %s5579_s5  ;;  %v1428_v22 = vstv %s5585_s7  ;;  %v5773_v14 = vadd.f32 %v1371_v37, %v1347_v26  ;;  %v1434_v52 = vstv %s5595_s11  ;;  %v1412_v48 = vpop.permute.xlu0 %1411  ;;  %s5936_s5 = sld [smem:[#allocation8 + $0x8c]]  ;;  %s8526_s7 = smov 94  }
 0x20d   : > { %v1440_v34 = vstv %s5597_s14  ;;  %v8167_v1 = vstv %s5617_s4  ;;  %v8166_v10 = vstv %s5619_s22  ;;  %v8165_v36 = vstv %s5635_s15  ;;  %s5927_s14 = sld [smem:[#allocation8 + $0x68]]  ;;  %s8527_s11 = smov 96  }
 0x20e   : > { %v8168_v30 = vstv %s5639_s6  ;;  %v1387_v62 = vsel %vm376_vm12, %v5553_v28, %v5681_v47  ;;  %v1636_v19 = vstv %s5649_s8  ;;  %v1642_v2 = vstv %s5654_s23  ;;  %v1446_v58 = vpop.permute.xlu1 %1445  ;;  %v5846_v46 = vpop.permute.xlu2 %1457  ;;  %s8524_s8 = smov 17   ;;  %s8529_s23 = smov 127  }
 0x20f   : > { %v1648_v15 = vstv %s5664_s28  ;;  %v1654_v51 = vstv %s5675_s10  ;;  %v1688_v25 = vstv %s5683_s20  ;;  %v1386_v45 = vsel %vm376_vm12, %v5615_v7, %v5553_v28  ;;  %s5999_s28 = sld [smem:[#allocation9 + $0x2]]  ;;  %s8530_s10 = smov 110  }
 0x210   : > { %v8169_v55 = vstv %s5693_s27  ;;  %v8170_v33 = vstv %s5700_s0  ;;  %v1413_v47 = vsel %vm8187_vm15, %v1408_v24, %v5698_v23  ;;  %v1396_v40 = vsel %vm4241_vm9, %v1387_v62, %v1392_v32  ;;  %s8531_s20 = smov 112  }
 0x211   : > { %v8171_v12 = vstv %s5709_s12  ;;  %v8173_v17 = vstv %s5714_s13  ;;  %v8172_v28 = vstv %s5721_s21  ;;  %v1403_v7 = vsel %vm8188_vm14, %v5691_v53, %v5633_v44 }
 0x212   : > { %v1395_v56 = vsel %vm4235_vm8, %v1386_v45, %v1391_v63  ;;  %v1492_v38 = vsel %vm4249_vm11, %v1392_v32, %v1387_v62  ;;  %v1417_v11 = vsel %vm4235_vm8, %v1403_v7, %v1413_v47  ;;  %v1491_v53 = vsel %vm4245_vm10, %v1391_v63, %v1386_v45 }
 0x213   : > { %v1424_v43 = vmul.f32 %v1422_v59, %v1396_v40  ;;  %v1430_v54 = vmul.f32 %v1428_v22, %v1396_v40  ;;  %v1436_v60 = vmul.f32 %v1434_v52, %v1396_v40  ;;  %v1442_v37 = vmul.f32 %v1440_v34, %v1396_v40 }
 0x214   : > { %v1493_v24 = vsel %vm4245_vm10, %v1413_v47, %v1403_v7  ;;  %v5834_v63 = vmul.f32 %v8167_v1, %v1492_v38  ;;  %v5838_v32 = vmul.f32 %v8166_v10, %v1492_v38  ;;  %v5842_v62 = vmul.f32 %v8165_v36, %v1492_v38 }
 0x215   : > { %v1419_v45 = vsel %vm8186_vm13, %v1417_v11, %v1395_v56  ;;  %v5852_v47 = vmul.f32 %v8168_v30, %v1492_v38  ;;  %v1404_v7 = vsel %vm8188_vm14, %v5633_v44, %v5740_v31  ;;  %v1414_v36 = vsel %vm8187_vm15, %v5698_v23, %v1412_v48  ;;  %v5883_v48 = vpop.permute.xlu0 %1449 }
 0x216   : > { %v5864_v56 = vsel %vm8186_vm13, %v1493_v24, %v1491_v53  ;;  %v5868_v1 = vmul.f32 %v1636_v19, %v1417_v11  ;;  %v5872_v30 = vmul.f32 %v1642_v2, %v1417_v11  ;;  %v5877_v31 = vmul.f32 %v1648_v15, %v1417_v11  ;;  %v1456_v5 = vpop.permute.xlu1 %1455 }
 0x217   : > { %v5881_v23 = vmul.f32 %v1654_v51, %v1417_v11  ;;  %v1423_v53 = vmul.f32 %v1422_v59, %v1419_v45  ;;  %v1429_v10 = vmul.f32 %v1428_v22, %v1419_v45  ;;  %v5891_v26 = vmul.f32 %v1688_v25, %v1493_v24 }
 0x218   : > { %v5895_v16 = vmul.f32 %v8169_v55, %v1493_v24  ;;  %v1418_v44 = vsel %vm4241_vm9, %v1404_v7, %v1414_v36  ;;  %v1435_v50 = vmul.f32 %v1434_v52, %v1419_v45  ;;  %v5905_v11 = vmul.f32 %v8170_v33, %v1493_v24 }
 0x219   : > { %v1494_v59 = vsel %vm4249_vm11, %v1414_v36, %v1404_v7  ;;  %v1441_v22 = vmul.f32 %v1440_v34, %v1419_v45  ;;  %v1461_v55 = vsel %vm8183_vm1, %v1456_v5, %v5846_v46  ;;  %v5917_v27 = vmul.f32 %v8171_v12, %v1493_v24 }
 0x21a   : > { %v1451_v52 = vsel %vm8184_vm0, %v1446_v58, %v5769_v61  ;;  %v5922_v33 = vadd.f32 %v1424_v43, %v5761_v35  ;;  %v5925_v34 = vadd.f32 %v1430_v54, %v5763_v29  ;;  %v1634_v36 = vsel %vm8185_vm2, %v1396_v40, %v1418_v44 }
 0x21b   : > { %v1425_v5 = vadd.f32 %v1423_v53, %v5696_v39  ;;  %v1431_v58 = vadd.f32 %v1429_v10, %v5712_v18  ;;  %v5934_v35 = vadd.f32 %v1436_v60, %v5765_v20  ;;  %v5940_v29 = vsel %vm8185_vm2, %v1492_v38, %v1494_v59 }
 0x21c   : > { %8461 = vst [vmem:[#allocation50_spill] sm:$0xff] %v5940_v29  ;;  %v1437_v40 = vadd.f32 %v1435_v50, %v5755_v49  ;;  %v1465_v39 = vsel %vm8186_vm13, %v1451_v52, %v1461_v55  ;;  %v5946_v18 = vadd.f32 %v1442_v37, %v5773_v14  ;;  %v5950_v20 = vmul.f32 %v8173_v17, %v1451_v52  ;;  %v5971_v50 = vpop.permute.xlu2 %1523 }
 0x21d   : > { %v1443_v10 = vadd.f32 %v1441_v22, %v5757_v57  ;;  %v5957_v54 = vmul.f32 %v1636_v19, %v1634_v36  ;;  %v5961_v49 = vmul.f32 %v1642_v2, %v1634_v36  ;;  %v5965_v14 = vmul.f32 %v1648_v15, %v1634_v36  ;;  %v1460_v15 = vpop.permute.xlu0 %1459 }
 0x21e   : > { %v5969_v55 = vmul.f32 %v8172_v28, %v1451_v52  ;;  %v5975_v57 = vmul.f32 %v1654_v51, %v1634_v36  ;;  %v5980_v60 = vmul.f32 %v1688_v25, %v5940_v29  ;;  %v8465_v19 = vstv %s5742_s24  ;;  %v1522_v36 = vpop.permute.xlu1 %1521 }
 0x21f   : > { %8462 = vst [vmem:[#allocation51_spill] sm:$0xff] %v5965_v14  ;;  %v1469_v37 = vmul.f32 %v8465_v19, %v1465_v39  ;;  %v8466_v2 = vstv %s5752_s29  ;;  %v8467_v45 = vstv %s5693_s27  ;;  %v8469_v44 = vstv %s5724_s30  ;;  %s6271_s27 = sld [smem:[#allocation11 + $0x4]] }
 0x220   : > { %8463 = vst [vmem:[#allocation52_spill] sm:$0xff] %v5975_v57  ;;  %v1475_v24 = vmul.f32 %v8466_v2, %v1465_v39  ;;  %v5989_v7 = vmul.f32 %v8467_v45, %v5940_v29  ;;  %v5993_v53 = vmul.f32 %v8469_v44, %v1451_v52  ;;  %v8470_v51 = vstv %s5759_s3 }
 0x221   : > { %8464 = vst [vmem:[#allocation53_spill] sm:$0xff] %v5980_v60  ;;  %v1481_v59 = vmul.f32 %v8470_v51, %v1465_v39  ;;  %v8471_v25 = vstv %s5771_s17  ;;  %v8472_v19 = vstv %s5738_s26  ;;  %v1571_v45 = vperm.slane %v5415_v8, 0 }
 0x222   : > { %8468 = vst [vmem:[#allocation54_spill] sm:$0xff] %v5989_v7  ;;  %v1487_v22 = vmul.f32 %v8471_v25, %v1465_v39  ;;  %v6003_v2 = vmul.f32 %v8472_v19, %v1451_v52  ;;  %v1581_v12 = vperm.slane %v5418_v13, 0  ;;  %v1591_v44 = vperm.slane %v5421_v41, 0 }
 0x223   : > { %v1462_v39 = vsel %vm8183_vm1, %v5846_v46, %v1460_v15  ;;  %v1601_v51 = vperm.slane %v5747_v0, 0  ;;  %v1471_v52 = vadd.f32 %v1469_v37, %v1425_v5  ;;  %v1477_v19 = vadd.f32 %v1475_v24, %v1431_v58 }
 0x224   : > { %v1483_v38 = vadd.f32 %v1481_v59, %v1437_v40  ;;  %v1489_v4 = vadd.f32 %v1487_v22, %v1443_v10  ;;  %v8473_v7 = vstv %s5617_s4  ;;  %v8474_v29 = vstv %s5619_s22  ;;  %s6094_s4 = sld [smem:[#allocation9 + $0x1]] }
 0x225   : > { %v1499_v60 = vmul.f32 %v8473_v7, %v5864_v56  ;;  %v1505_v57 = vmul.f32 %v8474_v29, %v5864_v56  ;;  %v1452_v46 = vsel %vm8184_vm0, %v5769_v61, %v5883_v48  ;;  %v8475_v15 = vstv %s5742_s24  ;;  %v1526_v43 = vpop.permute.xlu0 %1525  ;;  %s6102_s22 = sld [smem:[#allocation9]] }
 0x226   : > { %v1470_v25 = vmul.f32 %v8475_v15, %v1462_v39  ;;  %v8476_v5 = vstv %s5635_s15  ;;  %v8477_v37 = vstv %s5639_s6  ;;  %v8478_v10 = vstv %s5752_s29  ;;  %s6108_s15 = sld [smem:[#allocation9 + $0x3]]  ;;  %s8528_s6 = smov 95  }
 0x227   : > { %v1511_v58 = vmul.f32 %v8476_v5, %v5864_v56  ;;  %v1517_v40 = vmul.f32 %v8477_v37, %v5864_v56  ;;  %v1476_v24 = vmul.f32 %v8478_v10, %v1462_v39  ;;  %v8479_v59 = vstv %s5759_s3  ;;  %v1534_v56 = vpop.permute.xlu2 %1533  ;;  %v1532_v37 = vpop.permute.xlu1 %1531  ;;  %s6295_s24 = sld [smem:[#allocation11 + $0x6c]] }
 0x228   : > { %v1482_v7 = vmul.f32 %v8479_v59, %v1462_v39  ;;  %v1501_v17 = vadd.f32 %v1499_v60, %v1471_v52  ;;  %v1507_v61 = vadd.f32 %v1505_v57, %v1477_v19  ;;  %v8480_v5 = vstv %s5771_s17  ;;  %s6297_s29 = sld [smem:[#allocation11 + $0x2]] }
 0x229   : > { %v1488_v28 = vmul.f32 %v8480_v5, %v1462_v39  ;;  %v1513_v10 = vadd.f32 %v1511_v58, %v1483_v38  ;;  %v1519_v59 = vadd.f32 %v1517_v40, %v1489_v4  ;;  %v1472_v57 = vadd.f32 %v1470_v25, %v5922_v33  ;;  %s6299_s3 = sld [smem:[#allocation11 + $0x26]] }
 0x22a   : > { %v6046_v60 = vsel %vm8185_vm2, %v1462_v39, %v1452_v46  ;;  %v1527_v52 = vsel %vm8182_vm3, %v1522_v36, %v5971_v50  ;;  %v1537_v19 = vsel %vm8181_vm4, %v1532_v37, %v1534_v56  ;;  %v1478_v5 = vadd.f32 %v1476_v24, %v5925_v34  ;;  %s6301_s17 = sld [smem:[#allocation11 + $0x4a]] }
 0x22b   : > { %v1484_v38 = vadd.f32 %v1482_v7, %v5934_v35  ;;  %v1541_v4 = vsel %vm4235_vm8, %v1527_v52, %v1537_v19  ;;  %v1607_v33 = vsel %vm4245_vm10, %v1537_v19, %v1527_v52  ;;  %v8481_v39 = vstv %s5789_s9 }
 0x22c   : > { %v1545_v25 = vmul.f32 %v8481_v39, %v1541_v4  ;;  %v8482_v46 = vstv %s5798_s16  ;;  %v8483_v58 = vstv %s5848_s25  ;;  %v8484_v37 = vstv %s5860_s2 }
 0x22d   : > { %v1551_v36 = vmul.f32 %v8482_v46, %v1541_v4  ;;  %v1557_v40 = vmul.f32 %v8483_v58, %v1541_v4  ;;  %v1563_v34 = vmul.f32 %v8484_v37, %v1541_v4  ;;  %v1490_v24 = vadd.f32 %v1488_v28, %v5946_v18  ;;  %v1536_v14 = vpop.permute.xlu0 %1535 }
 0x22e   : > { %v8485_v35 = vstv %s5714_s13  ;;  %v8487_v29 = vstv %s5721_s21  ;;  %v8489_v52 = vstv %s5724_s30  ;;  %v1547_v39 = vadd.f32 %v1545_v25, %v1501_v17  ;;  %s6283_s13 = sld [smem:[#allocation11 + $0x70]] }
 0x22f   : > { %v6069_v7 = vmul.f32 %v8485_v35, %v6046_v60  ;;  %v6074_v15 = vmul.f32 %v8487_v29, %v6046_v60  ;;  %v6079_v19 = vmul.f32 %v8489_v52, %v6046_v60  ;;  %v1553_v46 = vadd.f32 %v1551_v36, %v1507_v61  ;;  %s6285_s21 = sld [smem:[#allocation11]] }
 0x230   : > { %v1559_v48 = vadd.f32 %v1557_v40, %v1513_v10  ;;  %v1565_v58 = vadd.f32 %v1563_v34, %v1519_v59  ;;  %v8490_v22 = vstv %s5901_s1  ;;  %v8491_v37 = vstv %s5913_s19  ;;  %s6287_s30 = sld [smem:[#allocation11 + $0x24]] }
 0x231   : > { %8486 = vst [vmem:[#allocation55_spill] sm:$0xff] %v6069_v7  ;;  %v1611_v4 = vmul.f32 %v8490_v22, %v1607_v33  ;;  %v1617_v28 = vmul.f32 %v8491_v37, %v1607_v33  ;;  %v8492_v18 = vstv %s5927_s14  ;;  %v8493_v35 = vstv %s5936_s5  ;;  %s6357_s19 = sld [smem:[#allocation11 + $0x49]] }
 0x232   : > { %8488 = vst [vmem:[#allocation58_spill] sm:$0xff] %v6074_v15  ;;  %v1623_v21 = vmul.f32 %v8492_v18, %v1607_v33  ;;  %v1629_v6 = vmul.f32 %v8493_v35, %v1607_v33  ;;  %v1575_v42 = vadd.f32 %v1571_v45, %v1547_v39  ;;  %v1585_v7 = vadd.f32 %v1581_v12, %v1553_v46  ;;  %s6370_s14 = sld [smem:[#allocation11 + $0x6d]] }
 0x233   : > { %v1595_v29 = vadd.f32 %v1591_v44, %v1559_v48  ;;  %v1605_v15 = vadd.f32 %v1601_v51, %v1565_v58  ;;  %v1528_v52 = vsel %vm8182_vm3, %v5971_v50, %v1526_v43  ;;  %v1502_v17 = vadd.f32 %v5834_v63, %v1472_v57  ;;  %s6374_s5 = sld [smem:[#allocation11 + $0x4e]] }
 0x234   : > { %v1508_v61 = vadd.f32 %v5838_v32, %v1478_v5  ;;  %v1538_v22 = vsel %vm8181_vm4, %v1534_v56, %v1536_v14  ;;  %v1613_v10 = vadd.f32 %v1611_v4, %v1575_v42  ;;  %v1619_v59 = vadd.f32 %v1617_v28, %v1585_v7 }
 0x235   : > { %v1625_v33 = vadd.f32 %v1623_v21, %v1595_v29  ;;  %v1631_v12 = vadd.f32 %v1629_v6, %v1605_v15  ;;  %v1514_v45 = vadd.f32 %v5842_v62, %v1484_v38  ;;  %v1520_v43 = vadd.f32 %v5852_v47, %v1490_v24 }
 0x236   : > { %v1542_v63 = vsel %vm4241_vm9, %v1528_v52, %v1538_v22  ;;  %v1608_v32 = vsel %vm4249_vm11, %v1538_v22, %v1528_v52  ;;  %v1639_v42 = vadd.f32 %v5868_v1, %v1613_v10  ;;  %v1645_v21 = vadd.f32 %v5872_v30, %v1619_v59 }
 0x237   : > { %v1651_v6 = vadd.f32 %v5877_v31, %v1625_v33  ;;  %v1657_v62 = vadd.f32 %v5881_v23, %v1631_v12  ;;  %v8494_v47 = vstv %s5789_s9  ;;  %v8495_v50 = vstv %s5798_s16  ;;  %s6307_s9 = sld [smem:[#allocation11 + $0x6e]] }
 0x238   : > { %v1546_v14 = vmul.f32 %v8494_v47, %v1542_v63  ;;  %v1552_v44 = vmul.f32 %v8495_v50, %v1542_v63  ;;  %v8496_v51 = vstv %s5848_s25  ;;  %v8497_v15 = vstv %s5860_s2  ;;  %s6311_s16 = sld [smem:[#allocation11 + $0x6]] }
 0x239   : > { %v1558_v48 = vmul.f32 %v8496_v51, %v1542_v63  ;;  %v1564_v1 = vmul.f32 %v8497_v15, %v1542_v63  ;;  %v1665_v30 = vadd.f32 %v5950_v20, %v1639_v42  ;;  %v1671_v31 = vadd.f32 %v5969_v55, %v1645_v21  ;;  %v8509_v63 = vld [vmem:[#allocation50_spill] sm:$0xff]  ;;  %v8515_v15 = vld [vmem:[#allocation53_spill] sm:$0xff]  ;;  %s6317_s25 = sld [smem:[#allocation11 + $0x2a]] }
 0x23a   : > { %v1677_v56 = vadd.f32 %v5993_v53, %v1651_v6  ;;  %v1683_v23 = vadd.f32 %v6003_v2, %v1657_v62  ;;  %v1548_v57 = vadd.f32 %v1546_v14, %v1502_v17  ;;  %v1554_v5 = vadd.f32 %v1552_v44, %v1508_v61  ;;  %v8514_v50 = vld [vmem:[#allocation58_spill] sm:$0xff]  ;;  %s6335_s2 = sld [smem:[#allocation11 + $0x1]] }
 0x23b   : > { %v1560_v38 = vadd.f32 %v1558_v48, %v1514_v45  ;;  %v1566_v25 = vadd.f32 %v1564_v1, %v1520_v43  ;;  %v8498_v36 = vstv %s5901_s1  ;;  %v8499_v34 = vmov %v8491_v37  ;;  %v8508_v43 = vld [vmem:[#allocation52_spill] sm:$0xff]  ;;  %s6347_s1 = sld [smem:[#allocation11 + $0x25]] }
 0x23c   : > { %v1612_v40 = vmul.f32 %v8498_v36, %v1608_v32  ;;  %v1618_v24 = vmul.f32 %v8499_v34, %v1608_v32  ;;  %v8500_v7 = vmov %v8492_v18  ;;  %v8501_v20 = vmov %v8493_v35 }
 0x23d   : > { %v1624_v39 = vmul.f32 %v8500_v7, %v1608_v32  ;;  %v1630_v46 = vmul.f32 %v8501_v20, %v1608_v32  ;;  %v8502_v55 = vperm.slane %v5415_v8, 1  ;;  %v8503_v2 = vperm.slane %v5418_v13, 1 }
 0x23e   : > { %v8504_v4 = vperm.slane %v5421_v41, 1  ;;  %v8505_v28 = vperm.slane %v5747_v0, 1  ;;  %v8506_v35 = vstv %s5738_s26  ;;  %v1703_v52 = vadd.f32 %v5905_v11, %v1677_v56  ;;  %v8507_v11 = vld [vmem:[#allocation51_spill] sm:$0xff]  ;;  %s6293_s26 = sld [smem:[#allocation11 + $0x48]] }
 0x23f   : > { %v1576_v53 = vadd.f32 %v8502_v55, %v1548_v57  ;;  %v1586_v58 = vadd.f32 %v8503_v2, %v1554_v5  ;;  %v1682_v29 = vmul.f32 %v8506_v35, %v6046_v60  ;;  %v1697_v8 = vadd.f32 %v5895_v16, %v1671_v31 }
 0x240   : > { %v1596_v37 = vadd.f32 %v8504_v4, %v1560_v38  ;;  %v1606_v18 = vadd.f32 %v8505_v28, %v1566_v25  ;;  %v1716_v17 = vstv %s6094_s4  ;;  %v1691_v41 = vadd.f32 %v5891_v26, %v1665_v30  ;;  %v8516_v30 = vld [vmem:[#allocation54_spill] sm:$0xff]  ;;  %s6394_s4 = sld [smem:[#allocation11 + $0x8]] }
 0x241   : > { %v1614_v61 = vadd.f32 %v1612_v40, %v1576_v53  ;;  %v1620_v13 = vadd.f32 %v1618_v24, %v1586_v58  ;;  %v1712_v59 = vstv %s6102_s22  ;;  %v1709_v0 = vadd.f32 %v5917_v27, %v1683_v23  ;;  %v8513_v27 = vld [vmem:[#allocation55_spill] sm:$0xff]  ;;  %s6410_s22 = sld [smem:[#allocation11 + $0x2c]] }
 0x242   : > { %v1626_v22 = vadd.f32 %v1624_v39, %v1596_v37  ;;  %v1632_v10 = vadd.f32 %v1630_v46, %v1606_v18  ;;  %v1724_v33 = vstv %s6108_s15  ;;  %v8510_v32 = vstv %s5700_s0  ;;  %s6273_s0 = sld [smem:[#allocation11 + $0x28]] }
 0x243   : > { %v1640_v60 = vadd.f32 %v5957_v54, %v1614_v61  ;;  %v1646_v12 = vadd.f32 %v5961_v49, %v1620_v13  ;;  %v1702_v42 = vmul.f32 %v8510_v32, %v8509_v63  ;;  %v8511_v21 = vstv %s5709_s12  ;;  %s6279_s12 = sld [smem:[#allocation11 + $0x4c]] }
 0x244   : > { %v1652_v45 = vadd.f32 %v8507_v11, %v1626_v22  ;;  %v1658_v16 = vadd.f32 %v8508_v43, %v1632_v10  ;;  %v1708_v6 = vmul.f32 %v8511_v21, %v8509_v63  ;;  %v8512_v62 = vstv %s5999_s28  ;;  %s6378_s28 = sld [smem:[#allocation11 + $0x72]] }
 0x245   : > { %v1721_v26 = vadd.f32 %v8512_v62, %v1703_v52  ;;  %v1717_v47 = vadd.f32 %v1716_v17, %v1697_v8  ;;  %v1666_v14 = vadd.f32 %v8513_v27, %v1640_v60  ;;  %v1672_v54 = vadd.f32 %v8514_v50, %v1646_v12  ;;  %s6426_s15 = sld [smem:[#allocation11 + $0x50]] }
 0x246   : > { %v1678_v49 = vadd.f32 %v6079_v19, %v1652_v45  ;;  %v1684_v44 = vadd.f32 %v1682_v29, %v1658_v16  ;;  %v1713_v51 = vadd.f32 %v1712_v59, %v1691_v41  ;;  %v1725_v48 = vadd.f32 %v1724_v33, %v1709_v0 }
 0x247   : > { %v1692_v1 = vadd.f32 %v8515_v15, %v1666_v14  ;;  %v1698_v31 = vadd.f32 %v8516_v30, %v1672_v54  ;;  %vm1739_vm5 = vcmp.ge.f32.partialorder %v1721_v26, 0.0  ;;  %v1741_v57 = vmul.f32 0.2, %v1721_v26 }
 0x248   : > { %v1704_v56 = vadd.f32 %v1702_v42, %v1678_v49  ;;  %v1710_v23 = vadd.f32 %v1708_v6, %v1684_v44  ;;  %vm1754_vm4 = vcmask 1040384   ;;  %vm1733_vm3 = vcmp.ge.f32.partialorder %v1717_v47, 0.0 }
 0x249   : > { %v8517_v5 = vmov %v8512_v62  ;;  %v1718_v25 = vadd.f32 %v1716_v17, %v1698_v31  ;;  %v1714_v36 = vadd.f32 %v1712_v59, %v1692_v1  ;;  %v1735_v34 = vmul.f32 0.2, %v1717_v47 }
 0x24a   : > { %v1722_v38 = vadd.f32 %v8517_v5, %v1704_v56  ;;  %v1726_v40 = vadd.f32 %v1724_v33, %v1710_v23  ;;  %v1729_v19 = vmul.f32 0.2, %v1713_v51  ;;  %v1747_v24 = vmul.f32 0.2, %v1725_v48 }
 0x24b   : > { %vm1734_vm0 = vcmp.ge.f32.partialorder %v1718_v25, 0.0  ;;  %v1736_v39 = vmul.f32 0.2, %v1718_v25  ;;  %vm1728_vm2 = vcmp.ge.f32.partialorder %v1714_v36, 0.0  ;;  %v1730_v20 = vmul.f32 0.2, %v1714_v36 }
 0x24c   : > { %vm1740_vm1 = vcmp.ge.f32.partialorder %v1722_v38, 0.0  ;;  %v1742_v7 = vmul.f32 0.2, %v1722_v38  ;;  %vm1746_vm13 = vcmp.ge.f32.partialorder %v1726_v40, 0.0  ;;  %v1748_v46 = vmul.f32 0.2, %v1726_v40 }
 0x24d   : > { %v6169_v53 = vsel %vm1734_vm0, %v1718_v25, %v1736_v39  ;;  %vm1727_vm15 = vcmp.ge.f32.partialorder %v1713_v51, 0.0  ;;  %vm1745_vm14 = vcmp.ge.f32.partialorder %v1725_v48, 0.0  ;;  %v6173_v4 = vsel %vm1728_vm2, %v1714_v36, %v1730_v20 }
 0x24e   : > { %v6167_v55 = vsel %vm1740_vm1, %v1722_v38, %v1742_v7  ;;  %8519 = vst [vmem:[#allocation60_spill] sm:$0xff] %v6169_v53  ;;  %v1764_v58 = vrot.slane %v6169_v53, 7  ;;  %v6175_v37 = vsel %vm1746_vm13, %v1726_v40, %v1748_v46  ;;  %v6178_v28 = vsel %vm1739_vm5, %v1721_v26, %v1741_v57 }
 0x24f   : > { %8518 = vst [vmem:[#allocation59_spill] sm:$0xff] %v6167_v55  ;;  %v1774_v2 = vrot.slane %v6167_v55, 7  ;;  %v6181_v18 = vsel %vm1733_vm3, %v1717_v47, %v1735_v34  ;;  %v1753_v35 = vrot.slane %v6173_v4, 7  ;;  %v1784_v29 = vrot.slane %v6175_v37, 7 }
 0x250   : > { %8520 = vst [vmem:[#allocation40_spill] sm:$0xff] %v6175_v37  ;;  %v1765_v8 = vsel %vm1754_vm4, %v6181_v18, %v1764_v58  ;;  %v6189_v17 = vsel %vm1727_vm15, %v1713_v51, %v1729_v19  ;;  %v6191_v61 = vsel %vm1745_vm14, %v1725_v48, %v1747_v24  ;;  %vm8536_vm13 = vcmask 785408  }
 0x251   : > { %8521 = vst [vmem:[#allocation41_spill] sm:$0xff] %v6178_v28  ;;  %v1775_v52 = vsel %vm1754_vm4, %v6178_v28, %v1774_v2  ;;  %1766 = vrot.lane.b32.xlu2 %v1765_v8, %s8524_s8  ;;  %v1755_v13 = vsel %vm1754_vm4, %v6189_v17, %v1753_v35  ;;  %v1785_v22 = vsel %vm1754_vm4, %v6191_v61, %v1784_v29  ;;  %vm8537_vm14 = vmmov %vm8536_vm13  ;;  %v1978_v0 = vstv %s6271_s27  ;;  %s6442_s27 = sld [smem:[#allocation11 + $0x7]] }
 0x252   : > { %8522 = vst [vmem:[#allocation42_spill] sm:$0xff] %v6181_v18  ;;  %1776 = vrot.lane.b32.xlu0 %v1775_v52, %s8524_s8  ;;  %1756 = vrot.lane.b32.xlu1 %v1755_v13, %s8524_s8  ;;  %vm8547_vm3 = vcmask 777216  }
 0x253   : > { %8523 = vst [vmem:[#allocation47_spill] sm:$0xff] %v6191_v61  ;;  %vm8548_vm5 = vmmov %vm8547_vm3 }
 0x25a   : > { %1786 = vrot.lane.b32.xlu1 %v1785_v22, %s8524_s8  ;;  %s6436_s8 = sld [smem:[#allocation11 + $0x74]] }
 0x2ab   : > { %v1767_v10 = vpop.permute.xlu2 %1766 }
 0x2ac   : > { %v1768_v41 = vrot.slane %v1767_v10, 7 }
 0x2ae   : > { %v1769_v59 = vsel %vm332_vm6, %v1768_v41, %v1767_v10  ;;  %v8539_v10 = vld [vmem:[#allocation36_spill] sm:$0xff] }
 0x2af   : > { %1771 = vst.msk [vmem:[#allocation2 + $0x1] ss:$4 sm:$0x7] %vm4046_vm7, %v1769_v59  ;;  %vm8540_vm15 = vcmp.lt.s32.totalorder %v8539_v10, 16 }
 0x2b0   : > { %vm8541_vm0 = vmmov %vm8540_vm15 }
 0x2b6   : > { %v2106_v26 = vld [vmem:[#allocation2 + $0x1] ss:$4 sm:$0x7] }
 0x2b7   : > { %v2110_v47 = vperm.slane %v2106_v26, 2  ;;  %v2109_v27 = vperm.slane %v2106_v26, 1  ;;  %v2108_v14 = vperm.slane %v2106_v26, 0 }
 0x2c4   : > { %v1777_v33 = vpop.permute.xlu0 %1776  ;;  %v1757_v12 = vpop.permute.xlu1 %1756 }
 0x2c5   : > { %v1778_v60 = vrot.slane %v1777_v33, 7  ;;  %v1758_v11 = vrot.slane %v1757_v12, 7 }
 0x2c7   : > { %v1779_v45 = vsel %vm332_vm6, %v1778_v60, %v1777_v33  ;;  %v1759_v43 = vsel %vm332_vm6, %v1758_v11, %v1757_v12  ;;  %v1984_v33 = vstv %s6273_s0  ;;  %v1990_v11 = vstv %s6279_s12  ;;  %s6444_s0 = sld [smem:[#allocation11 + $0x2b]] }
 0x2c8   : > { %1781 = vst.msk [vmem:[#allocation2 + $0x2] ss:$4 sm:$0x7] %vm4046_vm7, %v1779_v45  ;;  %v1996_v45 = vstv %s6283_s13  ;;  %s6450_s12 = sld [smem:[#allocation11 + $0x4f]] }
 0x2c9   : > { %1761 = vst.msk [vmem:[#allocation2] ss:$4 sm:$0x7] %vm4046_vm7, %v1759_v43  ;;  %v8542_v43 = vld [vmem:[#allocation37_spill] sm:$0xff]  ;;  %v6392_v26 = vmul.f32 %v1996_v45, %v6189_v17  ;;  %s6456_s13 = sld [smem:[#allocation11 + $0x73]] }
 0x2ca   : > { %vm8543_vm1 = vcmp.ge.s32.totalorder %v8542_v43, 240 }
 0x2cb   : > { %vm8544_vm2 = vmmov %vm8543_vm1 }
 0x2cc   : > { %v1787_v16 = vpop.permute.xlu1 %1786 }
 0x2cd   : > { %v1788_v63 = vrot.slane %v1787_v16, 7 }
 0x2cf   : > { %v1789_v32 = vsel %vm332_vm6, %v1788_v63, %v1787_v16  ;;  %v2427_v44 = vld [vmem:[#allocation2 + $0x2] ss:$4 sm:$0x7]  ;;  %vm8532_vm6 = vcmask 769024  }
 0x2d0   : > { %v1793_v42 = vld [vmem:[#allocation2] ss:$4 sm:$0x7]  ;;  %1791 = vst.msk [vmem:[#allocation2 + $0x3] ss:$4 sm:$0x7] %vm4046_vm7, %v1789_v32  ;;  %vm8533_vm7 = vmmov %vm8532_vm6 }
 0x2d1   : > { %v1797_v21 = vperm.slane %v1793_v42, 2  ;;  %v1796_v6 = vperm.slane %v1793_v42, 1  ;;  %v1795_v62 = vperm.slane %v1793_v42, 0  ;;  %v6255_v51 = vperm.slane %v2427_v44, 2 }
 0x2d2   : > { %v6257_v48 = vperm.slane %v2427_v44, 1  ;;  %v6259_v15 = vperm.slane %v2427_v44, 0  ;;  %v1792_v40 = vld [vmem:[#allocation2] ss:$4 sm:$0x3] }
 0x2d3   : > { %1802 = vrot.lane.b32.xlu1 %v1797_v21, %s8347_s18  ;;  %1800 = vrot.lane.b32.xlu0 %v1796_v6, %s8347_s18  ;;  %v1809_v34 = vperm.slane %v1792_v40, 0  ;;  %v1810_v19 = vperm.slane %v1792_v40, 1  ;;  %v6372_v32 = vld [vmem:[#allocation2 + $0x1] ss:$4 sm:$0x3]  ;;  %v1914_v40 = vstv %s6299_s3  ;;  %s6488_s3 = sld [smem:[#allocation11 + $0x29]] }
 0x2d4   : > { %1798 = vrot.lane.b32.xlu2 %v1795_v62, %s8347_s18  ;;  %8546 = vst [vmem:[#allocation39_spill] sm:$0xff] %v6372_v32 }
 0x2d7   : > { %v2748_v42 = vld [vmem:[#allocation2 + $0x3] ss:$4 sm:$0x7] }
 0x2db   : > { %1819 = vrot.lane.b32.xlu1 %v1797_v21, %s8526_s7  ;;  %1817 = vrot.lane.b32.xlu0 %v1796_v6, %s8526_s7 }
 0x2dc   : > { %1815 = vrot.lane.b32.xlu2 %v1795_v62, %s8526_s7 }
 0x2e3   : > { %1829 = vrot.lane.b32.xlu1 %v1797_v21, %s8527_s11  ;;  %1827 = vrot.lane.b32.xlu0 %v1796_v6, %s8527_s11 }
 0x2e4   : > { %1825 = vrot.lane.b32.xlu2 %v1795_v62, %s8527_s11 }
 0x2eb   : > { %1859 = vrot.lane.b32.xlu1 %v1797_v21, %s8528_s6  ;;  %1857 = vrot.lane.b32.xlu0 %v1796_v6, %s8528_s6 }
 0x2ec   : > { %1855 = vrot.lane.b32.xlu2 %v1795_v62, %s8528_s6 }
 0x2f3   : > { %1869 = vrot.lane.b32.xlu1 %v1797_v21, %s8529_s23  ;;  %1867 = vrot.lane.b32.xlu0 %v1796_v6, %s8529_s23 }
 0x2f4   : > { %1865 = vrot.lane.b32.xlu2 %v1795_v62, %s8529_s23 }
 0x2fb   : > { %1935 = vrot.lane.b32.xlu1 %v1797_v21, %s8530_s10  ;;  %1933 = vrot.lane.b32.xlu0 %v1796_v6, %s8530_s10 }
 0x2fc   : > { %1931 = vrot.lane.b32.xlu2 %v1795_v62, %s8530_s10 }
 0x303   : > { %1945 = vrot.lane.b32.xlu1 %v1797_v21, %s8531_s20  ;;  %1943 = vrot.lane.b32.xlu0 %v1796_v6, %s8531_s20  ;;  %v6383_v21 = vmul.f32 %v1978_v0, %v6189_v17  ;;  %v6386_v6 = vmul.f32 %v1984_v33, %v6189_v17 }
 0x304   : > { %1941 = vrot.lane.b32.xlu2 %v1795_v62, %s8531_s20  ;;  %v6389_v62 = vmul.f32 %v1990_v11, %v6189_v17  ;;  %v6405_v17 = vmul.f32 %v1990_v11, %v6173_v4 }
 0x30b   : > { %2115 = vrot.lane.b32.xlu1 %v2110_v47, %s8347_s18  ;;  %2113 = vrot.lane.b32.xlu0 %v2109_v27, %s8347_s18 }
 0x30c   : > { %2111 = vrot.lane.b32.xlu2 %v2108_v14, %s8347_s18 }
 0x313   : > { %2132 = vrot.lane.b32.xlu1 %v2110_v47, %s8526_s7  ;;  %2130 = vrot.lane.b32.xlu0 %v2109_v27, %s8526_s7 }
 0x314   : > { %2128 = vrot.lane.b32.xlu2 %v2108_v14, %s8526_s7 }
 0x31b   : > { %2142 = vrot.lane.b32.xlu1 %v2110_v47, %s8527_s11  ;;  %2140 = vrot.lane.b32.xlu0 %v2109_v27, %s8527_s11 }
 0x31c   : > { %2138 = vrot.lane.b32.xlu2 %v2108_v14, %s8527_s11 }
 0x323   : > { %2180 = vrot.lane.b32.xlu1 %v2110_v47, %s8528_s6  ;;  %2178 = vrot.lane.b32.xlu0 %v2109_v27, %s8528_s6 }
 0x324   : > { %2176 = vrot.lane.b32.xlu2 %v2108_v14, %s8528_s6 }
 0x32b   : > { %2190 = vrot.lane.b32.xlu1 %v2110_v47, %s8529_s23  ;;  %2188 = vrot.lane.b32.xlu0 %v2109_v27, %s8529_s23 }
 0x32c   : > { %2186 = vrot.lane.b32.xlu2 %v2108_v14, %s8529_s23 }
 0x32e   : > { %v1799_v50 = vpop.permute.xlu2 %1798 }
 0x333   : > { %2256 = vrot.lane.b32.xlu1 %v2110_v47, %s8530_s10  ;;  %2254 = vrot.lane.b32.xlu0 %v2109_v27, %s8530_s10 }
 0x334   : > { %2252 = vrot.lane.b32.xlu2 %v2108_v14, %s8530_s10 }
 0x336   : > { %v1816_v54 = vpop.permute.xlu2 %1815 }
 0x33b   : > { %2266 = vrot.lane.b32.xlu1 %v2110_v47, %s8531_s20  ;;  %2264 = vrot.lane.b32.xlu0 %v2109_v27, %s8531_s20 }
 0x33c   : > { %2262 = vrot.lane.b32.xlu2 %v2108_v14, %s8531_s20  ;;  %v6399_v14 = vmul.f32 %v1978_v0, %v6173_v4 }
 0x33e   : > { %v1826_v49 = vpop.permute.xlu2 %1825 }
 0x343   : > { %2436 = vrot.lane.b32.xlu1 %v6255_v51, %s8347_s18  ;;  %2434 = vrot.lane.b32.xlu0 %v6257_v48, %s8347_s18 }
 0x344   : > { %2432 = vrot.lane.b32.xlu2 %v6259_v15, %s8347_s18 }
 0x345   : > { %v1801_v1 = vpop.permute.xlu0 %1800  ;;  %v1803_v30 = vpop.permute.xlu1 %1802 }
 0x346   : > { %v1804_v31 = vsel %vm376_vm12, %v1799_v50, %v1801_v1  ;;  %v6268_v56 = vpop.permute.xlu2 %1855  ;;  %v1805_v23 = vsel %vm376_vm12, %v1801_v1, %v1803_v30  ;;  %v6402_v50 = vmul.f32 %v1984_v33, %v6173_v4  ;;  %v6421_v30 = vperm.slane %v2748_v42, 2 }
 0x347   : > { %v1813_v20 = vsel %vm4235_vm8, %v1804_v31, %v1809_v34  ;;  %v1901_v2 = vsel %vm4245_vm10, %v1809_v34, %v1804_v31  ;;  %v1814_v60 = vsel %vm4241_vm9, %v1805_v23, %v1810_v19  ;;  %v6355_v12 = vsel %vm4249_vm11, %v1810_v19, %v1805_v23 }
 0x348   : > { %v1840_v31 = vstv %s6285_s21  ;;  %v1844_v23 = vstv %s6287_s30  ;;  %v1920_v34 = vstv %s6301_s17  ;;  %v1926_v19 = vstv %s6307_s9  ;;  %s6466_s21 = sld [smem:[#allocation11 + $0x3]] }
 0x349   : > { %s6475_s30 = sld [smem:[#allocation11 + $0x27]] }
 0x34a   : > { %s6497_s17 = sld [smem:[#allocation11 + $0x4d]] }
 0x34b   : > { %2453 = vrot.lane.b32.xlu1 %v6255_v51, %s8526_s7  ;;  %2451 = vrot.lane.b32.xlu0 %v6257_v48, %s8526_s7  ;;  %s6509_s9 = sld [smem:[#allocation11 + $0x71]] }
 0x34c   : > { %2449 = vrot.lane.b32.xlu2 %v6259_v15, %s8526_s7 }
 0x34d   : > { %v1818_v57 = vpop.permute.xlu0 %1817  ;;  %v1820_v5 = vpop.permute.xlu1 %1819 }
 0x34e   : > { %v1821_v38 = vsel %vm8532_vm6, %v1816_v54, %v1818_v57  ;;  %v6290_v25 = vpop.permute.xlu2 %1865  ;;  %v1822_v36 = vsel %vm8533_vm7, %v1818_v57, %v1820_v5  ;;  %v6408_v54 = vmul.f32 %v1996_v45, %v6173_v4  ;;  %v6430_v57 = vperm.slane %v2748_v42, 0 }
 0x34f   : > { %v1848_v5 = vstv %s6293_s26  ;;  %v1916_v45 = vmul.f32 %v1914_v40, %v6355_v12  ;;  %vm8549_vm6 = vcmask 1039360   ;;  %s6482_s26 = sld [smem:[#allocation11 + $0x4b]] }
 0x350   : > { %v1850_v0 = vmul.f32 %v1848_v5, %v1814_v60  ;;  %vm8550_vm7 = vmmov %vm8549_vm6 }
 0x351   : > { %v8564_v43 = vstv %s6509_s9 }
 0x353   : > { %2463 = vrot.lane.b32.xlu1 %v6255_v51, %s8527_s11  ;;  %2461 = vrot.lane.b32.xlu0 %v6257_v48, %s8527_s11 }
 0x354   : > { %2459 = vrot.lane.b32.xlu2 %v6259_v15, %s8527_s11 }
 0x355   : > { %v1828_v24 = vpop.permute.xlu0 %1827  ;;  %v1830_v7 = vpop.permute.xlu1 %1829 }
 0x356   : > { %v1831_v58 = vsel %vm8536_vm13, %v1826_v49, %v1828_v24  ;;  %v6320_v35 = vpop.permute.xlu2 %1931  ;;  %v1832_v29 = vsel %vm8537_vm14, %v1828_v24, %v1830_v7  ;;  %vm8551_vm13 = vmmov %vm8541_vm0 }
 0x357   : > { %v6325_v52 = vsel %vm4235_vm8, %v1821_v38, %v1831_v58  ;;  %v6329_v8 = vsel %vm4245_vm10, %v1831_v58, %v1821_v38  ;;  %v1836_v13 = vsel %vm4241_vm9, %v1822_v36, %v1832_v29  ;;  %v1904_v22 = vsel %vm4249_vm11, %v1832_v29, %v1822_v36  ;;  %vm8552_vm14 = vmmov %vm8543_vm1 }
 0x358   : > { %8538 = vst [vmem:[#allocation48_spill] sm:$0xff] %v6329_v8  ;;  %v6340_v41 = vsel %vm8540_vm15, %v6325_v52, %v1813_v20  ;;  %v6345_v59 = vsel %vm8541_vm0, %v6329_v8, %v1901_v2  ;;  %v6363_v16 = vsel %vm8543_vm1, %v1814_v60, %v1836_v13  ;;  %v6368_v63 = vsel %vm8544_vm2, %v6355_v12, %v1904_v22 }
 0x359   : > { %8545 = vst [vmem:[#allocation56_spill] sm:$0xff] %v6368_v63  ;;  %v1852_v38 = vstv %s6295_s24  ;;  %v1908_v36 = vstv %s6297_s29  ;;  %v1878_v20 = vstv %s6335_s2  ;;  %v1884_v2 = vstv %s6347_s1  ;;  %s6484_s24 = sld [smem:[#allocation11 + $0x6f]] }
 0x35a   : > { %v1890_v58 = vstv %s6357_s19  ;;  %v1896_v29 = vstv %s6370_s14  ;;  %v1842_v13 = vmul.f32 %v1840_v31, %v1814_v60  ;;  %v1846_v22 = vmul.f32 %v1844_v23, %v1814_v60  ;;  %s6486_s29 = sld [smem:[#allocation11 + $0x5]] }
 0x35b   : > { %2501 = vrot.lane.b32.xlu1 %v6255_v51, %s8528_s6  ;;  %2499 = vrot.lane.b32.xlu0 %v6257_v48, %s8528_s6  ;;  %v1854_v33 = vmul.f32 %v1852_v38, %v1814_v60  ;;  %v1910_v11 = vmul.f32 %v1908_v36, %v6355_v12  ;;  %v1853_v4 = vmul.f32 %v1852_v38, %v6340_v41  ;;  %vm8553_vm15 = vcmask 900096   ;;  %s6682_s2 = sld [smem:[#allocation11 + $0x31]] }
 0x35c   : > { %2497 = vrot.lane.b32.xlu2 %v6259_v15, %s8528_s6  ;;  %v1909_v24 = vmul.f32 %v1908_v36, %v6345_v59  ;;  %v1915_v61 = vmul.f32 %v1914_v40, %v6345_v59  ;;  %vm8555_vm0 = vmmov %vm8553_vm15  ;;  %vm8561_vm1 = vcmask 916480   ;;  %s6696_s1 = sld [smem:[#allocation11 + $0x55]] }
 0x35d   : > { %v1858_v47 = vpop.permute.xlu0 %1857  ;;  %v1860_v27 = vpop.permute.xlu1 %1859  ;;  %vm8563_vm2 = vmmov %vm8561_vm1  ;;  %s6700_s19 = sld [smem:[#allocation11 + $0x79]] }
 0x35e   : > { %v6414_v49 = vsel %vm8547_vm3, %v6268_v56, %v1858_v47  ;;  %v6416_v44 = vpop.permute.xlu2 %1941  ;;  %v6419_v1 = vsel %vm8548_vm5, %v1858_v47, %v1860_v27  ;;  %v6428_v56 = vperm.slane %v2748_v42, 1  ;;  %v1841_v42 = vmul.f32 %v1840_v31, %v6340_v41  ;;  %s6714_s14 = sld [smem:[#allocation11 + $0x51]] }
 0x35f   : > { %v1845_v47 = vmul.f32 %v1844_v23, %v6340_v41  ;;  %v1849_v27 = vmul.f32 %v1848_v5, %v6340_v41  ;;  %v1921_v5 = vmul.f32 %v1920_v34, %v6345_v59  ;;  %v1927_v41 = vmul.f32 %v1926_v19, %v6345_v59 }
 0x360   : > { %vm8584_vm3 = vcmask 769024  }
 0x361   : > { %vm8585_vm5 = vmmov %vm8584_vm3 }
 0x363   : > { %2511 = vrot.lane.b32.xlu1 %v6255_v51, %s8529_s23  ;;  %2509 = vrot.lane.b32.xlu0 %v6257_v48, %s8529_s23 }
 0x364   : > { %2507 = vrot.lane.b32.xlu2 %v6259_v15, %s8529_s23 }
 0x365   : > { %v1868_v60 = vpop.permute.xlu0 %1867  ;;  %v1870_v7 = vpop.permute.xlu1 %1869 }
 0x366   : > { %v1871_v31 = vsel %vm8549_vm6, %v6290_v25, %v1868_v60  ;;  %v6472_v37 = vpop.permute.xlu2 %2111  ;;  %v1872_v23 = vsel %vm8550_vm7, %v1868_v60, %v1870_v7  ;;  %vm8589_vm6 = vcmask 785408  }
 0x367   : > { %v1875_v38 = vsel %vm8551_vm13, %v6414_v49, %v1871_v31  ;;  %v1880_v36 = vmul.f32 %v1878_v20, %v1872_v23  ;;  %v1886_v28 = vmul.f32 %v1884_v2, %v1872_v23  ;;  %v1892_v40 = vmul.f32 %v1890_v58, %v1872_v23  ;;  %vm8590_vm7 = vmmov %vm8589_vm6 }
 0x368   : > { %v1879_v25 = vmul.f32 %v1878_v20, %v1875_v38  ;;  %v1885_v55 = vmul.f32 %v1884_v2, %v1875_v38  ;;  %v1891_v53 = vmul.f32 %v1890_v58, %v1875_v38  ;;  %v1897_v18 = vmul.f32 %v1896_v29, %v1875_v38 }
 0x369   : > { %v1882_v7 = vadd.f32 %v1880_v36, %v1842_v13  ;;  %v1888_v60 = vadd.f32 %v1886_v28, %v1846_v22  ;;  %v1894_v63 = vadd.f32 %v1892_v40, %v1850_v0  ;;  %v1898_v59 = vmul.f32 %v1896_v29, %v1872_v23 }
 0x36a   : > { %v1881_v31 = vadd.f32 %v1879_v25, %v1841_v42  ;;  %v1887_v10 = vadd.f32 %v1885_v55, %v1845_v47  ;;  %v1893_v8 = vadd.f32 %v1891_v53, %v1849_v27  ;;  %v1899_v32 = vadd.f32 %v1897_v18, %v1853_v4 }
 0x36b   : > { %v1900_v20 = vadd.f32 %v1898_v59, %v1854_v33  ;;  %v6493_v2 = vsel %vm8552_vm14, %v1872_v23, %v6419_v1  ;;  %2585 = vrot.lane.b32.xlu1 %v6257_v48, %s8531_s20  ;;  %v6499_v28 = vadd.f32 %v1910_v11, %v1882_v7  ;;  %v6501_v58 = vadd.f32 %v1916_v45, %v1888_v60  ;;  %vm8593_vm14 = vmmov %vm8551_vm13 }
 0x36c   : > { %v1922_v55 = vmul.f32 %v1920_v34, %v6355_v12  ;;  %v1928_v53 = vmul.f32 %v1926_v19, %v6355_v12  ;;  %v2042_v18 = vstv %s6374_s5  ;;  %v2048_v4 = vstv %s6378_s28  ;;  %2577 = vrot.lane.b32.xlu0 %v6255_v51, %s8530_s10  ;;  %2575 = vrot.lane.b32.xlu2 %v6257_v48, %s8530_s10  ;;  %s6728_s5 = sld [smem:[#allocation11 + $0x75]] }
 0x36d   : > { %v1934_v1 = vpop.permute.xlu0 %1933  ;;  %v1936_v34 = vpop.permute.xlu1 %1935  ;;  %v1911_v12 = vadd.f32 %v1909_v24, %v1881_v31  ;;  %v1917_v19 = vadd.f32 %v1915_v61, %v1887_v10  ;;  %v1923_v29 = vadd.f32 %v1921_v5, %v1893_v8  ;;  %v1929_v13 = vadd.f32 %v1927_v41, %v1899_v32  ;;  %s6730_s28 = sld [smem:[#allocation11 + $0xb]] }
 0x36e   : > { %v1937_v22 = vsel %vm8553_vm15, %v6320_v35, %v1934_v1  ;;  %v6515_v0 = vpop.permute.xlu2 %2128  ;;  %v1938_v48 = vsel %vm8555_vm0, %v1934_v1, %v1936_v34  ;;  %v6518_v33 = vadd.f32 %v1922_v55, %v1894_v63  ;;  %v6520_v24 = vadd.f32 %v1928_v53, %v1900_v20 }
 0x36f   : > { %8554 = vst [vmem:[#allocation57_spill] sm:$0xff] %v6515_v0  ;;  %v2056_v35 = vstv %s6442_s27  ;;  %v2062_v11 = vstv %s6444_s0  ;;  %v8208_v45 = vstv %s6450_s12  ;;  %v8207_v42 = vstv %s6456_s13  ;;  %s6776_s27 = sld [smem:[#allocation11 + $0x33]] }
 0x370   : > { %v1954_v47 = vstv %s6466_s21  ;;  %v1960_v27 = vstv %s6475_s30  ;;  %v1966_v63 = vstv %s6482_s26  ;;  %v1972_v23 = vstv %s6484_s24  ;;  %s6790_s0 = sld [smem:[#allocation11 + $0x57]] }
 0x371   : > { %v8556_v5 = vstv %s6311_s16  ;;  %v8557_v38 = vstv %s6317_s25  ;;  %v2004_v40 = vstv %s6486_s29  ;;  %v8214_v25 = vstv %s6488_s3  ;;  %s6633_s16 = sld [smem:[#allocation11 + $0x9]] }
 0x372   : > { %v6537_v41 = vmul.f32 %v8556_v5, %v6325_v52  ;;  %v6542_v36 = vmul.f32 %v8557_v38, %v6325_v52  ;;  %v6547_v7 = vmul.f32 %v2042_v18, %v6325_v52  ;;  %v6550_v60 = vmul.f32 %v2048_v4, %v6325_v52  ;;  %s6637_s25 = sld [smem:[#allocation11 + $0x2d]] }
 0x373   : > { %v8558_v59 = vmov %v8556_v5  ;;  %v8559_v20 = vmov %v8557_v38  ;;  %2583 = vrot.lane.b32.xlu1 %v6259_v15, %s8531_s20  ;;  %v6565_v53 = vmul.f32 %v2042_v18, %v6363_v16  ;;  %v6568_v1 = vmul.f32 %v2048_v4, %v6363_v16  ;;  %s6825_s21 = sld [smem:[#allocation11 + $0x2e]] }
 0x374   : > { %v6555_v31 = vmul.f32 %v8558_v59, %v6363_v16  ;;  %v6560_v55 = vmul.f32 %v8559_v20, %v6363_v16  ;;  %2573 = vrot.lane.b32.xlu0 %v6259_v15, %s8530_s10  ;;  %v8215_v52 = vstv %s6497_s17  ;;  %v6575_v5 = vmul.f32 %v2056_v35, %v6414_v49  ;;  %2587 = vrot.lane.b32.xlu2 %v6255_v51, %s8531_s20  ;;  %s6833_s30 = sld [smem:[#allocation11 + $0x52]] }
 0x375   : > { %v6578_v38 = vmul.f32 %v2062_v11, %v6414_v49  ;;  %v6583_v59 = vmul.f32 %v8208_v45, %v6414_v49  ;;  %v6588_v18 = vmul.f32 %v8207_v42, %v6414_v49  ;;  %v1944_v15 = vpop.permute.xlu0 %1943  ;;  %v1946_v16 = vpop.permute.xlu1 %1945  ;;  %v6593_v4 = vmul.f32 %v2056_v35, %v6493_v2  ;;  %s6845_s26 = sld [smem:[#allocation11 + $0x11]] }
 0x376   : > { %v6596_v20 = vmul.f32 %v2062_v11, %v6493_v2  ;;  %v1947_v32 = vsel %vm8561_vm1, %v6416_v44, %v1944_v15  ;;  %v6600_v49 = vpop.permute.xlu2 %2138  ;;  %v1948_v10 = vsel %vm8563_vm2, %v1944_v15, %v1946_v16  ;;  %vm8598_vm1 = vcmask 777216   ;;  %s6858_s24 = sld [smem:[#allocation11 + $0x35]] }
 0x377   : > { %8562 = vst [vmem:[#allocation33_spill] sm:$0xff] %v6600_v49  ;;  %v1951_v51 = vsel %vm4235_vm8, %v1937_v22, %v1947_v32  ;;  %v2001_v8 = vsel %vm4245_vm10, %v1947_v32, %v1937_v22  ;;  %v1952_v35 = vsel %vm4241_vm9, %v1938_v48, %v1948_v10  ;;  %v2002_v11 = vsel %vm4249_vm11, %v1948_v10, %v1938_v48  ;;  %vm8599_vm2 = vmmov %vm8598_vm1  ;;  %s6869_s29 = sld [smem:[#allocation11 + $0x59]] }
 0x378   : > { %8560 = vst [vmem:[#allocation32_spill] sm:$0xff] %v6596_v20  ;;  %v1955_v61 = vmul.f32 %v1954_v47, %v1951_v51  ;;  %v1961_v42 = vmul.f32 %v1960_v27, %v1951_v51  ;;  %v1967_v45 = vmul.f32 %v1966_v63, %v1951_v51  ;;  %v1973_v44 = vmul.f32 %v1972_v23, %v1951_v51 }
 0x379   : > { %v2005_v34 = vmul.f32 %v2004_v40, %v2001_v8  ;;  %v2011_v15 = vmul.f32 %v8214_v25, %v2001_v8  ;;  %v2017_v16 = vmul.f32 %v8215_v52, %v2001_v8  ;;  %v2023_v49 = vmul.f32 %v8564_v43, %v2001_v8 }
 0x37a   : > { %v1957_v46 = vadd.f32 %v1955_v61, %v1911_v12  ;;  %v1963_v22 = vadd.f32 %v1961_v42, %v1917_v19  ;;  %v1969_v32 = vadd.f32 %v1967_v45, %v1923_v29  ;;  %v1975_v39 = vadd.f32 %v1973_v44, %v1929_v13 }
 0x37b   : > { %v1956_v0 = vmul.f32 %v1954_v47, %v1952_v35  ;;  %v1962_v20 = vmul.f32 %v1960_v27, %v1952_v35  ;;  %v1968_v9 = vmul.f32 %v1966_v63, %v1952_v35  ;;  %v1974_v48 = vmul.f32 %v1972_v23, %v1952_v35  ;;  %2753 = vrot.lane.b32.xlu1 %v6430_v57, %s8347_s18 }
 0x37c   : > { %v1981_v10 = vadd.f32 %v6383_v21, %v1957_v46  ;;  %v1987_v51 = vadd.f32 %v6386_v6, %v1963_v22  ;;  %v1993_v25 = vadd.f32 %v6389_v62, %v1969_v32  ;;  %v1999_v52 = vadd.f32 %v6392_v26, %v1975_v39  ;;  %2757 = vrot.lane.b32.xlu0 %v6421_v30, %s8347_s18 }
 0x37d   : > { %v1958_v43 = vadd.f32 %v1956_v0, %v6499_v28  ;;  %v1964_v12 = vadd.f32 %v1962_v20, %v6501_v58  ;;  %v1970_v19 = vadd.f32 %v1968_v9, %v6518_v33  ;;  %v1976_v29 = vadd.f32 %v1974_v48, %v6520_v24  ;;  %2755 = vrot.lane.b32.xlu2 %v6428_v56, %s8347_s18  ;;  %v2114_v46 = vpop.permute.xlu0 %2113  ;;  %v2116_v21 = vpop.permute.xlu1 %2115  ;;  %s6674_s18 = sld [smem:[#allocation11 + $0xd]] }
 0x37e   : > { %v2007_v39 = vadd.f32 %v2005_v34, %v1981_v10  ;;  %v2013_v6 = vadd.f32 %v2011_v15, %v1987_v51  ;;  %v2019_v62 = vadd.f32 %v2017_v16, %v1993_v25  ;;  %v2025_v26 = vadd.f32 %v2023_v49, %v1999_v52  ;;  %v6635_v28 = vpop.permute.xlu2 %2176  ;;  %v8573_v51 = vld [vmem:[#allocation48_spill] sm:$0xff] }
 0x37f   : > { %v1982_v9 = vadd.f32 %v6399_v14, %v1958_v43  ;;  %v1988_v58 = vadd.f32 %v6402_v50, %v1964_v12  ;;  %v1994_v13 = vadd.f32 %v6405_v17, %v1970_v19  ;;  %v2000_v0 = vadd.f32 %v6408_v54, %v1976_v29  ;;  %v8572_v22 = vld [vmem:[#allocation32_spill] sm:$0xff] }
 0x380   : > { %v2033_v33 = vadd.f32 %v6537_v41, %v2007_v39  ;;  %v2039_v24 = vadd.f32 %v6542_v36, %v2013_v6  ;;  %v2045_v61 = vadd.f32 %v6547_v7, %v2019_v62  ;;  %v2051_v8 = vadd.f32 %v6550_v60, %v2025_v26  ;;  %v8578_v6 = vld [vmem:[#allocation56_spill] sm:$0xff] }
 0x381   : > { %v2006_v45 = vmul.f32 %v2004_v40, %v2002_v11  ;;  %v8565_v42 = vstv %s6488_s3  ;;  %v8566_v47 = vstv %s6497_s17  ;;  %v8567_v27 = vstv %s6509_s9  ;;  %s6878_s3 = sld [smem:[#allocation11 + $0x7d]] }
 0x382   : > { %v2012_v14 = vmul.f32 %v8565_v42, %v2002_v11  ;;  %v2018_v50 = vmul.f32 %v8566_v47, %v2002_v11  ;;  %v2024_v17 = vmul.f32 %v8567_v27, %v2002_v11  ;;  %v2059_v54 = vadd.f32 %v6575_v5, %v2033_v33  ;;  %v8570_v11 = vld [vmem:[#allocation39_spill] sm:$0xff]  ;;  %s6891_s17 = sld [smem:[#allocation11 + $0x10]] }
 0x383   : > { %v2065_v63 = vadd.f32 %v6578_v38, %v2039_v24  ;;  %v2071_v23 = vadd.f32 %v6583_v59, %v2045_v61  ;;  %v2077_v41 = vadd.f32 %v6588_v18, %v2051_v8  ;;  %v2008_v36 = vadd.f32 %v2006_v45, %v1982_v9  ;;  %2780 = vrot.lane.b32.xlu1 %v6430_v57, %s8527_s11  ;;  %v8583_v45 = vld [vmem:[#allocation57_spill] sm:$0xff]  ;;  %s6902_s9 = sld [smem:[#allocation11 + $0x34]] }
 0x384   : > { %v2014_v25 = vadd.f32 %v2012_v14, %v1988_v58  ;;  %v2020_v7 = vadd.f32 %v2018_v50, %v1994_v13  ;;  %v2026_v60 = vadd.f32 %v2024_v17, %v2000_v0  ;;  %v8568_v40 = vstv %s6450_s12  ;;  %2772 = vrot.lane.b32.xlu0 %v6428_v56, %s8526_s7  ;;  %s6809_s12 = sld [smem:[#allocation11 + $0x7b]] }
 0x385   : > { %v2070_v52 = vmul.f32 %v8568_v40, %v6493_v2  ;;  %v8569_v34 = vstv %s6456_s13  ;;  %v2117_v38 = vsel %vm376_vm12, %v6472_v37, %v2114_v46  ;;  %v6670_v59 = vsel %vm376_vm12, %v2114_v46, %v2116_v21  ;;  %2770 = vrot.lane.b32.xlu2 %v6430_v57, %s8526_s7  ;;  %v2131_v37 = vpop.permute.xlu0 %2130  ;;  %s6821_s13 = sld [smem:[#allocation11 + $0xa]] }
 0x386   : > { %v2076_v5 = vmul.f32 %v8569_v34, %v6493_v2  ;;  %v2034_v18 = vadd.f32 %v6555_v31, %v2008_v36  ;;  %v2040_v20 = vadd.f32 %v6560_v55, %v2014_v25  ;;  %v2046_v49 = vadd.f32 %v6565_v53, %v2020_v7  ;;  %v2133_v2 = vpop.permute.xlu1 %2132  ;;  %v6694_v15 = vpop.permute.xlu2 %2186  ;;  %v8588_v34 = vld [vmem:[#allocation33_spill] sm:$0xff] }
 0x387   : > { %v2052_v35 = vadd.f32 %v6568_v1, %v2026_v60  ;;  %v2122_v44 = vperm.slane %v8570_v11, 0  ;;  %v2153_v31 = vstv %s6633_s16  ;;  %v2159_v55 = vstv %s6637_s25  ;;  %s6908_s16 = sld [smem:[#allocation11 + $0x58]] }
 0x388   : > { %v8571_v53 = vperm.slane %v8570_v11, 1  ;;  %v2060_v16 = vadd.f32 %v6593_v4, %v2034_v18  ;;  %v2066_v32 = vadd.f32 %v8572_v22, %v2040_v20  ;;  %v2072_v48 = vadd.f32 %v2070_v52, %v2046_v49  ;;  %s6916_s25 = sld [smem:[#allocation11 + $0x7c]] }
 0x389   : > { %v2078_v10 = vadd.f32 %v2076_v5, %v2052_v35  ;;  %v8574_v43 = vstv %s6394_s4  ;;  %v8575_v19 = vstv %s6410_s22  ;;  %v8576_v46 = vstv %s6426_s15  ;;  %s6741_s4 = sld [smem:[#allocation11 + $0x2f]] }
 0x38a   : > { %v6692_v1 = vsel %vm4241_vm9, %v6670_v59, %v8571_v53  ;;  %v2083_v12 = vmul.f32 %v8574_v43, %v8573_v51  ;;  %v2089_v29 = vmul.f32 %v8575_v19, %v8573_v51  ;;  %v2095_v21 = vmul.f32 %v8576_v46, %v8573_v51  ;;  %s6753_s22 = sld [smem:[#allocation11 + $0x53]] }
 0x38b   : > { %v8577_v39 = vstv %s6436_s8  ;;  %v8579_v62 = vmov %v8574_v43  ;;  %v8580_v9 = vmov %v8575_v19  ;;  %v8581_v13 = vmov %v8576_v46  ;;  %2832 = vrot.lane.b32.xlu1 %v6421_v30, %s8529_s23  ;;  %s6761_s15 = sld [smem:[#allocation11 + $0x77]] }
 0x38c   : > { %v2101_v4 = vmul.f32 %v8577_v39, %v8573_v51  ;;  %v2084_v26 = vmul.f32 %v8579_v62, %v8578_v6  ;;  %v2090_v58 = vmul.f32 %v8580_v9, %v8578_v6  ;;  %v2096_v0 = vmul.f32 %v8581_v13, %v8578_v6  ;;  %2830 = vrot.lane.b32.xlu0 %v6428_v56, %s8529_s23  ;;  %s6765_s8 = sld [smem:[#allocation11 + $0xf]] }
 0x38d   : > { %v8582_v33 = vmov %v8577_v39  ;;  %v2155_v61 = vmul.f32 %v2153_v31, %v6692_v1  ;;  %v2161_v8 = vmul.f32 %v2159_v55, %v6692_v1  ;;  %v2134_v42 = vsel %vm8584_vm3, %v8583_v45, %v2131_v37  ;;  %2782 = vrot.lane.b32.xlu2 %v6428_v56, %s8527_s11 }
 0x38e   : > { %v2102_v24 = vmul.f32 %v8582_v33, %v8578_v6  ;;  %v2135_v14 = vsel %vm8585_vm5, %v2131_v37, %v2133_v2  ;;  %v6745_v47 = vadd.f32 %v2083_v12, %v2059_v54  ;;  %v6747_v50 = vadd.f32 %v2089_v29, %v2065_v63  ;;  %v6769_v18 = vpop.permute.xlu2 %2252  ;;  %v8595_v12 = vld [vmem:[#allocation37_spill] sm:$0xff] }
 0x38f   : > { %v6749_v27 = vadd.f32 %v2095_v21, %v2071_v23  ;;  %v6751_v17 = vadd.f32 %v2101_v4, %v2077_v41  ;;  %v2086_v36 = vadd.f32 %v2084_v26, %v2060_v16  ;;  %v2092_v25 = vadd.f32 %v2090_v58, %v2066_v32  ;;  %v2141_v23 = vpop.permute.xlu0 %2140  ;;  %v2143_v41 = vpop.permute.xlu1 %2142 }
 0x390   : > { %v2098_v7 = vadd.f32 %v2096_v0, %v2072_v48  ;;  %v2104_v60 = vadd.f32 %v2102_v24, %v2078_v10  ;;  %v2126_v52 = vsel %vm4235_vm8, %v2117_v38, %v2122_v44  ;;  %v2222_v63 = vsel %vm4245_vm10, %v2122_v44, %v2117_v38 }
 0x391   : > { %v2144_v5 = vsel %vm8589_vm6, %v8588_v34, %v2141_v23  ;;  %v2145_v20 = vsel %vm8590_vm7, %v2141_v23, %v2143_v41  ;;  %v6772_v49 = vadd.f32 %v2155_v61, %v2086_v36  ;;  %v6774_v38 = vadd.f32 %v2161_v8, %v2092_v25  ;;  %v6875_v25 = vld [vmem:[#allocation2 + $0x2] ss:$4 sm:$0x3]  ;;  %vm8604_vm6 = vmmov %vm8551_vm13 }
 0x392   : > { %v6780_v35 = vsel %vm4235_vm8, %v2134_v42, %v2144_v5  ;;  %v6784_v37 = vsel %vm4245_vm10, %v2144_v5, %v2134_v42  ;;  %v2149_v2 = vsel %vm4241_vm9, %v2135_v14, %v2145_v20  ;;  %v2225_v53 = vsel %vm4249_vm11, %v2145_v20, %v2135_v14 }
 0x393   : > { %v2150_v22 = vsel %vm8551_vm13, %v6780_v35, %v2126_v52  ;;  %v6798_v32 = vsel %vm8593_vm14, %v6784_v37, %v2222_v63  ;;  %v2165_v48 = vstv %s6714_s14  ;;  %v2171_v10 = vstv %s6728_s5  ;;  %2828 = vrot.lane.b32.xlu1 %v6430_v57, %s8529_s23  ;;  %s6839_s23 = sld [smem:[#allocation11 + $0x76]]  ;;  %v8601_v52 = vld [vmem:[#allocation60_spill] sm:$0xff] }
 0x394   : > { %v8594_v51 = vperm.slane %v8570_v11, 1  ;;  %vm8596_vm15 = vcmp.ge.s32.totalorder %v8595_v12, 240  ;;  %v2305_v11 = vstv %s6682_s2  ;;  %v2167_v46 = vmul.f32 %v2165_v48, %v6692_v1  ;;  %2820 = vrot.lane.b32.xlu0 %v6428_v56, %s8528_s6  ;;  %s6935_s2 = sld [smem:[#allocation11 + $0x30]] }
 0x395   : > { %v6814_v19 = vsel %vm8596_vm15, %v6692_v1, %v2149_v2  ;;  %vm8597_vm0 = vmmov %vm8596_vm15  ;;  %v2173_v21 = vmul.f32 %v2171_v10, %v6692_v1  ;;  %v2311_v39 = vstv %s6696_s1  ;;  %v2317_v4 = vstv %s6700_s19  ;;  %2818 = vrot.lane.b32.xlu2 %v6430_v57, %s8528_s6  ;;  %s6937_s1 = sld [smem:[#allocation11 + $0x54]] }
 0x396   : > { %v6807_v43 = vsel %vm4249_vm11, %v8594_v51, %v6670_v59  ;;  %v2299_v59 = vstv %s6674_s18  ;;  %v2154_v26 = vmul.f32 %v2153_v31, %v2150_v22  ;;  %v2160_v9 = vmul.f32 %v2159_v55, %v2150_v22  ;;  %v6851_v0 = vpop.permute.xlu2 %2262  ;;  %v8600_v31 = vld [vmem:[#allocation42_spill] sm:$0xff]  ;;  %s6928_s18 = sld [smem:[#allocation11 + $0xc]]  ;;  %vm8605_vm7 = vmmov %vm8597_vm0 }
 0x397   : > { %v6819_v29 = vsel %vm8597_vm0, %v6807_v43, %v2225_v53  ;;  %v2179_v6 = vpop.permute.xlu0 %2178  ;;  %v2181_v62 = vpop.permute.xlu1 %2180  ;;  %v2166_v58 = vmul.f32 %v2165_v48, %v2150_v22  ;;  %v2172_v1 = vmul.f32 %v2171_v10, %v2150_v22  ;;  %v2169_v24 = vadd.f32 %v2167_v46, %v2098_v7  ;;  %s6941_s19 = sld [smem:[#allocation11 + $0x78]] }
 0x398   : > { %v6849_v13 = vsel %vm8598_vm1, %v6635_v28, %v2179_v6  ;;  %v6854_v33 = vsel %vm8599_vm2, %v2179_v6, %v2181_v62  ;;  %v6856_v61 = vadd.f32 %v2173_v21, %v2104_v60  ;;  %v6861_v55 = vmul.f32 %v2299_v59, %v8600_v31  ;;  %s6943_s14 = sld [smem:[#allocation11 + $0xe]] }
 0x399   : > { %v6864_v8 = vmul.f32 %v2305_v11, %v8600_v31  ;;  %v6867_v28 = vmul.f32 %v2311_v39, %v8600_v31  ;;  %v2156_v45 = vadd.f32 %v2154_v26, %v6745_v47  ;;  %v2162_v42 = vadd.f32 %v2160_v9, %v6747_v50  ;;  %s6953_s5 = sld [smem:[#allocation11 + $0x32]] }
 0x39a   : > { %v2168_v14 = vadd.f32 %v2166_v58, %v6749_v27  ;;  %v2174_v36 = vadd.f32 %v2172_v1, %v6751_v17  ;;  %v2229_v7 = vstv %s6730_s28  ;;  %v6881_v60 = vmul.f32 %v2317_v4, %v8600_v31  ;;  %s6965_s28 = sld [smem:[#allocation11 + $0x56]] }
 0x39b   : > { %v6884_v63 = vmul.f32 %v2299_v59, %v8601_v52  ;;  %v6887_v47 = vmul.f32 %v2305_v11, %v8601_v52  ;;  %v2235_v50 = vstv %s6741_s4  ;;  %v2241_v27 = vstv %s6753_s22  ;;  %2906 = vrot.lane.b32.xlu1 %v6428_v56, %s8531_s20  ;;  %s6969_s4 = sld [smem:[#allocation11 + $0x7a]] }
 0x39c   : > { %v6894_v17 = vmul.f32 %v2311_v39, %v8601_v52  ;;  %v6897_v23 = vmul.f32 %v2317_v4, %v8601_v52  ;;  %v2247_v41 = vstv %s6761_s15  ;;  %v2231_v2 = vmul.f32 %v2229_v7, %v6807_v43  ;;  %2898 = vrot.lane.b32.xlu0 %v6421_v30, %s8530_s10  ;;  %s7099_s22 = sld [smem:[#allocation11 + $0x43]] }
 0x39d   : > { %v2199_v53 = vstv %s6821_s13  ;;  %v2205_v22 = vstv %s6825_s21  ;;  %v2211_v48 = vstv %s6833_s30  ;;  %v2237_v10 = vmul.f32 %v2235_v50, %v6807_v43  ;;  %2896 = vrot.lane.b32.xlu2 %v6428_v56, %s8530_s10  ;;  %s7101_s15 = sld [smem:[#allocation11 + $0x67]] }
 0x39e   : > { %v2217_v51 = vstv %s6839_s23  ;;  %v2230_v46 = vmul.f32 %v2229_v7, %v6798_v32  ;;  %v2236_v21 = vmul.f32 %v2235_v50, %v6798_v32  ;;  %vm8602_vm3 = vcmask 1039360   ;;  %v6925_v4 = vpop.permute.xlu2 %2432  ;;  %s7129_s13 = sld [smem:[#allocation11 + $0x7e]] }
 0x39f   : > { %v2189_v59 = vpop.permute.xlu0 %2188  ;;  %v2191_v11 = vpop.permute.xlu1 %2190  ;;  %vm8603_vm5 = vmmov %vm8602_vm3  ;;  %v2242_v62 = vmul.f32 %v2241_v27, %v6798_v32  ;;  %v2248_v56 = vmul.f32 %v2247_v41, %v6798_v32  ;;  %vm8606_vm13 = vcmask 900096   ;;  %vm8612_vm15 = vcmask 916480   ;;  %s7139_s21 = sld [smem:[#allocation11 + $0x14]] }
 0x3a0   : > { %v2192_v39 = vsel %vm8602_vm3, %v6694_v15, %v2189_v59  ;;  %v2193_v6 = vsel %vm8603_vm5, %v2189_v59, %v2191_v11  ;;  %vm8607_vm14 = vmmov %vm8606_vm13  ;;  %s7145_s30 = sld [smem:[#allocation11 + $0x38]]  ;;  %vm8630_vm1 = vcmask 769024   ;;  %vm8633_vm3 = vcmask 785408  }
 0x3a1   : > { %v2196_v26 = vsel %vm8604_vm6, %v6849_v13, %v2192_v39  ;;  %v2201_v9 = vmul.f32 %v2199_v53, %v2193_v6  ;;  %v2207_v58 = vmul.f32 %v2205_v22, %v2193_v6  ;;  %v2213_v1 = vmul.f32 %v2211_v48, %v2193_v6  ;;  %vm8614_vm0 = vmmov %vm8612_vm15  ;;  %s7147_s23 = sld [smem:[#allocation11 + $0x5c]] }
 0x3a2   : > { %v2200_v15 = vmul.f32 %v2199_v53, %v2196_v26  ;;  %v2206_v31 = vmul.f32 %v2205_v22, %v2196_v26  ;;  %v2212_v7 = vmul.f32 %v2211_v48, %v2196_v26  ;;  %v2218_v52 = vmul.f32 %v2217_v51, %v2196_v26  ;;  %vm8631_vm2 = vmmov %vm8630_vm1 }
 0x3a3   : > { %v2203_v50 = vadd.f32 %v2201_v9, %v6772_v49  ;;  %v2209_v59 = vadd.f32 %v2207_v58, %v6774_v38  ;;  %v2215_v32 = vadd.f32 %v2213_v1, %v2169_v24  ;;  %v2219_v11 = vmul.f32 %v2217_v51, %v2193_v6  ;;  %2904 = vrot.lane.b32.xlu1 %v6430_v57, %s8531_s20  ;;  %vm8634_vm5 = vmmov %vm8633_vm3 }
 0x3a4   : > { %v2202_v39 = vadd.f32 %v2200_v15, %v2156_v45  ;;  %v2208_v20 = vadd.f32 %v2206_v31, %v2162_v42  ;;  %v2214_v5 = vadd.f32 %v2212_v7, %v2168_v14  ;;  %v2220_v34 = vadd.f32 %v2218_v52, %v2174_v36  ;;  %2894 = vrot.lane.b32.xlu0 %v6430_v57, %s8530_s10  ;;  %s7083_s10 = sld [smem:[#allocation11 + $0x82]] }
 0x3a5   : > { %v2221_v53 = vadd.f32 %v2219_v11, %v6856_v61  ;;  %v6949_v49 = vsel %vm8605_vm7, %v2193_v6, %v6854_v33  ;;  %v6955_v38 = vadd.f32 %v2231_v2, %v2203_v50  ;;  %v6957_v24 = vadd.f32 %v2237_v10, %v2209_v59  ;;  %2908 = vrot.lane.b32.xlu2 %v6421_v30, %s8531_s20  ;;  %s7093_s20 = sld [smem:[#allocation11 + $0x1f]]  ;;  %vm8637_vm7 = vmmov %vm8604_vm6 }
 0x3a6   : > { %v2243_v45 = vmul.f32 %v2241_v27, %v6807_v43  ;;  %v2249_v42 = vmul.f32 %v2247_v41, %v6807_v43  ;;  %v2363_v14 = vstv %s6790_s0  ;;  %v2369_v61 = vstv %s6809_s12  ;;  %v6981_v22 = vpop.permute.xlu2 %2449  ;;  %s7115_s0 = sld [smem:[#allocation11 + $0x36]] }
 0x3a7   : > { %v2255_v33 = vpop.permute.xlu0 %2254  ;;  %v2257_v36 = vpop.permute.xlu1 %2256  ;;  %v6971_v43 = vadd.f32 %v2230_v46, %v2202_v39  ;;  %v6973_v27 = vadd.f32 %v2236_v21, %v2208_v20  ;;  %v6975_v57 = vadd.f32 %v2242_v62, %v2214_v5  ;;  %v6977_v41 = vadd.f32 %v2248_v56, %v2220_v34  ;;  %s7123_s12 = sld [smem:[#allocation11 + $0x5a]] }
 0x3a8   : > { %v2258_v2 = vsel %vm8606_vm13, %v6769_v18, %v2255_v33  ;;  %v2259_v48 = vsel %vm8607_vm14, %v2255_v33, %v2257_v36  ;;  %v6984_v10 = vadd.f32 %v2243_v45, %v2215_v32  ;;  %v6986_v20 = vadd.f32 %v2249_v42, %v2221_v53 }
 0x3a9   : > { %v2377_v21 = vstv %s6891_s17  ;;  %v2383_v6 = vstv %s6902_s9  ;;  %v8217_v62 = vstv %s6908_s16  ;;  %v8216_v18 = vstv %s6916_s25  ;;  %s7157_s17 = sld [smem:[#allocation11 + $0x80]] }
 0x3aa   : > { %v8608_v56 = vstv %s6765_s8  ;;  %v2275_v9 = vstv %s6928_s18  ;;  %v2281_v58 = vstv %s6935_s2  ;;  %v2287_v1 = vstv %s6937_s1  ;;  %s7107_s8 = sld [smem:[#allocation11 + $0x8b]] }
 0x3ab   : > { %v6999_v26 = vmul.f32 %v8608_v56, %v6780_v35  ;;  %v8609_v15 = vstv %s6776_s27  ;;  %v7010_v7 = vmul.f32 %v2363_v14, %v6780_v35  ;;  %v7013_v52 = vmul.f32 %v2369_v61, %v6780_v35  ;;  %2822 = vrot.lane.b32.xlu1 %v6421_v30, %s8528_s6  ;;  %s7058_s6 = sld [smem:[#allocation11 + $0x16]] }
 0x3ac   : > { %v7007_v31 = vmul.f32 %v8609_v15, %v6780_v35  ;;  %v8610_v50 = vmov %v8608_v56  ;;  %v8611_v32 = vmov %v8609_v15  ;;  %v7026_v39 = vmul.f32 %v2363_v14, %v6814_v19  ;;  %2784 = vrot.lane.b32.xlu0 %v6421_v30, %s8527_s11  ;;  %s7081_s11 = sld [smem:[#allocation11 + $0x5e]] }
 0x3ad   : > { %v7018_v59 = vmul.f32 %v8610_v50, %v6814_v19  ;;  %v7023_v11 = vmul.f32 %v8611_v32, %v6814_v19  ;;  %v7029_v53 = vmul.f32 %v2369_v61, %v6814_v19  ;;  %v7032_v45 = vmul.f32 %v2377_v21, %v6849_v13  ;;  %2774 = vrot.lane.b32.xlu2 %v6421_v30, %s8526_s7  ;;  %s7071_s7 = sld [smem:[#allocation11 + $0x3a]] }
 0x3ae   : > { %v7037_v35 = vmul.f32 %v2383_v6, %v6849_v13  ;;  %v7042_v42 = vmul.f32 %v8217_v62, %v6849_v13  ;;  %v2293_v14 = vstv %s6941_s19  ;;  %v8221_v33 = vstv %s6943_s14  ;;  %v7068_v30 = vpop.permute.xlu2 %2459  ;;  %s7113_s27 = sld [smem:[#allocation11 + $0x12]] }
 0x3af   : > { %v7051_v19 = vmul.f32 %v8216_v18, %v6849_v13  ;;  %v8222_v61 = vstv %s6953_s5  ;;  %v2337_v36 = vstv %s6965_s28  ;;  %v2265_v15 = vpop.permute.xlu0 %2264  ;;  %v2267_v50 = vpop.permute.xlu1 %2266  ;;  %v7061_v32 = vmul.f32 %v2377_v21, %v6949_v49  ;;  %8613 = vst [vmem:[#allocation51_spill] sm:$0xff] %v7068_v30  ;;  %s7166_s9 = sld [smem:[#allocation11 + $0x18]] }
 0x3b0   : > { %v7064_v46 = vmul.f32 %v2383_v6, %v6949_v49  ;;  %v2268_v13 = vsel %vm8612_vm15, %v6851_v0, %v2265_v15  ;;  %v2269_v34 = vsel %vm8614_vm0, %v2265_v15, %v2267_v50  ;;  %s7198_s18 = sld [smem:[#allocation11 + $0x84]]  ;;  %vm8644_vm15 = vcmask 777216  }
 0x3b1   : > { %v2272_v21 = vsel %vm4235_vm8, %v2258_v2, %v2268_v13  ;;  %v2322_v51 = vsel %vm4245_vm10, %v2268_v13, %v2258_v2  ;;  %v2273_v6 = vsel %vm4241_vm9, %v2259_v48, %v2269_v34  ;;  %v2323_v0 = vsel %vm4249_vm11, %v2269_v34, %v2259_v48  ;;  %s7212_s2 = sld [smem:[#allocation11 + $0x1a]] }
 0x3b2   : > { %v2276_v5 = vmul.f32 %v2275_v9, %v2272_v21  ;;  %v2282_v18 = vmul.f32 %v2281_v58, %v2272_v21  ;;  %v2288_v62 = vmul.f32 %v2287_v1, %v2272_v21  ;;  %v2294_v15 = vmul.f32 %v2293_v14, %v2272_v21  ;;  %s7247_s1 = sld [smem:[#allocation11 + $0x13]] }
 0x3b3   : > { %v2326_v50 = vmul.f32 %v8221_v33, %v2322_v51  ;;  %v2332_v56 = vmul.f32 %v8222_v61, %v2322_v51  ;;  %v2338_v2 = vmul.f32 %v2337_v36, %v2322_v51  ;;  %v8615_v13 = vstv %s6969_s4  ;;  %s7267_s19 = sld [smem:[#allocation11 + $0x37]] }
 0x3b4   : > { %v2344_v12 = vmul.f32 %v8615_v13, %v2322_v51  ;;  %v2278_v48 = vadd.f32 %v2276_v5, %v6971_v43  ;;  %v2284_v34 = vadd.f32 %v2282_v18, %v6973_v27  ;;  %v2290_v16 = vadd.f32 %v2288_v62, %v6975_v57  ;;  %s7300_s28 = sld [smem:[#allocation11 + $0x15]] }
 0x3b5   : > { %v2296_v21 = vadd.f32 %v2294_v15, %v6977_v41  ;;  %v2277_v44 = vmul.f32 %v2275_v9, %v2273_v6  ;;  %v2283_v33 = vmul.f32 %v2281_v58, %v2273_v6  ;;  %v2289_v30 = vmul.f32 %v2287_v1, %v2273_v6 }
 0x3b6   : > { %v2295_v61 = vmul.f32 %v2293_v14, %v2273_v6  ;;  %v2302_v51 = vadd.f32 %v6861_v55, %v2278_v48  ;;  %v2308_v13 = vadd.f32 %v6864_v8, %v2284_v34  ;;  %v2314_v43 = vadd.f32 %v6867_v28, %v2290_v16 }
 0x3b7   : > { %v2320_v27 = vadd.f32 %v6881_v60, %v2296_v21  ;;  %v2279_v57 = vadd.f32 %v2277_v44, %v6955_v38  ;;  %v2285_v41 = vadd.f32 %v2283_v33, %v6957_v24  ;;  %v2291_v5 = vadd.f32 %v2289_v30, %v6984_v10  ;;  %v2435_v18 = vpop.permute.xlu0 %2434  ;;  %v2437_v55 = vpop.permute.xlu1 %2436 }
 0x3b8   : > { %v2297_v62 = vadd.f32 %v2295_v61, %v6986_v20  ;;  %v2328_v9 = vadd.f32 %v2326_v50, %v2302_v51  ;;  %v2334_v8 = vadd.f32 %v2332_v56, %v2308_v13  ;;  %v2340_v16 = vadd.f32 %v2338_v2, %v2314_v43  ;;  %v7121_v10 = vpop.permute.xlu2 %2497 }
 0x3b9   : > { %v2346_v28 = vadd.f32 %v2344_v12, %v2320_v27  ;;  %v2303_v44 = vadd.f32 %v6884_v63, %v2279_v57  ;;  %v2309_v60 = vadd.f32 %v6887_v47, %v2285_v41  ;;  %v2315_v38 = vadd.f32 %v6894_v17, %v2291_v5 }
 0x3ba   : > { %v2321_v24 = vadd.f32 %v6897_v23, %v2297_v62  ;;  %v2354_v20 = vadd.f32 %v6999_v26, %v2328_v9  ;;  %v2360_v58 = vadd.f32 %v7007_v31, %v2334_v8  ;;  %v2366_v12 = vadd.f32 %v7010_v7, %v2340_v16 }
 0x3bb   : > { %v2372_v1 = vadd.f32 %v7013_v52, %v2346_v28  ;;  %v8616_v63 = vstv %s6943_s14  ;;  %v8617_v17 = vstv %s6953_s5  ;;  %v2339_v14 = vmul.f32 %v2337_v36, %v2323_v0  ;;  %s7277_s14 = sld [smem:[#allocation11 + $0x5b]] }
 0x3bc   : > { %v2327_v47 = vmul.f32 %v8616_v63, %v2323_v0  ;;  %v2333_v23 = vmul.f32 %v8617_v17, %v2323_v0  ;;  %v8618_v33 = vstv %s6969_s4  ;;  %v2380_v26 = vadd.f32 %v7032_v45, %v2354_v20  ;;  %s7288_s5 = sld [smem:[#allocation11 + $0x7f]] }
 0x3bd   : > { %v2345_v61 = vmul.f32 %v8618_v33, %v2323_v0  ;;  %v2386_v31 = vadd.f32 %v7037_v35, %v2360_v58  ;;  %v2392_v7 = vadd.f32 %v7042_v42, %v2366_v12  ;;  %v2398_v52 = vadd.f32 %v7051_v19, %v2372_v1  ;;  %s7308_s4 = sld [smem:[#allocation11 + $0x39]] }
 0x3be   : > { %v2329_v56 = vadd.f32 %v2327_v47, %v2303_v44  ;;  %v2335_v30 = vadd.f32 %v2333_v23, %v2309_v60  ;;  %v2341_v6 = vadd.f32 %v2339_v14, %v2315_v38  ;;  %v8619_v36 = vstv %s6908_s16  ;;  %s7178_s16 = sld [smem:[#allocation11 + $0x3c]] }
 0x3bf   : > { %v2347_v15 = vadd.f32 %v2345_v61, %v2321_v24  ;;  %v2391_v0 = vmul.f32 %v8619_v36, %v6949_v49  ;;  %v8620_v45 = vstv %s6916_s25  ;;  %v2438_v42 = vsel %vm376_vm12, %v6925_v4, %v2435_v18  ;;  %v2452_v21 = vpop.permute.xlu0 %2451  ;;  %s7184_s25 = sld [smem:[#allocation11 + $0x60]] }
 0x3c0   : > { %v2397_v35 = vmul.f32 %v8620_v45, %v6949_v49  ;;  %v7160_v19 = vsel %vm376_vm12, %v2435_v18, %v2437_v55  ;;  %v2355_v50 = vadd.f32 %v7018_v59, %v2329_v56  ;;  %v2361_v2 = vadd.f32 %v7023_v11, %v2335_v30  ;;  %v2454_v49 = vpop.permute.xlu1 %2453  ;;  %v7182_v57 = vpop.permute.xlu2 %2507 }
 0x3c1   : > { %v2367_v48 = vadd.f32 %v7026_v39, %v2341_v6  ;;  %v2373_v34 = vadd.f32 %v7029_v53, %v2347_v15  ;;  %v2443_v4 = vperm.slane %v6875_v25, 0  ;;  %v2474_v51 = vstv %s7113_s27  ;;  %s7387_s27 = sld [smem:[#allocation11 + $0x5f]] }
 0x3c2   : > { %v2480_v59 = vstv %s7115_s0  ;;  %v8621_v11 = vperm.slane %v6875_v25, 1  ;;  %v2381_v53 = vadd.f32 %v7061_v32, %v2355_v50  ;;  %v2387_v13 = vadd.f32 %v7064_v46, %v2361_v2  ;;  %s7392_s0 = sld [smem:[#allocation11 + $0x83]] }
 0x3c3   : > { %v2393_v43 = vadd.f32 %v2391_v0, %v2367_v48  ;;  %v2399_v27 = vadd.f32 %v2397_v35, %v2373_v34  ;;  %v8622_v41 = vstv %s6845_s26  ;;  %v8623_v62 = vstv %s6858_s24  ;;  %s7223_s26 = sld [smem:[#allocation11 + $0x3e]] }
 0x3c4   : > { %v7176_v39 = vsel %vm4241_vm9, %v7160_v19, %v8621_v11  ;;  %v2404_v5 = vmul.f32 %v8622_v41, %v6784_v37  ;;  %v2410_v18 = vmul.f32 %v8623_v62, %v6784_v37  ;;  %v8624_v55 = vstv %s6869_s29  ;;  %s7225_s24 = sld [smem:[#allocation11 + $0x19]] }
 0x3c5   : > { %v2416_v9 = vmul.f32 %v8624_v55, %v6784_v37  ;;  %v8625_v32 = vstv %s6878_s3  ;;  %v8626_v46 = vmov %v8622_v41  ;;  %v8627_v28 = vmov %v8623_v62  ;;  %s7235_s29 = sld [smem:[#allocation11 + $0x3d]]  ;;  %v8639_v41 = vld [vmem:[#allocation37_spill] sm:$0xff] }
 0x3c6   : > { %v2422_v8 = vmul.f32 %v8625_v32, %v6784_v37  ;;  %v2405_v16 = vmul.f32 %v8626_v46, %v6819_v29  ;;  %v2411_v44 = vmul.f32 %v8627_v28, %v6819_v29  ;;  %v8628_v60 = vmov %v8624_v55  ;;  %s7241_s3 = sld [smem:[#allocation11 + $0x61]] }
 0x3c7   : > { %v2417_v38 = vmul.f32 %v8628_v60, %v6819_v29  ;;  %v8629_v24 = vmov %v8625_v32  ;;  %v2476_v58 = vmul.f32 %v2474_v51, %v7176_v39  ;;  %v2482_v37 = vmul.f32 %v2480_v59, %v7176_v39  ;;  %v8643_v32 = vld [vmem:[#allocation41_spill] sm:$0xff] }
 0x3c8   : > { %v2423_v20 = vmul.f32 %v8629_v24, %v6819_v29  ;;  %v2455_v12 = vsel %vm8630_vm1, %v6981_v22, %v2452_v21  ;;  %v2456_v1 = vsel %vm8631_vm2, %v2452_v21, %v2454_v49  ;;  %v7227_v63 = vadd.f32 %v2404_v5, %v2380_v26  ;;  %v2462_v26 = vpop.permute.xlu0 %2461  ;;  %v2464_v30 = vpop.permute.xlu1 %2463  ;;  %vm8647_vm2 = vmmov %vm8604_vm6 }
 0x3c9   : > { %v7229_v29 = vadd.f32 %v2410_v18, %v2386_v31  ;;  %v7231_v47 = vadd.f32 %v2416_v9, %v2392_v7  ;;  %v7233_v17 = vadd.f32 %v2422_v8, %v2398_v52  ;;  %v2407_v23 = vadd.f32 %v2405_v16, %v2381_v53  ;;  %v8632_v7 = vld [vmem:[#allocation51_spill] sm:$0xff]  ;;  %v7261_v35 = vpop.permute.xlu2 %2575 }
 0x3ca   : > { %v2413_v14 = vadd.f32 %v2411_v44, %v2387_v13  ;;  %v2419_v22 = vadd.f32 %v2417_v38, %v2393_v43  ;;  %v2425_v33 = vadd.f32 %v2423_v20, %v2399_v27  ;;  %v2447_v61 = vsel %vm4235_vm8, %v2438_v42, %v2443_v4 }
 0x3cb   : > { %v2543_v56 = vsel %vm4245_vm10, %v2443_v4, %v2438_v42  ;;  %v2620_v31 = vstv %s7058_s6  ;;  %v2465_v52 = vsel %vm8633_vm3, %v8632_v7, %v2462_v26  ;;  %v2466_v6 = vsel %vm8634_vm5, %v2462_v26, %v2464_v30  ;;  %s7324_s6 = sld [smem:[#allocation11 + $0x5d]]  ;;  %vm8648_vm3 = vmmov %vm8644_vm15 }
 0x3cc   : > { %v7249_v15 = vadd.f32 %v2476_v58, %v2407_v23  ;;  %v7251_v36 = vadd.f32 %v2482_v37, %v2413_v14  ;;  %v7255_v0 = vsel %vm4235_vm8, %v2455_v12, %v2465_v52  ;;  %v7259_v45 = vsel %vm4245_vm10, %v2465_v52, %v2455_v12 }
 0x3cd   : > { %v2470_v42 = vsel %vm4241_vm9, %v2456_v1, %v2466_v6  ;;  %v2546_v2 = vsel %vm4249_vm11, %v2466_v6, %v2456_v1  ;;  %v2471_v34 = vsel %vm8604_vm6, %v7255_v0, %v2447_v61  ;;  %v7275_v21 = vsel %vm8637_vm7, %v7259_v45, %v2543_v56 }
 0x3ce   : > { %v2626_v49 = vstv %s7071_s7  ;;  %v2632_v4 = vstv %s7081_s11  ;;  %v2486_v11 = vstv %s7123_s12  ;;  %v2492_v53 = vstv %s7129_s13  ;;  %s7338_s7 = sld [smem:[#allocation11 + $0x81]] }
 0x3cf   : > { %v8638_v13 = vperm.slane %v6875_v25, 1  ;;  %v2638_v27 = vstv %s7083_s10  ;;  %vm8640_vm13 = vcmp.ge.s32.totalorder %v8639_v41, 240  ;;  %v8642_v25 = vld [vmem:[#allocation59_spill] sm:$0xff]  ;;  %v7317_v8 = vmul.f32 %v2620_v31, %v8643_v32  ;;  %s7344_s11 = sld [smem:[#allocation11 + $0x17]] }
 0x3d0   : > { %v7294_v5 = vsel %vm8640_vm13, %v7176_v39, %v2470_v42  ;;  %vm8641_vm14 = vmmov %vm8640_vm13  ;;  %v7303_v18 = vmul.f32 %v2620_v31, %v8642_v25  ;;  %v7311_v55 = vmul.f32 %v2632_v4, %v8642_v25  ;;  %v7314_v9 = vmul.f32 %v2638_v27, %v8642_v25  ;;  %v7332_v38 = vpop.permute.xlu1 %2501  ;;  %v7340_v37 = vpop.permute.xlu0 %2499  ;;  %s7350_s10 = sld [smem:[#allocation11 + $0x3b]] }
 0x3d1   : > { %v2544_v43 = vsel %vm4249_vm11, %v8638_v13, %v7160_v19  ;;  %v7306_v19 = vmul.f32 %v2626_v49, %v8642_v25  ;;  %v7320_v46 = vmul.f32 %v2626_v49, %v8643_v32  ;;  %v2488_v16 = vmul.f32 %v2486_v11, %v7176_v39  ;;  %s7394_s12 = sld [smem:[#allocation11 + $0x85]]  ;;  %vm8656_vm7 = vmmov %vm8640_vm13 }
 0x3d2   : > { %v7298_v62 = vsel %vm8641_vm14, %v2544_v43, %v2546_v2  ;;  %v2494_v28 = vmul.f32 %v2492_v53, %v7176_v39  ;;  %v7327_v44 = vmul.f32 %v2632_v4, %v8643_v32  ;;  %v7330_v60 = vmul.f32 %v2638_v27, %v8643_v32  ;;  %s7425_s13 = sld [smem:[#allocation11 + $0x62]] }
 0x3d3   : > { %v2475_v24 = vmul.f32 %v2474_v51, %v2471_v34  ;;  %v2481_v20 = vmul.f32 %v2480_v59, %v2471_v34  ;;  %v2487_v58 = vmul.f32 %v2486_v11, %v2471_v34  ;;  %v2493_v39 = vmul.f32 %v2492_v53, %v2471_v34 }
 0x3d4   : > { %v2490_v12 = vadd.f32 %v2488_v16, %v2419_v22  ;;  %v7342_v1 = vadd.f32 %v2494_v28, %v2425_v33  ;;  %v2550_v33 = vstv %s7139_s21  ;;  %v2556_v56 = vstv %s7145_s30  ;;  %s7435_s21 = sld [smem:[#allocation11 + $0x86]] }
 0x3d5   : > { %v2477_v59 = vadd.f32 %v2475_v24, %v7227_v63  ;;  %v2483_v14 = vadd.f32 %v2481_v20, %v7229_v29  ;;  %v2562_v26 = vstv %s7147_s23  ;;  %v2568_v30 = vstv %s7157_s17  ;;  %v2588_v63 = vpop.permute.xlu2 %2587  ;;  %s7469_s30 = sld [smem:[#allocation11 + $0x1b]] }
 0x3d6   : > { %v2489_v29 = vadd.f32 %v2487_v58, %v7231_v47  ;;  %v2495_v52 = vadd.f32 %v2493_v39, %v7233_v17  ;;  %v2520_v53 = vstv %s7247_s1  ;;  %v2552_v13 = vmul.f32 %v2550_v33, %v2544_v43  ;;  %s7479_s23 = sld [smem:[#allocation11 + $0x3f]] }
 0x3d7   : > { %v2558_v27 = vmul.f32 %v2556_v56, %v2544_v43  ;;  %v2564_v47 = vmul.f32 %v2562_v26, %v2544_v43  ;;  %v2526_v25 = vstv %s7267_s19  ;;  %v2570_v32 = vmul.f32 %v2568_v30, %v2544_v43  ;;  %s7481_s17 = sld [smem:[#allocation11 + $0x63]] }
 0x3d8   : > { %v2532_v17 = vstv %s7277_s14  ;;  %v2538_v16 = vstv %s7288_s5  ;;  %v2512_v28 = vpop.permute.xlu1 %2511  ;;  %v2596_v24 = vstv %s7300_s28  ;;  %v2510_v20 = vpop.permute.xlu0 %2509  ;;  %v7381_v23 = vsel %vm8644_vm15, %v7121_v10, %v7340_v37  ;;  %s7489_s1 = sld [smem:[#allocation11 + $0x87]] }
 0x3d9   : > { %vm8645_vm0 = vcmask 1039360   ;;  %vm8649_vm5 = vcmask 916480   ;;  %vm8650_vm6 = vcmask 900096   ;;  %s7495_s19 = sld [smem:[#allocation11 + $0x1d]]  ;;  %vm8692_vm15 = vcmask 769024  }
 0x3da   : > { %v2513_v51 = vsel %vm8645_vm0, %v7182_v57, %v2510_v20  ;;  %vm8646_vm1 = vmmov %vm8645_vm0  ;;  %s7505_s14 = sld [smem:[#allocation11 + $0x41]]  ;;  %vm8693_vm0 = vcmask 785408  }
 0x3db   : > { %v2514_v34 = vsel %vm8646_vm1, %v2510_v20, %v2512_v28  ;;  %v2517_v2 = vsel %vm8647_vm2, %v7381_v23, %v2513_v51  ;;  %vm8662_vm13 = vmmov %vm8649_vm5  ;;  %s7517_s5 = sld [smem:[#allocation11 + $0x65]] }
 0x3dc   : > { %v2522_v11 = vmul.f32 %v2520_v53, %v2514_v34  ;;  %v2528_v4 = vmul.f32 %v2526_v25, %v2514_v34  ;;  %v2534_v49 = vmul.f32 %v2532_v17, %v2514_v34  ;;  %v2521_v42 = vmul.f32 %v2520_v53, %v2517_v2  ;;  %vm8665_vm14 = vmmov %vm8650_vm6  ;;  %s7525_s28 = sld [smem:[#allocation11 + $0x89]] }
 0x3dd   : > { %v2527_v10 = vmul.f32 %v2526_v25, %v2517_v2  ;;  %v2533_v6 = vmul.f32 %v2532_v17, %v2517_v2  ;;  %v2539_v61 = vmul.f32 %v2538_v16, %v2517_v2  ;;  %v2540_v43 = vmul.f32 %v2538_v16, %v2514_v34  ;;  %v7398_v39 = vpop.permute.xlu2 %2755 }
 0x3de   : > { %v2524_v57 = vadd.f32 %v2522_v11, %v7249_v15  ;;  %v2530_v28 = vadd.f32 %v2528_v4, %v7251_v36  ;;  %v2536_v20 = vadd.f32 %v2534_v49, %v2490_v12  ;;  %v2523_v7 = vadd.f32 %v2521_v42, %v2477_v59 }
 0x3df   : > { %v2529_v31 = vadd.f32 %v2527_v10, %v2483_v14  ;;  %v2535_v51 = vadd.f32 %v2533_v6, %v2489_v29  ;;  %v2541_v22 = vadd.f32 %v2539_v61, %v2495_v52  ;;  %v2542_v58 = vadd.f32 %v2540_v43, %v7342_v1 }
 0x3e0   : > { %v2554_v53 = vadd.f32 %v2552_v13, %v2524_v57  ;;  %v2560_v25 = vadd.f32 %v2558_v27, %v2530_v28  ;;  %v2551_v2 = vmul.f32 %v2550_v33, %v7275_v21  ;;  %v2504_v15 = vsel %vm8648_vm3, %v7340_v37, %v7332_v38  ;;  %v2586_v36 = vpop.permute.xlu1 %2585  ;;  %v2578_v1 = vpop.permute.xlu0 %2577 }
 0x3e1   : > { %v2557_v12 = vmul.f32 %v2556_v56, %v7275_v21  ;;  %v2563_v59 = vmul.f32 %v2562_v26, %v7275_v21  ;;  %v2569_v14 = vmul.f32 %v2568_v30, %v7275_v21  ;;  %v2566_v61 = vadd.f32 %v2564_v47, %v2536_v20 }
 0x3e2   : > { %v2572_v29 = vadd.f32 %v2570_v32, %v2542_v58  ;;  %v2590_v33 = vsel %vm8649_vm5, %v2586_v36, %v2588_v63  ;;  %v7409_v52 = vadd.f32 %v2551_v2, %v2523_v7  ;;  %v2580_v38 = vsel %vm8650_vm6, %v7261_v35, %v2578_v1 }
 0x3e3   : > { %v7413_v37 = vadd.f32 %v2557_v12, %v2529_v31  ;;  %v7415_v56 = vadd.f32 %v2563_v59, %v2535_v51  ;;  %v7417_v21 = vadd.f32 %v2569_v14, %v2541_v22  ;;  %v2658_v26 = vstv %s7387_s27  ;;  %s7779_s27 = sld [smem:[#allocation11 + $0x8a]] }
 0x3e4   : > { %v2664_v30 = vstv %s7392_s0  ;;  %v2594_v6 = vsel %vm4241_vm9, %v2580_v38, %v2590_v33  ;;  %v2644_v7 = vsel %vm4249_vm11, %v2590_v33, %v2580_v38  ;;  %v8651_v63 = vstv %s7308_s4  ;;  %s7835_s0 = sld [smem:[#allocation11 + $0x8e]] }
 0x3e5   : > { %v2598_v31 = vmul.f32 %v2596_v24, %v2594_v6  ;;  %v2604_v42 = vmul.f32 %v8651_v63, %v2594_v6  ;;  %v8652_v22 = vstv %s7324_s6  ;;  %v8653_v4 = vstv %s7338_s7  ;;  %v7454_v14 = vpop.permute.xlu2 %2770 }
 0x3e6   : > { %v2610_v49 = vmul.f32 %v8652_v22, %v2594_v6  ;;  %v2616_v11 = vmul.f32 %v8653_v4, %v2594_v6  ;;  %v8654_v13 = vstv %s7166_s9  ;;  %v8655_v47 = vstv %s7178_s16 }
 0x3e7   : > { %v2674_v27 = vmul.f32 %v8654_v13, %v7294_v5  ;;  %v2680_v32 = vmul.f32 %v8655_v47, %v7294_v5  ;;  %v2716_v17 = vstv %s7394_s12  ;;  %v2696_v16 = vsel %vm8656_vm7, %v2514_v34, %v2504_v15  ;;  %s7843_s12 = sld [smem:[#allocation11 + $0x20]]  ;;  %vm8703_vm7 = vmmov %vm8662_vm13 }
 0x3e8   : > { %v2600_v58 = vadd.f32 %v2598_v31, %v2554_v53  ;;  %v2606_v43 = vadd.f32 %v2604_v42, %v2560_v25  ;;  %v2612_v10 = vadd.f32 %v2610_v49, %v2566_v61  ;;  %v2618_v57 = vadd.f32 %v2616_v11, %v2572_v29  ;;  %v2584_v15 = vpop.permute.xlu1 %2583  ;;  %v2574_v31 = vpop.permute.xlu0 %2573 }
 0x3e9   : > { %v8657_v28 = vstv %s7344_s11  ;;  %v8658_v51 = vstv %s7350_s10  ;;  %v2660_v12 = vmul.f32 %v2658_v26, %v2644_v7  ;;  %v2666_v59 = vmul.f32 %v2664_v30, %v2644_v7 }
 0x3ea   : > { %v2648_v20 = vmul.f32 %v8657_v28, %v2644_v7  ;;  %v2654_v2 = vmul.f32 %v8658_v51, %v2644_v7  ;;  %v2624_v1 = vadd.f32 %v7303_v18, %v2600_v58  ;;  %v2630_v34 = vadd.f32 %v7306_v19, %v2606_v43 }
 0x3eb   : > { %v2636_v53 = vadd.f32 %v7311_v55, %v2612_v10  ;;  %v2642_v25 = vadd.f32 %v7314_v9, %v2618_v57  ;;  %v8659_v61 = vstv %s7184_s25  ;;  %v8660_v33 = vstv %s7198_s18 }
 0x3ec   : > { %v2686_v29 = vmul.f32 %v8659_v61, %v7294_v5  ;;  %v2692_v38 = vmul.f32 %v8660_v33, %v7294_v5  ;;  %v8661_v6 = vstv %s7225_s24  ;;  %v2589_v18 = vsel %vm8662_vm13, %v2584_v15, %v2586_v36  ;;  %vm8705_vm13 = vmmov %vm8665_vm14 }
 0x3ed   : > { %v2700_v7 = vmul.f32 %v8661_v6, %v2696_v16  ;;  %v2650_v63 = vadd.f32 %v2648_v20, %v2624_v1  ;;  %v2656_v19 = vadd.f32 %v2654_v2, %v2630_v34  ;;  %v2662_v42 = vadd.f32 %v2660_v12, %v2636_v53 }
 0x3ee   : > { %v2668_v55 = vadd.f32 %v2666_v59, %v2642_v25  ;;  %v8663_v9 = vstv %s7235_s29  ;;  %v8664_v49 = vstv %s7241_s3  ;;  %v2718_v11 = vmul.f32 %v2716_v17, %v2696_v16 }
 0x3ef   : > { %v2706_v22 = vmul.f32 %v8663_v9, %v2696_v16  ;;  %v2712_v4 = vmul.f32 %v8664_v49, %v2696_v16  ;;  %v2579_v5 = vsel %vm8665_vm14, %v2574_v31, %v7261_v35  ;;  %v2676_v36 = vadd.f32 %v2674_v27, %v2650_v63  ;;  %vm8711_vm14 = vmmov %vm8703_vm7 }
 0x3f0   : > { %v2682_v13 = vadd.f32 %v2680_v32, %v2656_v19  ;;  %v2688_v47 = vadd.f32 %v2686_v29, %v2662_v42  ;;  %v2694_v58 = vadd.f32 %v2692_v38, %v2668_v55  ;;  %v2736_v43 = vstv %s7425_s13  ;;  %v7519_v6 = vpop.permute.xlu1 %2753  ;;  %v7527_v19 = vpop.permute.xlu0 %2757  ;;  %s7854_s13 = sld [smem:[#allocation11 + $0x44]] }
 0x3f1   : > { %v2742_v10 = vstv %s7435_s21  ;;  %v2593_v35 = vsel %vm4235_vm8, %v2579_v5, %v2589_v18  ;;  %v2643_v27 = vsel %vm4245_vm10, %v2589_v18, %v2579_v5  ;;  %v2702_v32 = vadd.f32 %v2700_v7, %v2676_v36  ;;  %v7529_v42 = vpop.permute.xlu2 %2782  ;;  %s7862_s21 = sld [smem:[#allocation11 + $0x68]] }
 0x3f2   : > { %v2708_v16 = vadd.f32 %v2706_v22, %v2682_v13  ;;  %v7491_v57 = vadd.f32 %v2712_v4, %v2688_v47  ;;  %v7493_v28 = vadd.f32 %v2718_v11, %v2694_v58  ;;  %v2597_v20 = vmul.f32 %v2596_v24, %v2593_v35  ;;  %v8677_v58 = vld [vmem:[#allocation40_spill] sm:$0xff] }
 0x3f3   : > { %v8666_v51 = vstv %s7308_s4  ;;  %v8667_v12 = vstv %s7324_s6  ;;  %v8668_v1 = vstv %s7338_s7  ;;  %v8669_v53 = vstv %s7212_s2  ;;  %s7535_s4 = sld [smem:[#allocation11 + $0x21]] }
 0x3f4   : > { %v2603_v2 = vmul.f32 %v8666_v51, %v2593_v35  ;;  %v2609_v59 = vmul.f32 %v8667_v12, %v2593_v35  ;;  %v2615_v34 = vmul.f32 %v8668_v1, %v2593_v35  ;;  %v2726_v25 = vmul.f32 %v8669_v53, %v7298_v62  ;;  %s7545_s6 = sld [smem:[#allocation11 + $0x45]] }
 0x3f5   : > { %v8670_v15 = vstv %s7223_s26  ;;  %v8671_v29 = vstv %s7344_s11  ;;  %v8672_v38 = vstv %s7350_s10  ;;  %v2599_v7 = vadd.f32 %v2597_v20, %v7409_v52  ;;  %s7559_s7 = sld [smem:[#allocation11 + $0x69]] }
 0x3f6   : > { %v2732_v61 = vmul.f32 %v8670_v15, %v7298_v62  ;;  %v2647_v33 = vmul.f32 %v8671_v29, %v2643_v27  ;;  %v2653_v24 = vmul.f32 %v8672_v38, %v2643_v27  ;;  %v2605_v31 = vadd.f32 %v2603_v2, %v7413_v37  ;;  %s7561_s11 = sld [smem:[#allocation11 + $0x8d]]  ;;  %v7593_v15 = vld [vmem:[#allocation2 + $0x3] ss:$4 sm:$0x3]  ;;  %v8682_v29 = vld [vmem:[#allocation47_spill] sm:$0xff] }
 0x3f7   : > { %v2611_v18 = vadd.f32 %v2609_v59, %v7415_v56  ;;  %v2617_v63 = vadd.f32 %v2615_v34, %v7417_v21  ;;  %v2659_v55 = vmul.f32 %v2658_v26, %v2643_v27  ;;  %v2665_v52 = vmul.f32 %v2664_v30, %v2643_v27  ;;  %s7761_s10 = sld [smem:[#allocation11 + $0x66]] }
 0x3f8   : > { %v7537_v37 = vadd.f32 %v2726_v25, %v2702_v32  ;;  %v7539_v56 = vadd.f32 %v2732_v61, %v2708_v16  ;;  %v2623_v21 = vadd.f32 %v7317_v8, %v2599_v7  ;;  %v2629_v9 = vadd.f32 %v7320_v46, %v2605_v31  ;;  %v2781_v61 = vpop.permute.xlu1 %2780 }
 0x3f9   : > { %v2635_v22 = vadd.f32 %v7327_v44, %v2611_v18  ;;  %v2641_v49 = vadd.f32 %v7330_v60, %v2617_v63  ;;  %v8673_v26 = vstv %s7166_s9  ;;  %v8674_v4 = vstv %s7178_s16  ;;  %s7563_s9 = sld [smem:[#allocation11 + $0x23]] }
 0x3fa   : > { %v2673_v30 = vmul.f32 %v8673_v26, %v7255_v0  ;;  %v2679_v11 = vmul.f32 %v8674_v4, %v7255_v0  ;;  %v8675_v8 = vstv %s7184_s25  ;;  %v8676_v46 = vstv %s7198_s18  ;;  %s7585_s16 = sld [smem:[#allocation11 + $0x47]] }
 0x3fb   : > { %v2685_v5 = vmul.f32 %v8675_v8, %v7255_v0  ;;  %v2691_v36 = vmul.f32 %v8676_v46, %v7255_v0  ;;  %v2649_v44 = vadd.f32 %v2647_v33, %v2623_v21  ;;  %v2655_v60 = vadd.f32 %v2653_v24, %v2629_v9  ;;  %s7595_s25 = sld [smem:[#allocation11 + $0x6b]] }
 0x3fc   : > { %v2661_v13 = vadd.f32 %v2659_v55, %v2635_v22  ;;  %v2667_v47 = vadd.f32 %v2665_v52, %v2641_v49  ;;  %v8678_v35 = vstv %s7093_s20  ;;  %v8679_v0 = vstv %s7099_s22  ;;  %v7613_v55 = vpop.permute.xlu0 %2772  ;;  %s7615_s18 = sld [smem:[#allocation11 + $0x8f]] }
 0x3fd   : > { %v7568_v27 = vmul.f32 %v8678_v35, %v8677_v58  ;;  %v7573_v32 = vmul.f32 %v8679_v0, %v8677_v58  ;;  %v8680_v16 = vstv %s7101_s15  ;;  %v8681_v51 = vstv %s7107_s8  ;;  %s7639_s20 = sld [smem:[#allocation11 + $0x1c]] }
 0x3fe   : > { %v7578_v20 = vmul.f32 %v8680_v16, %v8677_v58  ;;  %v7583_v2 = vmul.f32 %v8681_v51, %v8677_v58  ;;  %v2675_v12 = vadd.f32 %v2673_v30, %v2649_v44  ;;  %v2681_v59 = vadd.f32 %v2679_v11, %v2655_v60  ;;  %s7649_s22 = sld [smem:[#allocation11 + $0x40]] }
 0x3ff   : > { %v2687_v1 = vadd.f32 %v2685_v5, %v2661_v13  ;;  %v2693_v34 = vadd.f32 %v2691_v36, %v2667_v47  ;;  %v2738_v53 = vmul.f32 %v2736_v43, %v7298_v62  ;;  %v2744_v25 = vmul.f32 %v2742_v10, %v7298_v62  ;;  %v7651_v13 = vpop.permute.xlu2 %2818  ;;  %s7653_s15 = sld [smem:[#allocation11 + $0x64]] }
 0x400   : > { %v8683_v33 = vmov %v8678_v35  ;;  %v8684_v24 = vmov %v8679_v0  ;;  %v8685_v31 = vstv %s7225_s24  ;;  %v8686_v62 = vstv %s7235_s29  ;;  %s7663_s8 = sld [smem:[#allocation11 + $0x88]] }
 0x401   : > { %v7600_v38 = vmul.f32 %v8683_v33, %v8682_v29  ;;  %v7605_v7 = vmul.f32 %v8684_v24, %v8682_v29  ;;  %v2699_v18 = vmul.f32 %v8685_v31, %v7381_v23  ;;  %v2705_v63 = vmul.f32 %v8686_v62, %v7381_v23  ;;  %s7724_s24 = sld [smem:[#allocation11 + $0x6a]] }
 0x402   : > { %v8687_v52 = vmov %v8680_v16  ;;  %v8688_v9 = vmov %v8681_v51  ;;  %v8689_v49 = vstv %s7241_s3  ;;  %v2717_v30 = vmul.f32 %v2716_v17, %v7381_v23  ;;  %s7738_s29 = sld [smem:[#allocation11 + $0x1e]] }
 0x403   : > { %v7620_v21 = vmul.f32 %v8687_v52, %v8682_v29  ;;  %v7625_v22 = vmul.f32 %v8688_v9, %v8682_v29  ;;  %v2711_v26 = vmul.f32 %v8689_v49, %v7381_v23  ;;  %v7634_v4 = vadd.f32 %v2738_v53, %v7491_v57  ;;  %s7752_s3 = sld [smem:[#allocation11 + $0x42]] }
 0x404   : > { %v7637_v11 = vadd.f32 %v2744_v25, %v7493_v28  ;;  %v8690_v8 = vstv %s7212_s2  ;;  %v8691_v46 = vstv %s7223_s26  ;;  %v2765_v23 = vperm.slane %v7593_v15, 1  ;;  %s7703_s2 = sld [smem:[#allocation11 + $0x22]] }
 0x405   : > { %v2725_v5 = vmul.f32 %v8690_v8, %v7259_v45  ;;  %v2731_v36 = vmul.f32 %v8691_v46, %v7259_v45  ;;  %v2764_v17 = vperm.slane %v7593_v15, 0  ;;  %v2701_v57 = vadd.f32 %v2699_v18, %v2675_v12  ;;  %v2831_v18 = vpop.permute.xlu0 %2830  ;;  %s7716_s26 = sld [smem:[#allocation11 + $0x46]] }
 0x406   : > { %v2707_v28 = vadd.f32 %v2705_v63, %v2681_v59  ;;  %v2713_v44 = vadd.f32 %v2711_v26, %v2687_v1  ;;  %v2719_v60 = vadd.f32 %v2717_v30, %v2693_v34  ;;  %v2737_v47 = vmul.f32 %v2736_v43, %v7259_v45 }
 0x407   : > { %v2743_v58 = vmul.f32 %v2742_v10, %v7259_v45  ;;  %v2795_v35 = vstv %s7469_s30  ;;  %v2801_v0 = vstv %s7479_s23  ;;  %v8239_v16 = vstv %s7481_s17  ;;  %v2833_v10 = vpop.permute.xlu1 %2832  ;;  %s7872_s30 = sld [smem:[#allocation11 + $0x8c]] }
 0x408   : > { %v8238_v51 = vstv %s7489_s1  ;;  %v8224_v12 = vstv %s7495_s19  ;;  %v2760_v59 = vsel %vm376_vm12, %v7398_v39, %v7527_v19  ;;  %v8223_v1 = vstv %s7505_s14  ;;  %s7905_s23 = sld [smem:[#allocation12]] }
 0x409   : > { %v8225_v43 = vstv %s7517_s5  ;;  %v8226_v34 = vstv %s7525_s28  ;;  %v8227_v45 = vstv %s7535_s4  ;;  %v7675_v53 = vadd.f32 %v2725_v5, %v2701_v57 }
 0x40a   : > { %v7677_v25 = vadd.f32 %v2731_v36, %v2707_v28  ;;  %v7679_v15 = vadd.f32 %v2737_v47, %v2713_v44  ;;  %v7681_v29 = vadd.f32 %v2743_v58, %v2719_v60  ;;  %v7685_v19 = vsel %vm4241_vm9, %v2760_v59, %v2765_v23  ;;  %v7731_v44 = vpop.permute.xlu2 %2896 }
 0x40b   : > { %v8230_v33 = vstv %s7545_s6  ;;  %v8231_v24 = vstv %s7559_s7  ;;  %v8236_v31 = vstv %s7561_s11  ;;  %v2759_v62 = vsel %vm376_vm12, %v7519_v6, %v7398_v39  ;;  %vm8694_vm12 = vmmov %vm8646_vm1 }
 0x40c   : > { %v2776_v63 = vsel %vm8692_vm15, %v7454_v14, %v7613_v55  ;;  %v8234_v52 = vstv %s7563_s9  ;;  %v2786_v9 = vsel %vm8693_vm0, %v2781_v61, %v7529_v42  ;;  %v8235_v49 = vstv %s7585_s16  ;;  %vm8695_vm1 = vmmov %vm8647_vm2 }
 0x40d   : > { %v8237_v26 = vstv %s7595_s25  ;;  %v8240_v30 = vstv %s7615_s18  ;;  %v8229_v8 = vstv %s7639_s20  ;;  %v2797_v39 = vmul.f32 %v2795_v35, %v7685_v19  ;;  %vm8696_vm2 = vmmov %vm8695_vm1 }
 0x40e   : > { %v2803_v6 = vmul.f32 %v2801_v0, %v7685_v19  ;;  %v7713_v14 = vsel %vm4249_vm11, %v2765_v23, %v2760_v59  ;;  %v8228_v61 = vstv %s7649_s22  ;;  %v2768_v5 = vsel %vm4235_vm8, %v2759_v62, %v2764_v17  ;;  %vm8698_vm5 = vmmov %vm8694_vm12 }
 0x40f   : > { %v2790_v46 = vsel %vm4235_vm8, %v2776_v63, %v2786_v9  ;;  %v8232_v36 = vstv %s7653_s15  ;;  %v8233_v57 = vstv %s7663_s8  ;;  %v2809_v23 = vmul.f32 %v8239_v16, %v7685_v19  ;;  %vm8701_vm6 = vmmov %vm8695_vm1 }
 0x410   : > { %v2864_v28 = vsel %vm4245_vm10, %v2764_v17, %v2759_v62  ;;  %v2866_v60 = vsel %vm4245_vm10, %v2786_v9, %v2776_v63  ;;  %v7736_v47 = vsel %vm8694_vm12, %v2831_v18, %v2833_v10  ;;  %v2815_v58 = vmul.f32 %v8238_v51, %v7685_v19  ;;  %vm8714_vm15 = vmmov %vm8705_vm13 }
 0x411   : > { %v2873_v59 = vmul.f32 %v8224_v12, %v7713_v14  ;;  %v2879_v17 = vmul.f32 %v8223_v1, %v7713_v14  ;;  %v2885_v62 = vmul.f32 %v8225_v43, %v7713_v14  ;;  %v2891_v10 = vmul.f32 %v8226_v34, %v7713_v14  ;;  %v2829_v12 = vpop.permute.xlu1 %2828 }
 0x412   : > { %v2792_v63 = vsel %vm8695_vm1, %v2790_v46, %v2768_v5  ;;  %v2799_v9 = vadd.f32 %v2797_v39, %v7537_v37  ;;  %v2805_v1 = vadd.f32 %v2803_v6, %v7539_v56  ;;  %v7765_v43 = vsel %vm8696_vm2, %v2866_v60, %v2864_v28  ;;  %v7777_v39 = vpop.permute.xlu0 %2820 }
 0x413   : > { %v7769_v34 = vmul.f32 %v8227_v45, %v2790_v46  ;;  %v2843_v5 = vmul.f32 %v8229_v8, %v7736_v47  ;;  %v2849_v37 = vmul.f32 %v8228_v61, %v7736_v47  ;;  %v7783_v56 = vmul.f32 %v8230_v33, %v2790_v46 }
 0x414   : > { %v7787_v6 = vmul.f32 %v8231_v24, %v2790_v46  ;;  %v2855_v28 = vmul.f32 %v8232_v36, %v7736_v47  ;;  %v2861_v45 = vmul.f32 %v8233_v57, %v7736_v47  ;;  %v7797_v61 = vmul.f32 %v8236_v31, %v2790_v46 }
 0x415   : > { %v7801_v8 = vmul.f32 %v8234_v52, %v2866_v60  ;;  %v7805_v33 = vmul.f32 %v8235_v49, %v2866_v60  ;;  %v7809_v24 = vmul.f32 %v8237_v26, %v2866_v60  ;;  %v2811_v36 = vadd.f32 %v2809_v23, %v7634_v4 }
 0x416   : > { %v2817_v57 = vadd.f32 %v2815_v58, %v7637_v11  ;;  %v7816_v46 = vsel %vm8648_vm3, %v7651_v13, %v7777_v39  ;;  %v2834_v52 = vsel %vm8698_vm5, %v2829_v12, %v2831_v18  ;;  %v7821_v49 = vmul.f32 %v8240_v30, %v2866_v60  ;;  %v2909_v60 = vpop.permute.xlu2 %2908 }
 0x417   : > { %8697 = vst [vmem:[#allocation52_spill] sm:$0xff] %v7809_v24  ;;  %v2845_v31 = vadd.f32 %v2843_v5, %v2799_v9  ;;  %v2851_v26 = vadd.f32 %v2849_v37, %v2805_v1  ;;  %v2857_v4 = vadd.f32 %v2855_v28, %v2811_v36  ;;  %v2796_v13 = vmul.f32 %v2795_v35, %v2792_v63 }
 0x418   : > { %8699 = vst [vmem:[#allocation50_spill] sm:$0xff] %v7821_v49  ;;  %v2863_v23 = vadd.f32 %v2861_v45, %v2817_v57  ;;  %v2802_v16 = vmul.f32 %v2801_v0, %v2792_v63  ;;  %v8700_v24 = vstv %s7481_s17  ;;  %v2838_v18 = vsel %vm8701_vm6, %v7816_v46, %v2834_v52  ;;  %s7911_s17 = sld [smem:[#allocation12 + $0x1]] }
 0x419   : > { %v2808_v12 = vmul.f32 %v8700_v24, %v2792_v63  ;;  %v8702_v1 = vstv %s7489_s1  ;;  %v2917_v45 = vstv %s7738_s29  ;;  %v2923_v57 = vstv %s7752_s3  ;;  %v2907_v9 = vpop.permute.xlu1 %2906  ;;  %s7954_s1 = sld [smem:[#allocation12 + $0x2]] }
 0x41a   : > { %v2814_v36 = vmul.f32 %v8702_v1, %v2792_v63  ;;  %v2929_v35 = vstv %s7761_s10  ;;  %v2899_v0 = vpop.permute.xlu0 %2898  ;;  %v2875_v5 = vadd.f32 %v2873_v59, %v2845_v31  ;;  %v2881_v37 = vadd.f32 %v2879_v17, %v2851_v26 }
 0x41b   : > { %v2935_v24 = vstv %s7779_s27  ;;  %v7846_v48 = vsel %vm8703_vm7, %v2907_v9, %v2909_v60  ;;  %v8704_v52 = vstv %s7639_s20  ;;  %v7852_v63 = vsel %vm8705_vm13, %v7731_v44, %v2899_v0 }
 0x41c   : > { %v2842_v28 = vmul.f32 %v8704_v52, %v2838_v18  ;;  %v2887_v1 = vadd.f32 %v2885_v62, %v2857_v4  ;;  %v2893_v30 = vadd.f32 %v2891_v10, %v2863_v23  ;;  %v8706_v58 = vstv %s7649_s22 }
 0x41d   : > { %v2848_v11 = vmul.f32 %v8706_v58, %v2838_v18  ;;  %v8707_v31 = vstv %s7653_s15  ;;  %v8708_v59 = vstv %s7663_s8  ;;  %v2915_v60 = vsel %vm4241_vm9, %v7852_v63, %v7846_v48 }
 0x41e   : > { %v2854_v26 = vmul.f32 %v8707_v31, %v2838_v18  ;;  %v2860_v17 = vmul.f32 %v8708_v59, %v2838_v18  ;;  %v2919_v52 = vmul.f32 %v2917_v45, %v2915_v60  ;;  %v2925_v0 = vmul.f32 %v2923_v57, %v2915_v60 }
 0x41f   : > { %v2931_v51 = vmul.f32 %v2929_v35, %v2915_v60  ;;  %v2937_v62 = vmul.f32 %v2935_v24, %v2915_v60  ;;  %v2798_v10 = vadd.f32 %v2796_v13, %v7675_v53  ;;  %v2804_v4 = vadd.f32 %v2802_v16, %v7677_v25 }
 0x420   : > { %v2810_v23 = vadd.f32 %v2808_v12, %v7679_v15  ;;  %v2816_v58 = vadd.f32 %v2814_v36, %v7681_v29  ;;  %v2921_v18 = vadd.f32 %v2919_v52, %v2875_v5  ;;  %v2927_v31 = vadd.f32 %v2925_v0, %v2881_v37 }
 0x421   : > { %v2933_v59 = vadd.f32 %v2931_v51, %v2887_v1  ;;  %v2939_v49 = vadd.f32 %v2937_v62, %v2893_v30  ;;  %v2844_v60 = vadd.f32 %v2842_v28, %v2798_v10  ;;  %v2850_v53 = vadd.f32 %v2848_v11, %v2804_v4  ;;  %v2905_v30 = vpop.permute.xlu1 %2904 }
 0x422   : > { %v2856_v16 = vadd.f32 %v2854_v26, %v2810_v23  ;;  %v2862_v25 = vadd.f32 %v2860_v17, %v2816_v58  ;;  %v7875_v15 = vadd.f32 %v7568_v27, %v2921_v18  ;;  %v7878_v29 = vadd.f32 %v7573_v32, %v2927_v31  ;;  %v2895_v36 = vpop.permute.xlu0 %2894 }
 0x423   : > { %v7881_v13 = vadd.f32 %v7578_v20, %v2933_v59  ;;  %v7884_v51 = vadd.f32 %v7583_v2, %v2939_v49  ;;  %v3037_v12 = vstv %s7835_s0  ;;  %v8709_v11 = vstv %s7495_s19  ;;  %s7967_s19 = sld [smem:[#allocation12 + $0x3]] }
 0x424   : > { %v2872_v5 = vmul.f32 %v8709_v11, %v7765_v43  ;;  %v8710_v37 = vstv %s7505_s14  ;;  %v2910_v27 = vsel %vm8711_vm14, %v2905_v30, %v2907_v9  ;;  %v2967_v1 = vstv %s7843_s12  ;;  %v2775_v30 = vpop.permute.xlu2 %2774  ;;  %s8735_s14 = sld [smem:[#allocation25_spill]] }
 0x425   : > { %v2878_v28 = vmul.f32 %v8710_v37, %v7765_v43  ;;  %v2973_v32 = vstv %s7854_s13  ;;  %v8712_v26 = vstv %s7517_s5  ;;  %v8713_v17 = vstv %s7525_s28  ;;  %s8738_s5 = sld [smem:[#allocation31_spill]] }
 0x426   : > { %v2884_v20 = vmul.f32 %v8712_v26, %v7765_v43  ;;  %v2890_v2 = vmul.f32 %v8713_v17, %v7765_v43  ;;  %v2979_v49 = vstv %s7862_s21  ;;  %v2900_v52 = vsel %vm8714_vm15, %v2895_v36, %v7731_v44 }
 0x427   : > { %v2874_v0 = vadd.f32 %v2872_v5, %v2844_v60  ;;  %v2880_v62 = vadd.f32 %v2878_v28, %v2850_v53  ;;  %v2914_v4 = vsel %vm4235_vm8, %v2900_v52, %v2910_v27  ;;  %v2964_v23 = vsel %vm4245_vm10, %v2910_v27, %v2900_v52  ;;  %vm8719_vm10 = vmmov %vm8693_vm0 }
 0x428   : > { %v2886_v9 = vadd.f32 %v2884_v20, %v2856_v16  ;;  %v2892_v10 = vadd.f32 %v2890_v2, %v2862_v25  ;;  %v2918_v43 = vmul.f32 %v2917_v45, %v2914_v4  ;;  %v2924_v58 = vmul.f32 %v2923_v57, %v2914_v4  ;;  %vm8720_vm0 = vmmov %vm8648_vm3 }
 0x429   : > { %v2930_v18 = vmul.f32 %v2929_v35, %v2914_v4  ;;  %v2936_v31 = vmul.f32 %v2935_v24, %v2914_v4  ;;  %v8715_v44 = vstv %s7703_s2  ;;  %v8716_v60 = vstv %s7716_s26  ;;  %v2823_v17 = vpop.permute.xlu1 %2822 }
 0x42a   : > { %v3020_v59 = vmul.f32 %v8715_v44, %v7816_v46  ;;  %v3026_v53 = vmul.f32 %v8716_v60, %v7816_v46  ;;  %v8717_v16 = vstv %s7724_s24  ;;  %v2985_v40 = vstv %s7872_s30  ;;  %v2785_v20 = vpop.permute.xlu0 %2784  ;;  %s3574_s28 = sshll.u32 %s8735_s14, 3 }
 0x42b   : > { %v3032_v25 = vmul.f32 %v8717_v16, %v7816_v46  ;;  %v2920_v54 = vadd.f32 %v2918_v43, %v2874_v0  ;;  %v2926_v36 = vadd.f32 %v2924_v58, %v2880_v62  ;;  %v2932_v11 = vadd.f32 %v2930_v18, %v2886_v9 }
 0x42c   : > { %v2938_v5 = vadd.f32 %v2936_v31, %v2892_v10  ;;  %v2968_v45 = vmul.f32 %v2967_v1, %v2964_v23  ;;  %v2974_v57 = vmul.f32 %v2973_v32, %v2964_v23  ;;  %v2980_v35 = vmul.f32 %v2979_v49, %v2964_v23 }
 0x42d   : > { %v2986_v24 = vmul.f32 %v2985_v40, %v2964_v23  ;;  %v2944_v37 = vadd.f32 %v7600_v38, %v2920_v54  ;;  %v2950_v28 = vadd.f32 %v7605_v7, %v2926_v36  ;;  %v2956_v27 = vadd.f32 %v7620_v21, %v2932_v11 }
 0x42e   : > { %v2962_v26 = vadd.f32 %v7625_v22, %v2938_v5  ;;  %v3038_v2 = vmul.f32 %v3037_v12, %v7816_v46  ;;  %vm8718_vm8 = vcmask 769024   ;;  %v2965_v38 = vsel %vm4249_vm11, %v7846_v48, %v7852_v63 }
 0x42f   : > { %v2777_v52 = vsel %vm8718_vm8, %v7613_v55, %v2775_v30  ;;  %v2787_v7 = vsel %vm8719_vm10, %v7529_v42, %v2785_v20  ;;  %v2970_v0 = vadd.f32 %v2968_v45, %v2944_v37  ;;  %v2976_v21 = vadd.f32 %v2974_v57, %v2950_v28 }
 0x430   : > { %v2982_v62 = vadd.f32 %v2980_v35, %v2956_v27  ;;  %v2988_v22 = vadd.f32 %v2986_v24, %v2962_v26  ;;  %v2791_v9 = vsel %vm4241_vm9, %v2777_v52, %v2787_v7  ;;  %v3069_v10 = vstv %s7905_s23 }
 0x431   : > { %v3073_v46 = vstv %s7911_s17  ;;  %v2825_v55 = vsel %vm8720_vm0, %v7777_v39, %v2823_v17  ;;  %v2969_v4 = vmul.f32 %v2967_v1, %v2965_v38  ;;  %v2975_v48 = vmul.f32 %v2973_v32, %v2965_v38 }
 0x432   : > { %v2981_v63 = vmul.f32 %v2979_v49, %v2965_v38  ;;  %v2987_v42 = vmul.f32 %v2985_v40, %v2965_v38  ;;  %v2996_v23 = vadd.f32 %v7769_v34, %v2970_v0  ;;  %v3002_v43 = vadd.f32 %v7783_v56, %v2976_v21 }
 0x433   : > { %v2867_v3 = vsel %vm4249_vm11, %v2787_v7, %v2777_v52  ;;  %vm8721_vm9 = vcmp.ge.s32.totalorder %v8639_v41, 240  ;;  %v2971_v18 = vadd.f32 %v2969_v4, %v7875_v15  ;;  %v3008_v39 = vadd.f32 %v7787_v6, %v2982_v62  ;;  %v8736_v62 = vld [vmem:[#allocation52_spill] sm:$0xff] }
 0x434   : > { %v2991_v58 = vsel %vm8721_vm9, %v7685_v19, %v2791_v9  ;;  %v3014_v1 = vadd.f32 %v7797_v61, %v2988_v22  ;;  %vm8722_vm12 = vmmov %vm8721_vm9  ;;  %v8723_v50 = vstv %s7535_s4  ;;  %v8724_v32 = vstv %s7545_s6  ;;  %v8737_v9 = vld [vmem:[#allocation50_spill] sm:$0xff]  ;;  %s8739_s4 = sld [smem:[#allocation30_spill]] }
 0x435   : > { %v3017_v34 = vsel %vm8722_vm12, %v7736_v47, %v2825_v55  ;;  %v2995_v56 = vmul.f32 %v8723_v50, %v2991_v58  ;;  %v3001_v49 = vmul.f32 %v8724_v32, %v2991_v58  ;;  %v8725_v31 = vstv %s7559_s7  ;;  %vm8727_vm11 = vmmov %vm8721_vm9 }
 0x436   : > { %v3007_v19 = vmul.f32 %v8725_v31, %v2991_v58  ;;  %v8726_v44 = vstv %s7561_s11  ;;  %v2977_v61 = vadd.f32 %v2975_v48, %v7878_v29  ;;  %v2983_v6 = vadd.f32 %v2981_v63, %v7881_v13  ;;  %s8740_s11 = sld [smem:[#allocation66_spill]] }
 0x437   : > { %v3013_v15 = vmul.f32 %v8726_v44, %v2991_v58  ;;  %v2989_v60 = vadd.f32 %v2987_v42, %v7884_v51  ;;  %v3043_v47 = vsel %vm8727_vm11, %v7713_v14, %v2867_v3  ;;  %v3022_v16 = vadd.f32 %v3020_v59, %v2996_v23 }
 0x438   : > { %v3028_v40 = vadd.f32 %v3026_v53, %v3002_v43  ;;  %v8728_v30 = vstv %s7703_s2  ;;  %v8729_v36 = vstv %s7716_s26  ;;  %v2997_v5 = vadd.f32 %v2995_v56, %v2971_v18 }
 0x439   : > { %v3021_v54 = vmul.f32 %v8728_v30, %v3017_v34  ;;  %v3027_v11 = vmul.f32 %v8729_v36, %v3017_v34  ;;  %v3003_v29 = vadd.f32 %v3001_v49, %v2977_v61  ;;  %v3009_v45 = vadd.f32 %v3007_v19, %v2983_v6  ;;  %v3671_v49 = vld [vmem:[%s8738_s5 + $0x1] ss:$4 sm:$0x3] }
 0x43a   : > { %v3015_v13 = vadd.f32 %v3013_v15, %v2989_v60  ;;  %v3034_v57 = vadd.f32 %v3032_v25, %v3008_v39  ;;  %v3040_v51 = vadd.f32 %v3038_v2, %v3014_v1  ;;  %v8730_v35 = vstv %s7563_s9  ;;  %s3123_s15 = scalar_lea.sflag [#allocation5], %s8739_s4 }
 0x43b   : > { %v3047_v24 = vmul.f32 %v8730_v35, %v3043_v47  ;;  %v8731_v41 = vstv %s7585_s16  ;;  %v3023_v59 = vadd.f32 %v3021_v54, %v2997_v5  ;;  %v3029_v53 = vadd.f32 %v3027_v11, %v3003_v29  ;;  %s8744_s16 = sshll.u32 %s8739_s4, 3 }
 0x43c   : > { %v3053_v14 = vmul.f32 %v8731_v41, %v3043_v47  ;;  %v8732_v37 = vstv %s7724_s24  ;;  %v3039_v27 = vmul.f32 %v3037_v12, %v3017_v34  ;;  %v3048_v26 = vadd.f32 %v7801_v8, %v3022_v16  ;;  %s3134_s9 = scalar_lea.hbm %s8740_s11, %s3574_s28  ;;  %s3784_s29 = scalar_lea.hbm %s8740_s11, 16 }
 0x43d   : > { %v3033_v28 = vmul.f32 %v8732_v37, %v3017_v34  ;;  %v3054_v20 = vadd.f32 %v7805_v33, %v3028_v40  ;;  %v8733_v17 = vstv %s7595_s25  ;;  %v8734_v25 = vstv %s7615_s18  ;;  %v3673_v40 = vld [vmem:[%s8738_s5 + $0x3] ss:$4 sm:$0x3]  ;;  %s295_s25 = scalar_lea.vmem [#allocation14], %s8744_s16  ;;  %s3138_s22 = sshll.u32 %s3134_s9, 4  ;;  %s3139_s22 = int_to_ptr.hbm [resolvable:$true] %s3138_s22 }
 0x43e   : > { %v3059_v52 = vmul.f32 %v8733_v17, %v3043_v47  ;;  %v3065_v2 = vmul.f32 %v8734_v25, %v3043_v47  ;;  %v3041_v7 = vadd.f32 %v3039_v27, %v3015_v13  ;;  %v3049_v0 = vadd.f32 %v3047_v24, %v3023_v59  ;;  %v3672_v47 = vld [vmem:[%s8738_s5 + $0x2] ss:$4 sm:$0x3]  ;;  %s3136_s20 = sshll.u32 %s295_s25, 4  ;;  %s3778_s8 = sshra.s32 %s3139_s22, 4  ;;  %s3137_s20 = int_to_ptr.vmem [resolvable:$true] %s3136_s20  ;;  %s3779_s8 = int_to_ptr.hbm [resolvable:$true] %s3778_s8 }
 0x43f   : > { %v3035_v38 = vadd.f32 %v3033_v28, %v3009_v45  ;;  %v3055_v21 = vadd.f32 %v3053_v14, %v3029_v53  ;;  %v3060_v22 = vadd.f32 %v8736_v62, %v3034_v57  ;;  %v3066_v55 = vadd.f32 %v8737_v9, %v3040_v51  ;;  %s3780_s2 = scalar_lea.hbm %s3779_s8, 8  ;;  %p3785_p12 = scmp.lt.s32.totalorder %s3779_s8, %s8740_s11 }
 0x440   : > { %v3077_v4 = vstv %s7954_s1  ;;  %v3081_v48 = vstv %s7967_s19  ;;  %v3067_v63 = vadd.f32 %v3065_v2, %v3041_v7  ;;  %v3071_v8 = vadd.f32 %v3069_v10, %v3049_v0  ;;  %p3781_p1 = scmp.ne.s32.totalorder %s3779_s8, %s3780_s2  ;;  %p3786_p7 = scmp.lt.s32.totalorder %s3784_s29, %s3780_s2 }
 0x441   : > { %v3061_v12 = vadd.f32 %v3059_v52, %v3035_v38  ;;  %v3075_v33 = vadd.f32 %v3073_v46, %v3055_v21  ;;  %v3070_v42 = vadd.f32 %v3069_v10, %v3048_v26  ;;  %v3074_v23 = vadd.f32 %v3073_v46, %v3054_v20  ;;  %v3670_v10 = vld [vmem:[%s8738_s5] ss:$4 sm:$0x3] }
 0x442   : > { %v3083_v3 = vadd.f32 %v3081_v48, %v3067_v63  ;;  %v3086_v58 = vrot.slane %v3071_v8, 7  ;;  %v3078_v39 = vadd.f32 %v3077_v4, %v3060_v22  ;;  %v3082_v1 = vadd.f32 %v3081_v48, %v3066_v55  ;;  %p3782_p3 = pnand %p3781_p1, %p3965_p5  ;;  %p3787_p8 = por %p3786_p7, %p3785_p12 }
 0x443   : > { %v3079_v43 = vadd.f32 %v3077_v4, %v3061_v12  ;;  %v3097_v18 = vrot.slane %v3075_v33, 7  ;;  %v8741_v19 = vlaneseq }
 0x444   : > { %v3115_v50 = vrot.slane %v3083_v3, 7  ;;  %v3087_v56 = vsel %vm1754_vm4, %v3070_v42, %v3086_v58  ;;  %p3783_p4 = pneg %p3782_p3 }
 0x445   : > { %v3106_v34 = vrot.slane %v3079_v43, 7  ;;  %v3098_v32 = vsel %vm1754_vm4, %v3074_v23, %v3097_v18  ;;  %v3089_v46 = vadd.f32 %v3670_v10, %v3087_v56  ;;  %vm8006_vm1 = vcmp.lt.s32.totalorder %v8741_v19, 256 }
 0x446   : > { %v3100_v31 = vadd.f32 %v3671_v49, %v3098_v32  ;;  %v3116_v61 = vsel %vm1754_vm4, %v3082_v1, %v3115_v50  ;;  %p3788_p9 = pnand %p3787_p8, %p3783_p4 }
 0x447   : > { %v3107_v15 = vsel %vm1754_vm4, %v3078_v39, %v3106_v34  ;;  %v3090_v6 = vmul.f32 0.70710677, %v3089_v46  ;;  %v3118_v30 = vadd.f32 %v3673_v40, %v3116_v61 }
 0x448   : > { %v3101_v60 = vmul.f32 0.70710677, %v3100_v31  ;;  %v3109_v16 = vadd.f32 %v3672_v47, %v3107_v15 }
 0x449   : > { %3094 = vst.msk [vmem:[%s295_s25] ss:$4 sm:$0x3] %vm8006_vm1, %v3090_v6  ;;  %v3119_v36 = vmul.f32 0.70710677, %v3118_v30 }
 0x44a   : > { %v3110_v54 = vmul.f32 0.70710677, %v3109_v16  ;;  %3565 = vst.msk [vmem:[%s295_s25 + $0x1] ss:$4 sm:$0x3] %vm8006_vm1, %v3101_v60 }
 0x44b   : > { %3567 = vst.msk [vmem:[%s295_s25 + $0x3] ss:$4 sm:$0x3] %vm8006_vm1, %v3119_v36 }
 0x44c   : > { %3566 = vst.msk [vmem:[%s295_s25 + $0x2] ss:$4 sm:$0x3] %vm8006_vm1, %v3110_v54 }
 0x44d   : > { %3791 = shalt.err (!%p3788_p9)
}
 0x44e   : > { %3593 = dma.vmem_to_hbm [thread:$0]  (%p3965_p5), %s3137_s20, 128, %s3139_s22, %s3123_s15  }
 0x44f PF: > { %s8746_s27 = sld [smem:[#allocation21_spill]] }
 0x450   : > { %s8748_s12 = sld [smem:[#allocation24_spill]] }
 0x455   : > { %s3150_s13 = sand.u32 1, %s8746_s27  }
 0x456   : > { %p8749_p10 = scmp.ge.s32.totalorder %s8748_s12, 2  ;;  %s3151_s21 = scalar_lea.sflag [#allocation5], %s3150_s13 }
 0x458   : > { %p3613_p13 = pnand %p8749_p10, %p3969_p6 }
 0x45a   : > { %p3614_p11 = pneg %p3613_p13 }
 0x45c   : > { %3829 = dma.done.wait (%p3614_p11), %s3151_s21, 128  }
 0x45d   : > { %3831 = vsyncadd (%p3614_p11), %s3151_s21, 4294967168  ;;  %s8750_s21 = sld [smem:[#allocation26_spill]] }
 0x45e   : > { %s8751_s18 = sld [smem:[#allocation22_spill]] }
 0x45f   : > { %s8752_s19 = sld [smem:[#allocation23_spill]] }
 0x460   : > { %s8753_s20 = sld [smem:[#allocation27_spill]] }
 0x463   : > { %p22_p0 = scmp.ge.s32.totalorder %s8750_s21, 4  }
 0x465   :  { %24 = sbr.rel (!%p22_p0) target bundleno = 16 (0x10), region = 112 }
 0x46a   :  { %3157 = vsyncpa [#allocation4], 1 }
 0x46b   :  { %3159 = vsyncpa [#allocation4 + $0x1], 1 }
 0x46c   :  { %3160 = vsyncpa [#allocation5], 1 }
 0x46d   :  { %3162 = vsyncpa [#allocation5 + $0x1], 1 }
 0x46e   :  { %3163 = vsyncpa [#allocation6], 1 }
 0x46f   :  { %3165 = vsyncpa [#allocation6 + $0x1], 1 }
 0x470   :  { %3166 = vsyncpa [#allocation10], 1 }
 0x471   :  { %3167 = vsyncpa [#allocation7], 1 }
 0x472   :  { %3169 = vsyncpa [#allocation7 + $0x1], 1 }
 0x473   :  { %3170 = vsyncpa [#allocation13], 1 }

</bundles_post_ra>
